<compile_context>
chip_gen: v5e
topology: v5e:2x2
jax: 0.10.0
libtpu: 0.0.40
codegen_flags: <defaults>
</compile_context>

<pallas_src>
import functools

import jax
import jax.numpy as jnp
from jax import lax
from jax.experimental import pallas as pl
from jax.experimental.pallas import tpu as pltpu

# Small, TPU-friendly variants of the module's hyper-parameters.
INPUT_SIZE = 256      # module default is 2048; shrunk for a small example
HIDDEN1 = 128
HIDDEN2 = 64
HIDDEN2_PAD = 128     # layer-2 hidden padded to a full 128-lane vreg per gate
FC_DIM = 64
FC_PAD = 128          # fc1/fc2 padded to full 128 lanes
OUTPUT_SIZE = 2
OUT_PAD = 128         # lane-dense output block; sliced to 2 in the wrapper
BN_EPS = 1e-5
NEG_INF = -1e9        # bias for padded logit lanes -> exp underflows to 0


# ---------------------------------------------------------------------------
# Fused kernel: lstm1 + lstm2 (time-chunked) + head (fc1->BN->relu->fc2->BN->
# relu->out->softmax) on the final hidden state.
# ---------------------------------------------------------------------------
def _fused_kernel(x_ref, wx1_ref, wh1_ref, b1_ref,
                  wx2_ref, wh2_ref, b2_ref,
                  fc1w_ref, fc1b_ref, fc2w_ref, fc2b_ref, outw_ref, outb_ref,
                  o_ref,
                  xw1_scr, h1_scr, c1_scr, h2_scr, c2_scr,
                  *, unroll):
    tc = pl.program_id(1)
    n_tc = pl.num_programs(1)
    Tc, Bt, D = x_ref.shape
    H1 = HIDDEN1
    H2P = HIDDEN2_PAD
    bf16 = jnp.bfloat16

    # Re-initialize the recurrent state at the start of each batch tile.
    @pl.when(tc == 0)
    def _():
        h1_scr[...] = jnp.zeros_like(h1_scr)
        c1_scr[...] = jnp.zeros_like(c1_scr)
        h2_scr[...] = jnp.zeros_like(h2_scr)
        c2_scr[...] = jnp.zeros_like(c2_scr)

    # Hoisted layer-1 input projection for THIS time chunk: one big MXU pass
    # (Tc*Bt, D) @ (D, 4H1) into f32 VMEM scratch; bf16 operands, f32 accum.
    x_flat = x_ref[...].reshape(Tc * Bt, D)
    xw1_scr[...] = (jnp.dot(x_flat, wx1_ref[...],
                            preferred_element_type=jnp.float32)
                    + b1_ref[...])

    wh1 = wh1_ref[...]
    wx2 = wx2_ref[...]
    wh2 = wh2_ref[...]
    # Hoist the layer-2 bias broadcast out of the timestep loop (no CSE in-loop).
    b2b = jnp.broadcast_to(b2_ref[...], (Bt, 4 * H2P))

    def step(t, carry):
        h1, c1, h2, c2 = carry

        # --- layer 1: only the recurrent K=H1 matmul stays on the serial path
        row = pl.multiple_of(t * Bt, 8)
        g1 = xw1_scr[pl.ds(row, Bt), :] + jnp.dot(
            h1.astype(bf16), wh1, preferred_element_type=jnp.float32)
        i1 = jax.nn.sigmoid(g1[:, 0 * H1:1 * H1])
        f1 = jax.nn.sigmoid(g1[:, 1 * H1:2 * H1])
        gg1 = jnp.tanh(g1[:, 2 * H1:3 * H1])
        o1 = jax.nn.sigmoid(g1[:, 3 * H1:4 * H1])
        c1 = f1 * c1 + i1 * gg1
        h1 = o1 * jnp.tanh(c1)

        # --- layer 2: split dots (no per-step concat materialization); gates
        # are 128-lane padded so every slice is a lane-aligned vreg view.
        # Padded hidden units provably stay exactly 0 (zero weights/bias).
        g2 = (jnp.dot(h1.astype(bf16), wx2, preferred_element_type=jnp.float32)
              + jnp.dot(h2.astype(bf16), wh2, preferred_element_type=jnp.float32)
              + b2b)
        i2 = jax.nn.sigmoid(g2[:, 0 * H2P:1 * H2P])
        f2 = jax.nn.sigmoid(g2[:, 1 * H2P:2 * H2P])
        gg2 = jnp.tanh(g2[:, 2 * H2P:3 * H2P])
        o2 = jax.nn.sigmoid(g2[:, 3 * H2P:4 * H2P])
        c2 = f2 * c2 + i2 * gg2
        h2 = o2 * jnp.tanh(c2)
        return h1, c1, h2, c2

    init = (h1_scr[...], c1_scr[...], h2_scr[...], c2_scr[...])
    h1, c1, h2, c2 = lax.fori_loop(0, Tc, step, init, unroll=unroll)
    h1_scr[...] = h1
    c1_scr[...] = c1
    h2_scr[...] = h2
    c2_scr[...] = c2

    # --- classifier head on the final hidden state, last time-chunk only.
    # Eval-mode BatchNorm is already folded into fc1/fc2 weights+biases.
    @pl.when(tc == n_tc - 1)
    def _():
        z = jnp.dot(h2.astype(bf16), fc1w_ref[...],
                    preferred_element_type=jnp.float32) + fc1b_ref[...]
        z = jnp.maximum(z, 0.0)
        z = jnp.dot(z.astype(bf16), fc2w_ref[...],
                    preferred_element_type=jnp.float32) + fc2b_ref[...]
        z = jnp.maximum(z, 0.0)
        logits = jnp.dot(z.astype(bf16), outw_ref[...],
                         preferred_element_type=jnp.float32) + outb_ref[...]
        # Padded logit lanes carry a -1e9 bias -> exp underflows to exactly 0,
        # so softmax over the 128-lane block equals softmax(dim=1) over 2.
        m = jnp.max(logits, axis=-1, keepdims=True)
        e = jnp.exp(logits - m)
        o_ref[...] = e / jnp.sum(e, axis=-1, keepdims=True)


# ---------------------------------------------------------------------------
# Wrapper: weight layout / padding / BN-folding + single pallas_call
# ---------------------------------------------------------------------------
def _pick_b_tile(B):
    # Largest sublane-aligned tile <= 128 that divides B while keeping >= 2
    # grid tiles (v7x has 2 TensorCores); fall back to B for tiny batches.
    for cand in (128, 64, 32, 16, 8):
        if B % cand == 0 and B // cand >= 2:
            return cand
    return B


def _pick_t_chunk(T):
    # Bound the hoisted-projection scratch regardless of sequence length.
    for cand in (64, 32, 16, 8):
        if T % cand == 0:
            return cand
    return T


def lstm_classifier(x, params, *, b_tile=None, t_chunk=None):
    B, T, D = x.shape
    H1, H2, H2P = HIDDEN1, HIDDEN2, HIDDEN2_PAD
    f32, bf16 = jnp.float32, jnp.bfloat16

    bt = b_tile if b_tile is not None else _pick_b_tile(B)
    tck = t_chunk if t_chunk is not None else _pick_t_chunk(T)
    assert B % bt == 0 and T % tck == 0
    unroll = tck if tck <= 16 else 4   # avoid instruction/vreg blowup on long chunks

    # Time-major input so each timestep of a chunk is a lane/sublane-aligned
    # (Bt, D) slab; bf16 activations halve x DMA bytes and feed the MXU natively.
    x_tbd = jnp.transpose(x, (1, 0, 2)).astype(bf16)            # (T, B, D)

    # ---- layer 1 weights (gate order i,f,g,o; combined bias), bf16 ----
    wx1 = params["w_ih1"].T.astype(bf16)                        # (D, 4H1)
    wh1 = params["w_hh1"].T.astype(bf16)                        # (H1, 4H1)
    b1 = (params["b_ih1"] + params["b_hh1"]).reshape(1, 4 * H1).astype(f32)

    # ---- layer 2: pad every gate block H2 -> H2P lanes with zeros ----
    def pad_gate_cols(w_t):                                     # (K,4H2)->(K,4H2P)
        k = w_t.shape[0]
        return jnp.pad(w_t.reshape(k, 4, H2),
                       ((0, 0), (0, 0), (0, H2P - H2))).reshape(k, 4 * H2P)

    wx2 = pad_gate_cols(params["w_ih2"].T).astype(bf16)         # (H1, 4H2P)
    wh2 = jnp.pad(pad_gate_cols(params["w_hh2"].T),
                  ((0, H2P - H2), (0, 0))).astype(bf16)         # (H2P, 4H2P)
    b2 = jnp.pad((params["b_ih2"] + params["b_hh2"]).reshape(4, H2),
                 ((0, 0), (0, H2P - H2))).reshape(1, 4 * H2P).astype(f32)

    # ---- head: fold eval-mode BatchNorm (general form) into fc1 / fc2 ----
    bn_s = params["bn_gamma"] / jnp.sqrt(params["bn_var"] + BN_EPS)
    bn_t = params["bn_beta"] - params["bn_mean"] * bn_s
    fc1_w = params["fc1_w"].T * bn_s[None, :]                   # (H2, FC)
    fc1_b = params["fc1_b"] * bn_s + bn_t
    fc2_w = params["fc2_w"].T * bn_s[None, :]                   # (FC, FC)
    fc2_b = params["fc2_b"] * bn_s + bn_t

    fc1_w = jnp.pad(fc1_w, ((0, H2P - H2), (0, FC_PAD - FC_DIM))).astype(bf16)
    fc1_b = jnp.pad(fc1_b.reshape(1, -1),
                    ((0, 0), (0, FC_PAD - FC_DIM))).astype(f32)
    fc2_w = jnp.pad(fc2_w, ((0, FC_PAD - FC_DIM), (0, FC_PAD - FC_DIM))).astype(bf16)
    fc2_b = jnp.pad(fc2_b.reshape(1, -1),
                    ((0, 0), (0, FC_PAD - FC_DIM))).astype(f32)
    out_w = jnp.pad(params["out_w"].T,
                    ((0, FC_PAD - FC_DIM), (0, OUT_PAD - OUTPUT_SIZE))).astype(bf16)
    out_b = jnp.pad(params["out_b"].reshape(1, -1),
                    ((0, 0), (0, OUT_PAD - OUTPUT_SIZE)),
                    constant_values=NEG_INF).astype(f32)

    def w_spec(arr):
        return pl.BlockSpec(arr.shape, lambda i, t: (0, 0))

    kernel = functools.partial(_fused_kernel, unroll=unroll)

    out = pl.pallas_call(
        kernel,
        out_shape=jax.ShapeDtypeStruct((B, OUT_PAD), f32),
        grid_spec=pltpu.PrefetchScalarGridSpec(
            num_scalar_prefetch=0,
            grid=(B // bt, T // tck),                 # (batch tiles, time chunks)
            in_specs=[
                pl.BlockSpec((tck, bt, D), lambda i, t: (t, i, 0)),
                w_spec(wx1), w_spec(wh1), w_spec(b1),
                w_spec(wx2), w_spec(wh2), w_spec(b2),
                w_spec(fc1_w), w_spec(fc1_b),
                w_spec(fc2_w), w_spec(fc2_b),
                w_spec(out_w), w_spec(out_b),
            ],
            out_specs=pl.BlockSpec((bt, OUT_PAD), lambda i, t: (i, 0)),
            scratch_shapes=[
                pltpu.VMEM((tck * bt, 4 * H1), f32),  # per-chunk x-projection
                pltpu.VMEM((bt, H1), f32),            # h1 (carried across chunks)
                pltpu.VMEM((bt, H1), f32),            # c1
                pltpu.VMEM((bt, H2P), f32),           # h2
                pltpu.VMEM((bt, H2P), f32),           # c2
            ],
        ),
        compiler_params=pltpu.CompilerParams(
            dimension_semantics=("parallel", "arbitrary"),   # batch // time
            vmem_limit_bytes=48 * 1024 * 1024),              # safe on v5e/v6e/v7x
    )(x_tbd, wx1, wh1, b1, wx2, wh2, b2,
      fc1_w, fc1_b, fc2_w, fc2_b, out_w, out_b)
    return out[:, :OUTPUT_SIZE]


# ---------------------------------------------------------------------------
# Pure-JAX reference (for correctness check)
# ---------------------------------------------------------------------------
def reference(x, params):
    def lstm_ref(xs, w_ih, w_hh, b_ih, b_hh):
        Bn, Tn, _ = xs.shape
        H = w_ih.shape[0] // 4
        h = jnp.zeros((Bn, H), jnp.float32)
        c = jnp.zeros((Bn, H), jnp.float32)
        ys = []
        for t in range(Tn):
            g = xs[:, t, :] @ w_ih.T + h @ w_hh.T + b_ih + b_hh
            i = jax.nn.sigmoid(g[:, :H])
            f = jax.nn.sigmoid(g[:, H:2 * H])
            gg = jnp.tanh(g[:, 2 * H:3 * H])
            o = jax.nn.sigmoid(g[:, 3 * H:])
            c = f * c + i * gg
            h = o * jnp.tanh(c)
            ys.append(h)
        return jnp.stack(ys, axis=1)

    h1 = lstm_ref(x, params["w_ih1"], params["w_hh1"],
                  params["b_ih1"], params["b_hh1"])
    h2 = lstm_ref(h1, params["w_ih2"], params["w_hh2"],
                  params["b_ih2"], params["b_hh2"])
    z = h2[:, -1, :]
    s = params["bn_gamma"] / jnp.sqrt(params["bn_var"] + BN_EPS)
    t = params["bn_beta"] - params["bn_mean"] * s
    z = jnp.maximum((z @ params["fc1_w"].T + params["fc1_b"]) * s + t, 0.0)
    z = jnp.maximum((z @ params["fc2_w"].T + params["fc2_b"]) * s + t, 0.0)
    logits = z @ params["out_w"].T + params["out_b"]
    return jax.nn.softmax(logits, axis=1)


def init_params(key):
    ks = jax.random.split(key, 18)

    def u(k, shape, scale):
        return jax.random.uniform(k, shape, jnp.float32, -scale, scale)

    s1 = 1.0 / float(jnp.sqrt(jnp.float32(HIDDEN1)))
    s2 = 1.0 / float(jnp.sqrt(jnp.float32(HIDDEN2)))
    sf = 1.0 / float(jnp.sqrt(jnp.float32(FC_DIM)))
    return {
        # nn.LSTM(input_size, hidden1)
        "w_ih1": u(ks[0], (4 * HIDDEN1, INPUT_SIZE), s1),
        "w_hh1": u(ks[1], (4 * HIDDEN1, HIDDEN1), s1),
        "b_ih1": u(ks[2], (4 * HIDDEN1,), s1),
        "b_hh1": u(ks[3], (4 * HIDDEN1,), s1),
        # nn.LSTM(hidden1, hidden2)
        "w_ih2": u(ks[4], (4 * HIDDEN2, HIDDEN1), s2),
        "w_hh2": u(ks[5], (4 * HIDDEN2, HIDDEN2), s2),
        "b_ih2": u(ks[6], (4 * HIDDEN2,), s2),
        "b_hh2": u(ks[7], (4 * HIDDEN2,), s2),
        # fc1: Linear(hidden2, 64)
        "fc1_w": u(ks[8], (FC_DIM, HIDDEN2), sf),
        "fc1_b": u(ks[9], (FC_DIM,), sf),
        # fc2: Linear(64, 64)
        "fc2_w": u(ks[10], (FC_DIM, FC_DIM), sf),
        "fc2_b": u(ks[11], (FC_DIM,), sf),
        # output_layer: Linear(64, 2)
        "out_w": u(ks[12], (OUTPUT_SIZE, FC_DIM), sf),
        "out_b": u(ks[13], (OUTPUT_SIZE,), sf),
        # BatchNorm1d(64) eval-mode params (non-trivial to exercise the
        # general gamma/beta/mean/var folding; a fresh module has 1/0/0/1).
        "bn_gamma": 1.0 + 0.1 * u(ks[14], (FC_DIM,), 1.0),
        "bn_beta": 0.1 * u(ks[15], (FC_DIM,), 1.0),
        "bn_mean": 0.1 * u(ks[16], (FC_DIM,), 1.0),
        "bn_var": 1.0 + 0.1 * jnp.abs(u(ks[17], (FC_DIM,), 1.0)),
    }


if __name__ == "__main__":
    key = jax.random.PRNGKey(0)
    k_x, k_p = jax.random.split(key)

    B, T = 32, 16
    x = jax.random.normal(k_x, (B, T, INPUT_SIZE), dtype=jnp.float32)
    params = init_params(k_p)

    # Small demo tiles that still exercise both grid axes:
    #   grid = (2 batch tiles, 2 time chunks) -> megacore + state carry paths.
    fn = jax.jit(functools.partial(lstm_classifier, b_tile=16, t_chunk=8))
    out = jax.block_until_ready(fn(x, params))
    ref = reference(x, params)

    assert out.shape == (B, OUTPUT_SIZE)
    assert bool(jnp.all(jnp.isfinite(out)))
    # softmax rows sum to ~1 (exact division in-kernel)
    assert bool(jnp.allclose(jnp.sum(out, axis=1), 1.0, atol=1e-5))
    # match the pure-JAX f32 reference (tolerance relaxed for bf16 MXU operands)
    assert bool(jnp.allclose(out, ref, atol=5e-2)), \
        float(jnp.max(jnp.abs(out - ref)))
    print("KERNEL_OK")
</pallas_src>

<mosaic_0001>
module attributes {stable_mosaic.version = 11 : i64} {
  func.func @_fused_kernel(%arg0: i32, %arg1: i32, %arg2: memref<8x16x256xbf16, #tpu.memory_space<vmem>>, %arg3: memref<256x512xbf16, #tpu.memory_space<vmem>>, %arg4: memref<128x512xbf16, #tpu.memory_space<vmem>>, %arg5: memref<1x512xf32, #tpu.memory_space<vmem>>, %arg6: memref<128x512xbf16, #tpu.memory_space<vmem>>, %arg7: memref<128x512xbf16, #tpu.memory_space<vmem>>, %arg8: memref<1x512xf32, #tpu.memory_space<vmem>>, %arg9: memref<128x128xbf16, #tpu.memory_space<vmem>>, %arg10: memref<1x128xf32, #tpu.memory_space<vmem>>, %arg11: memref<128x128xbf16, #tpu.memory_space<vmem>>, %arg12: memref<1x128xf32, #tpu.memory_space<vmem>>, %arg13: memref<128x128xbf16, #tpu.memory_space<vmem>>, %arg14: memref<1x128xf32, #tpu.memory_space<vmem>>, %arg15: memref<16x128xf32, #tpu.memory_space<vmem>>, %arg16: memref<128x512xf32, #tpu.memory_space<vmem>>, %arg17: memref<16x128xf32, #tpu.memory_space<vmem>>, %arg18: memref<16x128xf32, #tpu.memory_space<vmem>>, %arg19: memref<16x128xf32, #tpu.memory_space<vmem>>, %arg20: memref<16x128xf32, #tpu.memory_space<vmem>>) attributes {dimension_semantics = [#tpu.dimension_semantics<parallel>, #tpu.dimension_semantics<arbitrary>], iteration_bounds = array<i64: 2, 2>, scalar_prefetch = 0 : i64, scratch_operands = 5 : i64, tpu.core_type = #tpu.core_type<tc>, window_params = [{transform_indices = @transform_0, window_bounds = array<i64: 8, 16, 256>}, {pipeline_mode = #tpu.pipeline_mode<synchronous>, transform_indices = @transform_1, window_bounds = array<i64: 256, 512>}, {pipeline_mode = #tpu.pipeline_mode<synchronous>, transform_indices = @transform_2, window_bounds = array<i64: 128, 512>}, {pipeline_mode = #tpu.pipeline_mode<synchronous>, transform_indices = @transform_3, window_bounds = array<i64: 1, 512>}, {pipeline_mode = #tpu.pipeline_mode<synchronous>, transform_indices = @transform_4, window_bounds = array<i64: 128, 512>}, {pipeline_mode = #tpu.pipeline_mode<synchronous>, transform_indices = @transform_5, window_bounds = array<i64: 128, 512>}, {pipeline_mode = #tpu.pipeline_mode<synchronous>, transform_indices = @transform_6, window_bounds = array<i64: 1, 512>}, {pipeline_mode = #tpu.pipeline_mode<synchronous>, transform_indices = @transform_7, window_bounds = array<i64: 128, 128>}, {pipeline_mode = #tpu.pipeline_mode<synchronous>, transform_indices = @transform_8, window_bounds = array<i64: 1, 128>}, {pipeline_mode = #tpu.pipeline_mode<synchronous>, transform_indices = @transform_9, window_bounds = array<i64: 128, 128>}, {pipeline_mode = #tpu.pipeline_mode<synchronous>, transform_indices = @transform_10, window_bounds = array<i64: 1, 128>}, {pipeline_mode = #tpu.pipeline_mode<synchronous>, transform_indices = @transform_11, window_bounds = array<i64: 128, 128>}, {pipeline_mode = #tpu.pipeline_mode<synchronous>, transform_indices = @transform_12, window_bounds = array<i64: 1, 128>}, {transform_indices = @transform_13, window_bounds = array<i64: 16, 128>}]} {
    %c0_i32 = arith.constant 0 : i32
    %0 = arith.cmpi eq, %arg1, %c0_i32 : i32
    %1 = arith.extui %0 : i1 to i32
    %c0_i32_0 = arith.constant 0 : i32
    %2 = arith.cmpi ne, %1, %c0_i32_0 : i32
    scf.if %2 {
      %cst_123 = arith.constant 0.000000e+00 : f32
      %532 = vector.broadcast %cst_123 : f32 to vector<16x128xf32>
      %c0_124 = arith.constant 0 : index
      %c0_125 = arith.constant 0 : index
      %533 = vector.load %arg17[%c0_124, %c0_125] : memref<16x128xf32, #tpu.memory_space<vmem>>, vector<16x128xf32>
      tpu.vector_store %arg17[%c0_124, %c0_125], %532 {strides = array<i32>} : memref<16x128xf32, #tpu.memory_space<vmem>>, vector<16x128xf32>,
      %cst_126 = arith.constant 0.000000e+00 : f32
      %534 = vector.broadcast %cst_126 : f32 to vector<16x128xf32>
      %c0_127 = arith.constant 0 : index
      %c0_128 = arith.constant 0 : index
      %535 = vector.load %arg18[%c0_127, %c0_128] : memref<16x128xf32, #tpu.memory_space<vmem>>, vector<16x128xf32>
      tpu.vector_store %arg18[%c0_127, %c0_128], %534 {strides = array<i32>} : memref<16x128xf32, #tpu.memory_space<vmem>>, vector<16x128xf32>,
      %cst_129 = arith.constant 0.000000e+00 : f32
      %536 = vector.broadcast %cst_129 : f32 to vector<16x128xf32>
      %c0_130 = arith.constant 0 : index
      %c0_131 = arith.constant 0 : index
      %537 = vector.load %arg19[%c0_130, %c0_131] : memref<16x128xf32, #tpu.memory_space<vmem>>, vector<16x128xf32>
      tpu.vector_store %arg19[%c0_130, %c0_131], %536 {strides = array<i32>} : memref<16x128xf32, #tpu.memory_space<vmem>>, vector<16x128xf32>,
      %cst_132 = arith.constant 0.000000e+00 : f32
      %538 = vector.broadcast %cst_132 : f32 to vector<16x128xf32>
      %c0_133 = arith.constant 0 : index
      %c0_134 = arith.constant 0 : index
      %539 = vector.load %arg20[%c0_133, %c0_134] : memref<16x128xf32, #tpu.memory_space<vmem>>, vector<16x128xf32>
      tpu.vector_store %arg20[%c0_133, %c0_134], %538 {strides = array<i32>} : memref<16x128xf32, #tpu.memory_space<vmem>>, vector<16x128xf32>,
    } else {
    }
    %c0 = arith.constant 0 : index
    %c0_1 = arith.constant 0 : index
    %c0_2 = arith.constant 0 : index
    %3 = vector.load %arg2[%c0, %c0_1, %c0_2] : memref<8x16x256xbf16, #tpu.memory_space<vmem>>, vector<8x16x256xbf16>
    %4 = vector.shape_cast %3 : vector<8x16x256xbf16> to vector<128x256xbf16>
    %c0_3 = arith.constant 0 : index
    %c0_4 = arith.constant 0 : index
    %5 = vector.load %arg3[%c0_3, %c0_4] : memref<256x512xbf16, #tpu.memory_space<vmem>>, vector<256x512xbf16>
    %cst = arith.constant dense<0.000000e+00> : vector<128x512xf32>
    %6 = tpu.matmul %4, %5, %cst {dimension_numbers = #tpu.dot_dimension_numbers<[1], [0], [0], [1], [0, 0, 1, 1], [], []>} : vector<128x256xbf16>, vector<256x512xbf16>, vector<128x512xf32> -> vector<128x512xf32>
    %c0_5 = arith.constant 0 : index
    %c0_6 = arith.constant 0 : index
    %7 = vector.load %arg5[%c0_5, %c0_6] : memref<1x512xf32, #tpu.memory_space<vmem>>, vector<1x512xf32>
    %8 = vector.broadcast %7 : vector<1x512xf32> to vector<128x512xf32>
    %9 = arith.addf %6, %8 : vector<128x512xf32>
    %c0_7 = arith.constant 0 : index
    %c0_8 = arith.constant 0 : index
    %10 = vector.load %arg16[%c0_7, %c0_8] : memref<128x512xf32, #tpu.memory_space<vmem>>, vector<128x512xf32>
    tpu.vector_store %arg16[%c0_7, %c0_8], %9 {strides = array<i32>} : memref<128x512xf32, #tpu.memory_space<vmem>>, vector<128x512xf32>,
    %c0_9 = arith.constant 0 : index
    %c0_10 = arith.constant 0 : index
    %11 = vector.load %arg4[%c0_9, %c0_10] : memref<128x512xbf16, #tpu.memory_space<vmem>>, vector<128x512xbf16>
    %c0_11 = arith.constant 0 : index
    %c0_12 = arith.constant 0 : index
    %12 = vector.load %arg6[%c0_11, %c0_12] : memref<128x512xbf16, #tpu.memory_space<vmem>>, vector<128x512xbf16>
    %c0_13 = arith.constant 0 : index
    %c0_14 = arith.constant 0 : index
    %13 = vector.load %arg7[%c0_13, %c0_14] : memref<128x512xbf16, #tpu.memory_space<vmem>>, vector<128x512xbf16>
    %c0_15 = arith.constant 0 : index
    %c0_16 = arith.constant 0 : index
    %14 = vector.load %arg8[%c0_15, %c0_16] : memref<1x512xf32, #tpu.memory_space<vmem>>, vector<1x512xf32>
    %15 = vector.shape_cast %14 : vector<1x512xf32> to vector<1x512xf32>
    %16 = vector.broadcast %15 : vector<1x512xf32> to vector<16x512xf32>
    %c0_17 = arith.constant 0 : index
    %c0_18 = arith.constant 0 : index
    %17 = vector.load %arg17[%c0_17, %c0_18] : memref<16x128xf32, #tpu.memory_space<vmem>>, vector<16x128xf32>
    %c0_19 = arith.constant 0 : index
    %c0_20 = arith.constant 0 : index
    %18 = vector.load %arg18[%c0_19, %c0_20] : memref<16x128xf32, #tpu.memory_space<vmem>>, vector<16x128xf32>
    %c0_21 = arith.constant 0 : index
    %c0_22 = arith.constant 0 : index
    %19 = vector.load %arg19[%c0_21, %c0_22] : memref<16x128xf32, #tpu.memory_space<vmem>>, vector<16x128xf32>
    %c0_23 = arith.constant 0 : index
    %c0_24 = arith.constant 0 : index
    %20 = vector.load %arg20[%c0_23, %c0_24] : memref<16x128xf32, #tpu.memory_space<vmem>>, vector<16x128xf32>
    %c0_i32_25 = arith.constant 0 : i32
    %c16_i32 = arith.constant 16 : i32
    %21 = arith.muli %c0_i32_25, %c16_i32 : i32
    %22 = tpu.assume_multiple %21, 8 : i32
    %23 = arith.index_cast %22 : i32 to index
    %c0_26 = arith.constant 0 : index
    %24 = vector.load %arg16[%23, %c0_26] : memref<128x512xf32, #tpu.memory_space<vmem>>, vector<16x512xf32>
    %25 = arith.truncf %17 : vector<16x128xf32> to vector<16x128xbf16>
    %cst_27 = arith.constant dense<0.000000e+00> : vector<16x512xf32>
    %26 = tpu.matmul %25, %11, %cst_27 {dimension_numbers = #tpu.dot_dimension_numbers<[1], [0], [0], [1], [0, 0, 1, 1], [], []>} : vector<16x128xbf16>, vector<128x512xbf16>, vector<16x512xf32> -> vector<16x512xf32>
    %27 = arith.addf %24, %26 : vector<16x512xf32>
    %28 = vector.extract_strided_slice %27 {offsets = [0, 0], sizes = [16, 128], strides = [1, 1]} : vector<16x512xf32> to vector<16x128xf32>
    %29 = arith.negf %28 : vector<16x128xf32>
    %30 = math.exp %29 : vector<16x128xf32>
    %cst_28 = arith.constant 1.000000e+00 : f32
    %31 = vector.broadcast %cst_28 : f32 to vector<16x128xf32>
    %32 = arith.addf %31, %30 : vector<16x128xf32>
    %33 = arith.divf %31, %32 : vector<16x128xf32>
    %34 = vector.extract_strided_slice %27 {offsets = [0, 128], sizes = [16, 128], strides = [1, 1]} : vector<16x512xf32> to vector<16x128xf32>
    %35 = arith.negf %34 : vector<16x128xf32>
    %36 = math.exp %35 : vector<16x128xf32>
    %cst_29 = arith.constant 1.000000e+00 : f32
    %37 = vector.broadcast %cst_29 : f32 to vector<16x128xf32>
    %38 = arith.addf %37, %36 : vector<16x128xf32>
    %39 = arith.divf %37, %38 : vector<16x128xf32>
    %40 = vector.extract_strided_slice %27 {offsets = [0, 256], sizes = [16, 128], strides = [1, 1]} : vector<16x512xf32> to vector<16x128xf32>
    %41 = math.tanh %40 : vector<16x128xf32>
    %42 = vector.extract_strided_slice %27 {offsets = [0, 384], sizes = [16, 128], strides = [1, 1]} : vector<16x512xf32> to vector<16x128xf32>
    %43 = arith.negf %42 : vector<16x128xf32>
    %44 = math.exp %43 : vector<16x128xf32>
    %cst_30 = arith.constant 1.000000e+00 : f32
    %45 = vector.broadcast %cst_30 : f32 to vector<16x128xf32>
    %46 = arith.addf %45, %44 : vector<16x128xf32>
    %47 = arith.divf %45, %46 : vector<16x128xf32>
    %48 = arith.mulf %39, %18 : vector<16x128xf32>
    %49 = arith.mulf %33, %41 : vector<16x128xf32>
    %50 = arith.addf %48, %49 : vector<16x128xf32>
    %51 = math.tanh %50 : vector<16x128xf32>
    %52 = arith.mulf %47, %51 : vector<16x128xf32>
    %53 = arith.truncf %52 : vector<16x128xf32> to vector<16x128xbf16>
    %cst_31 = arith.constant dense<0.000000e+00> : vector<16x512xf32>
    %54 = tpu.matmul %53, %12, %cst_31 {dimension_numbers = #tpu.dot_dimension_numbers<[1], [0], [0], [1], [0, 0, 1, 1], [], []>} : vector<16x128xbf16>, vector<128x512xbf16>, vector<16x512xf32> -> vector<16x512xf32>
    %55 = arith.truncf %19 : vector<16x128xf32> to vector<16x128xbf16>
    %cst_32 = arith.constant dense<0.000000e+00> : vector<16x512xf32>
    %56 = tpu.matmul %55, %13, %cst_32 {dimension_numbers = #tpu.dot_dimension_numbers<[1], [0], [0], [1], [0, 0, 1, 1], [], []>} : vector<16x128xbf16>, vector<128x512xbf16>, vector<16x512xf32> -> vector<16x512xf32>
    %57 = arith.addf %54, %56 : vector<16x512xf32>
    %58 = arith.addf %57, %16 : vector<16x512xf32>
    %59 = vector.extract_strided_slice %58 {offsets = [0, 0], sizes = [16, 128], strides = [1, 1]} : vector<16x512xf32> to vector<16x128xf32>
    %60 = arith.negf %59 : vector<16x128xf32>
    %61 = math.exp %60 : vector<16x128xf32>
    %cst_33 = arith.constant 1.000000e+00 : f32
    %62 = vector.broadcast %cst_33 : f32 to vector<16x128xf32>
    %63 = arith.addf %62, %61 : vector<16x128xf32>
    %64 = arith.divf %62, %63 : vector<16x128xf32>
    %65 = vector.extract_strided_slice %58 {offsets = [0, 128], sizes = [16, 128], strides = [1, 1]} : vector<16x512xf32> to vector<16x128xf32>
    %66 = arith.negf %65 : vector<16x128xf32>
    %67 = math.exp %66 : vector<16x128xf32>
    %cst_34 = arith.constant 1.000000e+00 : f32
    %68 = vector.broadcast %cst_34 : f32 to vector<16x128xf32>
    %69 = arith.addf %68, %67 : vector<16x128xf32>
    %70 = arith.divf %68, %69 : vector<16x128xf32>
    %71 = vector.extract_strided_slice %58 {offsets = [0, 256], sizes = [16, 128], strides = [1, 1]} : vector<16x512xf32> to vector<16x128xf32>
    %72 = math.tanh %71 : vector<16x128xf32>
    %73 = vector.extract_strided_slice %58 {offsets = [0, 384], sizes = [16, 128], strides = [1, 1]} : vector<16x512xf32> to vector<16x128xf32>
    %74 = arith.negf %73 : vector<16x128xf32>
    %75 = math.exp %74 : vector<16x128xf32>
    %cst_35 = arith.constant 1.000000e+00 : f32
    %76 = vector.broadcast %cst_35 : f32 to vector<16x128xf32>
    %77 = arith.addf %76, %75 : vector<16x128xf32>
    %78 = arith.divf %76, %77 : vector<16x128xf32>
    %79 = arith.mulf %70, %20 : vector<16x128xf32>
    %80 = arith.mulf %64, %72 : vector<16x128xf32>
    %81 = arith.addf %79, %80 : vector<16x128xf32>
    %82 = math.tanh %81 : vector<16x128xf32>
    %83 = arith.mulf %78, %82 : vector<16x128xf32>
    %c1_i32 = arith.constant 1 : i32
    %c16_i32_36 = arith.constant 16 : i32
    %84 = arith.muli %c1_i32, %c16_i32_36 : i32
    %85 = tpu.assume_multiple %84, 8 : i32
    %86 = arith.index_cast %85 : i32 to index
    %c0_37 = arith.constant 0 : index
    %87 = vector.load %arg16[%86, %c0_37] : memref<128x512xf32, #tpu.memory_space<vmem>>, vector<16x512xf32>
    %88 = arith.truncf %52 : vector<16x128xf32> to vector<16x128xbf16>
    %cst_38 = arith.constant dense<0.000000e+00> : vector<16x512xf32>
    %89 = tpu.matmul %88, %11, %cst_38 {dimension_numbers = #tpu.dot_dimension_numbers<[1], [0], [0], [1], [0, 0, 1, 1], [], []>} : vector<16x128xbf16>, vector<128x512xbf16>, vector<16x512xf32> -> vector<16x512xf32>
    %90 = arith.addf %87, %89 : vector<16x512xf32>
    %91 = vector.extract_strided_slice %90 {offsets = [0, 0], sizes = [16, 128], strides = [1, 1]} : vector<16x512xf32> to vector<16x128xf32>
    %92 = arith.negf %91 : vector<16x128xf32>
    %93 = math.exp %92 : vector<16x128xf32>
    %cst_39 = arith.constant 1.000000e+00 : f32
    %94 = vector.broadcast %cst_39 : f32 to vector<16x128xf32>
    %95 = arith.addf %94, %93 : vector<16x128xf32>
    %96 = arith.divf %94, %95 : vector<16x128xf32>
    %97 = vector.extract_strided_slice %90 {offsets = [0, 128], sizes = [16, 128], strides = [1, 1]} : vector<16x512xf32> to vector<16x128xf32>
    %98 = arith.negf %97 : vector<16x128xf32>
    %99 = math.exp %98 : vector<16x128xf32>
    %cst_40 = arith.constant 1.000000e+00 : f32
    %100 = vector.broadcast %cst_40 : f32 to vector<16x128xf32>
    %101 = arith.addf %100, %99 : vector<16x128xf32>
    %102 = arith.divf %100, %101 : vector<16x128xf32>
    %103 = vector.extract_strided_slice %90 {offsets = [0, 256], sizes = [16, 128], strides = [1, 1]} : vector<16x512xf32> to vector<16x128xf32>
    %104 = math.tanh %103 : vector<16x128xf32>
    %105 = vector.extract_strided_slice %90 {offsets = [0, 384], sizes = [16, 128], strides = [1, 1]} : vector<16x512xf32> to vector<16x128xf32>
    %106 = arith.negf %105 : vector<16x128xf32>
    %107 = math.exp %106 : vector<16x128xf32>
    %cst_41 = arith.constant 1.000000e+00 : f32
    %108 = vector.broadcast %cst_41 : f32 to vector<16x128xf32>
    %109 = arith.addf %108, %107 : vector<16x128xf32>
    %110 = arith.divf %108, %109 : vector<16x128xf32>
    %111 = arith.mulf %102, %50 : vector<16x128xf32>
    %112 = arith.mulf %96, %104 : vector<16x128xf32>
    %113 = arith.addf %111, %112 : vector<16x128xf32>
    %114 = math.tanh %113 : vector<16x128xf32>
    %115 = arith.mulf %110, %114 : vector<16x128xf32>
    %116 = arith.truncf %115 : vector<16x128xf32> to vector<16x128xbf16>
    %cst_42 = arith.constant dense<0.000000e+00> : vector<16x512xf32>
    %117 = tpu.matmul %116, %12, %cst_42 {dimension_numbers = #tpu.dot_dimension_numbers<[1], [0], [0], [1], [0, 0, 1, 1], [], []>} : vector<16x128xbf16>, vector<128x512xbf16>, vector<16x512xf32> -> vector<16x512xf32>
    %118 = arith.truncf %83 : vector<16x128xf32> to vector<16x128xbf16>
    %cst_43 = arith.constant dense<0.000000e+00> : vector<16x512xf32>
    %119 = tpu.matmul %118, %13, %cst_43 {dimension_numbers = #tpu.dot_dimension_numbers<[1], [0], [0], [1], [0, 0, 1, 1], [], []>} : vector<16x128xbf16>, vector<128x512xbf16>, vector<16x512xf32> -> vector<16x512xf32>
    %120 = arith.addf %117, %119 : vector<16x512xf32>
    %121 = arith.addf %120, %16 : vector<16x512xf32>
    %122 = vector.extract_strided_slice %121 {offsets = [0, 0], sizes = [16, 128], strides = [1, 1]} : vector<16x512xf32> to vector<16x128xf32>
    %123 = arith.negf %122 : vector<16x128xf32>
    %124 = math.exp %123 : vector<16x128xf32>
    %cst_44 = arith.constant 1.000000e+00 : f32
    %125 = vector.broadcast %cst_44 : f32 to vector<16x128xf32>
    %126 = arith.addf %125, %124 : vector<16x128xf32>
    %127 = arith.divf %125, %126 : vector<16x128xf32>
    %128 = vector.extract_strided_slice %121 {offsets = [0, 128], sizes = [16, 128], strides = [1, 1]} : vector<16x512xf32> to vector<16x128xf32>
    %129 = arith.negf %128 : vector<16x128xf32>
    %130 = math.exp %129 : vector<16x128xf32>
    %cst_45 = arith.constant 1.000000e+00 : f32
    %131 = vector.broadcast %cst_45 : f32 to vector<16x128xf32>
    %132 = arith.addf %131, %130 : vector<16x128xf32>
    %133 = arith.divf %131, %132 : vector<16x128xf32>
    %134 = vector.extract_strided_slice %121 {offsets = [0, 256], sizes = [16, 128], strides = [1, 1]} : vector<16x512xf32> to vector<16x128xf32>
    %135 = math.tanh %134 : vector<16x128xf32>
    %136 = vector.extract_strided_slice %121 {offsets = [0, 384], sizes = [16, 128], strides = [1, 1]} : vector<16x512xf32> to vector<16x128xf32>
    %137 = arith.negf %136 : vector<16x128xf32>
    %138 = math.exp %137 : vector<16x128xf32>
    %cst_46 = arith.constant 1.000000e+00 : f32
    %139 = vector.broadcast %cst_46 : f32 to vector<16x128xf32>
    %140 = arith.addf %139, %138 : vector<16x128xf32>
    %141 = arith.divf %139, %140 : vector<16x128xf32>
    %142 = arith.mulf %133, %81 : vector<16x128xf32>
    %143 = arith.mulf %127, %135 : vector<16x128xf32>
    %144 = arith.addf %142, %143 : vector<16x128xf32>
    %145 = math.tanh %144 : vector<16x128xf32>
    %146 = arith.mulf %141, %145 : vector<16x128xf32>
    %c2_i32 = arith.constant 2 : i32
    %c16_i32_47 = arith.constant 16 : i32
    %147 = arith.muli %c2_i32, %c16_i32_47 : i32
    %148 = tpu.assume_multiple %147, 8 : i32
    %149 = arith.index_cast %148 : i32 to index
    %c0_48 = arith.constant 0 : index
    %150 = vector.load %arg16[%149, %c0_48] : memref<128x512xf32, #tpu.memory_space<vmem>>, vector<16x512xf32>
    %151 = arith.truncf %115 : vector<16x128xf32> to vector<16x128xbf16>
    %cst_49 = arith.constant dense<0.000000e+00> : vector<16x512xf32>
    %152 = tpu.matmul %151, %11, %cst_49 {dimension_numbers = #tpu.dot_dimension_numbers<[1], [0], [0], [1], [0, 0, 1, 1], [], []>} : vector<16x128xbf16>, vector<128x512xbf16>, vector<16x512xf32> -> vector<16x512xf32>
    %153 = arith.addf %150, %152 : vector<16x512xf32>
    %154 = vector.extract_strided_slice %153 {offsets = [0, 0], sizes = [16, 128], strides = [1, 1]} : vector<16x512xf32> to vector<16x128xf32>
    %155 = arith.negf %154 : vector<16x128xf32>
    %156 = math.exp %155 : vector<16x128xf32>
    %cst_50 = arith.constant 1.000000e+00 : f32
    %157 = vector.broadcast %cst_50 : f32 to vector<16x128xf32>
    %158 = arith.addf %157, %156 : vector<16x128xf32>
    %159 = arith.divf %157, %158 : vector<16x128xf32>
    %160 = vector.extract_strided_slice %153 {offsets = [0, 128], sizes = [16, 128], strides = [1, 1]} : vector<16x512xf32> to vector<16x128xf32>
    %161 = arith.negf %160 : vector<16x128xf32>
    %162 = math.exp %161 : vector<16x128xf32>
    %cst_51 = arith.constant 1.000000e+00 : f32
    %163 = vector.broadcast %cst_51 : f32 to vector<16x128xf32>
    %164 = arith.addf %163, %162 : vector<16x128xf32>
    %165 = arith.divf %163, %164 : vector<16x128xf32>
    %166 = vector.extract_strided_slice %153 {offsets = [0, 256], sizes = [16, 128], strides = [1, 1]} : vector<16x512xf32> to vector<16x128xf32>
    %167 = math.tanh %166 : vector<16x128xf32>
    %168 = vector.extract_strided_slice %153 {offsets = [0, 384], sizes = [16, 128], strides = [1, 1]} : vector<16x512xf32> to vector<16x128xf32>
    %169 = arith.negf %168 : vector<16x128xf32>
    %170 = math.exp %169 : vector<16x128xf32>
    %cst_52 = arith.constant 1.000000e+00 : f32
    %171 = vector.broadcast %cst_52 : f32 to vector<16x128xf32>
    %172 = arith.addf %171, %170 : vector<16x128xf32>
    %173 = arith.divf %171, %172 : vector<16x128xf32>
    %174 = arith.mulf %165, %113 : vector<16x128xf32>
    %175 = arith.mulf %159, %167 : vector<16x128xf32>
    %176 = arith.addf %174, %175 : vector<16x128xf32>
    %177 = math.tanh %176 : vector<16x128xf32>
    %178 = arith.mulf %173, %177 : vector<16x128xf32>
    %179 = arith.truncf %178 : vector<16x128xf32> to vector<16x128xbf16>
    %cst_53 = arith.constant dense<0.000000e+00> : vector<16x512xf32>
    %180 = tpu.matmul %179, %12, %cst_53 {dimension_numbers = #tpu.dot_dimension_numbers<[1], [0], [0], [1], [0, 0, 1, 1], [], []>} : vector<16x128xbf16>, vector<128x512xbf16>, vector<16x512xf32> -> vector<16x512xf32>
    %181 = arith.truncf %146 : vector<16x128xf32> to vector<16x128xbf16>
    %cst_54 = arith.constant dense<0.000000e+00> : vector<16x512xf32>
    %182 = tpu.matmul %181, %13, %cst_54 {dimension_numbers = #tpu.dot_dimension_numbers<[1], [0], [0], [1], [0, 0, 1, 1], [], []>} : vector<16x128xbf16>, vector<128x512xbf16>, vector<16x512xf32> -> vector<16x512xf32>
    %183 = arith.addf %180, %182 : vector<16x512xf32>
    %184 = arith.addf %183, %16 : vector<16x512xf32>
    %185 = vector.extract_strided_slice %184 {offsets = [0, 0], sizes = [16, 128], strides = [1, 1]} : vector<16x512xf32> to vector<16x128xf32>
    %186 = arith.negf %185 : vector<16x128xf32>
    %187 = math.exp %186 : vector<16x128xf32>
    %cst_55 = arith.constant 1.000000e+00 : f32
    %188 = vector.broadcast %cst_55 : f32 to vector<16x128xf32>
    %189 = arith.addf %188, %187 : vector<16x128xf32>
    %190 = arith.divf %188, %189 : vector<16x128xf32>
    %191 = vector.extract_strided_slice %184 {offsets = [0, 128], sizes = [16, 128], strides = [1, 1]} : vector<16x512xf32> to vector<16x128xf32>
    %192 = arith.negf %191 : vector<16x128xf32>
    %193 = math.exp %192 : vector<16x128xf32>
    %cst_56 = arith.constant 1.000000e+00 : f32
    %194 = vector.broadcast %cst_56 : f32 to vector<16x128xf32>
    %195 = arith.addf %194, %193 : vector<16x128xf32>
    %196 = arith.divf %194, %195 : vector<16x128xf32>
    %197 = vector.extract_strided_slice %184 {offsets = [0, 256], sizes = [16, 128], strides = [1, 1]} : vector<16x512xf32> to vector<16x128xf32>
    %198 = math.tanh %197 : vector<16x128xf32>
    %199 = vector.extract_strided_slice %184 {offsets = [0, 384], sizes = [16, 128], strides = [1, 1]} : vector<16x512xf32> to vector<16x128xf32>
    %200 = arith.negf %199 : vector<16x128xf32>
    %201 = math.exp %200 : vector<16x128xf32>
    %cst_57 = arith.constant 1.000000e+00 : f32
    %202 = vector.broadcast %cst_57 : f32 to vector<16x128xf32>
    %203 = arith.addf %202, %201 : vector<16x128xf32>
    %204 = arith.divf %202, %203 : vector<16x128xf32>
    %205 = arith.mulf %196, %144 : vector<16x128xf32>
    %206 = arith.mulf %190, %198 : vector<16x128xf32>
    %207 = arith.addf %205, %206 : vector<16x128xf32>
    %208 = math.tanh %207 : vector<16x128xf32>
    %209 = arith.mulf %204, %208 : vector<16x128xf32>
    %c3_i32 = arith.constant 3 : i32
    %c16_i32_58 = arith.constant 16 : i32
    %210 = arith.muli %c3_i32, %c16_i32_58 : i32
    %211 = tpu.assume_multiple %210, 8 : i32
    %212 = arith.index_cast %211 : i32 to index
    %c0_59 = arith.constant 0 : index
    %213 = vector.load %arg16[%212, %c0_59] : memref<128x512xf32, #tpu.memory_space<vmem>>, vector<16x512xf32>
    %214 = arith.truncf %178 : vector<16x128xf32> to vector<16x128xbf16>
    %cst_60 = arith.constant dense<0.000000e+00> : vector<16x512xf32>
    %215 = tpu.matmul %214, %11, %cst_60 {dimension_numbers = #tpu.dot_dimension_numbers<[1], [0], [0], [1], [0, 0, 1, 1], [], []>} : vector<16x128xbf16>, vector<128x512xbf16>, vector<16x512xf32> -> vector<16x512xf32>
    %216 = arith.addf %213, %215 : vector<16x512xf32>
    %217 = vector.extract_strided_slice %216 {offsets = [0, 0], sizes = [16, 128], strides = [1, 1]} : vector<16x512xf32> to vector<16x128xf32>
    %218 = arith.negf %217 : vector<16x128xf32>
    %219 = math.exp %218 : vector<16x128xf32>
    %cst_61 = arith.constant 1.000000e+00 : f32
    %220 = vector.broadcast %cst_61 : f32 to vector<16x128xf32>
    %221 = arith.addf %220, %219 : vector<16x128xf32>
    %222 = arith.divf %220, %221 : vector<16x128xf32>
    %223 = vector.extract_strided_slice %216 {offsets = [0, 128], sizes = [16, 128], strides = [1, 1]} : vector<16x512xf32> to vector<16x128xf32>
    %224 = arith.negf %223 : vector<16x128xf32>
    %225 = math.exp %224 : vector<16x128xf32>
    %cst_62 = arith.constant 1.000000e+00 : f32
    %226 = vector.broadcast %cst_62 : f32 to vector<16x128xf32>
    %227 = arith.addf %226, %225 : vector<16x128xf32>
    %228 = arith.divf %226, %227 : vector<16x128xf32>
    %229 = vector.extract_strided_slice %216 {offsets = [0, 256], sizes = [16, 128], strides = [1, 1]} : vector<16x512xf32> to vector<16x128xf32>
    %230 = math.tanh %229 : vector<16x128xf32>
    %231 = vector.extract_strided_slice %216 {offsets = [0, 384], sizes = [16, 128], strides = [1, 1]} : vector<16x512xf32> to vector<16x128xf32>
    %232 = arith.negf %231 : vector<16x128xf32>
    %233 = math.exp %232 : vector<16x128xf32>
    %cst_63 = arith.constant 1.000000e+00 : f32
    %234 = vector.broadcast %cst_63 : f32 to vector<16x128xf32>
    %235 = arith.addf %234, %233 : vector<16x128xf32>
    %236 = arith.divf %234, %235 : vector<16x128xf32>
    %237 = arith.mulf %228, %176 : vector<16x128xf32>
    %238 = arith.mulf %222, %230 : vector<16x128xf32>
    %239 = arith.addf %237, %238 : vector<16x128xf32>
    %240 = math.tanh %239 : vector<16x128xf32>
    %241 = arith.mulf %236, %240 : vector<16x128xf32>
    %242 = arith.truncf %241 : vector<16x128xf32> to vector<16x128xbf16>
    %cst_64 = arith.constant dense<0.000000e+00> : vector<16x512xf32>
    %243 = tpu.matmul %242, %12, %cst_64 {dimension_numbers = #tpu.dot_dimension_numbers<[1], [0], [0], [1], [0, 0, 1, 1], [], []>} : vector<16x128xbf16>, vector<128x512xbf16>, vector<16x512xf32> -> vector<16x512xf32>
    %244 = arith.truncf %209 : vector<16x128xf32> to vector<16x128xbf16>
    %cst_65 = arith.constant dense<0.000000e+00> : vector<16x512xf32>
    %245 = tpu.matmul %244, %13, %cst_65 {dimension_numbers = #tpu.dot_dimension_numbers<[1], [0], [0], [1], [0, 0, 1, 1], [], []>} : vector<16x128xbf16>, vector<128x512xbf16>, vector<16x512xf32> -> vector<16x512xf32>
    %246 = arith.addf %243, %245 : vector<16x512xf32>
    %247 = arith.addf %246, %16 : vector<16x512xf32>
    %248 = vector.extract_strided_slice %247 {offsets = [0, 0], sizes = [16, 128], strides = [1, 1]} : vector<16x512xf32> to vector<16x128xf32>
    %249 = arith.negf %248 : vector<16x128xf32>
    %250 = math.exp %249 : vector<16x128xf32>
    %cst_66 = arith.constant 1.000000e+00 : f32
    %251 = vector.broadcast %cst_66 : f32 to vector<16x128xf32>
    %252 = arith.addf %251, %250 : vector<16x128xf32>
    %253 = arith.divf %251, %252 : vector<16x128xf32>
    %254 = vector.extract_strided_slice %247 {offsets = [0, 128], sizes = [16, 128], strides = [1, 1]} : vector<16x512xf32> to vector<16x128xf32>
    %255 = arith.negf %254 : vector<16x128xf32>
    %256 = math.exp %255 : vector<16x128xf32>
    %cst_67 = arith.constant 1.000000e+00 : f32
    %257 = vector.broadcast %cst_67 : f32 to vector<16x128xf32>
    %258 = arith.addf %257, %256 : vector<16x128xf32>
    %259 = arith.divf %257, %258 : vector<16x128xf32>
    %260 = vector.extract_strided_slice %247 {offsets = [0, 256], sizes = [16, 128], strides = [1, 1]} : vector<16x512xf32> to vector<16x128xf32>
    %261 = math.tanh %260 : vector<16x128xf32>
    %262 = vector.extract_strided_slice %247 {offsets = [0, 384], sizes = [16, 128], strides = [1, 1]} : vector<16x512xf32> to vector<16x128xf32>
    %263 = arith.negf %262 : vector<16x128xf32>
    %264 = math.exp %263 : vector<16x128xf32>
    %cst_68 = arith.constant 1.000000e+00 : f32
    %265 = vector.broadcast %cst_68 : f32 to vector<16x128xf32>
    %266 = arith.addf %265, %264 : vector<16x128xf32>
    %267 = arith.divf %265, %266 : vector<16x128xf32>
    %268 = arith.mulf %259, %207 : vector<16x128xf32>
    %269 = arith.mulf %253, %261 : vector<16x128xf32>
    %270 = arith.addf %268, %269 : vector<16x128xf32>
    %271 = math.tanh %270 : vector<16x128xf32>
    %272 = arith.mulf %267, %271 : vector<16x128xf32>
    %c4_i32 = arith.constant 4 : i32
    %c16_i32_69 = arith.constant 16 : i32
    %273 = arith.muli %c4_i32, %c16_i32_69 : i32
    %274 = tpu.assume_multiple %273, 8 : i32
    %275 = arith.index_cast %274 : i32 to index
    %c0_70 = arith.constant 0 : index
    %276 = vector.load %arg16[%275, %c0_70] : memref<128x512xf32, #tpu.memory_space<vmem>>, vector<16x512xf32>
    %277 = arith.truncf %241 : vector<16x128xf32> to vector<16x128xbf16>
    %cst_71 = arith.constant dense<0.000000e+00> : vector<16x512xf32>
    %278 = tpu.matmul %277, %11, %cst_71 {dimension_numbers = #tpu.dot_dimension_numbers<[1], [0], [0], [1], [0, 0, 1, 1], [], []>} : vector<16x128xbf16>, vector<128x512xbf16>, vector<16x512xf32> -> vector<16x512xf32>
    %279 = arith.addf %276, %278 : vector<16x512xf32>
    %280 = vector.extract_strided_slice %279 {offsets = [0, 0], sizes = [16, 128], strides = [1, 1]} : vector<16x512xf32> to vector<16x128xf32>
    %281 = arith.negf %280 : vector<16x128xf32>
    %282 = math.exp %281 : vector<16x128xf32>
    %cst_72 = arith.constant 1.000000e+00 : f32
    %283 = vector.broadcast %cst_72 : f32 to vector<16x128xf32>
    %284 = arith.addf %283, %282 : vector<16x128xf32>
    %285 = arith.divf %283, %284 : vector<16x128xf32>
    %286 = vector.extract_strided_slice %279 {offsets = [0, 128], sizes = [16, 128], strides = [1, 1]} : vector<16x512xf32> to vector<16x128xf32>
    %287 = arith.negf %286 : vector<16x128xf32>
    %288 = math.exp %287 : vector<16x128xf32>
    %cst_73 = arith.constant 1.000000e+00 : f32
    %289 = vector.broadcast %cst_73 : f32 to vector<16x128xf32>
    %290 = arith.addf %289, %288 : vector<16x128xf32>
    %291 = arith.divf %289, %290 : vector<16x128xf32>
    %292 = vector.extract_strided_slice %279 {offsets = [0, 256], sizes = [16, 128], strides = [1, 1]} : vector<16x512xf32> to vector<16x128xf32>
    %293 = math.tanh %292 : vector<16x128xf32>
    %294 = vector.extract_strided_slice %279 {offsets = [0, 384], sizes = [16, 128], strides = [1, 1]} : vector<16x512xf32> to vector<16x128xf32>
    %295 = arith.negf %294 : vector<16x128xf32>
    %296 = math.exp %295 : vector<16x128xf32>
    %cst_74 = arith.constant 1.000000e+00 : f32
    %297 = vector.broadcast %cst_74 : f32 to vector<16x128xf32>
    %298 = arith.addf %297, %296 : vector<16x128xf32>
    %299 = arith.divf %297, %298 : vector<16x128xf32>
    %300 = arith.mulf %291, %239 : vector<16x128xf32>
    %301 = arith.mulf %285, %293 : vector<16x128xf32>
    %302 = arith.addf %300, %301 : vector<16x128xf32>
    %303 = math.tanh %302 : vector<16x128xf32>
    %304 = arith.mulf %299, %303 : vector<16x128xf32>
    %305 = arith.truncf %304 : vector<16x128xf32> to vector<16x128xbf16>
    %cst_75 = arith.constant dense<0.000000e+00> : vector<16x512xf32>
    %306 = tpu.matmul %305, %12, %cst_75 {dimension_numbers = #tpu.dot_dimension_numbers<[1], [0], [0], [1], [0, 0, 1, 1], [], []>} : vector<16x128xbf16>, vector<128x512xbf16>, vector<16x512xf32> -> vector<16x512xf32>
    %307 = arith.truncf %272 : vector<16x128xf32> to vector<16x128xbf16>
    %cst_76 = arith.constant dense<0.000000e+00> : vector<16x512xf32>
    %308 = tpu.matmul %307, %13, %cst_76 {dimension_numbers = #tpu.dot_dimension_numbers<[1], [0], [0], [1], [0, 0, 1, 1], [], []>} : vector<16x128xbf16>, vector<128x512xbf16>, vector<16x512xf32> -> vector<16x512xf32>
    %309 = arith.addf %306, %308 : vector<16x512xf32>
    %310 = arith.addf %309, %16 : vector<16x512xf32>
    %311 = vector.extract_strided_slice %310 {offsets = [0, 0], sizes = [16, 128], strides = [1, 1]} : vector<16x512xf32> to vector<16x128xf32>
    %312 = arith.negf %311 : vector<16x128xf32>
    %313 = math.exp %312 : vector<16x128xf32>
    %cst_77 = arith.constant 1.000000e+00 : f32
    %314 = vector.broadcast %cst_77 : f32 to vector<16x128xf32>
    %315 = arith.addf %314, %313 : vector<16x128xf32>
    %316 = arith.divf %314, %315 : vector<16x128xf32>
    %317 = vector.extract_strided_slice %310 {offsets = [0, 128], sizes = [16, 128], strides = [1, 1]} : vector<16x512xf32> to vector<16x128xf32>
    %318 = arith.negf %317 : vector<16x128xf32>
    %319 = math.exp %318 : vector<16x128xf32>
    %cst_78 = arith.constant 1.000000e+00 : f32
    %320 = vector.broadcast %cst_78 : f32 to vector<16x128xf32>
    %321 = arith.addf %320, %319 : vector<16x128xf32>
    %322 = arith.divf %320, %321 : vector<16x128xf32>
    %323 = vector.extract_strided_slice %310 {offsets = [0, 256], sizes = [16, 128], strides = [1, 1]} : vector<16x512xf32> to vector<16x128xf32>
    %324 = math.tanh %323 : vector<16x128xf32>
    %325 = vector.extract_strided_slice %310 {offsets = [0, 384], sizes = [16, 128], strides = [1, 1]} : vector<16x512xf32> to vector<16x128xf32>
    %326 = arith.negf %325 : vector<16x128xf32>
    %327 = math.exp %326 : vector<16x128xf32>
    %cst_79 = arith.constant 1.000000e+00 : f32
    %328 = vector.broadcast %cst_79 : f32 to vector<16x128xf32>
    %329 = arith.addf %328, %327 : vector<16x128xf32>
    %330 = arith.divf %328, %329 : vector<16x128xf32>
    %331 = arith.mulf %322, %270 : vector<16x128xf32>
    %332 = arith.mulf %316, %324 : vector<16x128xf32>
    %333 = arith.addf %331, %332 : vector<16x128xf32>
    %334 = math.tanh %333 : vector<16x128xf32>
    %335 = arith.mulf %330, %334 : vector<16x128xf32>
    %c5_i32 = arith.constant 5 : i32
    %c16_i32_80 = arith.constant 16 : i32
    %336 = arith.muli %c5_i32, %c16_i32_80 : i32
    %337 = tpu.assume_multiple %336, 8 : i32
    %338 = arith.index_cast %337 : i32 to index
    %c0_81 = arith.constant 0 : index
    %339 = vector.load %arg16[%338, %c0_81] : memref<128x512xf32, #tpu.memory_space<vmem>>, vector<16x512xf32>
    %340 = arith.truncf %304 : vector<16x128xf32> to vector<16x128xbf16>
    %cst_82 = arith.constant dense<0.000000e+00> : vector<16x512xf32>
    %341 = tpu.matmul %340, %11, %cst_82 {dimension_numbers = #tpu.dot_dimension_numbers<[1], [0], [0], [1], [0, 0, 1, 1], [], []>} : vector<16x128xbf16>, vector<128x512xbf16>, vector<16x512xf32> -> vector<16x512xf32>
    %342 = arith.addf %339, %341 : vector<16x512xf32>
    %343 = vector.extract_strided_slice %342 {offsets = [0, 0], sizes = [16, 128], strides = [1, 1]} : vector<16x512xf32> to vector<16x128xf32>
    %344 = arith.negf %343 : vector<16x128xf32>
    %345 = math.exp %344 : vector<16x128xf32>
    %cst_83 = arith.constant 1.000000e+00 : f32
    %346 = vector.broadcast %cst_83 : f32 to vector<16x128xf32>
    %347 = arith.addf %346, %345 : vector<16x128xf32>
    %348 = arith.divf %346, %347 : vector<16x128xf32>
    %349 = vector.extract_strided_slice %342 {offsets = [0, 128], sizes = [16, 128], strides = [1, 1]} : vector<16x512xf32> to vector<16x128xf32>
    %350 = arith.negf %349 : vector<16x128xf32>
    %351 = math.exp %350 : vector<16x128xf32>
    %cst_84 = arith.constant 1.000000e+00 : f32
    %352 = vector.broadcast %cst_84 : f32 to vector<16x128xf32>
    %353 = arith.addf %352, %351 : vector<16x128xf32>
    %354 = arith.divf %352, %353 : vector<16x128xf32>
    %355 = vector.extract_strided_slice %342 {offsets = [0, 256], sizes = [16, 128], strides = [1, 1]} : vector<16x512xf32> to vector<16x128xf32>
    %356 = math.tanh %355 : vector<16x128xf32>
    %357 = vector.extract_strided_slice %342 {offsets = [0, 384], sizes = [16, 128], strides = [1, 1]} : vector<16x512xf32> to vector<16x128xf32>
    %358 = arith.negf %357 : vector<16x128xf32>
    %359 = math.exp %358 : vector<16x128xf32>
    %cst_85 = arith.constant 1.000000e+00 : f32
    %360 = vector.broadcast %cst_85 : f32 to vector<16x128xf32>
    %361 = arith.addf %360, %359 : vector<16x128xf32>
    %362 = arith.divf %360, %361 : vector<16x128xf32>
    %363 = arith.mulf %354, %302 : vector<16x128xf32>
    %364 = arith.mulf %348, %356 : vector<16x128xf32>
    %365 = arith.addf %363, %364 : vector<16x128xf32>
    %366 = math.tanh %365 : vector<16x128xf32>
    %367 = arith.mulf %362, %366 : vector<16x128xf32>
    %368 = arith.truncf %367 : vector<16x128xf32> to vector<16x128xbf16>
    %cst_86 = arith.constant dense<0.000000e+00> : vector<16x512xf32>
    %369 = tpu.matmul %368, %12, %cst_86 {dimension_numbers = #tpu.dot_dimension_numbers<[1], [0], [0], [1], [0, 0, 1, 1], [], []>} : vector<16x128xbf16>, vector<128x512xbf16>, vector<16x512xf32> -> vector<16x512xf32>
    %370 = arith.truncf %335 : vector<16x128xf32> to vector<16x128xbf16>
    %cst_87 = arith.constant dense<0.000000e+00> : vector<16x512xf32>
    %371 = tpu.matmul %370, %13, %cst_87 {dimension_numbers = #tpu.dot_dimension_numbers<[1], [0], [0], [1], [0, 0, 1, 1], [], []>} : vector<16x128xbf16>, vector<128x512xbf16>, vector<16x512xf32> -> vector<16x512xf32>
    %372 = arith.addf %369, %371 : vector<16x512xf32>
    %373 = arith.addf %372, %16 : vector<16x512xf32>
    %374 = vector.extract_strided_slice %373 {offsets = [0, 0], sizes = [16, 128], strides = [1, 1]} : vector<16x512xf32> to vector<16x128xf32>
    %375 = arith.negf %374 : vector<16x128xf32>
    %376 = math.exp %375 : vector<16x128xf32>
    %cst_88 = arith.constant 1.000000e+00 : f32
    %377 = vector.broadcast %cst_88 : f32 to vector<16x128xf32>
    %378 = arith.addf %377, %376 : vector<16x128xf32>
    %379 = arith.divf %377, %378 : vector<16x128xf32>
    %380 = vector.extract_strided_slice %373 {offsets = [0, 128], sizes = [16, 128], strides = [1, 1]} : vector<16x512xf32> to vector<16x128xf32>
    %381 = arith.negf %380 : vector<16x128xf32>
    %382 = math.exp %381 : vector<16x128xf32>
    %cst_89 = arith.constant 1.000000e+00 : f32
    %383 = vector.broadcast %cst_89 : f32 to vector<16x128xf32>
    %384 = arith.addf %383, %382 : vector<16x128xf32>
    %385 = arith.divf %383, %384 : vector<16x128xf32>
    %386 = vector.extract_strided_slice %373 {offsets = [0, 256], sizes = [16, 128], strides = [1, 1]} : vector<16x512xf32> to vector<16x128xf32>
    %387 = math.tanh %386 : vector<16x128xf32>
    %388 = vector.extract_strided_slice %373 {offsets = [0, 384], sizes = [16, 128], strides = [1, 1]} : vector<16x512xf32> to vector<16x128xf32>
    %389 = arith.negf %388 : vector<16x128xf32>
    %390 = math.exp %389 : vector<16x128xf32>
    %cst_90 = arith.constant 1.000000e+00 : f32
    %391 = vector.broadcast %cst_90 : f32 to vector<16x128xf32>
    %392 = arith.addf %391, %390 : vector<16x128xf32>
    %393 = arith.divf %391, %392 : vector<16x128xf32>
    %394 = arith.mulf %385, %333 : vector<16x128xf32>
    %395 = arith.mulf %379, %387 : vector<16x128xf32>
    %396 = arith.addf %394, %395 : vector<16x128xf32>
    %397 = math.tanh %396 : vector<16x128xf32>
    %398 = arith.mulf %393, %397 : vector<16x128xf32>
    %c6_i32 = arith.constant 6 : i32
    %c16_i32_91 = arith.constant 16 : i32
    %399 = arith.muli %c6_i32, %c16_i32_91 : i32
    %400 = tpu.assume_multiple %399, 8 : i32
    %401 = arith.index_cast %400 : i32 to index
    %c0_92 = arith.constant 0 : index
    %402 = vector.load %arg16[%401, %c0_92] : memref<128x512xf32, #tpu.memory_space<vmem>>, vector<16x512xf32>
    %403 = arith.truncf %367 : vector<16x128xf32> to vector<16x128xbf16>
    %cst_93 = arith.constant dense<0.000000e+00> : vector<16x512xf32>
    %404 = tpu.matmul %403, %11, %cst_93 {dimension_numbers = #tpu.dot_dimension_numbers<[1], [0], [0], [1], [0, 0, 1, 1], [], []>} : vector<16x128xbf16>, vector<128x512xbf16>, vector<16x512xf32> -> vector<16x512xf32>
    %405 = arith.addf %402, %404 : vector<16x512xf32>
    %406 = vector.extract_strided_slice %405 {offsets = [0, 0], sizes = [16, 128], strides = [1, 1]} : vector<16x512xf32> to vector<16x128xf32>
    %407 = arith.negf %406 : vector<16x128xf32>
    %408 = math.exp %407 : vector<16x128xf32>
    %cst_94 = arith.constant 1.000000e+00 : f32
    %409 = vector.broadcast %cst_94 : f32 to vector<16x128xf32>
    %410 = arith.addf %409, %408 : vector<16x128xf32>
    %411 = arith.divf %409, %410 : vector<16x128xf32>
    %412 = vector.extract_strided_slice %405 {offsets = [0, 128], sizes = [16, 128], strides = [1, 1]} : vector<16x512xf32> to vector<16x128xf32>
    %413 = arith.negf %412 : vector<16x128xf32>
    %414 = math.exp %413 : vector<16x128xf32>
    %cst_95 = arith.constant 1.000000e+00 : f32
    %415 = vector.broadcast %cst_95 : f32 to vector<16x128xf32>
    %416 = arith.addf %415, %414 : vector<16x128xf32>
    %417 = arith.divf %415, %416 : vector<16x128xf32>
    %418 = vector.extract_strided_slice %405 {offsets = [0, 256], sizes = [16, 128], strides = [1, 1]} : vector<16x512xf32> to vector<16x128xf32>
    %419 = math.tanh %418 : vector<16x128xf32>
    %420 = vector.extract_strided_slice %405 {offsets = [0, 384], sizes = [16, 128], strides = [1, 1]} : vector<16x512xf32> to vector<16x128xf32>
    %421 = arith.negf %420 : vector<16x128xf32>
    %422 = math.exp %421 : vector<16x128xf32>
    %cst_96 = arith.constant 1.000000e+00 : f32
    %423 = vector.broadcast %cst_96 : f32 to vector<16x128xf32>
    %424 = arith.addf %423, %422 : vector<16x128xf32>
    %425 = arith.divf %423, %424 : vector<16x128xf32>
    %426 = arith.mulf %417, %365 : vector<16x128xf32>
    %427 = arith.mulf %411, %419 : vector<16x128xf32>
    %428 = arith.addf %426, %427 : vector<16x128xf32>
    %429 = math.tanh %428 : vector<16x128xf32>
    %430 = arith.mulf %425, %429 : vector<16x128xf32>
    %431 = arith.truncf %430 : vector<16x128xf32> to vector<16x128xbf16>
    %cst_97 = arith.constant dense<0.000000e+00> : vector<16x512xf32>
    %432 = tpu.matmul %431, %12, %cst_97 {dimension_numbers = #tpu.dot_dimension_numbers<[1], [0], [0], [1], [0, 0, 1, 1], [], []>} : vector<16x128xbf16>, vector<128x512xbf16>, vector<16x512xf32> -> vector<16x512xf32>
    %433 = arith.truncf %398 : vector<16x128xf32> to vector<16x128xbf16>
    %cst_98 = arith.constant dense<0.000000e+00> : vector<16x512xf32>
    %434 = tpu.matmul %433, %13, %cst_98 {dimension_numbers = #tpu.dot_dimension_numbers<[1], [0], [0], [1], [0, 0, 1, 1], [], []>} : vector<16x128xbf16>, vector<128x512xbf16>, vector<16x512xf32> -> vector<16x512xf32>
    %435 = arith.addf %432, %434 : vector<16x512xf32>
    %436 = arith.addf %435, %16 : vector<16x512xf32>
    %437 = vector.extract_strided_slice %436 {offsets = [0, 0], sizes = [16, 128], strides = [1, 1]} : vector<16x512xf32> to vector<16x128xf32>
    %438 = arith.negf %437 : vector<16x128xf32>
    %439 = math.exp %438 : vector<16x128xf32>
    %cst_99 = arith.constant 1.000000e+00 : f32
    %440 = vector.broadcast %cst_99 : f32 to vector<16x128xf32>
    %441 = arith.addf %440, %439 : vector<16x128xf32>
    %442 = arith.divf %440, %441 : vector<16x128xf32>
    %443 = vector.extract_strided_slice %436 {offsets = [0, 128], sizes = [16, 128], strides = [1, 1]} : vector<16x512xf32> to vector<16x128xf32>
    %444 = arith.negf %443 : vector<16x128xf32>
    %445 = math.exp %444 : vector<16x128xf32>
    %cst_100 = arith.constant 1.000000e+00 : f32
    %446 = vector.broadcast %cst_100 : f32 to vector<16x128xf32>
    %447 = arith.addf %446, %445 : vector<16x128xf32>
    %448 = arith.divf %446, %447 : vector<16x128xf32>
    %449 = vector.extract_strided_slice %436 {offsets = [0, 256], sizes = [16, 128], strides = [1, 1]} : vector<16x512xf32> to vector<16x128xf32>
    %450 = math.tanh %449 : vector<16x128xf32>
    %451 = vector.extract_strided_slice %436 {offsets = [0, 384], sizes = [16, 128], strides = [1, 1]} : vector<16x512xf32> to vector<16x128xf32>
    %452 = arith.negf %451 : vector<16x128xf32>
    %453 = math.exp %452 : vector<16x128xf32>
    %cst_101 = arith.constant 1.000000e+00 : f32
    %454 = vector.broadcast %cst_101 : f32 to vector<16x128xf32>
    %455 = arith.addf %454, %453 : vector<16x128xf32>
    %456 = arith.divf %454, %455 : vector<16x128xf32>
    %457 = arith.mulf %448, %396 : vector<16x128xf32>
    %458 = arith.mulf %442, %450 : vector<16x128xf32>
    %459 = arith.addf %457, %458 : vector<16x128xf32>
    %460 = math.tanh %459 : vector<16x128xf32>
    %461 = arith.mulf %456, %460 : vector<16x128xf32>
    %c7_i32 = arith.constant 7 : i32
    %c16_i32_102 = arith.constant 16 : i32
    %462 = arith.muli %c7_i32, %c16_i32_102 : i32
    %463 = tpu.assume_multiple %462, 8 : i32
    %464 = arith.index_cast %463 : i32 to index
    %c0_103 = arith.constant 0 : index
    %465 = vector.load %arg16[%464, %c0_103] : memref<128x512xf32, #tpu.memory_space<vmem>>, vector<16x512xf32>
    %466 = arith.truncf %430 : vector<16x128xf32> to vector<16x128xbf16>
    %cst_104 = arith.constant dense<0.000000e+00> : vector<16x512xf32>
    %467 = tpu.matmul %466, %11, %cst_104 {dimension_numbers = #tpu.dot_dimension_numbers<[1], [0], [0], [1], [0, 0, 1, 1], [], []>} : vector<16x128xbf16>, vector<128x512xbf16>, vector<16x512xf32> -> vector<16x512xf32>
    %468 = arith.addf %465, %467 : vector<16x512xf32>
    %469 = vector.extract_strided_slice %468 {offsets = [0, 0], sizes = [16, 128], strides = [1, 1]} : vector<16x512xf32> to vector<16x128xf32>
    %470 = arith.negf %469 : vector<16x128xf32>
    %471 = math.exp %470 : vector<16x128xf32>
    %cst_105 = arith.constant 1.000000e+00 : f32
    %472 = vector.broadcast %cst_105 : f32 to vector<16x128xf32>
    %473 = arith.addf %472, %471 : vector<16x128xf32>
    %474 = arith.divf %472, %473 : vector<16x128xf32>
    %475 = vector.extract_strided_slice %468 {offsets = [0, 128], sizes = [16, 128], strides = [1, 1]} : vector<16x512xf32> to vector<16x128xf32>
    %476 = arith.negf %475 : vector<16x128xf32>
    %477 = math.exp %476 : vector<16x128xf32>
    %cst_106 = arith.constant 1.000000e+00 : f32
    %478 = vector.broadcast %cst_106 : f32 to vector<16x128xf32>
    %479 = arith.addf %478, %477 : vector<16x128xf32>
    %480 = arith.divf %478, %479 : vector<16x128xf32>
    %481 = vector.extract_strided_slice %468 {offsets = [0, 256], sizes = [16, 128], strides = [1, 1]} : vector<16x512xf32> to vector<16x128xf32>
    %482 = math.tanh %481 : vector<16x128xf32>
    %483 = vector.extract_strided_slice %468 {offsets = [0, 384], sizes = [16, 128], strides = [1, 1]} : vector<16x512xf32> to vector<16x128xf32>
    %484 = arith.negf %483 : vector<16x128xf32>
    %485 = math.exp %484 : vector<16x128xf32>
    %cst_107 = arith.constant 1.000000e+00 : f32
    %486 = vector.broadcast %cst_107 : f32 to vector<16x128xf32>
    %487 = arith.addf %486, %485 : vector<16x128xf32>
    %488 = arith.divf %486, %487 : vector<16x128xf32>
    %489 = arith.mulf %480, %428 : vector<16x128xf32>
    %490 = arith.mulf %474, %482 : vector<16x128xf32>
    %491 = arith.addf %489, %490 : vector<16x128xf32>
    %492 = math.tanh %491 : vector<16x128xf32>
    %493 = arith.mulf %488, %492 : vector<16x128xf32>
    %494 = arith.truncf %493 : vector<16x128xf32> to vector<16x128xbf16>
    %cst_108 = arith.constant dense<0.000000e+00> : vector<16x512xf32>
    %495 = tpu.matmul %494, %12, %cst_108 {dimension_numbers = #tpu.dot_dimension_numbers<[1], [0], [0], [1], [0, 0, 1, 1], [], []>} : vector<16x128xbf16>, vector<128x512xbf16>, vector<16x512xf32> -> vector<16x512xf32>
    %496 = arith.truncf %461 : vector<16x128xf32> to vector<16x128xbf16>
    %cst_109 = arith.constant dense<0.000000e+00> : vector<16x512xf32>
    %497 = tpu.matmul %496, %13, %cst_109 {dimension_numbers = #tpu.dot_dimension_numbers<[1], [0], [0], [1], [0, 0, 1, 1], [], []>} : vector<16x128xbf16>, vector<128x512xbf16>, vector<16x512xf32> -> vector<16x512xf32>
    %498 = arith.addf %495, %497 : vector<16x512xf32>
    %499 = arith.addf %498, %16 : vector<16x512xf32>
    %500 = vector.extract_strided_slice %499 {offsets = [0, 0], sizes = [16, 128], strides = [1, 1]} : vector<16x512xf32> to vector<16x128xf32>
    %501 = arith.negf %500 : vector<16x128xf32>
    %502 = math.exp %501 : vector<16x128xf32>
    %cst_110 = arith.constant 1.000000e+00 : f32
    %503 = vector.broadcast %cst_110 : f32 to vector<16x128xf32>
    %504 = arith.addf %503, %502 : vector<16x128xf32>
    %505 = arith.divf %503, %504 : vector<16x128xf32>
    %506 = vector.extract_strided_slice %499 {offsets = [0, 128], sizes = [16, 128], strides = [1, 1]} : vector<16x512xf32> to vector<16x128xf32>
    %507 = arith.negf %506 : vector<16x128xf32>
    %508 = math.exp %507 : vector<16x128xf32>
    %cst_111 = arith.constant 1.000000e+00 : f32
    %509 = vector.broadcast %cst_111 : f32 to vector<16x128xf32>
    %510 = arith.addf %509, %508 : vector<16x128xf32>
    %511 = arith.divf %509, %510 : vector<16x128xf32>
    %512 = vector.extract_strided_slice %499 {offsets = [0, 256], sizes = [16, 128], strides = [1, 1]} : vector<16x512xf32> to vector<16x128xf32>
    %513 = math.tanh %512 : vector<16x128xf32>
    %514 = vector.extract_strided_slice %499 {offsets = [0, 384], sizes = [16, 128], strides = [1, 1]} : vector<16x512xf32> to vector<16x128xf32>
    %515 = arith.negf %514 : vector<16x128xf32>
    %516 = math.exp %515 : vector<16x128xf32>
    %cst_112 = arith.constant 1.000000e+00 : f32
    %517 = vector.broadcast %cst_112 : f32 to vector<16x128xf32>
    %518 = arith.addf %517, %516 : vector<16x128xf32>
    %519 = arith.divf %517, %518 : vector<16x128xf32>
    %520 = arith.mulf %511, %459 : vector<16x128xf32>
    %521 = arith.mulf %505, %513 : vector<16x128xf32>
    %522 = arith.addf %520, %521 : vector<16x128xf32>
    %523 = math.tanh %522 : vector<16x128xf32>
    %524 = arith.mulf %519, %523 : vector<16x128xf32>
    %c8_i32 = arith.constant 8 : i32
    %c0_113 = arith.constant 0 : index
    %c0_114 = arith.constant 0 : index
    %525 = vector.load %arg17[%c0_113, %c0_114] : memref<16x128xf32, #tpu.memory_space<vmem>>, vector<16x128xf32>
    tpu.vector_store %arg17[%c0_113, %c0_114], %493 {strides = array<i32>} : memref<16x128xf32, #tpu.memory_space<vmem>>, vector<16x128xf32>,
    %c0_115 = arith.constant 0 : index
    %c0_116 = arith.constant 0 : index
    %526 = vector.load %arg18[%c0_115, %c0_116] : memref<16x128xf32, #tpu.memory_space<vmem>>, vector<16x128xf32>
    tpu.vector_store %arg18[%c0_115, %c0_116], %491 {strides = array<i32>} : memref<16x128xf32, #tpu.memory_space<vmem>>, vector<16x128xf32>,
    %c0_117 = arith.constant 0 : index
    %c0_118 = arith.constant 0 : index
    %527 = vector.load %arg19[%c0_117, %c0_118] : memref<16x128xf32, #tpu.memory_space<vmem>>, vector<16x128xf32>
    tpu.vector_store %arg19[%c0_117, %c0_118], %524 {strides = array<i32>} : memref<16x128xf32, #tpu.memory_space<vmem>>, vector<16x128xf32>,
    %c0_119 = arith.constant 0 : index
    %c0_120 = arith.constant 0 : index
    %528 = vector.load %arg20[%c0_119, %c0_120] : memref<16x128xf32, #tpu.memory_space<vmem>>, vector<16x128xf32>
    tpu.vector_store %arg20[%c0_119, %c0_120], %522 {strides = array<i32>} : memref<16x128xf32, #tpu.memory_space<vmem>>, vector<16x128xf32>,
    %c1_i32_121 = arith.constant 1 : i32
    %529 = arith.cmpi eq, %arg1, %c1_i32_121 : i32
    %530 = arith.extui %529 : i1 to i32
    %c0_i32_122 = arith.constant 0 : i32
    %531 = arith.cmpi ne, %530, %c0_i32_122 : i32
    scf.if %531 {
      %532 = arith.truncf %524 : vector<16x128xf32> to vector<16x128xbf16>
      %c0_123 = arith.constant 0 : index
      %c0_124 = arith.constant 0 : index
      %533 = vector.load %arg9[%c0_123, %c0_124] : memref<128x128xbf16, #tpu.memory_space<vmem>>, vector<128x128xbf16>
      %cst_125 = arith.constant dense<0.000000e+00> : vector<16x128xf32>
      %534 = tpu.matmul %532, %533, %cst_125 {dimension_numbers = #tpu.dot_dimension_numbers<[1], [0], [0], [1], [0, 0, 1, 1], [], []>} : vector<16x128xbf16>, vector<128x128xbf16>, vector<16x128xf32> -> vector<16x128xf32>
      %c0_126 = arith.constant 0 : index
      %c0_127 = arith.constant 0 : index
      %535 = vector.load %arg10[%c0_126, %c0_127] : memref<1x128xf32, #tpu.memory_space<vmem>>, vector<1x128xf32>
      %536 = vector.broadcast %535 : vector<1x128xf32> to vector<16x128xf32>
      %537 = arith.addf %534, %536 : vector<16x128xf32>
      %cst_128 = arith.constant 0.000000e+00 : f32
      %538 = vector.broadcast %cst_128 : f32 to vector<16x128xf32>
      %539 = arith.maximumf %537, %538 : vector<16x128xf32>
      %540 = arith.truncf %539 : vector<16x128xf32> to vector<16x128xbf16>
      %c0_129 = arith.constant 0 : index
      %c0_130 = arith.constant 0 : index
      %541 = vector.load %arg11[%c0_129, %c0_130] : memref<128x128xbf16, #tpu.memory_space<vmem>>, vector<128x128xbf16>
      %cst_131 = arith.constant dense<0.000000e+00> : vector<16x128xf32>
      %542 = tpu.matmul %540, %541, %cst_131 {dimension_numbers = #tpu.dot_dimension_numbers<[1], [0], [0], [1], [0, 0, 1, 1], [], []>} : vector<16x128xbf16>, vector<128x128xbf16>, vector<16x128xf32> -> vector<16x128xf32>
      %c0_132 = arith.constant 0 : index
      %c0_133 = arith.constant 0 : index
      %543 = vector.load %arg12[%c0_132, %c0_133] : memref<1x128xf32, #tpu.memory_space<vmem>>, vector<1x128xf32>
      %544 = vector.broadcast %543 : vector<1x128xf32> to vector<16x128xf32>
      %545 = arith.addf %542, %544 : vector<16x128xf32>
      %cst_134 = arith.constant 0.000000e+00 : f32
      %546 = vector.broadcast %cst_134 : f32 to vector<16x128xf32>
      %547 = arith.maximumf %545, %546 : vector<16x128xf32>
      %548 = arith.truncf %547 : vector<16x128xf32> to vector<16x128xbf16>
      %c0_135 = arith.constant 0 : index
      %c0_136 = arith.constant 0 : index
      %549 = vector.load %arg13[%c0_135, %c0_136] : memref<128x128xbf16, #tpu.memory_space<vmem>>, vector<128x128xbf16>
      %cst_137 = arith.constant dense<0.000000e+00> : vector<16x128xf32>
      %550 = tpu.matmul %548, %549, %cst_137 {dimension_numbers = #tpu.dot_dimension_numbers<[1], [0], [0], [1], [0, 0, 1, 1], [], []>} : vector<16x128xbf16>, vector<128x128xbf16>, vector<16x128xf32> -> vector<16x128xf32>
      %c0_138 = arith.constant 0 : index
      %c0_139 = arith.constant 0 : index
      %551 = vector.load %arg14[%c0_138, %c0_139] : memref<1x128xf32, #tpu.memory_space<vmem>>, vector<1x128xf32>
      %552 = vector.broadcast %551 : vector<1x128xf32> to vector<16x128xf32>
      %553 = arith.addf %550, %552 : vector<16x128xf32>
      %cst_140 = arith.constant dense<0xFF800000> : vector<16xf32>
      %554 = vector.multi_reduction <maximumf>, %553, %cst_140 [1] : vector<16x128xf32> to vector<16xf32>
      %555 = vector.shape_cast %554 : vector<16xf32> to vector<16x1xf32>
      %556 = vector.broadcast %555 : vector<16x1xf32> to vector<16x128xf32>
      %557 = arith.subf %553, %556 : vector<16x128xf32>
      %558 = math.exp %557 : vector<16x128xf32>
      %cst_141 = arith.constant dense<0.000000e+00> : vector<16xf32>
      %559 = vector.multi_reduction <add>, %558, %cst_141 [1] : vector<16x128xf32> to vector<16xf32>
      %560 = vector.shape_cast %559 : vector<16xf32> to vector<16x1xf32>
      %561 = vector.broadcast %560 : vector<16x1xf32> to vector<16x128xf32>
      %562 = arith.divf %558, %561 : vector<16x128xf32>
      %c0_142 = arith.constant 0 : index
      %c0_143 = arith.constant 0 : index
      %563 = vector.load %arg15[%c0_142, %c0_143] : memref<16x128xf32, #tpu.memory_space<vmem>>, vector<16x128xf32>
      tpu.vector_store %arg15[%c0_142, %c0_143], %562 {strides = array<i32>} : memref<16x128xf32, #tpu.memory_space<vmem>>, vector<16x128xf32>,
    } else {
    }
    return
  }
  func.func @transform_0(%arg0: i32, %arg1: i32) -> (i32, i32, i32) {
    %c0_i32 = arith.constant 0 : i32
    %c0_i32_0 = arith.constant 0 : i32
    return %arg1, %arg0, %c0_i32 : i32, i32, i32
  }
  func.func @transform_1(%arg0: i32, %arg1: i32) -> (i32, i32) {
    %c0_i32 = arith.constant 0 : i32
    %c0_i32_0 = arith.constant 0 : i32
    %c0_i32_1 = arith.constant 0 : i32
    return %c0_i32, %c0_i32_0 : i32, i32
  }
  func.func @transform_2(%arg0: i32, %arg1: i32) -> (i32, i32) {
    %c0_i32 = arith.constant 0 : i32
    %c0_i32_0 = arith.constant 0 : i32
    %c0_i32_1 = arith.constant 0 : i32
    return %c0_i32, %c0_i32_0 : i32, i32
  }
  func.func @transform_3(%arg0: i32, %arg1: i32) -> (i32, i32) {
    %c0_i32 = arith.constant 0 : i32
    %c0_i32_0 = arith.constant 0 : i32
    %c0_i32_1 = arith.constant 0 : i32
    return %c0_i32, %c0_i32_0 : i32, i32
  }
  func.func @transform_4(%arg0: i32, %arg1: i32) -> (i32, i32) {
    %c0_i32 = arith.constant 0 : i32
    %c0_i32_0 = arith.constant 0 : i32
    %c0_i32_1 = arith.constant 0 : i32
    return %c0_i32, %c0_i32_0 : i32, i32
  }
  func.func @transform_5(%arg0: i32, %arg1: i32) -> (i32, i32) {
    %c0_i32 = arith.constant 0 : i32
    %c0_i32_0 = arith.constant 0 : i32
    %c0_i32_1 = arith.constant 0 : i32
    return %c0_i32, %c0_i32_0 : i32, i32
  }
  func.func @transform_6(%arg0: i32, %arg1: i32) -> (i32, i32) {
    %c0_i32 = arith.constant 0 : i32
    %c0_i32_0 = arith.constant 0 : i32
    %c0_i32_1 = arith.constant 0 : i32
    return %c0_i32, %c0_i32_0 : i32, i32
  }
  func.func @transform_7(%arg0: i32, %arg1: i32) -> (i32, i32) {
    %c0_i32 = arith.constant 0 : i32
    %c0_i32_0 = arith.constant 0 : i32
    %c0_i32_1 = arith.constant 0 : i32
    return %c0_i32, %c0_i32_0 : i32, i32
  }
  func.func @transform_8(%arg0: i32, %arg1: i32) -> (i32, i32) {
    %c0_i32 = arith.constant 0 : i32
    %c0_i32_0 = arith.constant 0 : i32
    %c0_i32_1 = arith.constant 0 : i32
    return %c0_i32, %c0_i32_0 : i32, i32
  }
  func.func @transform_9(%arg0: i32, %arg1: i32) -> (i32, i32) {
    %c0_i32 = arith.constant 0 : i32
    %c0_i32_0 = arith.constant 0 : i32
    %c0_i32_1 = arith.constant 0 : i32
    return %c0_i32, %c0_i32_0 : i32, i32
  }
  func.func @transform_10(%arg0: i32, %arg1: i32) -> (i32, i32) {
    %c0_i32 = arith.constant 0 : i32
    %c0_i32_0 = arith.constant 0 : i32
    %c0_i32_1 = arith.constant 0 : i32
    return %c0_i32, %c0_i32_0 : i32, i32
  }
  func.func @transform_11(%arg0: i32, %arg1: i32) -> (i32, i32) {
    %c0_i32 = arith.constant 0 : i32
    %c0_i32_0 = arith.constant 0 : i32
    %c0_i32_1 = arith.constant 0 : i32
    return %c0_i32, %c0_i32_0 : i32, i32
  }
  func.func @transform_12(%arg0: i32, %arg1: i32) -> (i32, i32) {
    %c0_i32 = arith.constant 0 : i32
    %c0_i32_0 = arith.constant 0 : i32
    %c0_i32_1 = arith.constant 0 : i32
    return %c0_i32, %c0_i32_0 : i32, i32
  }
  func.func @transform_13(%arg0: i32, %arg1: i32) -> (i32, i32) {
    %c0_i32 = arith.constant 0 : i32
    %c0_i32_0 = arith.constant 0 : i32
    return %arg0, %c0_i32 : i32, i32
  }
}

</mosaic_0001>

<bundles_post_ra>
// kernel: lstm_classifier.1
= control target key start
LH: loop header
LB: loop body
LE: loop exit
PB: predicated region body
PF: predicated region fallthrough
CT: control target
= control target key end

     0   :  { %s12344_s0 = inlined_call_operand.vmem [shape: bf16[16,32,256], index: 0, kind: input, shape index: {}]   ;;  %s12345_s1 = inlined_call_operand.vmem [shape: bf16[256,512], index: 1, kind: input, shape index: {}]   ;;  %s12346_s2 = inlined_call_operand.vmem [shape: bf16[128,512], index: 2, kind: input, shape index: {}]   ;;  %s12347_s3 = inlined_call_operand.vmem [shape: f32[1,512], index: 3, kind: input, shape index: {}]   ;;  %s12348_s4 = inlined_call_operand.vmem [shape: bf16[128,512], index: 4, kind: input, shape index: {}]   ;;  %s12349_s5 = inlined_call_operand.vmem [shape: bf16[128,512], index: 5, kind: input, shape index: {}]   ;;  %s12350_s6 = inlined_call_operand.vmem [shape: f32[1,512], index: 6, kind: input, shape index: {}]   ;;  %s12351_s7 = inlined_call_operand.vmem [shape: bf16[128,128], index: 7, kind: input, shape index: {}]   ;;  %s12352_s8 = inlined_call_operand.vmem [shape: f32[1,128], index: 8, kind: input, shape index: {}]   ;;  %s12353_s9 = inlined_call_operand.vmem [shape: bf16[128,128], index: 9, kind: input, shape index: {}]   ;;  %s12354_s10 = inlined_call_operand.vmem [shape: f32[1,128], index: 10, kind: input, shape index: {}]   ;;  %s12355_s11 = inlined_call_operand.vmem [shape: bf16[128,128], index: 11, kind: input, shape index: {}]   ;;  %s12356_s12 = inlined_call_operand.vmem [shape: f32[1,128], index: 12, kind: input, shape index: {}]   ;;  %s12357_s13 = inlined_call_operand.vmem [shape: f32[32,128], index: 13, kind: output, shape index: {}]  }
   0x1   :  { %12556 = sst [smem:[#allocation173_spill]] %s12352_s8 }
   0x2   :  { %12557 = sst [smem:[#allocation174_spill]] %s12354_s10 }
   0x3   :  { %12558 = sst [smem:[#allocation175_spill]] %s12356_s12 }
   0x4   :  { %s7921_s25 = smov 0   ;;  %s7923_s26 = smov 0  }
   0x5   :  { %s7925_s27 = smov 0   ;;  %s7927_s28 = smov 0  }
   0x6   :  { %s7929_s29 = smov 0   ;;  %s7931_s30 = smov 0  }
   0x7   :  { %s7933_s14 = smov 0  }
   0x8 LB: > { %s32_s15 = sadd.s32 1, %s7840_s29  ;;  %s35_s16 = sadd.s32 1, %s7844_s30  ;;  %s7848_s14 = sphi %s7933_s14, %s23_s14   ;;  %s7844_s30 = sphi %s7931_s30, %s13471_s30   ;;  %s7840_s29 = sphi %s7929_s29, %s13470_s29   ;;  %s7836_s28 = sphi %s7927_s28, %s13469_s28   ;;  %s7832_s27 = sphi %s7925_s27, %s13468_s27   ;;  %s7828_s26 = sphi %s7923_s26, %s13467_s26   ;;  %s7824_s25 = sphi %s7921_s25, %s13466_s25  }
   0x9   : > { %p33_p0 = scmp.ge.s32.totalorder %s32_s15, 2  ;;  %p51_p1 = scmp.ne.s32.totalorder %s7828_s26, %s7824_s25 }
   0xa   : > { %p52_p2 = scmp.eq.s32.totalorder %s7848_s14, 0  ;;  %s44_s20 = sadd.s32 1, %s7828_s26 }
   0xb   : > { %s13473_s15 = smov (%p33_p0, %s32_s15), 0  ;;  %s13475_s16 = smov (!%p33_p0, %s35_s16), %s7844_s30 }
   0xc   : > { %12559 = sst [smem:[#allocation8_spill]] %s13473_s15  ;;  %p53_p3 = por %p52_p2, %p51_p1 }
   0xd   : > { %p37_p4 = scmp.ge.s32.totalorder %s13475_s16, 2  ;;  %s39_s17 = ssub.s32 %s7840_s29, %s13473_s15 }
   0xe   : > { %p6101_p6 = scmp.ge.s32.totalorder %s7848_s14, 4 }
   0xf   : > { %s13477_s16 = smov (%p37_p4, %s13475_s16), 0 }
  0x10   : > { %12560 = sst [smem:[#allocation9_spill]] %s13477_s16  ;;  %s40_s18 = ssub.s32 %s7844_s30, %s13477_s16 }
  0x11   : > { %s41_s19 = sor.u32 %s40_s18, %s39_s17  ;;  %391 = sbr.rel (%p6101_p6) target bundleno = 45 (0x2d), region = 64 }
  0x12   : > { %p42_p5 = scmp.eq.s32.totalorder %s41_s19, 0 }
  0x14   : > { %s7972_s21 = scalar_select %p42_p5, %s7828_s26, %s44_s20  }
  0x16   : > { %394 = sbr.rel (!%p53_p3) target bundleno = 45 (0x2d), region = 68  ;;  %s396_s22 = sand.u32 (%p53_p3), 1, %s7828_s26  }
  0x17   : > { %s7012_s23 = sshll.u32 (%p53_p3), %s7844_s30, 2  ;;  %s6102_s24 = sshll.u32 (%p53_p3), %s396_s22, 7 }
  0x18   : > { %s7013_s15 = sshll.u32 (%p53_p3), %s7840_s29, 6 }
  0x19   : > { %s403_s12 = sadd.s32 (%p53_p3), %s7013_s15, %s7012_s23  ;;  %s398_s15 = scalar_lea.vmem (%p53_p3), [#allocation7], %s6102_s24 }
  0x1a   : > { %s6107_s10 = sshll.u32 (%p53_p3), %s403_s12, 2 }
  0x1b   : > { %s7981_s17 = scalar_lea.vmem %s12344_s0, %s6107_s10 }
  0x1c   : > { %v464_v0 = vld [vmem:[%s7981_s17] sm:$0xff]  ;;  %v466_v1 = vld [vmem:[%s7981_s17 + $0x8] sm:$0xff] }
  0x1d   : > { %v468_v2 = vld [vmem:[%s7981_s17 + $0x20] sm:$0xff]  ;;  %465 = vst [vmem:[%s398_s15] sm:$0xff] %v464_v0  ;;  %v470_v3 = vld [vmem:[%s7981_s17 + $0x28] sm:$0xff] }
  0x1e   : > { %467 = vst [vmem:[%s398_s15 + $0x8] sm:$0xff] %v466_v1  ;;  %v472_v4 = vld [vmem:[%s7981_s17 + $0x40] sm:$0xff]  ;;  %v474_v5 = vld [vmem:[%s7981_s17 + $0x48] sm:$0xff] }
  0x1f   : > { %469 = vst [vmem:[%s398_s15 + $0x10] sm:$0xff] %v468_v2  ;;  %v476_v6 = vld [vmem:[%s7981_s17 + $0x60] sm:$0xff]  ;;  %v478_v7 = vld [vmem:[%s7981_s17 + $0x68] sm:$0xff] }
  0x20   : > { %471 = vst [vmem:[%s398_s15 + $0x18] sm:$0xff] %v470_v3  ;;  %v480_v8 = vld [vmem:[%s7981_s17 + $0x80] sm:$0xff]  ;;  %v482_v9 = vld [vmem:[%s7981_s17 + $0x88] sm:$0xff] }
  0x21   : > { %473 = vst [vmem:[%s398_s15 + $0x20] sm:$0xff] %v472_v4  ;;  %v484_v10 = vld [vmem:[%s7981_s17 + $0xa0] sm:$0xff]  ;;  %v486_v11 = vld [vmem:[%s7981_s17 + $0xa8] sm:$0xff] }
  0x22   : > { %475 = vst [vmem:[%s398_s15 + $0x28] sm:$0xff] %v474_v5  ;;  %v488_v12 = vld [vmem:[%s7981_s17 + $0xc0] sm:$0xff]  ;;  %v490_v13 = vld [vmem:[%s7981_s17 + $0xc8] sm:$0xff] }
  0x23   : > { %477 = vst [vmem:[%s398_s15 + $0x30] sm:$0xff] %v476_v6  ;;  %v492_v14 = vld [vmem:[%s7981_s17 + $0xe0] sm:$0xff]  ;;  %v494_v15 = vld [vmem:[%s7981_s17 + $0xe8] sm:$0xff] }
  0x24   : > { %479 = vst [vmem:[%s398_s15 + $0x38] sm:$0xff] %v478_v7 }
  0x25   : > { %481 = vst [vmem:[%s398_s15 + $0x40] sm:$0xff] %v480_v8 }
  0x26   : > { %483 = vst [vmem:[%s398_s15 + $0x48] sm:$0xff] %v482_v9 }
  0x27   : > { %485 = vst [vmem:[%s398_s15 + $0x50] sm:$0xff] %v484_v10 }
  0x28   : > { %487 = vst [vmem:[%s398_s15 + $0x58] sm:$0xff] %v486_v11 }
  0x29   : > { %489 = vst [vmem:[%s398_s15 + $0x60] sm:$0xff] %v488_v12 }
  0x2a   : > { %491 = vst [vmem:[%s398_s15 + $0x68] sm:$0xff] %v490_v13 }
  0x2b   : > { %493 = vst [vmem:[%s398_s15 + $0x70] sm:$0xff] %v492_v14 }
  0x2c   : > { %495 = vst [vmem:[%s398_s15 + $0x78] sm:$0xff] %v494_v15 }
  0x2d PF: > { %p6108_p7 = scmp.ge.s32.totalorder %s7848_s14, 1  ;;  %p500_p8 = scmp.lt.s32.totalorder %s7848_s14, 5 }
  0x2f   : > { %p501_p9 = pnand %p6108_p7, %p500_p8 }
  0x31   : > { %504 = sbr.rel (%p501_p9) target bundleno = 2925 (0xb6d), region = 106 }
  0x36   : > { %s507_s8 = sand.u32 1, %s7824_s25   ;;  %s6110_s10 = sshll.u32 %s7836_s28, 1 }
  0x37   : > { %s6109_s12 = sshll.u32 %s507_s8, 7  ;;  %p553_p10 = scmp.lt.s32.totalorder %s6110_s10, 3 }
  0x38   : > { %s8008_s22 = scalar_lea.vmem [#allocation7], %s6109_s12  ;;  %p6112_p11 = scmp.ne.s32.totalorder %s7832_s27, 0 }
  0x39   : > { %s13479_s10 = smov (!%p553_p10, %s6110_s10), 3 }
  0x3a   : > { %s6111_s16 = sshll.u32 %s13479_s10, 3  ;;  %561 = sbr.rel (%p6112_p11) target bundleno = 72 (0x48), region = 114 }
  0x3b   : > { %s8006_s20 = scalar_lea.vmem %s12357_s13, %s6111_s16 }
  0x3f   : > { %v7850_v16 = vmov 0.0  }
  0x40   : > { %562 = vst [vmem:[#allocation3] sm:$0xff] %v7850_v16 }
  0x41   : > { %563 = vst [vmem:[#allocation3 + $0x8] sm:$0xff] %v7850_v16 }
  0x42   : > { %564 = vst [vmem:[#allocation4 + $0x8] sm:$0xff] %v7850_v16 }
  0x43   : > { %565 = vst [vmem:[#allocation4] sm:$0xff] %v7850_v16 }
  0x44   : > { %566 = vst [vmem:[#allocation5 + $0x8] sm:$0xff] %v7850_v16 }
  0x45   : > { %567 = vst [vmem:[#allocation5] sm:$0xff] %v7850_v16 }
  0x46   : > { %568 = vst [vmem:[#allocation6] sm:$0xff] %v7850_v16 }
  0x47   : > { %569 = vst [vmem:[#allocation6 + $0x8] sm:$0xff] %v7850_v16 }
  0x48 PF: > { %v6291_v17 = vld [vmem:[%s12345_s1 + $0xe0] sm:$0xf]  ;;  %v7060_v18 = vld [vmem:[%s12345_s1 + $0xec] sm:$0xf0]  ;;  %v7058_v22 = vld [vmem:[%s12345_s1 + $0xe4] sm:$0xf] }
  0x49   : > { %v6419_v19 = vld [vmem:[%s12345_s1 + $0x1e0] sm:$0xf]  ;;  %v6292_v20 = vor.u32 %v7060_v18, %v6291_v17  ;;  %v7092_v21 = vld [vmem:[%s12345_s1 + $0x1ec] sm:$0xf0]  ;;  %v6293_v23 = vld [vmem:[%s12345_s1 + $0xf0] sm:$0xf0] }
  0x4a   : > { %v6420_v24 = vor.u32 %v7092_v21, %v6419_v19  ;;  %v6296_v25 = vor.u32 %v7058_v22, %v6293_v23  ;;  %v7090_v26 = vld [vmem:[%s12345_s1 + $0x1e4] sm:$0xf]  ;;  %v6421_v27 = vld [vmem:[%s12345_s1 + $0x1f0] sm:$0xf0]  ;;  %v6275_v28 = vld [vmem:[%s12345_s1 + $0xc0] sm:$0xf] }
  0x4b   : > { %1060 = vmatpush.bf16.msra.mxu0 %v6292_v20  ;;  %v6424_v29 = vor.u32 %v7090_v26, %v6421_v27  ;;  %v7056_v30 = vld [vmem:[%s12345_s1 + $0xcc] sm:$0xf0]  ;;  %v6403_v31 = vld [vmem:[%s12345_s1 + $0x1c0] sm:$0xf]  ;;  %v7054_v35 = vld [vmem:[%s12345_s1 + $0xc4] sm:$0xf] }
  0x4c   : > { %v7088_v32 = vld [vmem:[%s12345_s1 + $0x1cc] sm:$0xf0]  ;;  %1109 = vmatpush.bf16.msra.mxu1 %v6420_v24  ;;  %1158 = vmatpush.bf16.msra.mxu2 %v6296_v25  ;;  %v6276_v33 = vor.u32 %v7056_v30, %v6275_v28  ;;  %v6277_v36 = vld [vmem:[%s12345_s1 + $0xd0] sm:$0xf0]  ;;  %v7086_v37 = vld [vmem:[%s12345_s1 + $0x1c4] sm:$0xf] }
  0x4d   : > { %v6404_v34 = vor.u32 %v7088_v32, %v6403_v31  ;;  %1207 = vmatpush.bf16.msra.mxu3 %v6424_v29  ;;  %v6280_v38 = vor.u32 %v7054_v35, %v6277_v36  ;;  %v6405_v39 = vld [vmem:[%s12345_s1 + $0x1d0] sm:$0xf0]  ;;  %v6259_v40 = vld [vmem:[%s12345_s1 + $0xa0] sm:$0xf]  ;;  %v7052_v41 = vld [vmem:[%s12345_s1 + $0xac] sm:$0xf0] }
  0x4e   : > { %v6408_v42 = vor.u32 %v7086_v37, %v6405_v39  ;;  %v6387_v43 = vld [vmem:[%s12345_s1 + $0x1a0] sm:$0xf]  ;;  %v7084_v44 = vld [vmem:[%s12345_s1 + $0x1ac] sm:$0xf0]  ;;  %v7050_v45 = vld [vmem:[%s12345_s1 + $0xa4] sm:$0xf]  ;;  %v6260_v46 = vor.u32 %v7052_v41, %v6259_v40 }
  0x4f   : > { %1061 = vmatpush.bf16.msra.mxu0 %v6276_v33  ;;  %v6261_v47 = vld [vmem:[%s12345_s1 + $0xb0] sm:$0xf0]  ;;  %v7082_v48 = vld [vmem:[%s12345_s1 + $0x1a4] sm:$0xf]  ;;  %v6388_v50 = vor.u32 %v7084_v44, %v6387_v43  ;;  %v6243_v52 = vld [vmem:[%s12345_s1 + $0x80] sm:$0xf] }
  0x50   : > { %v6389_v49 = vld [vmem:[%s12345_s1 + $0x1b0] sm:$0xf0]  ;;  %1110 = vmatpush.bf16.msra.mxu1 %v6404_v34  ;;  %1159 = vmatpush.bf16.msra.mxu2 %v6280_v38  ;;  %v6264_v51 = vor.u32 %v7050_v45, %v6261_v47  ;;  %v7048_v53 = vld [vmem:[%s12345_s1 + $0x8c] sm:$0xf0]  ;;  %v6371_v54 = vld [vmem:[%s12345_s1 + $0x180] sm:$0xf] }
  0x51   : > { %1208 = vmatpush.bf16.msra.mxu3 %v6408_v42  ;;  %v6392_v55 = vor.u32 %v7082_v48, %v6389_v49  ;;  %v7080_v56 = vld [vmem:[%s12345_s1 + $0x18c] sm:$0xf0]  ;;  %v7046_v57 = vld [vmem:[%s12345_s1 + $0x84] sm:$0xf]  ;;  %v6245_v58 = vld [vmem:[%s12345_s1 + $0x90] sm:$0xf0]  ;;  %v6244_v61 = vor.u32 %v7048_v53, %v6243_v52 }
  0x52   : > { %v7078_v59 = vld [vmem:[%s12345_s1 + $0x184] sm:$0xf]  ;;  %v6373_v60 = vld [vmem:[%s12345_s1 + $0x190] sm:$0xf0]  ;;  %v6372_v62 = vor.u32 %v7080_v56, %v6371_v54  ;;  %v6248_v63 = vor.u32 %v7046_v57, %v6245_v58  ;;  %v6227_v0 = vld [vmem:[%s12345_s1 + $0x60] sm:$0xf] }
  0x53   : > { %1062 = vmatpush.bf16.msra.mxu0 %v6260_v46  ;;  %v7044_v1 = vld [vmem:[%s12345_s1 + $0x6c] sm:$0xf0]  ;;  %v6355_v2 = vld [vmem:[%s12345_s1 + $0x160] sm:$0xf]  ;;  %v6376_v3 = vor.u32 %v7078_v59, %v6373_v60  ;;  %v7042_v5 = vld [vmem:[%s12345_s1 + $0x64] sm:$0xf] }
  0x54   : > { %1111 = vmatpush.bf16.msra.mxu1 %v6388_v50  ;;  %1160 = vmatpush.bf16.msra.mxu2 %v6264_v51  ;;  %v7076_v4 = vld [vmem:[%s12345_s1 + $0x16c] sm:$0xf0]  ;;  %v6229_v6 = vld [vmem:[%s12345_s1 + $0x70] sm:$0xf0]  ;;  %v7074_v7 = vld [vmem:[%s12345_s1 + $0x164] sm:$0xf]  ;;  %v6228_v9 = vor.u32 %v7044_v1, %v6227_v0 }
  0x55   : > { %1209 = vmatpush.bf16.msra.mxu3 %v6392_v55  ;;  %v6357_v8 = vld [vmem:[%s12345_s1 + $0x170] sm:$0xf0]  ;;  %v6356_v10 = vor.u32 %v7076_v4, %v6355_v2  ;;  %v6232_v11 = vor.u32 %v7042_v5, %v6229_v6  ;;  %v6211_v12 = vld [vmem:[%s12345_s1 + $0x40] sm:$0xf]  ;;  %v7040_v13 = vld [vmem:[%s12345_s1 + $0x4c] sm:$0xf0] }
  0x56   : > { %v6339_v14 = vld [vmem:[%s12345_s1 + $0x140] sm:$0xf]  ;;  %v6360_v15 = vor.u32 %v7074_v7, %v6357_v8  ;;  %v7072_v16 = vld [vmem:[%s12345_s1 + $0x14c] sm:$0xf0]  ;;  %v7038_v17 = vld [vmem:[%s12345_s1 + $0x44] sm:$0xf]  ;;  %v6212_v21 = vor.u32 %v7040_v13, %v6211_v12 }
  0x57   : > { %1063 = vmatpush.bf16.msra.mxu0 %v6244_v61  ;;  %v6213_v18 = vld [vmem:[%s12345_s1 + $0x50] sm:$0xf0]  ;;  %v7070_v19 = vld [vmem:[%s12345_s1 + $0x144] sm:$0xf]  ;;  %v6340_v22 = vor.u32 %v7072_v16, %v6339_v14  ;;  %v6195_v24 = vld [vmem:[%s12345_s1 + $0x20] sm:$0xf] }
  0x58   : > { %1112 = vmatpush.bf16.msra.mxu1 %v6372_v62  ;;  %1161 = vmatpush.bf16.msra.mxu2 %v6248_v63  ;;  %v6341_v20 = vld [vmem:[%s12345_s1 + $0x150] sm:$0xf0]  ;;  %v6216_v23 = vor.u32 %v7038_v17, %v6213_v18  ;;  %v7036_v25 = vld [vmem:[%s12345_s1 + $0x2c] sm:$0xf0]  ;;  %v6323_v26 = vld [vmem:[%s12345_s1 + $0x120] sm:$0xf] }
  0x59   : > { %1210 = vmatpush.bf16.msra.mxu3 %v6376_v3  ;;  %v6344_v27 = vor.u32 %v7070_v19, %v6341_v20  ;;  %v7068_v28 = vld [vmem:[%s12345_s1 + $0x12c] sm:$0xf0]  ;;  %v7034_v29 = vld [vmem:[%s12345_s1 + $0x24] sm:$0xf]  ;;  %v6197_v30 = vld [vmem:[%s12345_s1 + $0x30] sm:$0xf0]  ;;  %v6196_v33 = vor.u32 %v7036_v25, %v6195_v24 }
  0x5a   : > { %v7066_v31 = vld [vmem:[%s12345_s1 + $0x124] sm:$0xf]  ;;  %v6325_v32 = vld [vmem:[%s12345_s1 + $0x130] sm:$0xf0]  ;;  %v6179_v34 = vld [vmem:[%s12345_s1] sm:$0xf]  ;;  %v6324_v36 = vor.u32 %v7068_v28, %v6323_v26  ;;  %v6200_v37 = vor.u32 %v7034_v29, %v6197_v30 }
  0x5b   : > { %1064 = vmatpush.bf16.msra.mxu0 %v6228_v9  ;;  %v7032_v35 = vld [vmem:[%s12345_s1 + $0xc] sm:$0xf0]  ;;  %v6307_v38 = vld [vmem:[%s12345_s1 + $0x100] sm:$0xf]  ;;  %v7030_v40 = vld [vmem:[%s12345_s1 + $0x4] sm:$0xf]  ;;  %v6328_v41 = vor.u32 %v7066_v31, %v6325_v32 }
  0x5c   : > { %1113 = vmatpush.bf16.msra.mxu1 %v6356_v10  ;;  %1162 = vmatpush.bf16.msra.mxu2 %v6232_v11  ;;  %v7064_v39 = vld [vmem:[%s12345_s1 + $0x10c] sm:$0xf0]  ;;  %v6181_v42 = vld [vmem:[%s12345_s1 + $0x10] sm:$0xf0]  ;;  %v7062_v43 = vld [vmem:[%s12345_s1 + $0x104] sm:$0xf]  ;;  %v6180_v48 = vor.u32 %v7032_v35, %v6179_v34 }
  0x5d   : > { %1211 = vmatpush.bf16.msra.mxu3 %v6360_v15  ;;  %v6309_v44 = vld [vmem:[%s12345_s1 + $0x110] sm:$0xf0]  ;;  %v6115_v45 = vld [vmem:[%s8008_s22] sm:$0xf]  ;;  %v6299_v46 = vld [vmem:[%s12345_s1 + $0xe8] sm:$0xf]  ;;  %v6308_v52 = vor.u32 %v7064_v39, %v6307_v38  ;;  %v6184_v53 = vor.u32 %v7030_v40, %v6181_v42 }
  0x5e   : > { %v7061_v47 = vld [vmem:[%s12345_s1 + $0xf4] sm:$0xf0]  ;;  %v7015_v49 = vld [vmem:[%s8008_s22 + $0x4] sm:$0xf0]  ;;  %v7014_v54 = vld [vmem:[%s8008_s22 + $0x4] sm:$0xf]  ;;  %v6312_v56 = vor.u32 %v7062_v43, %v6309_v44 }
  0x5f   : > { %1065 = vmatpush.bf16.msra.mxu0 %v6212_v21  ;;  %v6427_v50 = vld [vmem:[%s12345_s1 + $0x1e8] sm:$0xf]  ;;  %v7093_v51 = vld [vmem:[%s12345_s1 + $0x1f4] sm:$0xf0]  ;;  %v6117_v55 = vld [vmem:[%s8008_s22 + $0x8] sm:$0xf0]  ;;  %v6300_v57 = vor.u32 %v7061_v47, %v6299_v46  ;;  %v8228_v61 = vor.u32 %v7015_v49, %v6115_v45 }
  0x60   : > { %1114 = vmatpush.bf16.msra.mxu1 %v6340_v22  ;;  %1163 = vmatpush.bf16.msra.mxu2 %v6216_v23  ;;  %v7091_v58 = vld [vmem:[%s12345_s1 + $0x1ec] sm:$0xf]  ;;  %v6301_v60 = vld [vmem:[%s12345_s1 + $0xf8] sm:$0xf0]  ;;  %v6428_v62 = vor.u32 %v7093_v51, %v6427_v50  ;;  %v6283_v0 = vld [vmem:[%s12345_s1 + $0xc8] sm:$0xf]  ;;  %v8239_v2 = vor.u32 %v7014_v54, %v6117_v55 }
  0x61   : > { %1212 = vmatpush.bf16.msra.mxu3 %v6344_v27  ;;  %v7059_v59 = vld [vmem:[%s12345_s1 + $0xec] sm:$0xf]  ;;  %v6429_v63 = vld [vmem:[%s12345_s1 + $0x1f8] sm:$0xf0]  ;;  %v7057_v1 = vld [vmem:[%s12345_s1 + $0xd4] sm:$0xf0] }
  0x62   : > { %v6411_v3 = vld [vmem:[%s12345_s1 + $0x1c8] sm:$0xf]  ;;  %v7089_v4 = vld [vmem:[%s12345_s1 + $0x1d4] sm:$0xf0]  ;;  %v6304_v5 = vor.u32 %v7059_v59, %v6301_v60  ;;  %v6432_v6 = vor.u32 %v7091_v58, %v6429_v63  ;;  %v6284_v7 = vor.u32 %v7057_v1, %v6283_v0  ;;  %v7055_v8 = vld [vmem:[%s12345_s1 + $0xcc] sm:$0xf] }
  0x63   : > { %1066 = vmatpush.bf16.msra.mxu0 %v6196_v33  ;;  %v6285_v9 = vld [vmem:[%s12345_s1 + $0xd8] sm:$0xf0]  ;;  %v6412_v10 = vor.u32 %v7089_v4, %v6411_v3  ;;  %v7087_v11 = vld [vmem:[%s12345_s1 + $0x1cc] sm:$0xf]  ;;  %v6267_v14 = vld [vmem:[%s12345_s1 + $0xa8] sm:$0xf] }
  0x64   : > { %1115 = vmatpush.bf16.msra.mxu1 %v6324_v36  ;;  %1164 = vmatpush.bf16.msra.mxu2 %v6200_v37  ;;  %v6413_v12 = vld [vmem:[%s12345_s1 + $0x1d8] sm:$0xf0]  ;;  %v6288_v13 = vor.u32 %v7055_v8, %v6285_v9  ;;  %v7053_v15 = vld [vmem:[%s12345_s1 + $0xb4] sm:$0xf0]  ;;  %v6395_v16 = vld [vmem:[%s12345_s1 + $0x1a8] sm:$0xf] }
  0x65   : > { %1213 = vmatpush.bf16.msra.mxu3 %v6328_v41  ;;  %v6416_v17 = vor.u32 %v7087_v11, %v6413_v12  ;;  %v6268_v18 = vor.u32 %v7053_v15, %v6267_v14  ;;  %v7085_v19 = vld [vmem:[%s12345_s1 + $0x1b4] sm:$0xf0]  ;;  %v7083_v20 = vld [vmem:[%s12345_s1 + $0x1ac] sm:$0xf]  ;;  %v6397_v22 = vld [vmem:[%s12345_s1 + $0x1b8] sm:$0xf0] }
  0x66   : > { %v6396_v21 = vor.u32 %v7085_v19, %v6395_v16  ;;  %v7051_v23 = vld [vmem:[%s12345_s1 + $0xac] sm:$0xf]  ;;  %v6269_v24 = vld [vmem:[%s12345_s1 + $0xb8] sm:$0xf0]  ;;  %v6400_v26 = vor.u32 %v7083_v20, %v6397_v22  ;;  %v6123_v27 = vld [vmem:[%s8008_s22 + $0x10] sm:$0xf] }
  0x67   : > { %1067 = vmatpush.bf16.msra.mxu0 %v6180_v48  ;;  %v6272_v25 = vor.u32 %v7051_v23, %v6269_v24  ;;  %v7017_v28 = vld [vmem:[%s8008_s22 + $0x14] sm:$0xf0]  ;;  %v7016_v29 = vld [vmem:[%s8008_s22 + $0x14] sm:$0xf]  ;;  %v6125_v30 = vld [vmem:[%s8008_s22 + $0x18] sm:$0xf0] }
  0x68   : > { %1116 = vmatpush.bf16.msra.mxu1 %v6308_v52  ;;  %1165 = vmatpush.bf16.msra.mxu2 %v6184_v53  ;;  %v8291_v31 = vor.u32 %v7017_v28, %v6123_v27  ;;  %v8293_v32 = vor.u32 %v7016_v29, %v6125_v30  ;;  %v6251_v33 = vld [vmem:[%s12345_s1 + $0x88] sm:$0xf]  ;;  %v7049_v34 = vld [vmem:[%s12345_s1 + $0x94] sm:$0xf0]  ;;  %v7079_v38 = vld [vmem:[%s12345_s1 + $0x18c] sm:$0xf] }
  0x69   : > { %1214 = vmatpush.bf16.msra.mxu3 %v6312_v56  ;;  %v6379_v35 = vld [vmem:[%s12345_s1 + $0x188] sm:$0xf]  ;;  %v6252_v36 = vor.u32 %v7049_v34, %v6251_v33  ;;  %v7081_v37 = vld [vmem:[%s12345_s1 + $0x194] sm:$0xf0]  ;;  %v6381_v39 = vld [vmem:[%s12345_s1 + $0x198] sm:$0xf0] }
  0x6a   : > { %1068 = vmatmul.bf16.vlgmr.msra.gmra.mxu0 %v8228_v61  ;;  %v6380_v40 = vor.u32 %v7081_v37, %v6379_v35  ;;  %v6384_v41 = vor.u32 %v7079_v38, %v6381_v39  ;;  %v7047_v42 = vld [vmem:[%s12345_s1 + $0x8c] sm:$0xf]  ;;  %v6253_v43 = vld [vmem:[%s12345_s1 + $0x98] sm:$0xf0]  ;;  %v6131_v45 = vld [vmem:[%s8008_s22 + $0x20] sm:$0xf] }
  0x6b   : > { %1256 = vmatpush.bf16.msrb.mxu0 %v6300_v57  ;;  %1117 = vmatmul.bf16.vlgmr.msra.gmra.mxu1 %v8239_v2  ;;  %v6256_v44 = vor.u32 %v7047_v42, %v6253_v43  ;;  %v7019_v46 = vld [vmem:[%s8008_s22 + $0x24] sm:$0xf0]  ;;  %v7018_v47 = vld [vmem:[%s8008_s22 + $0x24] sm:$0xf]  ;;  %v6133_v48 = vld [vmem:[%s8008_s22 + $0x28] sm:$0xf0] }
  0x6c   : > { %1305 = vmatpush.bf16.msrb.mxu1 %v6428_v62  ;;  %1166 = vmatmul.bf16.vlgmr.msra.gmra.mxu2 %v8228_v61  ;;  %v8327_v49 = vor.u32 %v7019_v46, %v6131_v45  ;;  %v8329_v50 = vor.u32 %v7018_v47, %v6133_v48  ;;  %v6235_v51 = vld [vmem:[%s12345_s1 + $0x68] sm:$0xf]  ;;  %v7045_v52 = vld [vmem:[%s12345_s1 + $0x74] sm:$0xf0]  ;;  %v7075_v56 = vld [vmem:[%s12345_s1 + $0x16c] sm:$0xf] }
  0x6d   : > { %1215 = vmatmul.bf16.vlgmr.msra.gmra.mxu3 %v8239_v2  ;;  %1354 = vmatpush.bf16.msrb.mxu2 %v6304_v5  ;;  %v6363_v53 = vld [vmem:[%s12345_s1 + $0x168] sm:$0xf]  ;;  %v6236_v54 = vor.u32 %v7045_v52, %v6235_v51  ;;  %v7077_v55 = vld [vmem:[%s12345_s1 + $0x174] sm:$0xf0]  ;;  %v6365_v57 = vld [vmem:[%s12345_s1 + $0x178] sm:$0xf0] }
  0x6e   : > { %1403 = vmatpush.bf16.msrb.mxu3 %v6432_v6  ;;  %v6364_v58 = vor.u32 %v7077_v55, %v6363_v53  ;;  %v6368_v59 = vor.u32 %v7075_v56, %v6365_v57  ;;  %v7043_v60 = vld [vmem:[%s12345_s1 + $0x6c] sm:$0xf]  ;;  %v6237_v62 = vld [vmem:[%s12345_s1 + $0x78] sm:$0xf0]  ;;  %v6139_v0 = vld [vmem:[%s8008_s22 + $0x30] sm:$0xf] }
  0x6f   : > { %1257 = vmatpush.bf16.msrb.mxu0 %v6284_v7  ;;  %v6240_v63 = vor.u32 %v7043_v60, %v6237_v62  ;;  %v7021_v1 = vld [vmem:[%s8008_s22 + $0x34] sm:$0xf0]  ;;  %v7020_v3 = vld [vmem:[%s8008_s22 + $0x34] sm:$0xf]  ;;  %v6141_v4 = vld [vmem:[%s8008_s22 + $0x38] sm:$0xf0] }
  0x70   : > { %1306 = vmatpush.bf16.msrb.mxu1 %v6412_v10  ;;  %v8363_v5 = vor.u32 %v7021_v1, %v6139_v0  ;;  %v8365_v6 = vor.u32 %v7020_v3, %v6141_v4  ;;  %v6219_v7 = vld [vmem:[%s12345_s1 + $0x48] sm:$0xf]  ;;  %v7041_v8 = vld [vmem:[%s12345_s1 + $0x54] sm:$0xf0]  ;;  %v7071_v12 = vld [vmem:[%s12345_s1 + $0x14c] sm:$0xf] }
  0x71   : > { %1355 = vmatpush.bf16.msrb.mxu2 %v6288_v13  ;;  %v6347_v9 = vld [vmem:[%s12345_s1 + $0x148] sm:$0xf]  ;;  %v6220_v10 = vor.u32 %v7041_v8, %v6219_v7  ;;  %v7073_v11 = vld [vmem:[%s12345_s1 + $0x154] sm:$0xf0]  ;;  %v6349_v13 = vld [vmem:[%s12345_s1 + $0x158] sm:$0xf0] }
  0x72   : > { %1404 = vmatpush.bf16.msrb.mxu3 %v6416_v17  ;;  %v6348_v14 = vor.u32 %v7073_v11, %v6347_v9  ;;  %v6352_v15 = vor.u32 %v7071_v12, %v6349_v13  ;;  %v7039_v16 = vld [vmem:[%s12345_s1 + $0x4c] sm:$0xf]  ;;  %v6221_v17 = vld [vmem:[%s12345_s1 + $0x58] sm:$0xf0]  ;;  %v6147_v19 = vld [vmem:[%s8008_s22 + $0x40] sm:$0xf] }
  0x73   : > { %1258 = vmatpush.bf16.msrb.mxu0 %v6268_v18  ;;  %v6224_v18 = vor.u32 %v7039_v16, %v6221_v17  ;;  %v7023_v20 = vld [vmem:[%s8008_s22 + $0x44] sm:$0xf0]  ;;  %v6149_v22 = vld [vmem:[%s8008_s22 + $0x48] sm:$0xf0]  ;;  %v7069_v29 = vld [vmem:[%s12345_s1 + $0x134] sm:$0xf0] }
  0x74   : > { %1307 = vmatpush.bf16.msrb.mxu1 %v6396_v21  ;;  %v7022_v21 = vld [vmem:[%s8008_s22 + $0x44] sm:$0xf]  ;;  %v8399_v23 = vor.u32 %v7023_v20, %v6147_v19  ;;  %v6331_v27 = vld [vmem:[%s12345_s1 + $0x128] sm:$0xf]  ;;  %v7067_v30 = vld [vmem:[%s12345_s1 + $0x12c] sm:$0xf] }
  0x75   : > { %1356 = vmatpush.bf16.msrb.mxu2 %v6272_v25  ;;  %v8401_v24 = vor.u32 %v7022_v21, %v6149_v22  ;;  %v6203_v25 = vld [vmem:[%s12345_s1 + $0x28] sm:$0xf]  ;;  %v6333_v33 = vld [vmem:[%s12345_s1 + $0x138] sm:$0xf0]  ;;  %v6332_v34 = vor.u32 %v7069_v29, %v6331_v27  ;;  %v6155_v39 = vld [vmem:[%s8008_s22 + $0x50] sm:$0xf] }
  0x76   : > { %1405 = vmatpush.bf16.msrb.mxu3 %v6400_v26  ;;  %v7037_v26 = vld [vmem:[%s12345_s1 + $0x34] sm:$0xf0]  ;;  %v6336_v35 = vor.u32 %v7067_v30, %v6333_v33  ;;  %v6205_v37 = vld [vmem:[%s12345_s1 + $0x38] sm:$0xf0]  ;;  %v6187_v45 = vld [vmem:[%s12345_s1 + $0x8] sm:$0xf] }
  0x77   : > { %1259 = vmatpush.bf16.msrb.mxu0 %v6252_v36  ;;  %v6204_v28 = vor.u32 %v7037_v26, %v6203_v25  ;;  %v7035_v36 = vld [vmem:[%s12345_s1 + $0x2c] sm:$0xf]  ;;  %v6157_v42 = vld [vmem:[%s8008_s22 + $0x58] sm:$0xf0]  ;;  %v7033_v46 = vld [vmem:[%s12345_s1 + $0x14] sm:$0xf0] }
  0x78   : > { %1308 = vmatpush.bf16.msrb.mxu1 %v6380_v40  ;;  %v6208_v38 = vor.u32 %v7035_v36, %v6205_v37  ;;  %v7025_v40 = vld [vmem:[%s8008_s22 + $0x54] sm:$0xf0]  ;;  %v6315_v47 = vld [vmem:[%s12345_s1 + $0x108] sm:$0xf]  ;;  %v6188_v48 = vor.u32 %v7033_v46, %v6187_v45  ;;  %v7063_v52 = vld [vmem:[%s12345_s1 + $0x10c] sm:$0xf] }
  0x79   : > { %1357 = vmatpush.bf16.msrb.mxu2 %v6256_v44  ;;  %v8435_v43 = vor.u32 %v7025_v40, %v6155_v39  ;;  %v7065_v51 = vld [vmem:[%s12345_s1 + $0x114] sm:$0xf0]  ;;  %v6317_v53 = vld [vmem:[%s12345_s1 + $0x118] sm:$0xf0]  ;;  %v6163_v56 = vld [vmem:[%s8008_s22 + $0x60] sm:$0xf] }
  0x7a   : > { %1073 = vmatmul.bf16.gmra.mxu0 %v8291_v31  ;;  %1406 = vmatpush.bf16.msrb.mxu3 %v6384_v41  ;;  %v7024_v41 = vld [vmem:[%s8008_s22 + $0x54] sm:$0xf]  ;;  %v6320_v55 = vor.u32 %v7063_v52, %v6317_v53  ;;  %v7027_v57 = vld [vmem:[%s8008_s22 + $0x64] sm:$0xf0]  ;;  %v7031_v62 = vld [vmem:[%s12345_s1 + $0xc] sm:$0xf] }
  0x7b   : > { %1122 = vmatmul.bf16.gmra.mxu1 %v8293_v32  ;;  %1260 = vmatpush.bf16.msrb.mxu0 %v6236_v54  ;;  %v8437_v44 = vor.u32 %v7024_v41, %v6157_v42  ;;  %v6316_v54 = vor.u32 %v7065_v51, %v6315_v47  ;;  %v8465_v60 = vor.u32 %v7027_v57, %v6163_v56  ;;  %v6547_v3 = vld [vmem:[%s12346_s2 + $0xe0] sm:$0xf]  ;;  %v7124_v4 = vld [vmem:[%s12346_s2 + $0xec] sm:$0xf0]  ;;  %v7122_v7 = vld [vmem:[%s12346_s2 + $0xe4] sm:$0xf] }
  0x7c   : > { %1171 = vmatmul.bf16.gmra.mxu2 %v8291_v31  ;;  %1309 = vmatpush.bf16.msrb.mxu1 %v6364_v58  ;;  %v7026_v58 = vld [vmem:[%s8008_s22 + $0x64] sm:$0xf]  ;;  %v8488_v8 = vor.u32 %v7124_v4, %v6547_v3  ;;  %v6549_v9 = vld [vmem:[%s12346_s2 + $0xf0] sm:$0xf0]  ;;  %v7123_v11 = vld [vmem:[%s12346_s2 + $0xec] sm:$0xf] }
  0x7d   : > { %1220 = vmatmul.bf16.gmra.mxu3 %v8293_v32  ;;  %1358 = vmatpush.bf16.msrb.mxu2 %v6240_v63  ;;  %v6189_v63 = vld [vmem:[%s12345_s1 + $0x18] sm:$0xf0]  ;;  %v6171_v13 = vld [vmem:[%s8008_s22 + $0x70] sm:$0xf]  ;;  %v7028_v16 = vld [vmem:[%s8008_s22 + $0x74] sm:$0xf] }
  0x7e   : > { %1407 = vmatpush.bf16.msrb.mxu3 %v6368_v59  ;;  %v6165_v59 = vld [vmem:[%s8008_s22 + $0x68] sm:$0xf0]  ;;  %v6192_v1 = vor.u32 %v7031_v62, %v6189_v63  ;;  %v6557_v12 = vld [vmem:[%s12346_s2 + $0xf8] sm:$0xf0]  ;;  %v6555_v20 = vld [vmem:[%s12346_s2 + $0xe8] sm:$0xf] }
  0x7f   : > { %1261 = vmatpush.bf16.msrb.mxu0 %v6220_v10  ;;  %v8473_v0 = vor.u32 %v7026_v58, %v6165_v59  ;;  %v8493_v10 = vor.u32 %v7122_v7, %v6549_v9  ;;  %v6173_v17 = vld [vmem:[%s8008_s22 + $0x78] sm:$0xf0]  ;;  %v7125_v21 = vld [vmem:[%s12346_s2 + $0xf4] sm:$0xf0]  ;;  %v6531_v25 = vld [vmem:[%s12346_s2 + $0xc0] sm:$0xf] }
  0x80   : > { %1310 = vmatpush.bf16.msrb.mxu1 %v6348_v14  ;;  %v7029_v14 = vld [vmem:[%s8008_s22 + $0x74] sm:$0xf0]  ;;  %v8512_v19 = vor.u32 %v7028_v16, %v6173_v17  ;;  %v8523_v22 = vor.u32 %v7125_v21, %v6555_v20  ;;  %v7120_v26 = vld [vmem:[%s12346_s2 + $0xcc] sm:$0xf0]  ;;  %v7118_v27 = vld [vmem:[%s12346_s2 + $0xc4] sm:$0xf] }
  0x81   : > { %1359 = vmatpush.bf16.msrb.mxu2 %v6224_v18  ;;  %v8510_v18 = vor.u32 %v7029_v14, %v6171_v13  ;;  %v6533_v29 = vld [vmem:[%s12346_s2 + $0xd0] sm:$0xf0]  ;;  %v8548_v33 = vld [vmem:[%s12347_s3] sm:$0xf]  ;;  %v6539_v42 = vld [vmem:[%s12346_s2 + $0xc8] sm:$0xf] }
  0x82   : > { %1408 = vmatpush.bf16.msrb.mxu3 %v6352_v15  ;;  %v8505_v15 = vor.u32 %v7123_v11, %v6557_v12  ;;  %v8541_v30 = vor.u32 %v7118_v27, %v6533_v29  ;;  %v8559_v37 = vperm.slane %v8548_v33, 0  ;;  %v7121_v45 = vld [vmem:[%s12346_s2 + $0xd4] sm:$0xf0]  ;;  %v8575_v46 = vperm.slane %v8548_v33, 1  ;;  %v7116_v51 = vld [vmem:[%s12346_s2 + $0xac] sm:$0xf0] }
  0x83   : > { %1262 = vmatpush.bf16.msrb.mxu0 %v6204_v28  ;;  %v8536_v28 = vor.u32 %v7120_v26, %v6531_v25  ;;  %v8577_v47 = vor.u32 %v7121_v45, %v6539_v42  ;;  %v7114_v52 = vld [vmem:[%s12346_s2 + $0xa4] sm:$0xf]  ;;  %v6525_v3 = vld [vmem:[%s12346_s2 + $0xb8] sm:$0xf0]  ;;  %v6523_v20 = vld [vmem:[%s12346_s2 + $0xa8] sm:$0xf] }
  0x84   : > { %1311 = vmatpush.bf16.msrb.mxu1 %v6332_v34  ;;  %v7119_v34 = vld [vmem:[%s12346_s2 + $0xcc] sm:$0xf]  ;;  %12562 = vst [vmem:[#allocation11_spill] sm:$0xff] %v8559_v37  ;;  %v7117_v21 = vld [vmem:[%s12346_s2 + $0xb4] sm:$0xf0]  ;;  %p6913_p12 = scmp.ne.s32.totalorder %s7832_s27, 1 }
  0x85   : > { %1360 = vmatpush.bf16.msrb.mxu2 %v6208_v38  ;;  %12563 = vst [vmem:[#allocation12_spill] sm:$0xff] %v8575_v46  ;;  %v8629_v25 = vor.u32 %v7117_v21, %v6523_v20  ;;  %v6499_v26 = vld [vmem:[%s12346_s2 + $0x80] sm:$0xf]  ;;  %v7112_v27 = vld [vmem:[%s12346_s2 + $0x8c] sm:$0xf0]  ;;  %s13461_s24 = sld [smem:[#allocation173_spill]] (!%p6913_p12) }
  0x86   : > { %1409 = vmatpush.bf16.msrb.mxu3 %v6336_v35  ;;  %v6541_v35 = vld [vmem:[%s12346_s2 + $0xd8] sm:$0xf0]  ;;  %12564 = vst [vmem:[#allocation13_spill] sm:$0xff] %v8577_v47  ;;  %v7110_v29 = vld [vmem:[%s12346_s2 + $0x84] sm:$0xf]  ;;  %s13462_s25 = sld [smem:[#allocation174_spill]] (!%p6913_p12) }
  0x87   : > { %1263 = vmatpush.bf16.msrb.mxu0 %v6188_v48  ;;  %v8556_v36 = vor.u32 %v7119_v34, %v6541_v35  ;;  %v6515_v48 = vld [vmem:[%s12346_s2 + $0xa0] sm:$0xf]  ;;  %12568 = vst [vmem:[#allocation17_spill] sm:$0xff] %v8629_v25  ;;  %v8642_v34 = vor.u32 %v7112_v27, %v6499_v26  ;;  %v7106_v20 = vld [vmem:[%s12346_s2 + $0x64] sm:$0xf] }
  0x88   : > { %1312 = vmatpush.bf16.msrb.mxu1 %v6316_v54 }
  0x89   : > { %1361 = vmatpush.bf16.msrb.mxu2 %v6192_v1  ;;  %12561 = vst [vmem:[#allocation10_spill] sm:$0xff] %v8556_v36  ;;  %v7115_v1 = vld [vmem:[%s12346_s2 + $0xac] sm:$0xf] }
  0x8a   : > { %1078 = vmatmul.bf16.gmra.mxu0 %v8327_v49  ;;  %1410 = vmatpush.bf16.msrb.mxu3 %v6320_v55  ;;  %v8611_v4 = vor.u32 %v7115_v1, %v6525_v3  ;;  %12569 = vst [vmem:[#allocation18_spill] sm:$0xff] %v8642_v34 }
  0x8b   : > { %1127 = vmatmul.bf16.gmra.mxu1 %v8329_v50  ;;  %1802 = vmatpush.bf16.msra.mxu0 %v8488_v8 }
  0x8c   : > { %1176 = vmatmul.bf16.gmra.mxu2 %v8327_v49  ;;  %1816 = vmatpush.bf16.msra.mxu1 %v8493_v10 }
  0x8d   : > { %1225 = vmatmul.bf16.gmra.mxu3 %v8329_v50  ;;  %1830 = vmatpush.bf16.msra.mxu2 %v8523_v22 }
  0x8e   : > { %1844 = vmatpush.bf16.msra.mxu3 %v8505_v15 }
  0x8f   : > { %1803 = vmatpush.bf16.msra.mxu0 %v8536_v28 }
  0x90   : > { %1817 = vmatpush.bf16.msra.mxu1 %v8541_v30 }
  0x91   : > { %1831 = vmatpush.bf16.msra.mxu2 %v8577_v47 }
  0x92   : > { %1845 = vmatpush.bf16.msra.mxu3 %v8556_v36 }
  0x95   : > { %1832 = vmatpush.bf16.msra.mxu2 %v8629_v25 }
  0x96   : > { %1846 = vmatpush.bf16.msra.mxu3 %v8611_v4 }
  0x9a   : > { %1083 = vmatmul.bf16.gmra.mxu0 %v8363_v5 }
  0x9b   : > { %1132 = vmatmul.bf16.gmra.mxu1 %v8365_v6 }
  0x9c   : > { %1181 = vmatmul.bf16.gmra.mxu2 %v8363_v5 }
  0x9d   : > { %1230 = vmatmul.bf16.gmra.mxu3 %v8365_v6 }
  0xaa   : > { %1088 = vmatmul.bf16.gmra.mxu0 %v8399_v23 }
  0xab   : > { %1137 = vmatmul.bf16.gmra.mxu1 %v8401_v24 }
  0xac   : > { %1186 = vmatmul.bf16.gmra.mxu2 %v8399_v23 }
  0xad   : > { %1235 = vmatmul.bf16.gmra.mxu3 %v8401_v24 }
  0xba   : > { %1093 = vmatmul.bf16.gmra.mxu0 %v8435_v43 }
  0xbb   : > { %1142 = vmatmul.bf16.gmra.mxu1 %v8437_v44 }
  0xbc   : > { %1191 = vmatmul.bf16.gmra.mxu2 %v8435_v43 }
  0xbd   : > { %1240 = vmatmul.bf16.gmra.mxu3 %v8437_v44 }
  0xca   : > { %1098 = vmatmul.bf16.gmra.mxu0 %v8465_v60 }
  0xcb   : > { %1147 = vmatmul.bf16.gmra.mxu1 %v8473_v0 }
  0xcc   : > { %1196 = vmatmul.bf16.gmra.mxu2 %v8465_v60 }
  0xcd   : > { %1245 = vmatmul.bf16.gmra.mxu3 %v8473_v0 }
  0xda   : > { %1103 = vmatmul.bf16.gmra.mxu0 %v8510_v18 }
  0xdb   : > { %1152 = vmatmul.bf16.gmra.mxu1 %v8512_v19 }
  0xdc   : > { %1201 = vmatmul.bf16.gmra.mxu2 %v8510_v18 }
  0xdd   : > { %1250 = vmatmul.bf16.gmra.mxu3 %v8512_v19 }
  0xe7   : > { %v1069_v38 = vpop.f32.mrf.mxu0 }
  0xe8   : > { %v1070_v39 = vadd.f32 %v1069_v38, %v8559_v37  ;;  %v1118_v40 = vpop.f32.mrf.mxu1 }
  0xea   : > { %v8563_v41 = vadd.f32 %v1118_v40, %v1070_v39  ;;  %1264 = vmatmul.bf16.vlgmr.msrb.gmra.mxu0 %v8228_v61 }
  0xeb   : > { %1313 = vmatmul.bf16.vlgmr.msrb.gmra.mxu1 %v8239_v2 }
  0xec   : > { %1362 = vmatmul.bf16.vlgmr.msrb.gmra.mxu2 %v8228_v61  ;;  %v8590_v61 = vor.u32 %v7116_v51, %v6515_v48 }
  0xed   : > { %1411 = vmatmul.bf16.vlgmr.msrb.gmra.mxu3 %v8239_v2  ;;  %v6517_v2 = vld [vmem:[%s12346_s2 + $0xb0] sm:$0xf0] }
  0xee   : > { %12565 = vst [vmem:[#allocation14_spill] sm:$0xff] %v8590_v61  ;;  %v8595_v54 = vor.u32 %v7114_v52, %v6517_v2  ;;  %1804 = vmatpush.bf16.msra.mxu0 %v8590_v61  ;;  %v7111_v52 = vld [vmem:[%s12346_s2 + $0x8c] sm:$0xf]  ;;  %v6509_v2 = vld [vmem:[%s12346_s2 + $0x98] sm:$0xf0] }
  0xef   : > { %v1167_v53 = vpop.f32.mrf.mxu2  ;;  %v1071_v57 = vpop.f32.mrf.mxu0 }
  0xf0   : > { %12566 = vst [vmem:[#allocation15_spill] sm:$0xff] %v8595_v54  ;;  %v1168_v55 = vadd.f32 %v1167_v53, %v8575_v46  ;;  %v1216_v56 = vpop.f32.mrf.mxu3  ;;  %v1072_v58 = vadd.f32 %v1071_v57, %v8559_v37  ;;  %v1120_v59 = vpop.f32.mrf.mxu1  ;;  %1818 = vmatpush.bf16.msra.mxu1 %v8595_v54  ;;  %v8663_v53 = vor.u32 %v7111_v52, %v6509_v2 }
  0xf2   : > { %v8601_v62 = vadd.f32 %v1216_v56, %v1168_v55  ;;  %v8603_v63 = vadd.f32 %v1120_v59, %v1072_v58  ;;  %1805 = vmatpush.bf16.msra.mxu0 %v8642_v34  ;;  %1847 = vmatpush.bf16.msra.mxu3 %v8663_v53 }
  0xf7   : > { %v1169_v7 = vpop.f32.mrf.mxu2  ;;  %v1074_v12 = vpop.f32.mrf.mxu0 }
  0xf8   : > { %v1170_v9 = vadd.f32 %v1169_v7, %v8575_v46  ;;  %v1218_v11 = vpop.f32.mrf.mxu3  ;;  %v1075_v13 = vadd.f32 %v1074_v12, %v8559_v37  ;;  %v1123_v14 = vpop.f32.mrf.mxu1 }
  0xfa   : > { %v8616_v16 = vadd.f32 %v1218_v11, %v1170_v9  ;;  %v8618_v17 = vadd.f32 %v1123_v14, %v1075_v13  ;;  %1269 = vmatmul.bf16.gmra.mxu0 %v8291_v31  ;;  %v6507_v9 = vld [vmem:[%s12346_s2 + $0x88] sm:$0xf]  ;;  %v7113_v11 = vld [vmem:[%s12346_s2 + $0x94] sm:$0xf0]  ;;  %v6483_v13 = vld [vmem:[%s12346_s2 + $0x60] sm:$0xf] }
  0xfb   : > { %1318 = vmatmul.bf16.gmra.mxu1 %v8293_v32  ;;  %v8681_v12 = vor.u32 %v7113_v11, %v6507_v9  ;;  %v7108_v14 = vld [vmem:[%s12346_s2 + $0x6c] sm:$0xf0]  ;;  %v6491_v11 = vld [vmem:[%s12346_s2 + $0x68] sm:$0xf] }
  0xfc   : > { %12567 = vst [vmem:[#allocation16_spill] sm:$0xff] %v8618_v17  ;;  %1367 = vmatmul.bf16.gmra.mxu2 %v8291_v31  ;;  %v6501_v31 = vld [vmem:[%s12346_s2 + $0x90] sm:$0xf0]  ;;  %v8694_v21 = vor.u32 %v7108_v14, %v6483_v13  ;;  %v7109_v13 = vld [vmem:[%s12346_s2 + $0x74] sm:$0xf0] }
  0xfd   : > { %1416 = vmatmul.bf16.gmra.mxu3 %v8293_v32  ;;  %v8647_v35 = vor.u32 %v7110_v29, %v6501_v31  ;;  %12575 = vst [vmem:[#allocation24_spill] sm:$0xff] %v8681_v12  ;;  %1833 = vmatpush.bf16.msra.mxu2 %v8681_v12  ;;  %v8733_v14 = vor.u32 %v7109_v13, %v6491_v11 }
  0xfe   : > { %1806 = vmatpush.bf16.msra.mxu0 %v8694_v21 }
  0xff   : > { %v1172_v32 = vpop.f32.mrf.mxu2  ;;  %12570 = vst [vmem:[#allocation19_spill] sm:$0xff] %v8647_v35  ;;  %v1076_v40 = vpop.f32.mrf.mxu0  ;;  %1819 = vmatpush.bf16.msra.mxu1 %v8647_v35 }
 0x100   : > { %v1173_v38 = vadd.f32 %v1172_v32, %v8575_v46  ;;  %v1221_v39 = vpop.f32.mrf.mxu3  ;;  %v1077_v42 = vadd.f32 %v1076_v40, %v8559_v37  ;;  %v1125_v45 = vpop.f32.mrf.mxu1 }
 0x101   : > { %1834 = vmatpush.bf16.msra.mxu2 %v8733_v14 }
 0x102   : > { %v8653_v48 = vadd.f32 %v1221_v39, %v1173_v38  ;;  %v8655_v51 = vadd.f32 %v1125_v45, %v1077_v42  ;;  %v7107_v42 = vld [vmem:[%s12346_s2 + $0x6c] sm:$0xf]  ;;  %v6493_v45 = vld [vmem:[%s12346_s2 + $0x78] sm:$0xf0] }
 0x103   : > { %v8715_v52 = vor.u32 %v7107_v42, %v6493_v45 }
 0x104   : > { %12571 = vst [vmem:[#allocation20_spill] sm:$0xff] %v8653_v48 }
 0x105   : > { %12572 = vst [vmem:[#allocation21_spill] sm:$0xff] %v8655_v51  ;;  %1848 = vmatpush.bf16.msra.mxu3 %v8715_v52 }
 0x107   : > { %v1174_v55 = vpop.f32.mrf.mxu2  ;;  %v1079_v58 = vpop.f32.mrf.mxu0 }
 0x108   : > { %v1175_v56 = vadd.f32 %v1174_v55, %v8575_v46  ;;  %v1223_v57 = vpop.f32.mrf.mxu3  ;;  %v1080_v59 = vadd.f32 %v1079_v58, %v8559_v37  ;;  %v1128_v1 = vpop.f32.mrf.mxu1 }
 0x10a   : > { %v8668_v3 = vadd.f32 %v1223_v57, %v1175_v56  ;;  %v8670_v7 = vadd.f32 %v1128_v1, %v1080_v59  ;;  %1274 = vmatmul.bf16.gmra.mxu0 %v8327_v49 }
 0x10b   : > { %1323 = vmatmul.bf16.gmra.mxu1 %v8329_v50 }
 0x10c   : > { %12573 = vst [vmem:[#allocation22_spill] sm:$0xff] %v8668_v3  ;;  %1372 = vmatmul.bf16.gmra.mxu2 %v8327_v49  ;;  %v6485_v49 = vld [vmem:[%s12346_s2 + $0x70] sm:$0xf0] }
 0x10d   : > { %12574 = vst [vmem:[#allocation23_spill] sm:$0xff] %v8670_v7  ;;  %1421 = vmatmul.bf16.gmra.mxu3 %v8329_v50  ;;  %v8699_v26 = vor.u32 %v7106_v20, %v6485_v49  ;;  %v6467_v20 = vld [vmem:[%s12346_s2 + $0x40] sm:$0xf]  ;;  %v7104_v49 = vld [vmem:[%s12346_s2 + $0x4c] sm:$0xf0] }
 0x10f   : > { %v1177_v50 = vpop.f32.mrf.mxu2  ;;  %v1081_v31 = vpop.f32.mrf.mxu0  ;;  %1820 = vmatpush.bf16.msra.mxu1 %v8699_v26 }
 0x110   : > { %v1178_v27 = vadd.f32 %v1177_v50, %v8575_v46  ;;  %v1226_v29 = vpop.f32.mrf.mxu3  ;;  %v1082_v32 = vadd.f32 %v1081_v31, %v8559_v37  ;;  %v1130_v38 = vpop.f32.mrf.mxu1  ;;  %v7102_v50 = vld [vmem:[%s12346_s2 + $0x44] sm:$0xf] }
 0x112   : > { %v8705_v39 = vadd.f32 %v1226_v29, %v1178_v27  ;;  %v8707_v40 = vadd.f32 %v1130_v38, %v1082_v32  ;;  %v8746_v27 = vor.u32 %v7104_v49, %v6467_v20 }
 0x114   : > { %12576 = vst [vmem:[#allocation25_spill] sm:$0xff] %v8705_v39  ;;  %1807 = vmatpush.bf16.msra.mxu0 %v8746_v27 }
 0x115   : > { %12577 = vst [vmem:[#allocation26_spill] sm:$0xff] %v8707_v40 }
 0x117   : > { %v1179_v2 = vpop.f32.mrf.mxu2  ;;  %v1084_v57 = vpop.f32.mrf.mxu0 }
 0x118   : > { %v1180_v55 = vadd.f32 %v1179_v2, %v8575_v46  ;;  %v1228_v56 = vpop.f32.mrf.mxu3  ;;  %v1085_v58 = vadd.f32 %v1084_v57, %v8559_v37  ;;  %v1133_v59 = vpop.f32.mrf.mxu1  ;;  %v6477_v57 = vld [vmem:[%s12346_s2 + $0x58] sm:$0xf0] }
 0x11a   : > { %v8720_v1 = vadd.f32 %v1228_v56, %v1180_v55  ;;  %v8722_v9 = vadd.f32 %v1133_v59, %v1085_v58  ;;  %1279 = vmatmul.bf16.gmra.mxu0 %v8363_v5  ;;  %v7103_v56 = vld [vmem:[%s12346_s2 + $0x4c] sm:$0xf] }
 0x11b   : > { %1328 = vmatmul.bf16.gmra.mxu1 %v8365_v6  ;;  %v8767_v58 = vor.u32 %v7103_v56, %v6477_v57  ;;  %v7098_v56 = vld [vmem:[%s12346_s2 + $0x24] sm:$0xf] }
 0x11c   : > { %12578 = vst [vmem:[#allocation27_spill] sm:$0xff] %v8720_v1  ;;  %1377 = vmatmul.bf16.gmra.mxu2 %v8363_v5  ;;  %v6469_v5 = vld [vmem:[%s12346_s2 + $0x50] sm:$0xf0] }
 0x11d   : > { %12579 = vst [vmem:[#allocation28_spill] sm:$0xff] %v8722_v9  ;;  %1426 = vmatmul.bf16.gmra.mxu3 %v8365_v6  ;;  %v8751_v29 = vor.u32 %v7102_v50, %v6469_v5 }
 0x11e   : > { %1849 = vmatpush.bf16.msra.mxu3 %v8767_v58 }
 0x11f   : > { %v1182_v6 = vpop.f32.mrf.mxu2  ;;  %v1086_v38 = vpop.f32.mrf.mxu0  ;;  %1821 = vmatpush.bf16.msra.mxu1 %v8751_v29 }
 0x120   : > { %v1183_v31 = vadd.f32 %v1182_v6, %v8575_v46  ;;  %v1231_v32 = vpop.f32.mrf.mxu3  ;;  %v1087_v42 = vadd.f32 %v1086_v38, %v8559_v37  ;;  %v1135_v45 = vpop.f32.mrf.mxu1 }
 0x122   : > { %v8757_v2 = vadd.f32 %v1231_v32, %v1183_v31  ;;  %v8759_v55 = vadd.f32 %v1135_v45, %v1087_v42  ;;  %v6475_v31 = vld [vmem:[%s12346_s2 + $0x48] sm:$0xf]  ;;  %v7105_v32 = vld [vmem:[%s12346_s2 + $0x54] sm:$0xf0]  ;;  %v6451_v42 = vld [vmem:[%s12346_s2 + $0x20] sm:$0xf] }
 0x123   : > { %v8785_v38 = vor.u32 %v7105_v32, %v6475_v31  ;;  %v7100_v45 = vld [vmem:[%s12346_s2 + $0x2c] sm:$0xf0] }
 0x124   : > { %12580 = vst [vmem:[#allocation29_spill] sm:$0xff] %v8757_v2  ;;  %v8798_v57 = vor.u32 %v7100_v45, %v6451_v42  ;;  %v7099_v42 = vld [vmem:[%s12346_s2 + $0x2c] sm:$0xf]  ;;  %v6461_v45 = vld [vmem:[%s12346_s2 + $0x38] sm:$0xf0] }
 0x125   : > { %12581 = vst [vmem:[#allocation30_spill] sm:$0xff] %v8759_v55  ;;  %1835 = vmatpush.bf16.msra.mxu2 %v8785_v38 }
 0x126   : > { %12584 = vst [vmem:[#allocation33_spill] sm:$0xff] %v8798_v57  ;;  %1808 = vmatpush.bf16.msra.mxu0 %v8798_v57 }
 0x127   : > { %v1184_v59 = vpop.f32.mrf.mxu2  ;;  %v1089_v20 = vpop.f32.mrf.mxu0 }
 0x128   : > { %v1185_v11 = vadd.f32 %v1184_v59, %v8575_v46  ;;  %v1233_v13 = vpop.f32.mrf.mxu3  ;;  %v1090_v49 = vadd.f32 %v1089_v20, %v8559_v37  ;;  %v1138_v50 = vpop.f32.mrf.mxu1 }
 0x12a   : > { %v8772_v5 = vadd.f32 %v1233_v13, %v1185_v11  ;;  %v8774_v6 = vadd.f32 %v1138_v50, %v1090_v49  ;;  %1284 = vmatmul.bf16.gmra.mxu0 %v8399_v23 }
 0x12b   : > { %1333 = vmatmul.bf16.gmra.mxu1 %v8401_v24 }
 0x12c   : > { %12582 = vst [vmem:[#allocation31_spill] sm:$0xff] %v8772_v5  ;;  %1382 = vmatmul.bf16.gmra.mxu2 %v8399_v23  ;;  %v6453_v23 = vld [vmem:[%s12346_s2 + $0x30] sm:$0xf0] }
 0x12d   : > { %12583 = vst [vmem:[#allocation32_spill] sm:$0xff] %v8774_v6  ;;  %1431 = vmatmul.bf16.gmra.mxu3 %v8401_v24  ;;  %v8803_v59 = vor.u32 %v7098_v56, %v6453_v23  ;;  %v8819_v56 = vor.u32 %v7099_v42, %v6461_v45  ;;  %v6459_v42 = vld [vmem:[%s12346_s2 + $0x28] sm:$0xf]  ;;  %v7101_v45 = vld [vmem:[%s12346_s2 + $0x34] sm:$0xf0] }
 0x12f   : > { %v1187_v24 = vpop.f32.mrf.mxu2  ;;  %12585 = vst [vmem:[#allocation34_spill] sm:$0xff] %v8803_v59  ;;  %v1091_v20 = vpop.f32.mrf.mxu0  ;;  %1822 = vmatpush.bf16.msra.mxu1 %v8803_v59  ;;  %1850 = vmatpush.bf16.msra.mxu3 %v8819_v56 }
 0x130   : > { %v1188_v11 = vadd.f32 %v1187_v24, %v8575_v46  ;;  %v1236_v13 = vpop.f32.mrf.mxu3  ;;  %v1092_v49 = vadd.f32 %v1091_v20, %v8559_v37  ;;  %v1140_v50 = vpop.f32.mrf.mxu1  ;;  %12588 = vst [vmem:[#allocation37_spill] sm:$0xff] %v8819_v56 }
 0x132   : > { %v8809_v31 = vadd.f32 %v1236_v13, %v1188_v11  ;;  %v8811_v32 = vadd.f32 %v1140_v50, %v1092_v49 }
 0x134   : > { %12586 = vst [vmem:[#allocation35_spill] sm:$0xff] %v8809_v31 }
 0x135   : > { %12587 = vst [vmem:[#allocation36_spill] sm:$0xff] %v8811_v32 }
 0x137   : > { %v1189_v23 = vpop.f32.mrf.mxu2  ;;  %v1094_v11 = vpop.f32.mrf.mxu0 }
 0x138   : > { %v1190_v24 = vadd.f32 %v1189_v23, %v8575_v46  ;;  %v1238_v20 = vpop.f32.mrf.mxu3  ;;  %v1095_v13 = vadd.f32 %v1094_v11, %v8559_v37  ;;  %v1143_v49 = vpop.f32.mrf.mxu1  ;;  %v8837_v23 = vor.u32 %v7101_v45, %v6459_v42  ;;  %v7094_v11 = vld [vmem:[%s12346_s2 + $0x4] sm:$0xf] }
 0x13a   : > { %v8824_v50 = vadd.f32 %v1238_v20, %v1190_v24  ;;  %v8826_v32 = vadd.f32 %v1143_v49, %v1095_v13  ;;  %1289 = vmatmul.bf16.gmra.mxu0 %v8435_v43  ;;  %12591 = vst [vmem:[#allocation40_spill] sm:$0xff] %v8837_v23  ;;  %v6435_v24 = vld [vmem:[%s12346_s2] sm:$0xf]  ;;  %v7096_v20 = vld [vmem:[%s12346_s2 + $0xc] sm:$0xf0]  ;;  %1836 = vmatpush.bf16.msra.mxu2 %v8837_v23 }
 0x13b   : > { %1338 = vmatmul.bf16.gmra.mxu1 %v8437_v44  ;;  %v8850_v13 = vor.u32 %v7096_v20, %v6435_v24  ;;  %v7095_v20 = vld [vmem:[%s12346_s2 + $0xc] sm:$0xf] }
 0x13c   : > { %12589 = vst [vmem:[#allocation38_spill] sm:$0xff] %v8824_v50  ;;  %1387 = vmatmul.bf16.gmra.mxu2 %v8435_v43  ;;  %v6437_v43 = vld [vmem:[%s12346_s2 + $0x10] sm:$0xf0] }
 0x13d   : > { %12590 = vst [vmem:[#allocation39_spill] sm:$0xff] %v8826_v32  ;;  %1436 = vmatmul.bf16.gmra.mxu3 %v8437_v44  ;;  %v8855_v49 = vor.u32 %v7094_v11, %v6437_v43  ;;  %1809 = vmatpush.bf16.msra.mxu0 %v8850_v13  ;;  %v6445_v11 = vld [vmem:[%s12346_s2 + $0x18] sm:$0xf0] }
 0x13e   : > { %12592 = vst [vmem:[#allocation41_spill] sm:$0xff] %v8850_v13  ;;  %v8872_v43 = vor.u32 %v7095_v20, %v6445_v11 }
 0x13f   : > { %v1192_v44 = vpop.f32.mrf.mxu2  ;;  %12593 = vst [vmem:[#allocation42_spill] sm:$0xff] %v8855_v49  ;;  %v8858_v32 = vpop.f32.mrf.mxu0  ;;  %1823 = vmatpush.bf16.msra.mxu1 %v8855_v49 }
 0x140   : > { %v1193_v42 = vadd.f32 %v1192_v44, %v8575_v46  ;;  %v1241_v45 = vpop.f32.mrf.mxu3  ;;  %12594 = vst [vmem:[#allocation43_spill] sm:$0xff] %v8858_v32  ;;  %v8861_v50 = vpop.f32.mrf.mxu1  ;;  %1851 = vmatpush.bf16.msra.mxu3 %v8872_v43 }
 0x141   : > { %12595 = vst [vmem:[#allocation44_spill] sm:$0xff] %v8861_v50  ;;  %v6443_v50 = vld [vmem:[%s12346_s2 + $0x8] sm:$0xf] }
 0x142   : > { %v8864_v24 = vadd.f32 %v1241_v45, %v1193_v42  ;;  %12597 = vst [vmem:[#allocation46_spill] sm:$0xff] %v8872_v43  ;;  %v7097_v42 = vld [vmem:[%s12346_s2 + $0x14] sm:$0xf0] }
 0x143   : > { %v8885_v32 = vor.u32 %v7097_v42, %v6443_v50 }
 0x144   : > { %12596 = vst [vmem:[#allocation45_spill] sm:$0xff] %v8864_v24 }
 0x145   : > { %12600 = vst [vmem:[#allocation49_spill] sm:$0xff] %v8885_v32  ;;  %1837 = vmatpush.bf16.msra.mxu2 %v8885_v32 }
 0x147   : > { %v8875_v44 = vpop.f32.mrf.mxu2  ;;  %v1099_v24 = vpop.f32.mrf.mxu0 }
 0x148   : > { %12598 = vst [vmem:[#allocation47_spill] sm:$0xff] %v8875_v44  ;;  %v8883_v45 = vpop.f32.mrf.mxu3  ;;  %v1100_v20 = vadd.f32 %v1099_v24, %v8559_v37  ;;  %v1148_v11 = vpop.f32.mrf.mxu1 }
 0x149   : > { %12599 = vst [vmem:[#allocation48_spill] sm:$0xff] %v8883_v45 }
 0x14a   : > { %v8889_v31 = vadd.f32 %v1148_v11, %v1100_v20  ;;  %1294 = vmatmul.bf16.gmra.mxu0 %v8465_v60 }
 0x14b   : > { %1343 = vmatmul.bf16.gmra.mxu1 %v8473_v0 }
 0x14c   : > { %12601 = vst [vmem:[#allocation50_spill] sm:$0xff] %v8889_v31  ;;  %1392 = vmatmul.bf16.gmra.mxu2 %v8465_v60 }
 0x14d   : > { %1441 = vmatmul.bf16.gmra.mxu3 %v8473_v0 }
 0x14f   : > { %v1197_v44 = vpop.f32.mrf.mxu2  ;;  %v8896_v42 = vpop.f32.mrf.mxu0 }
 0x150   : > { %v1198_v45 = vadd.f32 %v1197_v44, %v8575_v46  ;;  %v1246_v50 = vpop.f32.mrf.mxu3  ;;  %12602 = vst [vmem:[#allocation51_spill] sm:$0xff] %v8896_v42  ;;  %v8898_v24 = vpop.f32.mrf.mxu1 }
 0x151   : > { %12603 = vst [vmem:[#allocation52_spill] sm:$0xff] %v8898_v24 }
 0x152   : > { %v8900_v6 = vadd.f32 %v1246_v50, %v1198_v45 }
 0x154   : > { %12604 = vst [vmem:[#allocation53_spill] sm:$0xff] %v8900_v6 }
 0x157   : > { %v8902_v20 = vpop.f32.mrf.mxu2  ;;  %v1104_v31 = vpop.f32.mrf.mxu0 }
 0x158   : > { %12605 = vst [vmem:[#allocation54_spill] sm:$0xff] %v8902_v20  ;;  %v8904_v11 = vpop.f32.mrf.mxu3  ;;  %v1105_v5 = vadd.f32 %v1104_v31, %v8559_v37  ;;  %v1153_v60 = vpop.f32.mrf.mxu1 }
 0x159   : > { %12606 = vst [vmem:[#allocation55_spill] sm:$0xff] %v8904_v11 }
 0x15a   : > { %v8907_v55 = vadd.f32 %v1153_v60, %v1105_v5  ;;  %1299 = vmatmul.bf16.gmra.mxu0 %v8510_v18  ;;  %v1622_v5 = vld [vmem:[#allocation3] sm:$0xff]  ;;  %v1623_v60 = vld [vmem:[#allocation3 + $0x8] sm:$0xff] }
 0x15b   : > { %1348 = vmatmul.bf16.gmra.mxu1 %v8512_v19 }
 0x15c   : > { %12607 = vst [vmem:[#allocation56_spill] sm:$0xff] %v8907_v55  ;;  %1397 = vmatmul.bf16.gmra.mxu2 %v8510_v18  ;;  %v8921_v55 = vperm.slane %v8548_v33, 2  ;;  %v1641_v18 = vpack.c.bf16 %v1623_v60, %v1622_v5 }
 0x15d   : > { %1446 = vmatmul.bf16.gmra.mxu3 %v8512_v19 }
 0x15e   : > { %12611 = vst [vmem:[#allocation60_spill] sm:$0xff] %v8921_v55 }
 0x15f   : > { %v1202_v0 = vpop.f32.mrf.mxu2  ;;  %v8914_v50 = vpop.f32.mrf.mxu0 }
 0x160   : > { %v1203_v44 = vadd.f32 %v1202_v0, %v8575_v46  ;;  %v1251_v45 = vpop.f32.mrf.mxu3  ;;  %12608 = vst [vmem:[#allocation57_spill] sm:$0xff] %v8914_v50  ;;  %v8916_v6 = vpop.f32.mrf.mxu1 }
 0x161   : > { %12609 = vst [vmem:[#allocation58_spill] sm:$0xff] %v8916_v6 }
 0x162   : > { %v8918_v31 = vadd.f32 %v1251_v45, %v1203_v44  ;;  %v8931_v44 = vperm.slane %v8548_v33, 3 }
 0x164   : > { %12610 = vst [vmem:[#allocation59_spill] sm:$0xff] %v8918_v31 }
 0x165   : > { %12614 = vst [vmem:[#allocation63_spill] sm:$0xff] %v8931_v44 }
 0x167   : > { %v8923_v11 = vpop.f32.mrf.mxu2  ;;  %v1265_v19 = vpop.f32.mrf.mxu0 }
 0x168   : > { %12612 = vst [vmem:[#allocation61_spill] sm:$0xff] %v8923_v11  ;;  %v8925_v24 = vpop.f32.mrf.mxu3  ;;  %v1266_v0 = vadd.f32 %v1265_v19, %v8921_v55  ;;  %v1314_v20 = vpop.f32.mrf.mxu1 }
 0x169   : > { %12613 = vst [vmem:[#allocation62_spill] sm:$0xff] %v8925_v24 }
 0x16a   : > { %v8928_v42 = vadd.f32 %v1314_v20, %v1266_v0  ;;  %1810 = vmatmul.bf16.vlgmr.msra.gmra.mxu0 %v1641_v18 }
 0x16b   : > { %1824 = vmatmul.bf16.vlgmr.msra.gmra.mxu1 %v1641_v18 }
 0x16c   : > { %1838 = vmatmul.bf16.vlgmr.msra.gmra.mxu2 %v1641_v18 }
 0x16d   : > { %1852 = vmatmul.bf16.vlgmr.msra.gmra.mxu3 %v1641_v18 }
 0x16f   : > { %v1363_v45 = vpop.f32.mrf.mxu2  ;;  %v8934_v5 = vpop.f32.mrf.mxu0 }
 0x170   : > { %v1364_v31 = vadd.f32 %v1363_v45, %v8931_v44  ;;  %v1412_v6 = vpop.f32.mrf.mxu3  ;;  %v8936_v60 = vpop.f32.mrf.mxu1 }
 0x172   : > { %v8938_v24 = vadd.f32 %v1412_v6, %v1364_v31 }
 0x177   : > { %v8940_v19 = vpop.f32.mrf.mxu2  ;;  %v1270_v0 = vpop.f32.mrf.mxu0 }
 0x178   : > { %v8942_v20 = vpop.f32.mrf.mxu3  ;;  %v1271_v11 = vadd.f32 %v1270_v0, %v8921_v55  ;;  %v1319_v33 = vpop.f32.mrf.mxu1 }
 0x17a   : > { %v8945_v50 = vadd.f32 %v1319_v33, %v1271_v11 }
 0x17c   : > { %12615 = vst [vmem:[#allocation64_spill] sm:$0xff] %v8945_v50 }
 0x17f   : > { %v1368_v18 = vpop.f32.mrf.mxu2  ;;  %v8948_v37 = vpop.f32.mrf.mxu0 }
 0x180   : > { %v1369_v45 = vadd.f32 %v1368_v18, %v8931_v44  ;;  %v1417_v46 = vpop.f32.mrf.mxu3  ;;  %12616 = vst [vmem:[#allocation65_spill] sm:$0xff] %v8948_v37  ;;  %v8950_v2 = vpop.f32.mrf.mxu1 }
 0x181   : > { %12617 = vst [vmem:[#allocation66_spill] sm:$0xff] %v8950_v2 }
 0x182   : > { %v8952_v6 = vadd.f32 %v1417_v46, %v1369_v45 }
 0x184   : > { %12618 = vst [vmem:[#allocation67_spill] sm:$0xff] %v8952_v6 }
 0x187   : > { %v8954_v31 = vpop.f32.mrf.mxu2  ;;  %v1275_v1 = vpop.f32.mrf.mxu0 }
 0x188   : > { %12619 = vst [vmem:[#allocation68_spill] sm:$0xff] %v8954_v31  ;;  %v8956_v9 = vpop.f32.mrf.mxu3  ;;  %v1276_v0 = vadd.f32 %v1275_v1, %v8921_v55  ;;  %v1324_v40 = vpop.f32.mrf.mxu1 }
 0x189   : > { %12620 = vst [vmem:[#allocation69_spill] sm:$0xff] %v8956_v9 }
 0x18a   : > { %v8959_v11 = vadd.f32 %v1324_v40, %v1276_v0 }
 0x18c   : > { %12621 = vst [vmem:[#allocation70_spill] sm:$0xff] %v8959_v11 }
 0x18f   : > { %v1373_v33 = vpop.f32.mrf.mxu2  ;;  %v8962_v7 = vpop.f32.mrf.mxu0 }
 0x190   : > { %v1374_v18 = vadd.f32 %v1373_v33, %v8931_v44  ;;  %v1422_v39 = vpop.f32.mrf.mxu3  ;;  %12622 = vst [vmem:[#allocation71_spill] sm:$0xff] %v8962_v7  ;;  %v8964_v50 = vpop.f32.mrf.mxu1 }
 0x191   : > { %12623 = vst [vmem:[#allocation72_spill] sm:$0xff] %v8964_v50 }
 0x192   : > { %v8966_v46 = vadd.f32 %v1422_v39, %v1374_v18 }
 0x194   : > { %12624 = vst [vmem:[#allocation73_spill] sm:$0xff] %v8966_v46 }
 0x197   : > { %v8968_v45 = vpop.f32.mrf.mxu2  ;;  %v1280_v37 = vpop.f32.mrf.mxu0 }
 0x198   : > { %12625 = vst [vmem:[#allocation74_spill] sm:$0xff] %v8968_v45  ;;  %v8970_v2 = vpop.f32.mrf.mxu3  ;;  %v1281_v1 = vadd.f32 %v1280_v37, %v8921_v55  ;;  %v1329_v3 = vpop.f32.mrf.mxu1 }
 0x199   : > { %12626 = vst [vmem:[#allocation75_spill] sm:$0xff] %v8970_v2 }
 0x19a   : > { %v8973_v40 = vadd.f32 %v1329_v3, %v1281_v1 }
 0x19c   : > { %12627 = vst [vmem:[#allocation76_spill] sm:$0xff] %v8973_v40 }
 0x19f   : > { %v1378_v0 = vpop.f32.mrf.mxu2  ;;  %v8976_v51 = vpop.f32.mrf.mxu0 }
 0x1a0   : > { %v1379_v33 = vadd.f32 %v1378_v0, %v8931_v44  ;;  %v1427_v11 = vpop.f32.mrf.mxu3  ;;  %12628 = vst [vmem:[#allocation77_spill] sm:$0xff] %v8976_v51  ;;  %v8978_v7 = vpop.f32.mrf.mxu1 }
 0x1a1   : > { %12629 = vst [vmem:[#allocation78_spill] sm:$0xff] %v8978_v7 }
 0x1a2   : > { %v8980_v39 = vadd.f32 %v1427_v11, %v1379_v33  ;;  %v6681_v33 = vld [vmem:[%s12349_s5 + $0xe0] sm:$0xf] }
 0x1a4   : > { %12630 = vst [vmem:[#allocation79_spill] sm:$0xff] %v8980_v39  ;;  %v6673_v39 = vld [vmem:[%s12349_s5 + $0xc8] sm:$0xf] }
 0x1a7   : > { %v8982_v18 = vpop.f32.mrf.mxu2  ;;  %v1285_v46 = vpop.f32.mrf.mxu0 }
 0x1a8   : > { %12631 = vst [vmem:[#allocation80_spill] sm:$0xff] %v8982_v18  ;;  %v8984_v50 = vpop.f32.mrf.mxu3  ;;  %v1286_v37 = vadd.f32 %v1285_v46, %v8921_v55  ;;  %v1334_v2 = vpop.f32.mrf.mxu1  ;;  %v7188_v46 = vld [vmem:[%s12349_s5 + $0xec] sm:$0xf0] }
 0x1a9   : > { %12632 = vst [vmem:[#allocation81_spill] sm:$0xff] %v8984_v50  ;;  %v7185_v50 = vld [vmem:[%s12349_s5 + $0xd4] sm:$0xf0] }
 0x1aa   : > { %v8987_v3 = vadd.f32 %v1334_v2, %v1286_v37  ;;  %v7186_v2 = vld [vmem:[%s12349_s5 + $0xe4] sm:$0xf]  ;;  %v9005_v37 = vor.u32 %v7188_v46, %v6681_v33  ;;  %v7187_v33 = vld [vmem:[%s12349_s5 + $0xec] sm:$0xf]  ;;  %v6691_v46 = vld [vmem:[%s12349_s5 + $0xf8] sm:$0xf0]  ;;  %v9059_v6 = vor.u32 %v7185_v50, %v6673_v39 }
 0x1ab   : > { %v7180_v50 = vld [vmem:[%s12349_s5 + $0xac] sm:$0xf0]  ;;  %v7178_v39 = vld [vmem:[%s12349_s5 + $0xa4] sm:$0xf] }
 0x1ac   : > { %12633 = vst [vmem:[#allocation82_spill] sm:$0xff] %v8987_v3  ;;  %2154 = vmatpush.bf16.msrb.mxu0 %v9005_v37 }
 0x1ad   : > { %12637 = vst [vmem:[#allocation86_spill] sm:$0xff] %v9005_v37 }
 0x1ae   : > { %12645 = vst [vmem:[#allocation94_spill] sm:$0xff] %v9059_v6 }
 0x1af   : > { %v1383_v1 = vpop.f32.mrf.mxu2  ;;  %v8990_v45 = vpop.f32.mrf.mxu0 }
 0x1b0   : > { %v1384_v0 = vadd.f32 %v1383_v1, %v8931_v44  ;;  %v1432_v40 = vpop.f32.mrf.mxu3  ;;  %12634 = vst [vmem:[#allocation83_spill] sm:$0xff] %v8990_v45  ;;  %v8992_v51 = vpop.f32.mrf.mxu1  ;;  %v6683_v1 = vld [vmem:[%s12349_s5 + $0xf0] sm:$0xf0]  ;;  %v9027_v45 = vor.u32 %v7187_v33, %v6691_v46  ;;  %v7182_v33 = vld [vmem:[%s12349_s5 + $0xc4] sm:$0xf] }
 0x1b1   : > { %12635 = vst [vmem:[#allocation84_spill] sm:$0xff] %v8992_v51  ;;  %v9016_v51 = vor.u32 %v7186_v2, %v6683_v1 }
 0x1b2   : > { %v8994_v11 = vadd.f32 %v1432_v40, %v1384_v0  ;;  %v6689_v40 = vld [vmem:[%s12349_s5 + $0xe8] sm:$0xf]  ;;  %v7189_v0 = vld [vmem:[%s12349_s5 + $0xf4] sm:$0xf0]  ;;  %12640 = vst [vmem:[#allocation89_spill] sm:$0xff] %v9027_v45  ;;  %2196 = vmatpush.bf16.msrb.mxu3 %v9027_v45 }
 0x1b3   : > { %12638 = vst [vmem:[#allocation87_spill] sm:$0xff] %v9016_v51  ;;  %v9018_v3 = vor.u32 %v7189_v0, %v6689_v40  ;;  %2168 = vmatpush.bf16.msrb.mxu1 %v9016_v51  ;;  %v6665_v40 = vld [vmem:[%s12349_s5 + $0xc0] sm:$0xf]  ;;  %v7184_v0 = vld [vmem:[%s12349_s5 + $0xcc] sm:$0xf0] }
 0x1b4   : > { %12636 = vst [vmem:[#allocation85_spill] sm:$0xff] %v8994_v11  ;;  %v9046_v7 = vor.u32 %v7184_v0, %v6665_v40  ;;  %v6675_v40 = vld [vmem:[%s12349_s5 + $0xd8] sm:$0xf0] }
 0x1b5   : > { %12639 = vst [vmem:[#allocation88_spill] sm:$0xff] %v9018_v3  ;;  %2182 = vmatpush.bf16.msrb.mxu2 %v9018_v3 }
 0x1b6   : > { %12643 = vst [vmem:[#allocation92_spill] sm:$0xff] %v9046_v7  ;;  %2155 = vmatpush.bf16.msrb.mxu0 %v9046_v7 }
 0x1b7   : > { %v9029_v11 = vpop.f32.mrf.mxu2  ;;  %v1290_v1 = vpop.f32.mrf.mxu0 }
 0x1b8   : > { %12641 = vst [vmem:[#allocation90_spill] sm:$0xff] %v9029_v11  ;;  %v9033_v2 = vpop.f32.mrf.mxu3  ;;  %v1291_v46 = vadd.f32 %v1290_v1, %v8921_v55  ;;  %v1339_v11 = vpop.f32.mrf.mxu1  ;;  %v7183_v1 = vld [vmem:[%s12349_s5 + $0xcc] sm:$0xf] }
 0x1b9   : > { %12642 = vst [vmem:[#allocation91_spill] sm:$0xff] %v9033_v2  ;;  %v6667_v2 = vld [vmem:[%s12349_s5 + $0xd0] sm:$0xf0]  ;;  %v9070_v48 = vor.u32 %v7183_v1, %v6675_v40  ;;  %2183 = vmatpush.bf16.msrb.mxu2 %v9059_v6  ;;  %v7181_v1 = vld [vmem:[%s12349_s5 + $0xb4] sm:$0xf0] }
 0x1ba   : > { %v9057_v18 = vor.u32 %v7182_v33, %v6667_v2  ;;  %v9067_v0 = vadd.f32 %v1339_v11, %v1291_v46  ;;  %v6649_v2 = vld [vmem:[%s12349_s5 + $0xa0] sm:$0xf]  ;;  %v6651_v33 = vld [vmem:[%s12349_s5 + $0xb0] sm:$0xf0]  ;;  %v6657_v46 = vld [vmem:[%s12349_s5 + $0xa8] sm:$0xf] }
 0x1bb   : > { %12647 = vst [vmem:[#allocation96_spill] sm:$0xff] %v9070_v48  ;;  %v9083_v11 = vor.u32 %v7180_v50, %v6649_v2  ;;  %2197 = vmatpush.bf16.msrb.mxu3 %v9070_v48  ;;  %v9095_v40 = vor.u32 %v7178_v39, %v6651_v33  ;;  %v7179_v2 = vld [vmem:[%s12349_s5 + $0xac] sm:$0xf]  ;;  %v6659_v50 = vld [vmem:[%s12349_s5 + $0xb8] sm:$0xf0] }
 0x1bc   : > { %12644 = vst [vmem:[#allocation93_spill] sm:$0xff] %v9057_v18  ;;  %2169 = vmatpush.bf16.msrb.mxu1 %v9057_v18  ;;  %v9105_v17 = vor.u32 %v7179_v2, %v6659_v50  ;;  %v6633_v33 = vld [vmem:[%s12349_s5 + $0x80] sm:$0xf]  ;;  %v6635_v50 = vld [vmem:[%s12349_s5 + $0x90] sm:$0xf0] }
 0x1bd   : > { %12646 = vst [vmem:[#allocation95_spill] sm:$0xff] %v9067_v0  ;;  %v9097_v0 = vor.u32 %v7181_v1, %v6657_v46  ;;  %2156 = vmatpush.bf16.msrb.mxu0 %v9083_v11  ;;  %v7176_v46 = vld [vmem:[%s12349_s5 + $0x8c] sm:$0xf0]  ;;  %v7174_v1 = vld [vmem:[%s12349_s5 + $0x84] sm:$0xf] }
 0x1be   : > { %12648 = vst [vmem:[#allocation97_spill] sm:$0xff] %v9083_v11  ;;  %v9125_v2 = vor.u32 %v7176_v46, %v6633_v33  ;;  %v9138_v11 = vor.u32 %v7174_v1, %v6635_v50  ;;  %v7175_v33 = vld [vmem:[%s12349_s5 + $0x8c] sm:$0xf]  ;;  %v6643_v46 = vld [vmem:[%s12349_s5 + $0x98] sm:$0xf0] }
 0x1bf   : > { %12649 = vst [vmem:[#allocation98_spill] sm:$0xff] %v9095_v40  ;;  %v1388_v9 = vpop.f32.mrf.mxu2  ;;  %v9109_v39 = vpop.f32.mrf.mxu0  ;;  %2184 = vmatpush.bf16.msrb.mxu2 %v9097_v0  ;;  %2198 = vmatpush.bf16.msrb.mxu3 %v9105_v17  ;;  %v6619_v1 = vld [vmem:[%s12349_s5 + $0x70] sm:$0xf0]  ;;  %v6625_v50 = vld [vmem:[%s12349_s5 + $0x68] sm:$0xf] }
 0x1c0   : > { %12650 = vst [vmem:[#allocation99_spill] sm:$0xff] %v9097_v0  ;;  %v1389_v31 = vadd.f32 %v1388_v9, %v8931_v44  ;;  %v1437_v48 = vpop.f32.mrf.mxu3  ;;  %2170 = vmatpush.bf16.msrb.mxu1 %v9095_v40  ;;  %v9122_v9 = vpop.f32.mrf.mxu1  ;;  %v7177_v0 = vld [vmem:[%s12349_s5 + $0x94] sm:$0xf0] }
 0x1c1   : > { %12651 = vst [vmem:[#allocation100_spill] sm:$0xff] %v9105_v17  ;;  %2157 = vmatpush.bf16.msrb.mxu0 %v9125_v2  ;;  %v9149_v17 = vor.u32 %v7175_v33, %v6643_v46  ;;  %v7173_v33 = vld [vmem:[%s12349_s5 + $0x74] sm:$0xf0] }
 0x1c2   : > { %12652 = vst [vmem:[#allocation101_spill] sm:$0xff] %v9109_v39  ;;  %v6641_v39 = vld [vmem:[%s12349_s5 + $0x88] sm:$0xf]  ;;  %v9136_v40 = vadd.f32 %v1437_v48, %v1389_v31  ;;  %v6617_v48 = vld [vmem:[%s12349_s5 + $0x60] sm:$0xf] }
 0x1c3   : > { %12653 = vst [vmem:[#allocation102_spill] sm:$0xff] %v9122_v9  ;;  %v9140_v9 = vor.u32 %v7177_v0, %v6641_v39  ;;  %v7172_v31 = vld [vmem:[%s12349_s5 + $0x6c] sm:$0xf0]  ;;  %v7170_v0 = vld [vmem:[%s12349_s5 + $0x64] sm:$0xf]  ;;  %2199 = vmatpush.bf16.msrb.mxu3 %v9149_v17 }
 0x1c4   : > { %12654 = vst [vmem:[#allocation103_spill] sm:$0xff] %v9125_v2  ;;  %2171 = vmatpush.bf16.msrb.mxu1 %v9138_v11  ;;  %v9162_v39 = vor.u32 %v7172_v31, %v6617_v48  ;;  %v9174_v46 = vor.u32 %v7170_v0, %v6619_v1  ;;  %v7171_v48 = vld [vmem:[%s12349_s5 + $0x6c] sm:$0xf]  ;;  %v6627_v31 = vld [vmem:[%s12349_s5 + $0x78] sm:$0xf0] }
 0x1c5   : > { %12655 = vst [vmem:[#allocation104_spill] sm:$0xff] %v9136_v40  ;;  %2185 = vmatpush.bf16.msrb.mxu2 %v9140_v9  ;;  %v9176_v40 = vor.u32 %v7173_v33, %v6625_v50  ;;  %v6601_v1 = vld [vmem:[%s12349_s5 + $0x40] sm:$0xf]  ;;  %v7168_v50 = vld [vmem:[%s12349_s5 + $0x4c] sm:$0xf0] }
 0x1c6   : > { %12656 = vst [vmem:[#allocation105_spill] sm:$0xff] %v9138_v11  ;;  %2158 = vmatpush.bf16.msrb.mxu0 %v9162_v39  ;;  %v7166_v33 = vld [vmem:[%s12349_s5 + $0x44] sm:$0xf] }
 0x1c7   : > { %12657 = vst [vmem:[#allocation106_spill] sm:$0xff] %v9140_v9  ;;  %v9184_v9 = vor.u32 %v7171_v48, %v6627_v31  ;;  %v9186_v11 = vpop.f32.mrf.mxu2  ;;  %v1295_v0 = vpop.f32.mrf.mxu0 }
 0x1c8   : > { %12658 = vst [vmem:[#allocation107_spill] sm:$0xff] %v9149_v17  ;;  %v9189_v2 = vpop.f32.mrf.mxu3  ;;  %2172 = vmatpush.bf16.msrb.mxu1 %v9174_v46  ;;  %v1296_v48 = vadd.f32 %v1295_v0, %v8921_v55  ;;  %v1344_v31 = vpop.f32.mrf.mxu1 }
 0x1c9   : > { %12659 = vst [vmem:[#allocation108_spill] sm:$0xff] %v9162_v39  ;;  %2186 = vmatpush.bf16.msrb.mxu2 %v9176_v40  ;;  %2200 = vmatpush.bf16.msrb.mxu3 %v9184_v9 }
 0x1ca   : > { %12660 = vst [vmem:[#allocation109_spill] sm:$0xff] %v9174_v46  ;;  %v7169_v46 = vld [vmem:[%s12349_s5 + $0x54] sm:$0xf0] }
 0x1cb   : > { %12661 = vst [vmem:[#allocation110_spill] sm:$0xff] %v9176_v40  ;;  %v6609_v40 = vld [vmem:[%s12349_s5 + $0x48] sm:$0xf] }
 0x1cc   : > { %12662 = vst [vmem:[#allocation111_spill] sm:$0xff] %v9184_v9  ;;  %v9217_v0 = vor.u32 %v7169_v46, %v6609_v40  ;;  %v9225_v9 = vadd.f32 %v1344_v31, %v1296_v48  ;;  %v7164_v40 = vld [vmem:[%s12349_s5 + $0x2c] sm:$0xf0]  ;;  %v7162_v46 = vld [vmem:[%s12349_s5 + $0x24] sm:$0xf] }
 0x1cd   : > { %12663 = vst [vmem:[#allocation112_spill] sm:$0xff] %v9186_v11  ;;  %v6603_v11 = vld [vmem:[%s12349_s5 + $0x50] sm:$0xf0]  ;;  %v6593_v31 = vld [vmem:[%s12349_s5 + $0x28] sm:$0xf] }
 0x1ce   : > { %12664 = vst [vmem:[#allocation113_spill] sm:$0xff] %v9189_v2  ;;  %v9204_v2 = vor.u32 %v7168_v50, %v6601_v1  ;;  %v9215_v39 = vor.u32 %v7166_v33, %v6603_v11  ;;  %v7167_v1 = vld [vmem:[%s12349_s5 + $0x4c] sm:$0xf]  ;;  %v6611_v50 = vld [vmem:[%s12349_s5 + $0x58] sm:$0xf0]  ;;  %2187 = vmatpush.bf16.msrb.mxu2 %v9217_v0 }
 0x1cf   : > { %12667 = vst [vmem:[#allocation116_spill] sm:$0xff] %v9217_v0  ;;  %v9228_v17 = vor.u32 %v7167_v1, %v6611_v50  ;;  %v6585_v11 = vld [vmem:[%s12349_s5 + $0x20] sm:$0xf]  ;;  %v6587_v48 = vld [vmem:[%s12349_s5 + $0x30] sm:$0xf0] }
 0x1d0   : > { %12665 = vst [vmem:[#allocation114_spill] sm:$0xff] %v9204_v2  ;;  %2159 = vmatpush.bf16.msrb.mxu0 %v9204_v2  ;;  %2173 = vmatpush.bf16.msrb.mxu1 %v9215_v39  ;;  %v9242_v33 = vor.u32 %v7164_v40, %v6585_v11  ;;  %v7165_v1 = vld [vmem:[%s12349_s5 + $0x34] sm:$0xf0]  ;;  %v9253_v50 = vor.u32 %v7162_v46, %v6587_v48  ;;  %v7163_v11 = vld [vmem:[%s12349_s5 + $0x2c] sm:$0xf]  ;;  %v1442_v2 = vpop.f32.mrf.mxu3  ;;  %v9267_v46 = vpop.f32.mrf.mxu0 }
 0x1d1   : > { %12666 = vst [vmem:[#allocation115_spill] sm:$0xff] %v9215_v39  ;;  %2201 = vmatpush.bf16.msrb.mxu3 %v9228_v17  ;;  %v6595_v40 = vld [vmem:[%s12349_s5 + $0x38] sm:$0xf0]  ;;  %v9271_v48 = vpop.f32.mrf.mxu1 }
 0x1d2   : > { %12668 = vst [vmem:[#allocation117_spill] sm:$0xff] %v9225_v9  ;;  %v9255_v9 = vor.u32 %v7165_v1, %v6593_v31  ;;  %v9264_v0 = vor.u32 %v7163_v11, %v6595_v40  ;;  %v6569_v1 = vld [vmem:[%s12349_s5] sm:$0xf]  ;;  %v7158_v11 = vld [vmem:[%s12349_s5 + $0x4] sm:$0xf] }
 0x1d3   : > { %12669 = vst [vmem:[#allocation118_spill] sm:$0xff] %v9228_v17  ;;  %v1393_v17 = vpop.f32.mrf.mxu2 }
 0x1d4   : > { %12670 = vst [vmem:[#allocation119_spill] sm:$0xff] %v9242_v33  ;;  %2160 = vmatpush.bf16.msrb.mxu0 %v9242_v33  ;;  %v1394_v39 = vadd.f32 %v1393_v17, %v8931_v44  ;;  %2174 = vmatpush.bf16.msrb.mxu1 %v9253_v50  ;;  %v7160_v17 = vld [vmem:[%s12349_s5 + $0xc] sm:$0xf0] }
 0x1d5   : > { %12671 = vst [vmem:[#allocation120_spill] sm:$0xff] %v9253_v50  ;;  %2188 = vmatpush.bf16.msrb.mxu2 %v9255_v9  ;;  %2202 = vmatpush.bf16.msrb.mxu3 %v9264_v0  ;;  %v9285_v40 = vor.u32 %v7160_v17, %v6569_v1  ;;  %v7159_v1 = vld [vmem:[%s12349_s5 + $0xc] sm:$0xf]  ;;  %v6579_v17 = vld [vmem:[%s12349_s5 + $0x18] sm:$0xf0] }
 0x1d6   : > { %12672 = vst [vmem:[#allocation121_spill] sm:$0xff] %v9255_v9  ;;  %v9274_v31 = vadd.f32 %v1442_v2, %v1394_v39  ;;  %v6577_v2 = vld [vmem:[%s12349_s5 + $0x8] sm:$0xf]  ;;  %v7161_v39 = vld [vmem:[%s12349_s5 + $0x14] sm:$0xf0]  ;;  %v9310_v9 = vor.u32 %v7159_v1, %v6579_v17 }
 0x1d7   : > { %12673 = vst [vmem:[#allocation122_spill] sm:$0xff] %v9264_v0  ;;  %v6809_v0 = vld [vmem:[%s12348_s4 + $0xe0] sm:$0xf]  ;;  %v6817_v17 = vld [vmem:[%s12348_s4 + $0xe8] sm:$0xf] }
 0x1d8   : > { %12674 = vst [vmem:[#allocation123_spill] sm:$0xff] %v9267_v46  ;;  %v9298_v46 = vor.u32 %v7161_v39, %v6577_v2  ;;  %2161 = vmatpush.bf16.msrb.mxu0 %v9285_v40  ;;  %v6811_v2 = vld [vmem:[%s12348_s4 + $0xf0] sm:$0xf0]  ;;  %v7155_v50 = vld [vmem:[%s12348_s4 + $0xec] sm:$0xf] }
 0x1d9   : > { %12675 = vst [vmem:[#allocation124_spill] sm:$0xff] %v9271_v48  ;;  %v6571_v48 = vld [vmem:[%s12349_s5 + $0x10] sm:$0xf0]  ;;  %2203 = vmatpush.bf16.msrb.mxu3 %v9310_v9 }
 0x1da   : > { %12676 = vst [vmem:[#allocation125_spill] sm:$0xff] %v9274_v31  ;;  %v9296_v31 = vor.u32 %v7158_v11, %v6571_v48  ;;  %v7156_v48 = vld [vmem:[%s12348_s4 + $0xec] sm:$0xf0]  ;;  %v7154_v11 = vld [vmem:[%s12348_s4 + $0xe4] sm:$0xf]  ;;  %2189 = vmatpush.bf16.msrb.mxu2 %v9298_v46 }
 0x1db   : > { %12677 = vst [vmem:[#allocation126_spill] sm:$0xff] %v9285_v40  ;;  %v9323_v39 = vor.u32 %v7156_v48, %v6809_v0  ;;  %v9325_v1 = vor.u32 %v7154_v11, %v6811_v2  ;;  %v7157_v40 = vld [vmem:[%s12348_s4 + $0xf4] sm:$0xf0]  ;;  %v9336_v33 = vpop.f32.mrf.mxu2  ;;  %v6819_v48 = vld [vmem:[%s12348_s4 + $0xf8] sm:$0xf0]  ;;  %v9344_v11 = vpop.f32.mrf.mxu3 }
 0x1dc   : > { %12678 = vst [vmem:[#allocation127_spill] sm:$0xff] %v9296_v31  ;;  %2175 = vmatpush.bf16.msrb.mxu1 %v9296_v31  ;;  %v9339_v0 = vor.u32 %v7157_v40, %v6817_v17  ;;  %v1300_v2 = vpop.f32.mrf.mxu0  ;;  %v6793_v40 = vld [vmem:[%s12348_s4 + $0xc0] sm:$0xf]  ;;  %v7152_v17 = vld [vmem:[%s12348_s4 + $0xcc] sm:$0xf0] }
 0x1dd   : > { %12679 = vst [vmem:[#allocation128_spill] sm:$0xff] %v9298_v46  ;;  %2370 = vmatpush.bf16.msra.mxu0 %v9323_v39  ;;  %v9348_v46 = vor.u32 %v7155_v50, %v6819_v48  ;;  %v1301_v31 = vadd.f32 %v1300_v2, %v8921_v55  ;;  %v9362_v50 = vor.u32 %v7152_v17, %v6793_v40  ;;  %v6795_v48 = vld [vmem:[%s12348_s4 + $0xd0] sm:$0xf0]  ;;  %v6801_v2 = vld [vmem:[%s12348_s4 + $0xc8] sm:$0xf] }
 0x1de   : > { %12680 = vst [vmem:[#allocation129_spill] sm:$0xff] %v9310_v9  ;;  %2398 = vmatpush.bf16.msra.mxu2 %v9339_v0  ;;  %v7151_v40 = vld [vmem:[%s12348_s4 + $0xcc] sm:$0xf]  ;;  %v6803_v17 = vld [vmem:[%s12348_s4 + $0xd8] sm:$0xf0] }
 0x1df   : > { %12681 = vst [vmem:[#allocation130_spill] sm:$0xff] %v9323_v39  ;;  %2412 = vmatpush.bf16.msra.mxu3 %v9348_v46 }
 0x1e0   : > { %12682 = vst [vmem:[#allocation131_spill] sm:$0xff] %v9325_v1  ;;  %2384 = vmatpush.bf16.msra.mxu1 %v9325_v1 }
 0x1e1   : > { %12683 = vst [vmem:[#allocation132_spill] sm:$0xff] %v9336_v33  ;;  %v1349_v33 = vpop.f32.mrf.mxu1  ;;  %2371 = vmatpush.bf16.msra.mxu0 %v9362_v50 }
 0x1e2   : > { %12684 = vst [vmem:[#allocation133_spill] sm:$0xff] %v9339_v0  ;;  %v7153_v0 = vld [vmem:[%s12348_s4 + $0xd4] sm:$0xf0]  ;;  %v9373_v1 = vadd.f32 %v1349_v33, %v1301_v31  ;;  %v6777_v33 = vld [vmem:[%s12348_s4 + $0xa0] sm:$0xf] }
 0x1e3   : > { %12685 = vst [vmem:[#allocation134_spill] sm:$0xff] %v9344_v11  ;;  %v7150_v11 = vld [vmem:[%s12348_s4 + $0xc4] sm:$0xf]  ;;  %v9377_v9 = vor.u32 %v7153_v0, %v6801_v2  ;;  %v7148_v31 = vld [vmem:[%s12348_s4 + $0xac] sm:$0xf0] }
 0x1e4   : > { %12686 = vst [vmem:[#allocation135_spill] sm:$0xff] %v9348_v46  ;;  %v9375_v39 = vor.u32 %v7150_v11, %v6795_v48  ;;  %v9386_v46 = vor.u32 %v7151_v40, %v6803_v17  ;;  %v7146_v0 = vld [vmem:[%s12348_s4 + $0xa4] sm:$0xf]  ;;  %v9400_v11 = vor.u32 %v7148_v31, %v6777_v33  ;;  %v6779_v48 = vld [vmem:[%s12348_s4 + $0xb0] sm:$0xf0]  ;;  %v1398_v17 = vpop.f32.mrf.mxu2 }
 0x1e5   : > { %12687 = vst [vmem:[#allocation136_spill] sm:$0xff] %v9362_v50  ;;  %2399 = vmatpush.bf16.msra.mxu2 %v9377_v9  ;;  %v6785_v2 = vld [vmem:[%s12348_s4 + $0xa8] sm:$0xf]  ;;  %v7149_v40 = vld [vmem:[%s12348_s4 + $0xb4] sm:$0xf0]  ;;  %v9422_v50 = vpop.f32.mrf.mxu0 }
 0x1e6   : > { %12688 = vst [vmem:[#allocation137_spill] sm:$0xff] %v9373_v1  ;;  %2385 = vmatpush.bf16.msra.mxu1 %v9375_v39  ;;  %2413 = vmatpush.bf16.msra.mxu3 %v9386_v46  ;;  %v9411_v1 = vor.u32 %v7146_v0, %v6779_v48  ;;  %v7147_v33 = vld [vmem:[%s12348_s4 + $0xac] sm:$0xf]  ;;  %v6787_v31 = vld [vmem:[%s12348_s4 + $0xb8] sm:$0xf0] }
 0x1e7   : > { %12689 = vst [vmem:[#allocation138_spill] sm:$0xff] %v9375_v39  ;;  %v1447_v39 = vpop.f32.mrf.mxu3  ;;  %2372 = vmatpush.bf16.msra.mxu0 %v9400_v11  ;;  %v9425_v6 = vor.u32 %v7147_v33, %v6787_v31  ;;  %v6761_v48 = vld [vmem:[%s12348_s4 + $0x80] sm:$0xf]  ;;  %v6763_v31 = vld [vmem:[%s12348_s4 + $0x90] sm:$0xf0] }
 0x1e8   : > { %12690 = vst [vmem:[#allocation139_spill] sm:$0xff] %v9377_v9  ;;  %v9413_v9 = vor.u32 %v7149_v40, %v6785_v2  ;;  %v7144_v2 = vld [vmem:[%s12348_s4 + $0x8c] sm:$0xf0]  ;;  %v7142_v40 = vld [vmem:[%s12348_s4 + $0x84] sm:$0xf] }
 0x1e9   : > { %12691 = vst [vmem:[#allocation140_spill] sm:$0xff] %v9386_v46  ;;  %v1399_v46 = vadd.f32 %v1398_v17, %v8931_v44  ;;  %v9427_v0 = vpop.f32.mrf.mxu1  ;;  %v9443_v33 = vor.u32 %v7144_v2, %v6761_v48 }
 0x1ea   : > { %12692 = vst [vmem:[#allocation141_spill] sm:$0xff] %v9400_v11  ;;  %2386 = vmatpush.bf16.msra.mxu1 %v9411_v1  ;;  %2400 = vmatpush.bf16.msra.mxu2 %v9413_v9 }
 0x1eb   : > { %12693 = vst [vmem:[#allocation142_spill] sm:$0xff] %v9411_v1  ;;  %v9440_v17 = vadd.f32 %v1447_v39, %v1399_v46  ;;  %2414 = vmatpush.bf16.msra.mxu3 %v9425_v6  ;;  %v7143_v46 = vld [vmem:[%s12348_s4 + $0x8c] sm:$0xf]  ;;  %v6771_v39 = vld [vmem:[%s12348_s4 + $0x98] sm:$0xf0]  ;;  %2373 = vmatpush.bf16.msra.mxu0 %v9443_v33 }
 0x1ec   : > { %12694 = vst [vmem:[#allocation143_spill] sm:$0xff] %v9413_v9  ;;  %v7145_v9 = vld [vmem:[%s12348_s4 + $0x94] sm:$0xf0]  ;;  %v9465_v2 = vor.u32 %v7143_v46, %v6771_v39  ;;  %v6753_v46 = vld [vmem:[%s12348_s4 + $0x68] sm:$0xf] }
 0x1ed   : > { %12695 = vst [vmem:[#allocation144_spill] sm:$0xff] %v9422_v50  ;;  %v9451_v50 = vor.u32 %v7142_v40, %v6763_v31  ;;  %v6745_v40 = vld [vmem:[%s12348_s4 + $0x60] sm:$0xf]  ;;  %v7140_v31 = vld [vmem:[%s12348_s4 + $0x6c] sm:$0xf0] }
 0x1ee   : > { %12696 = vst [vmem:[#allocation145_spill] sm:$0xff] %v9425_v6  ;;  %v7141_v39 = vld [vmem:[%s12348_s4 + $0x74] sm:$0xf0]  ;;  %v6729_v1 = vld [vmem:[%s12348_s4 + $0x40] sm:$0xf] }
 0x1ef   : > { %12697 = vst [vmem:[#allocation146_spill] sm:$0xff] %v9427_v0  ;;  %v6769_v0 = vld [vmem:[%s12348_s4 + $0x88] sm:$0xf]  ;;  %2387 = vmatpush.bf16.msra.mxu1 %v9451_v50  ;;  %2415 = vmatpush.bf16.msra.mxu3 %v9465_v2 }
 0x1f0   : > { %12698 = vst [vmem:[#allocation147_spill] sm:$0xff] %v9440_v17  ;;  %v9463_v48 = vor.u32 %v7145_v9, %v6769_v0  ;;  %v7138_v17 = vld [vmem:[%s12348_s4 + $0x64] sm:$0xf]  ;;  %v9479_v9 = vor.u32 %v7140_v31, %v6745_v40  ;;  %v6747_v0 = vld [vmem:[%s12348_s4 + $0x70] sm:$0xf0] }
 0x1f1   : > { %12699 = vst [vmem:[#allocation148_spill] sm:$0xff] %v9443_v33  ;;  %v9492_v33 = vor.u32 %v7141_v39, %v6753_v46  ;;  %v7139_v40 = vld [vmem:[%s12348_s4 + $0x6c] sm:$0xf]  ;;  %v6755_v31 = vld [vmem:[%s12348_s4 + $0x78] sm:$0xf0]  ;;  %v1627_v39 = vld [vmem:[#allocation5] sm:$0xff] }
 0x1f2   : > { %12700 = vst [vmem:[#allocation149_spill] sm:$0xff] %v9451_v50  ;;  %2401 = vmatpush.bf16.msra.mxu2 %v9463_v48  ;;  %v9490_v50 = vor.u32 %v7138_v17, %v6747_v0  ;;  %2374 = vmatpush.bf16.msra.mxu0 %v9479_v9  ;;  %v9503_v6 = vor.u32 %v7139_v40, %v6755_v31  ;;  %v1825_v0 = vpop.f32.mrf.mxu1  ;;  %v1626_v46 = vld [vmem:[#allocation5 + $0x8] sm:$0xff]  ;;  %v6731_v40 = vld [vmem:[%s12348_s4 + $0x50] sm:$0xf0] }
 0x1f3   : > { %12701 = vst [vmem:[#allocation150_spill] sm:$0xff] %v9463_v48  ;;  %v1811_v48 = vpop.f32.mrf.mxu0  ;;  %v1859_v11 = vadd.f32 %v1825_v0, %v8601_v62  ;;  %v6737_v0 = vld [vmem:[%s12348_s4 + $0x48] sm:$0xf] }
 0x1f4   : > { %12702 = vst [vmem:[#allocation151_spill] sm:$0xff] %v9465_v2  ;;  %v9500_v2 = vpop.f32.mrf.mxu3  ;;  %v1858_v17 = vadd.f32 %v1811_v48, %v8563_v41  ;;  %2388 = vmatpush.bf16.msra.mxu1 %v9490_v50  ;;  %2416 = vmatpush.bf16.msra.mxu3 %v9503_v6  ;;  %v7136_v41 = vld [vmem:[%s12348_s4 + $0x4c] sm:$0xf0]  ;;  %v7134_v48 = vld [vmem:[%s12348_s4 + $0x44] sm:$0xf] }
 0x1f5   : > { %12703 = vst [vmem:[#allocation152_spill] sm:$0xff] %v9479_v9  ;;  %v9524_v62 = vor.u32 %v7134_v48, %v6731_v40  ;;  %v7132_v48 = vld [vmem:[%s12348_s4 + $0x2c] sm:$0xf0]  ;;  %v7130_v40 = vld [vmem:[%s12348_s4 + $0x24] sm:$0xf] }
 0x1f6   : > { %12704 = vst [vmem:[#allocation153_spill] sm:$0xff] %v9490_v50  ;;  %2402 = vmatpush.bf16.msra.mxu2 %v9492_v33  ;;  %v6561_v31 = vmul.f32 -1.442695, %v1858_v17  ;;  %v9522_v50 = vor.u32 %v7136_v41, %v6729_v1  ;;  %v7135_v1 = vld [vmem:[%s12348_s4 + $0x4c] sm:$0xf] }
 0x1f7   : > { %12705 = vst [vmem:[#allocation154_spill] sm:$0xff] %v9492_v33  ;;  %v6739_v17 = vld [vmem:[%s12348_s4 + $0x58] sm:$0xf0] }
 0x1f8   : > { %12706 = vst [vmem:[#allocation155_spill] sm:$0xff] %v9500_v2  ;;  %v1993_v2 = vpack.c.bf16 %v1627_v39, %v1626_v46  ;;  %v7137_v46 = vld [vmem:[%s12348_s4 + $0x54] sm:$0xf0]  ;;  %v6563_v39 = vmul.f32 -1.442695, %v1859_v11  ;;  %7271 = vpow2.f32 %v6561_v31  ;;  %2375 = vmatpush.bf16.msra.mxu0 %v9522_v50  ;;  %2389 = vmatpush.bf16.msra.mxu1 %v9524_v62  ;;  %v9542_v41 = vor.u32 %v7135_v1, %v6739_v17 }
 0x1f9   : > { %12707 = vst [vmem:[#allocation156_spill] sm:$0xff] %v9503_v6  ;;  %v9532_v6 = vor.u32 %v7137_v46, %v6737_v0  ;;  %v6713_v11 = vld [vmem:[%s12348_s4 + $0x20] sm:$0xf]  ;;  %v9553_v0 = vpop.f32.mrf.mxu2  ;;  %v6715_v46 = vld [vmem:[%s12348_s4 + $0x30] sm:$0xf0] }
 0x1fa   : > { %12708 = vst [vmem:[#allocation157_spill] sm:$0xff] %v9522_v50  ;;  %2162 = vmatmul.bf16.vlgmr.msrb.gmra.mxu0 %v1993_v2  ;;  %2176 = vmatmul.bf16.vlgmr.msrb.gmra.mxu1 %v1993_v2  ;;  %7273 = vpow2.f32 %v6563_v39  ;;  %v9556_v31 = vor.u32 %v7132_v48, %v6713_v11  ;;  %v6721_v1 = vld [vmem:[%s12348_s4 + $0x28] sm:$0xf]  ;;  %v7133_v17 = vld [vmem:[%s12348_s4 + $0x34] sm:$0xf0]  ;;  %v9568_v39 = vor.u32 %v7130_v40, %v6715_v46  ;;  %v1827_v46 = vpop.f32.mrf.mxu1 }
 0x1fb   : > { %12709 = vst [vmem:[#allocation158_spill] sm:$0xff] %v9524_v62  ;;  %2403 = vmatpush.bf16.msra.mxu2 %v9532_v6  ;;  %2204 = vmatmul.bf16.vlgmr.msrb.gmra.mxu3 %v1993_v2  ;;  %v7131_v11 = vld [vmem:[%s12348_s4 + $0x2c] sm:$0xf]  ;;  %v6723_v48 = vld [vmem:[%s12348_s4 + $0x38] sm:$0xf0]  ;;  %v1813_v62 = vpop.f32.mrf.mxu0 }
 0x1fc   : > { %12710 = vst [vmem:[#allocation159_spill] sm:$0xff] %v9532_v6  ;;  %2417 = vmatpush.bf16.msra.mxu3 %v9542_v41  ;;  %2190 = vmatmul.bf16.vlgmr.msrb.gmra.mxu2 %v1993_v2  ;;  %v1853_v6 = vpop.f32.mrf.mxu3  ;;  %v9578_v50 = vor.u32 %v7131_v11, %v6723_v48  ;;  %v1862_v40 = vadd.f32 %v1813_v62, %v8603_v63  ;;  %v7128_v2 = vld [vmem:[%s12348_s4 + $0xc] sm:$0xf0]  ;;  %v6705_v62 = vld [vmem:[%s12348_s4 + $0x8] sm:$0xf] }
 0x1fd   : > { %12711 = vst [vmem:[#allocation160_spill] sm:$0xff] %v9542_v41  ;;  %v1861_v33 = vadd.f32 %v1853_v6, %v8938_v24  ;;  %2376 = vmatpush.bf16.msra.mxu0 %v9556_v31  ;;  %2390 = vmatpush.bf16.msra.mxu1 %v9568_v39  ;;  %v1863_v24 = vadd.f32 %v1827_v46, %v8616_v16  ;;  %v6699_v6 = vld [vmem:[%s12348_s4 + $0x10] sm:$0xf0]  ;;  %v7129_v46 = vld [vmem:[%s12348_s4 + $0x14] sm:$0xf0] }
 0x1fe   : > { %12712 = vst [vmem:[#allocation161_spill] sm:$0xff] %v9553_v0  ;;  %v9570_v0 = vor.u32 %v7133_v17, %v6721_v1  ;;  %v6697_v1 = vld [vmem:[%s12348_s4] sm:$0xf]  ;;  %v7126_v17 = vld [vmem:[%s12348_s4 + $0x4] sm:$0xf]  ;;  %v7272_v11 = vpop.eup %7271  ;;  %v1366_v48 = vadd.f32 %v8940_v19, %v8931_v44 }
 0x1ff   : > { %12713 = vst [vmem:[#allocation162_spill] sm:$0xff] %v9556_v31  ;;  %v9595_v63 = vor.u32 %v7128_v2, %v6697_v1  ;;  %v9606_v16 = vor.u32 %v7126_v17, %v6699_v6  ;;  %v9611_v2 = vadd.f32 1.0, %v7272_v11  ;;  %v9613_v31 = vor.u32 %v7129_v46, %v6705_v62 }
 0x200   : > { %12714 = vst [vmem:[#allocation163_spill] sm:$0xff] %v9568_v39  ;;  %2404 = vmatpush.bf16.msra.mxu2 %v9570_v0  ;;  %v6565_v39 = vmul.f32 -1.442695, %v1861_v33  ;;  %2418 = vmatpush.bf16.msra.mxu3 %v9578_v50  ;;  %v7274_v1 = vpop.eup %7273  ;;  %v6564_v9 = vmul.f32 -1.442695, %v1863_v24  ;;  %v1415_v19 = vadd.f32 %v8942_v20, %v1366_v48 }
 0x201   : > { %12715 = vst [vmem:[#allocation164_spill] sm:$0xff] %v9570_v0  ;;  %v6562_v0 = vmul.f32 -1.442695, %v1862_v40  ;;  %v9615_v41 = vadd.f32 1.0, %v7274_v1  ;;  %2377 = vmatpush.bf16.msra.mxu0 %v9595_v63  ;;  %2391 = vmatpush.bf16.msra.mxu1 %v9606_v16  ;;  %v7127_v33 = vld [vmem:[%s12348_s4 + $0xc] sm:$0xf]  ;;  %v1839_v40 = vpop.f32.mrf.mxu2  ;;  %vm1879_vm2 = vweird.f32 %v9611_v2 }
 0x202   : > { %12716 = vst [vmem:[#allocation165_spill] sm:$0xff] %v9578_v50  ;;  %7275 = vpow2.f32 %v6565_v39  ;;  %v6707_v39 = vld [vmem:[%s12348_s4 + $0x18] sm:$0xf0]  ;;  %v1860_v62 = vadd.f32 %v1839_v40, %v8928_v42  ;;  %v1268_v42 = vadd.f32 %v8934_v5, %v8921_v55  ;;  %v1883_v40 = vand.u32 2147483647, %v9611_v2 }
 0x203   : > { %12717 = vst [vmem:[#allocation166_spill] sm:$0xff] %v9595_v63  ;;  %7277 = vrcp.f32 %v9611_v2  ;;  %v9632_v20 = vor.u32 %v7127_v33, %v6707_v39  ;;  %vm1917_vm3 = vweird.f32 %v9615_v41 }
 0x204   : > { %12718 = vst [vmem:[#allocation167_spill] sm:$0xff] %v9606_v16  ;;  %2405 = vmatpush.bf16.msra.mxu2 %v9613_v31  ;;  %7279 = vrcp.f32 %v9615_v41  ;;  %v1855_v17 = vpop.f32.mrf.mxu3  ;;  %vm1884_vm6 = vcmp.eq.f32.partialorder %v1883_v40, 8.507059e+37 }
 0x205   : > { %12719 = vst [vmem:[#allocation168_spill] sm:$0xff] %v9613_v31  ;;  %2571 = vmatpush.bf16.msrb.mxu0 %v8488_v8  ;;  %2585 = vmatpush.bf16.msrb.mxu1 %v8493_v10  ;;  %7281 = vpow2.f32 %v6562_v0  ;;  %v1865_v24 = vadd.f32 %v1855_v17, %v1415_v19 }
 0x206   : > { %7283 = vpow2.f32 %v6564_v9  ;;  %12720 = vst [vmem:[#allocation169_spill] sm:$0xff] %v9632_v20  ;;  %2419 = vmatpush.bf16.msra.mxu3 %v9632_v20 }
 0x207   : > { %v6566_v11 = vmul.f32 -1.442695, %v1865_v24 }
 0x208   : > { %2599 = vmatpush.bf16.msrb.mxu2 %v8523_v22  ;;  %v7276_v6 = vpop.eup %7275 }
 0x209   : > { %2572 = vmatpush.bf16.msrb.mxu0 %v8536_v28  ;;  %2586 = vmatpush.bf16.msrb.mxu1 %v8541_v30  ;;  %v7278_v48 = vpop.eup %7277  ;;  %v9638_v46 = vadd.f32 1.0, %v7276_v6  ;;  %7285 = vpow2.f32 %v6566_v11  ;;  %v1885_v6 = vand.u32 2147483648, %v9611_v2  ;;  %v1923_v11 = vand.u32 2147483648, %v9615_v41 }
 0x20a   : > { %v7280_v0 = vpop.eup %7279  ;;  %v1875_v9 = vmul.f32 %v7278_v48, %v9611_v2  ;;  %2613 = vmatpush.bf16.msrb.mxu3 %v8505_v15  ;;  %7287 = vtanh.f32 %v1860_v62  ;;  %vm1880_vm0 = vweird.f32 %v7278_v48 }
 0x20b   : > { %v7282_v1 = vpop.eup %7281  ;;  %v1913_v19 = vmul.f32 %v7280_v0, %v9615_v41  ;;  %7289 = vrcp.f32 %v9638_v46  ;;  %vm1918_vm1 = vweird.f32 %v7280_v0  ;;  %vm1881_vm4 = vmor %vm1879_vm2, %vm1880_vm0  ;;  %vm1957_vm2 = vweird.f32 %v9638_v46 }
 0x20c   : > { %2600 = vmatpush.bf16.msrb.mxu2 %v8577_v47  ;;  %v7284_v33 = vpop.eup %7283  ;;  %v1876_v39 = vsub.f32 1.0, %v1875_v9  ;;  %v9648_v17 = vadd.f32 1.0, %v7282_v1  ;;  %v1921_v9 = vand.u32 2147483647, %v9615_v41  ;;  %vm1919_vm5 = vmor %vm1917_vm3, %vm1918_vm1 }
 0x20d   : > { %2573 = vmatpush.bf16.msrb.mxu0 %v8590_v61  ;;  %2587 = vmatpush.bf16.msrb.mxu1 %v8595_v54  ;;  %v1914_v24 = vsub.f32 1.0, %v1913_v19  ;;  %v9654_v5 = vadd.f32 1.0, %v7284_v33  ;;  %v1886_v33 = vor.u32 1.1754944e-38, %v1885_v6 }
 0x20e   : > { %v1877_v61 = vmul.f32 %v7278_v48, %v1876_v39  ;;  %7291 = vrcp.f32 %v9648_v17  ;;  %2614 = vmatpush.bf16.msrb.mxu3 %v8556_v36  ;;  %v1317_v36 = vadd.f32 %v8936_v60, %v1268_v42  ;;  %vm1922_vm7 = vcmp.eq.f32.partialorder %v1921_v9, 8.507059e+37 }
 0x20f   : > { %v1915_v62 = vmul.f32 %v7280_v0, %v1914_v24  ;;  %7293 = vrcp.f32 %v9654_v5  ;;  %v7286_v1 = vpop.eup %7285  ;;  %v1841_v24 = vpop.f32.mrf.mxu2  ;;  %vm1894_vm10 = vweird.f32 %v9648_v17  ;;  %vm1932_vm11 = vweird.f32 %v9654_v5 }
 0x210   : > { %2601 = vmatpush.bf16.msrb.mxu2 %v8629_v25  ;;  %v1878_v19 = vadd.f32 %v7278_v48, %v1877_v61  ;;  %v9666_v25 = vadd.f32 1.0, %v7286_v1  ;;  %v7288_v54 = vpop.eup %7287  ;;  %v1924_v61 = vor.u32 1.1754944e-38, %v1923_v11  ;;  %v1864_v47 = vadd.f32 %v1841_v24, %v1317_v36 }
 0x211   : > { %2574 = vmatpush.bf16.msrb.mxu0 %v8642_v34  ;;  %2588 = vmatpush.bf16.msrb.mxu1 %v8647_v35  ;;  %v1916_v39 = vadd.f32 %v7280_v0, %v1915_v62  ;;  %v1624_v34 = vld [vmem:[#allocation4 + $0x8] sm:$0xff]  ;;  %v1900_v11 = vand.u32 2147483648, %v9648_v17  ;;  %v1936_v24 = vand.u32 2147483647, %v9654_v5 }
 0x212   : > { %v1882_v2 = vsel %vm1881_vm4, %v7278_v48, %v1878_v19  ;;  %2615 = vmatpush.bf16.msrb.mxu3 %v8611_v4  ;;  %7295 = vrcp.f32 %v9666_v25  ;;  %v1898_v19 = vand.u32 2147483647, %v9648_v17  ;;  %vm1972_vm4 = vweird.f32 %v9666_v25 }
 0x213   : > { %v1887_v41 = vsel %vm1884_vm6, %v1886_v33, %v1882_v2  ;;  %v1920_v35 = vsel %vm1919_vm5, %v7280_v0, %v1916_v39  ;;  %7297 = vtanh.f32 %v1864_v47  ;;  %vm1937_vm15 = vcmp.eq.f32.partialorder %v1936_v24, 8.507059e+37 }
 0x214   : > { %2602 = vmatpush.bf16.msrb.mxu2 %v8681_v12  ;;  %v9671_v12 = vpop.eup %7289  ;;  %v1925_v62 = vsel %vm1922_vm7, %v1924_v61, %v1920_v35  ;;  %v1984_v1 = vmul.f32 %v7288_v54, %v1887_v41  ;;  %v1901_v41 = vor.u32 1.1754944e-38, %v1900_v11  ;;  %vm1899_vm14 = vcmp.eq.f32.partialorder %v1898_v19, 8.507059e+37 }
 0x215   : > { %2575 = vmatpush.bf16.msrb.mxu0 %v8694_v21  ;;  %v7292_v6 = vpop.eup %7291  ;;  %2589 = vmatpush.bf16.msrb.mxu1 %v8699_v26  ;;  %v1982_v48 = vmul.f32 %v1925_v62, %v1624_v34  ;;  %v1953_v54 = vmul.f32 %v9671_v12, %v9638_v46  ;;  %v1938_v34 = vand.u32 2147483648, %v9654_v5  ;;  %vm1958_vm0 = vweird.f32 %v9671_v12 }
 0x216   : > { %v7294_v60 = vpop.eup %7293  ;;  %v1890_v42 = vmul.f32 %v7292_v6, %v9648_v17  ;;  %2616 = vmatpush.bf16.msrb.mxu3 %v8663_v53  ;;  %vm1895_vm8 = vweird.f32 %v7292_v6  ;;  %v1963_v19 = vand.u32 2147483648, %v9638_v46  ;;  %v1978_v24 = vand.u32 2147483648, %v9666_v25  ;;  %vm1959_vm3 = vmor %vm1957_vm2, %vm1958_vm0 }
 0x217   : > { %v1928_v40 = vmul.f32 %v7294_v60, %v9654_v5  ;;  %v9680_v0 = vadd.f32 %v1984_v1, %v1982_v48  ;;  %vm1933_vm9 = vweird.f32 %v7294_v60  ;;  %v1954_v61 = vsub.f32 1.0, %v1953_v54  ;;  %vm1896_vm12 = vmor %vm1894_vm10, %vm1895_vm8  ;;  %v1625_v48 = vld [vmem:[#allocation4] sm:$0xff] }
 0x218   : > { %2603 = vmatpush.bf16.msrb.mxu2 %v8733_v14  ;;  %v1891_v36 = vsub.f32 1.0, %v1890_v42  ;;  %v9690_v33 = vpop.eup %7295  ;;  %vm1934_vm13 = vmor %vm1932_vm11, %vm1933_vm9  ;;  %v1939_v1 = vor.u32 1.1754944e-38, %v1938_v34 }
 0x219   : > { %2576 = vmatpush.bf16.msrb.mxu0 %v8746_v27  ;;  %v1929_v35 = vsub.f32 1.0, %v1928_v40  ;;  %2590 = vmatpush.bf16.msrb.mxu1 %v8751_v29  ;;  %v1968_v2 = vmul.f32 %v9690_v33, %v9666_v25  ;;  %v7298_v40 = vpop.eup %7297  ;;  %v1955_v5 = vmul.f32 %v9671_v12, %v1954_v61  ;;  %7299 = vtanh.f32 %v9680_v0 }
 0x21a   : > { %v1892_v9 = vmul.f32 %v7292_v6, %v1891_v36  ;;  %2617 = vmatpush.bf16.msrb.mxu3 %v8715_v52  ;;  %vm1973_vm1 = vweird.f32 %v9690_v33  ;;  %v1961_v61 = vand.u32 2147483647, %v9638_v46 }
 0x21b   : > { %v1930_v39 = vmul.f32 %v7294_v60, %v1929_v35  ;;  %v1969_v17 = vsub.f32 1.0, %v1968_v2  ;;  %vm1974_vm5 = vmor %vm1972_vm4, %vm1973_vm1 }
 0x21c   : > { %2604 = vmatpush.bf16.msrb.mxu2 %v8785_v38  ;;  %v1893_v47 = vadd.f32 %v7292_v6, %v1892_v9  ;;  %vm1962_vm6 = vcmp.eq.f32.partialorder %v1961_v61, 8.507059e+37  ;;  %v12733_v61 = vld [vmem:[#allocation110_spill] sm:$0xff] }
 0x21d   : > { %2577 = vmatpush.bf16.msrb.mxu0 %v8798_v57  ;;  %v1931_v62 = vadd.f32 %v7294_v60, %v1930_v39  ;;  %2591 = vmatpush.bf16.msrb.mxu1 %v8803_v59  ;;  %v1970_v9 = vmul.f32 %v9690_v33, %v1969_v17 }
 0x21e   : > { %v1897_v42 = vsel %vm1896_vm12, %v7292_v6, %v1893_v47  ;;  %2618 = vmatpush.bf16.msrb.mxu3 %v8767_v58  ;;  %v1976_v47 = vand.u32 2147483647, %v9666_v25  ;;  %v12721_v25 = vld [vmem:[#allocation94_spill] sm:$0xff] }
 0x21f   : > { %v1902_v54 = vsel %vm1899_vm14, %v1901_v41, %v1897_v42  ;;  %v1935_v36 = vsel %vm1934_vm13, %v7294_v60, %v1931_v62  ;;  %v1956_v60 = vadd.f32 %v9671_v12, %v1955_v5  ;;  %v1971_v34 = vadd.f32 %v9690_v33, %v1970_v9  ;;  %v7300_v62 = vpop.eup %7299  ;;  %v12724_v5 = vld [vmem:[#allocation98_spill] sm:$0xff]  ;;  %v12727_v9 = vld [vmem:[#allocation103_spill] sm:$0xff] }
 0x220   : > { %2605 = vmatpush.bf16.msrb.mxu2 %v8837_v23  ;;  %v1940_v35 = vsel %vm1937_vm15, %v1939_v1, %v1935_v36  ;;  %v1985_v11 = vmul.f32 %v7298_v40, %v1902_v54  ;;  %v1964_v1 = vor.u32 1.1754944e-38, %v1963_v19  ;;  %vm1977_vm7 = vcmp.eq.f32.partialorder %v1976_v47, 8.507059e+37  ;;  %v12731_v19 = vld [vmem:[#allocation108_spill] sm:$0xff]  ;;  %v12734_v47 = vld [vmem:[#allocation111_spill] sm:$0xff] }
 0x221   : > { %2578 = vmatpush.bf16.msrb.mxu0 %v8850_v13  ;;  %v1983_v39 = vmul.f32 %v1940_v35, %v1625_v48  ;;  %2592 = vmatpush.bf16.msrb.mxu1 %v8855_v49  ;;  %v1960_v2 = vsel %vm1959_vm3, %v9671_v12, %v1956_v60  ;;  %v1975_v41 = vsel %vm1974_vm5, %v9690_v33, %v1971_v34  ;;  %v1979_v48 = vor.u32 1.1754944e-38, %v1978_v24  ;;  %v12722_v12 = vld [vmem:[#allocation96_spill] sm:$0xff]  ;;  %v12723_v33 = vld [vmem:[#allocation97_spill] sm:$0xff]  ;;  %v12725_v35 = vld [vmem:[#allocation99_spill] sm:$0xff] }
 0x222   : > { %2619 = vmatpush.bf16.msrb.mxu3 %v8819_v56  ;;  %v1965_v17 = vsel %vm1962_vm6, %v1964_v1, %v1960_v2  ;;  %v12729_v60 = vld [vmem:[#allocation106_spill] sm:$0xff]  ;;  %v12730_v34 = vld [vmem:[#allocation107_spill] sm:$0xff]  ;;  %v12732_v24 = vld [vmem:[#allocation109_spill] sm:$0xff] }
 0x223   : > { %v9709_v6 = vadd.f32 %v1985_v11, %v1983_v39  ;;  %v1980_v40 = vsel %vm1977_vm7, %v1979_v48, %v1975_v41  ;;  %v1990_v46 = vmul.f32 %v7300_v62, %v1965_v17  ;;  %v12726_v11 = vld [vmem:[#allocation100_spill] sm:$0xff]  ;;  %v12728_v39 = vld [vmem:[#allocation105_spill] sm:$0xff]  ;;  %v12735_v2 = vld [vmem:[#allocation114_spill] sm:$0xff] }
 0x224   : > { %2606 = vmatpush.bf16.msrb.mxu2 %v8885_v32  ;;  %v12736_v41 = vld [vmem:[#allocation115_spill] sm:$0xff]  ;;  %v12737_v62 = vld [vmem:[#allocation116_spill] sm:$0xff]  ;;  %v12738_v1 = vld [vmem:[#allocation118_spill] sm:$0xff] }
 0x225   : > { %7301 = vtanh.f32 %v9709_v6  ;;  %v12739_v48 = vld [vmem:[#allocation119_spill] sm:$0xff]  ;;  %v12741_v17 = vld [vmem:[#allocation121_spill] sm:$0xff] }
 0x226   : > { %2620 = vmatpush.bf16.msrb.mxu3 %v8872_v43 }
 0x22b   : > { %v7302_v42 = vpop.eup %7301 }
 0x22c   : > { %v1991_v54 = vmul.f32 %v7302_v42, %v1980_v40  ;;  %v12740_v42 = vld [vmem:[#allocation120_spill] sm:$0xff]  ;;  %v12742_v40 = vld [vmem:[#allocation122_spill] sm:$0xff] }
 0x22e   : > { %v1992_v36 = vpack.c.bf16 %v1991_v54, %v1990_v46  ;;  %v12743_v46 = vld [vmem:[#allocation126_spill] sm:$0xff]  ;;  %v12744_v54 = vld [vmem:[#allocation127_spill] sm:$0xff] }
 0x230   : > { %2378 = vmatmul.bf16.vlgmr.msra.gmra.mxu0 %v1992_v36  ;;  %2392 = vmatmul.bf16.vlgmr.msra.gmra.mxu1 %v1992_v36 }
 0x231   : > { %2406 = vmatmul.bf16.vlgmr.msra.gmra.mxu2 %v1992_v36  ;;  %2420 = vmatmul.bf16.vlgmr.msra.gmra.mxu3 %v1992_v36 }
 0x232   : > { %2763 = vmatpush.bf16.msra.mxu0 %v9005_v37  ;;  %2777 = vmatpush.bf16.msra.mxu1 %v9016_v51 }
 0x233   : > { %2791 = vmatpush.bf16.msra.mxu2 %v9018_v3  ;;  %2805 = vmatpush.bf16.msra.mxu3 %v9027_v45  ;;  %v1628_v45 = vld [vmem:[#allocation6] sm:$0xff] }
 0x236   : > { %2764 = vmatpush.bf16.msra.mxu0 %v9046_v7  ;;  %2778 = vmatpush.bf16.msra.mxu1 %v9057_v18 }
 0x237   : > { %2792 = vmatpush.bf16.msra.mxu2 %v12721_v25  ;;  %2806 = vmatpush.bf16.msra.mxu3 %v12722_v12  ;;  %v12791_v25 = vld [vmem:[#allocation21_spill] sm:$0xff] }
 0x23a   : > { %2765 = vmatpush.bf16.msra.mxu0 %v12723_v33  ;;  %2779 = vmatpush.bf16.msra.mxu1 %v12724_v5 }
 0x23b   : > { %2793 = vmatpush.bf16.msra.mxu2 %v12725_v35  ;;  %2807 = vmatpush.bf16.msra.mxu3 %v12726_v11 }
 0x23e   : > { %2766 = vmatpush.bf16.msra.mxu0 %v12727_v9  ;;  %2780 = vmatpush.bf16.msra.mxu1 %v12728_v39 }
 0x23f   : > { %2794 = vmatpush.bf16.msra.mxu2 %v12729_v60  ;;  %2808 = vmatpush.bf16.msra.mxu3 %v12730_v34 }
 0x240   : > { %2579 = vmatmul.bf16.vlgmr.msrb.gmra.mxu0 %v1992_v36  ;;  %2593 = vmatmul.bf16.vlgmr.msrb.gmra.mxu1 %v1992_v36 }
 0x241   : > { %2607 = vmatmul.bf16.vlgmr.msrb.gmra.mxu2 %v1992_v36  ;;  %2621 = vmatmul.bf16.vlgmr.msrb.gmra.mxu3 %v1992_v36  ;;  %v12745_v36 = vld [vmem:[#allocation128_spill] sm:$0xff] }
 0x242   : > { %2767 = vmatpush.bf16.msra.mxu0 %v12731_v19  ;;  %2781 = vmatpush.bf16.msra.mxu1 %v12732_v24 }
 0x243   : > { %2795 = vmatpush.bf16.msra.mxu2 %v12733_v61  ;;  %2809 = vmatpush.bf16.msra.mxu3 %v12734_v47 }
 0x246   : > { %2768 = vmatpush.bf16.msra.mxu0 %v12735_v2  ;;  %2782 = vmatpush.bf16.msra.mxu1 %v12736_v41  ;;  %v12746_v2 = vld [vmem:[#allocation129_spill] sm:$0xff]  ;;  %v12747_v41 = vld [vmem:[#allocation130_spill] sm:$0xff] }
 0x247   : > { %2796 = vmatpush.bf16.msra.mxu2 %v12737_v62  ;;  %2810 = vmatpush.bf16.msra.mxu3 %v12738_v1  ;;  %v12748_v62 = vld [vmem:[#allocation131_spill] sm:$0xff]  ;;  %v12749_v1 = vld [vmem:[#allocation133_spill] sm:$0xff] }
 0x24a   : > { %2769 = vmatpush.bf16.msra.mxu0 %v12739_v48  ;;  %2783 = vmatpush.bf16.msra.mxu1 %v12740_v42  ;;  %v12750_v48 = vld [vmem:[#allocation135_spill] sm:$0xff]  ;;  %v12751_v42 = vld [vmem:[#allocation136_spill] sm:$0xff] }
 0x24b   : > { %2797 = vmatpush.bf16.msra.mxu2 %v12741_v17  ;;  %2811 = vmatpush.bf16.msra.mxu3 %v12742_v40  ;;  %v12752_v17 = vld [vmem:[#allocation138_spill] sm:$0xff]  ;;  %v12753_v40 = vld [vmem:[#allocation139_spill] sm:$0xff] }
 0x24e   : > { %2770 = vmatpush.bf16.msra.mxu0 %v12743_v46  ;;  %2784 = vmatpush.bf16.msra.mxu1 %v12744_v54  ;;  %v12754_v46 = vld [vmem:[#allocation140_spill] sm:$0xff]  ;;  %v12755_v54 = vld [vmem:[#allocation141_spill] sm:$0xff] }
 0x24f   : > { %2798 = vmatpush.bf16.msra.mxu2 %v12745_v36  ;;  %2812 = vmatpush.bf16.msra.mxu3 %v12746_v2  ;;  %v12756_v36 = vld [vmem:[#allocation142_spill] sm:$0xff]  ;;  %v12757_v2 = vld [vmem:[#allocation143_spill] sm:$0xff] }
 0x252   : > { %2819 = vmatpush.bf16.msrb.mxu0 %v12747_v41  ;;  %2833 = vmatpush.bf16.msrb.mxu1 %v12748_v62  ;;  %v12758_v41 = vld [vmem:[#allocation145_spill] sm:$0xff]  ;;  %v12759_v62 = vld [vmem:[#allocation148_spill] sm:$0xff] }
 0x253   : > { %2847 = vmatpush.bf16.msrb.mxu2 %v12749_v1  ;;  %2861 = vmatpush.bf16.msrb.mxu3 %v12750_v48  ;;  %v12760_v1 = vld [vmem:[#allocation149_spill] sm:$0xff]  ;;  %v12761_v48 = vld [vmem:[#allocation150_spill] sm:$0xff] }
 0x256   : > { %2820 = vmatpush.bf16.msrb.mxu0 %v12751_v42  ;;  %2834 = vmatpush.bf16.msrb.mxu1 %v12752_v17  ;;  %v12762_v42 = vld [vmem:[#allocation151_spill] sm:$0xff]  ;;  %v12763_v17 = vld [vmem:[#allocation152_spill] sm:$0xff] }
 0x257   : > { %2848 = vmatpush.bf16.msrb.mxu2 %v12753_v40  ;;  %2862 = vmatpush.bf16.msrb.mxu3 %v12754_v46  ;;  %v12764_v40 = vld [vmem:[#allocation153_spill] sm:$0xff]  ;;  %v12765_v46 = vld [vmem:[#allocation154_spill] sm:$0xff] }
 0x25a   : > { %2821 = vmatpush.bf16.msrb.mxu0 %v12755_v54  ;;  %2835 = vmatpush.bf16.msrb.mxu1 %v12756_v36  ;;  %v12766_v54 = vld [vmem:[#allocation156_spill] sm:$0xff]  ;;  %v12767_v36 = vld [vmem:[#allocation157_spill] sm:$0xff] }
 0x25b   : > { %2849 = vmatpush.bf16.msrb.mxu2 %v12757_v2  ;;  %2863 = vmatpush.bf16.msrb.mxu3 %v12758_v41  ;;  %v12768_v2 = vld [vmem:[#allocation158_spill] sm:$0xff]  ;;  %v12769_v41 = vld [vmem:[#allocation159_spill] sm:$0xff] }
 0x25e   : > { %2822 = vmatpush.bf16.msrb.mxu0 %v12759_v62  ;;  %2836 = vmatpush.bf16.msrb.mxu1 %v12760_v1  ;;  %v12770_v62 = vld [vmem:[#allocation160_spill] sm:$0xff]  ;;  %v12771_v1 = vld [vmem:[#allocation162_spill] sm:$0xff] }
 0x25f   : > { %2850 = vmatpush.bf16.msrb.mxu2 %v12761_v48  ;;  %2864 = vmatpush.bf16.msrb.mxu3 %v12762_v42  ;;  %v12772_v48 = vld [vmem:[#allocation163_spill] sm:$0xff]  ;;  %v12773_v42 = vld [vmem:[#allocation164_spill] sm:$0xff] }
 0x262   : > { %2823 = vmatpush.bf16.msrb.mxu0 %v12763_v17  ;;  %2837 = vmatpush.bf16.msrb.mxu1 %v12764_v40 }
 0x263   : > { %2851 = vmatpush.bf16.msrb.mxu2 %v12765_v46  ;;  %2865 = vmatpush.bf16.msrb.mxu3 %v12766_v54 }
 0x266   : > { %2824 = vmatpush.bf16.msrb.mxu0 %v12767_v36  ;;  %2838 = vmatpush.bf16.msrb.mxu1 %v12768_v2 }
 0x267   : > { %2852 = vmatpush.bf16.msrb.mxu2 %v12769_v41  ;;  %2866 = vmatpush.bf16.msrb.mxu3 %v12770_v62 }
 0x26a   : > { %2825 = vmatpush.bf16.msrb.mxu0 %v12771_v1  ;;  %2839 = vmatpush.bf16.msrb.mxu1 %v12772_v48 }
 0x26b   : > { %2853 = vmatpush.bf16.msrb.mxu2 %v12773_v42  ;;  %2867 = vmatpush.bf16.msrb.mxu3 %v9578_v50  ;;  %v1612_v42 = vld [vmem:[%s12350_s6] sm:$0xf] }
 0x26c   : > { %v9792_v50 = vperm.slane %v1612_v42, 0  ;;  %v9798_v19 = vperm.slane %v1612_v42, 3 }
 0x26e   : > { %2826 = vmatpush.bf16.msrb.mxu0 %v9595_v63  ;;  %2840 = vmatpush.bf16.msrb.mxu1 %v9606_v16  ;;  %12774 = vst [vmem:[#allocation170_spill] sm:$0xff] %v9792_v50  ;;  %v9794_v63 = vperm.slane %v1612_v42, 1 }
 0x26f   : > { %2854 = vmatpush.bf16.msrb.mxu2 %v9613_v31  ;;  %2868 = vmatpush.bf16.msrb.mxu3 %v9632_v20  ;;  %12776 = vst [vmem:[#allocation172_spill] sm:$0xff] %v9798_v19 }
 0x270   : > { %12775 = vst [vmem:[#allocation171_spill] sm:$0xff] %v9794_v63 }
 0x277   : > { %v2163_v2 = vpop.f32.mrf.mxu0  ;;  %v2177_v41 = vpop.f32.mrf.mxu1 }
 0x27e   : > { %v2205_v36 = vpop.f32.mrf.mxu3 }
 0x27f   : > { %v2165_v62 = vpop.f32.mrf.mxu0  ;;  %v2179_v54 = vpop.f32.mrf.mxu1 }
 0x280   : > { %v2191_v1 = vpop.f32.mrf.mxu2 }
 0x286   : > { %v2207_v48 = vpop.f32.mrf.mxu3 }
 0x288   : > { %v2193_v20 = vpop.f32.mrf.mxu2 }
 0x2ad   : > { %v2379_v16 = vpop.f32.mrf.mxu0  ;;  %v2393_v46 = vpop.f32.mrf.mxu1 }
 0x2ae   : > { %v2380_v31 = vadd.f32 %v2379_v16, %v2163_v2  ;;  %v2394_v40 = vadd.f32 %v2393_v46, %v2177_v41 }
 0x2b0   : > { %v2426_v17 = vadd.f32 %v2380_v31, %v9792_v50  ;;  %v2427_v47 = vadd.f32 %v2394_v40, %v9794_v63 }
 0x2b2   : > { %v6823_v61 = vmul.f32 -1.442695, %v2426_v17  ;;  %v6825_v24 = vmul.f32 -1.442695, %v2427_v47 }
 0x2b4   : > { %7303 = vpow2.f32 %v6823_v61  ;;  %v2421_v34 = vpop.f32.mrf.mxu3  ;;  %v2407_v41 = vpop.f32.mrf.mxu2 }
 0x2b5   : > { %7305 = vpow2.f32 %v6825_v24  ;;  %v2422_v60 = vadd.f32 %v2421_v34, %v2205_v36  ;;  %v2381_v39 = vpop.f32.mrf.mxu0  ;;  %v2395_v9 = vpop.f32.mrf.mxu1  ;;  %v2408_v36 = vadd.f32 %v2407_v41, %v2191_v1 }
 0x2b6   : > { %v2382_v11 = vadd.f32 %v2381_v39, %v2165_v62  ;;  %v2396_v35 = vadd.f32 %v2395_v9, %v2179_v54  ;;  %v9811_v54 = vperm.slane %v1612_v42, 2 }
 0x2b7   : > { %v2429_v16 = vadd.f32 %v2422_v60, %v9798_v19 }
 0x2b8   : > { %v2430_v2 = vadd.f32 %v2382_v11, %v9792_v50  ;;  %v2431_v31 = vadd.f32 %v2396_v35, %v9794_v63  ;;  %v12777_v35 = vld [vmem:[#allocation68_spill] sm:$0xff] }
 0x2b9   : > { %v6827_v40 = vmul.f32 -1.442695, %v2429_v16  ;;  %v1371_v11 = vadd.f32 %v12777_v35, %v8931_v44  ;;  %12778 = vst [vmem:[#allocation68_spill] sm:$0xff] %v9811_v54 }
 0x2ba   : > { %v7304_v17 = vpop.eup %7303  ;;  %v6824_v47 = vmul.f32 -1.442695, %v2430_v2  ;;  %v6826_v24 = vmul.f32 -1.442695, %v2431_v31 }
 0x2bb   : > { %v7306_v46 = vpop.eup %7305  ;;  %v9803_v5 = vadd.f32 1.0, %v7304_v17  ;;  %7307 = vpow2.f32 %v6827_v40 }
 0x2bc   : > { %v9805_v34 = vadd.f32 1.0, %v7306_v46  ;;  %7309 = vpow2.f32 %v6824_v47  ;;  %v2423_v9 = vpop.f32.mrf.mxu3  ;;  %v2409_v40 = vpop.f32.mrf.mxu2  ;;  %v12779_v46 = vld [vmem:[#allocation69_spill] sm:$0xff] }
 0x2bd   : > { %7311 = vrcp.f32 %v9803_v5  ;;  %v2424_v39 = vadd.f32 %v2423_v9, %v2207_v48  ;;  %v2580_v61 = vpop.f32.mrf.mxu0  ;;  %v2594_v16 = vpop.f32.mrf.mxu1  ;;  %v12780_v9 = vld [vmem:[#allocation16_spill] sm:$0xff]  ;;  %v2451_v50 = vand.u32 2147483647, %v9803_v5  ;;  %vm2447_vm10 = vweird.f32 %v9803_v5 }
 0x2be   : > { %7313 = vrcp.f32 %v9805_v34  ;;  %v2627_v42 = vadd.f32 %v2580_v61, %v12780_v9  ;;  %v2453_v61 = vand.u32 2147483648, %v9803_v5  ;;  %v2491_v33 = vand.u32 2147483648, %v9805_v34 }
 0x2bf   : > { %7315 = vpow2.f32 %v6826_v24  ;;  %v2433_v17 = vadd.f32 %v2424_v39, %v9798_v19  ;;  %v9821_v24 = vadd.f32 %v12779_v46, %v1371_v11  ;;  %v2428_v19 = vadd.f32 %v2408_v36, %v9811_v54 }
 0x2c0   : > { %v2410_v46 = vadd.f32 %v2409_v40, %v2193_v20  ;;  %v6829_v12 = vmul.f32 -1.442695, %v2627_v42  ;;  %vm2485_vm11 = vweird.f32 %v9805_v34  ;;  %vm9856_vm13 = vcmp.eq.f32.partialorder %v2451_v50, 8.507059e+37 }
 0x2c1   : > { %v7308_v60 = vpop.eup %7307  ;;  %v6828_v9 = vmul.f32 -1.442695, %v2433_v17 }
 0x2c2   : > { %v7310_v62 = vpop.eup %7309  ;;  %v9828_v41 = vadd.f32 1.0, %v7308_v60  ;;  %v2432_v17 = vadd.f32 %v2410_v46, %v9811_v54 }
 0x2c3   : > { %v9813_v2 = vpop.eup %7311  ;;  %v9815_v31 = vadd.f32 1.0, %v7310_v62  ;;  %v12781_v62 = vld [vmem:[#allocation20_spill] sm:$0xff] }
 0x2c4   : > { %v9818_v47 = vpop.eup %7313  ;;  %v2443_v48 = vmul.f32 %v9813_v2, %v9803_v5  ;;  %v2628_v39 = vadd.f32 %v2594_v16, %v12781_v62  ;;  %vm2448_vm8 = vweird.f32 %v9813_v2  ;;  %v2622_v36 = vpop.f32.mrf.mxu3  ;;  %v2492_v62 = vor.u32 1.1754944e-38, %v2491_v33 }
 0x2c5   : > { %v7316_v35 = vpop.eup %7315  ;;  %v2481_v1 = vmul.f32 %v9818_v47, %v9805_v34  ;;  %7317 = vrcp.f32 %v9815_v31  ;;  %vm2486_vm9 = vweird.f32 %v9818_v47  ;;  %vm9852_vm12 = vmor %vm2447_vm10, %vm2448_vm8  ;;  %vm2462_vm0 = vweird.f32 %v9815_v31 }
 0x2c6   : > { %v2444_v44 = vsub.f32 1.0, %v2443_v48  ;;  %v9833_v11 = vadd.f32 1.0, %v7316_v35  ;;  %v6831_v20 = vmul.f32 -1.442695, %v2628_v39  ;;  %v2489_v48 = vand.u32 2147483647, %v9805_v34  ;;  %vm9867_vm14 = vmor %vm2485_vm11, %vm2486_vm9 }
 0x2c7   : > { %v2482_v63 = vsub.f32 1.0, %v2481_v1  ;;  %vm2525_vm9 = vweird.f32 %v9828_v41 }
 0x2c8   : > { %v2445_v60 = vmul.f32 %v9813_v2, %v2444_v44  ;;  %7319 = vrcp.f32 %v9833_v11  ;;  %vm9871_vm15 = vcmp.eq.f32.partialorder %v2489_v48, 8.507059e+37  ;;  %vm2500_vm1 = vweird.f32 %v9833_v11 }
 0x2c9   : > { %v2483_v16 = vmul.f32 %v9818_v47, %v2482_v63  ;;  %7321 = vrcp.f32 %v9828_v41  ;;  %v12790_v63 = vld [vmem:[#allocation67_spill] sm:$0xff]  ;;  %v2506_v39 = vand.u32 2147483648, %v9833_v11 }
 0x2ca   : > { %v2446_v40 = vadd.f32 %v9813_v2, %v2445_v60  ;;  %7323 = vpow2.f32 %v6828_v9  ;;  %v2466_v9 = vand.u32 2147483647, %v9815_v31  ;;  %v2468_v60 = vand.u32 2147483648, %v9815_v31 }
 0x2cb   : > { %v9846_v35 = vpop.eup %7317  ;;  %v2484_v44 = vadd.f32 %v9818_v47, %v2483_v16  ;;  %7325 = vtanh.f32 %v2428_v19  ;;  %v2454_v19 = vor.u32 1.1754944e-38, %v2453_v61  ;;  %v2596_v16 = vpop.f32.mrf.mxu1 }
 0x2cc   : > { %v2458_v1 = vmul.f32 %v9846_v35, %v9815_v31  ;;  %7327 = vpow2.f32 %v6829_v12  ;;  %v2450_v5 = vsel %vm9852_vm12, %v9813_v2, %v2446_v40  ;;  %v2582_v12 = vpop.f32.mrf.mxu0  ;;  %vm2463_vm3 = vweird.f32 %v9846_v35 }
 0x2cd   : > { %7329 = vpow2.f32 %v6831_v20  ;;  %v2488_v2 = vsel %vm9867_vm14, %v9818_v47, %v2484_v44  ;;  %v2455_v40 = vsel %vm9856_vm13, %v2454_v19, %v2450_v5  ;;  %v2631_v18 = vadd.f32 %v2582_v12, %v12791_v25  ;;  %v2624_v25 = vpop.f32.mrf.mxu3  ;;  %vm9911_vm4 = vmor %vm2462_vm0, %vm2463_vm3 }
 0x2ce   : > { %v9865_v34 = vpop.eup %7319  ;;  %v2459_v46 = vsub.f32 1.0, %v2458_v1  ;;  %7331 = vtanh.f32 %v2432_v17  ;;  %v2608_v17 = vpop.f32.mrf.mxu2  ;;  %v2630_v1 = vadd.f32 %v2622_v36, %v12790_v63  ;;  %v2493_v42 = vsel %vm9871_vm15, %v2492_v62, %v2488_v2 }
 0x2cf   : > { %v9876_v33 = vpop.eup %7321  ;;  %v2496_v61 = vmul.f32 %v9865_v34, %v9833_v11  ;;  %vm2501_vm2 = vweird.f32 %v9865_v34  ;;  %v2550_v2 = vmul.f32 %v2493_v42, %v1628_v45  ;;  %v2531_v42 = vand.u32 2147483648, %v9828_v41 }
 0x2d0   : > { %v7324_v20 = vpop.eup %7323  ;;  %v2460_v48 = vmul.f32 %v9846_v35, %v2459_v46  ;;  %v2521_v5 = vmul.f32 %v9876_v33, %v9828_v41  ;;  %v6833_v19 = vmul.f32 -1.442695, %v2630_v1  ;;  %v12792_v46 = vld [vmem:[#allocation22_spill] sm:$0xff]  ;;  %vm9925_vm5 = vmor %vm2500_vm1, %vm2501_vm2  ;;  %vm2467_vm6 = vcmp.eq.f32.partialorder %v2466_v9, 8.507059e+37 }
 0x2d1   : > { %v7326_v47 = vpop.eup %7325  ;;  %v2497_v44 = vsub.f32 1.0, %v2496_v61  ;;  %v9891_v54 = vadd.f32 1.0, %v7324_v20  ;;  %v2632_v3 = vadd.f32 %v2596_v16, %v12792_v46  ;;  %vm2526_vm8 = vweird.f32 %v9876_v33 }
 0x2d2   : > { %v7328_v7 = vpop.eup %7327  ;;  %v2552_v63 = vmul.f32 %v7326_v47, %v2455_v40  ;;  %v2461_v20 = vadd.f32 %v9846_v35, %v2460_v48  ;;  %v6830_v40 = vmul.f32 -1.442695, %v2631_v18  ;;  %v2504_v47 = vand.u32 2147483647, %v9833_v11  ;;  %vm9984_vm3 = vmor %vm2525_vm9, %vm2526_vm8 }
 0x2d3   : > { %v7330_v36 = vpop.eup %7329  ;;  %v2498_v61 = vmul.f32 %v9865_v34, %v2497_v44  ;;  %7333 = vrcp.f32 %v9891_v54  ;;  %v9904_v62 = vadd.f32 1.0, %v7328_v7  ;;  %v6832_v48 = vmul.f32 -1.442695, %v2632_v3  ;;  %v12795_v44 = vld [vmem:[#allocation65_spill] sm:$0xff] }
 0x2d4   : > { %v7332_v12 = vpop.eup %7331  ;;  %v9906_v50 = vadd.f32 1.0, %v7330_v36  ;;  %7335 = vpow2.f32 %v6833_v19  ;;  %v2634_v7 = vadd.f32 %v2624_v25, %v9821_v24  ;;  %v1273_v45 = vadd.f32 %v12795_v44, %v8921_v55  ;;  %v12798_v19 = vld [vmem:[#allocation64_spill] sm:$0xff]  ;;  %v1629_v55 = vld [vmem:[#allocation6 + $0x8] sm:$0xff] }
 0x2d5   : > { %v2499_v16 = vadd.f32 %v9865_v34, %v2498_v61  ;;  %7337 = vrcp.f32 %v9904_v62  ;;  %v2522_v31 = vsub.f32 1.0, %v2521_v5  ;;  %v2465_v3 = vsel %vm9911_vm4, %v9846_v35, %v2461_v20  ;;  %v12799_v35 = vld [vmem:[#allocation66_spill] sm:$0xff] }
 0x2d6   : > { %7339 = vrcp.f32 %v9906_v50  ;;  %v2629_v46 = vadd.f32 %v2608_v17, %v12798_v19  ;;  %v9937_v36 = vadd.f32 %v2552_v63, %v2550_v2  ;;  %v2507_v11 = vor.u32 1.1754944e-38, %v2506_v39  ;;  %v2610_v5 = vpop.f32.mrf.mxu2 }
 0x2d7   : > { %v2503_v24 = vsel %vm9925_vm5, %v9865_v34, %v2499_v16  ;;  %v2469_v61 = vor.u32 1.1754944e-38, %v2468_v60  ;;  %7341 = vpow2.f32 %v6830_v40  ;;  %vm2505_vm7 = vcmp.eq.f32.partialorder %v2504_v47, 8.507059e+37 }
 0x2d8   : > { %7343 = vpow2.f32 %v6832_v48  ;;  %v6834_v44 = vmul.f32 -1.442695, %v2634_v7  ;;  %v1322_v20 = vadd.f32 %v12799_v35, %v1273_v45  ;;  %v2508_v34 = vsel %vm2505_vm7, %v2507_v11, %v2503_v24 }
 0x2d9   : > { %v9939_v25 = vpop.eup %7333  ;;  %v2470_v18 = vsel %vm2467_vm6, %v2469_v61, %v2465_v3  ;;  %v2523_v17 = vmul.f32 %v9876_v33, %v2522_v31  ;;  %v9943_v63 = vor.u32 1.1754944e-38, %v2531_v42  ;;  %7345 = vtanh.f32 %v2629_v46 }
 0x2da   : > { %v7336_v1 = vpop.eup %7335  ;;  %v2536_v60 = vmul.f32 %v9939_v25, %v9891_v54  ;;  %7347 = vtanh.f32 %v9937_v36  ;;  %v2633_v40 = vadd.f32 %v2610_v5, %v1322_v20  ;;  %v2551_v47 = vmul.f32 %v2508_v34, %v1629_v55 }
 0x2db   : > { %v7338_v16 = vpop.eup %7337  ;;  %v9950_v2 = vadd.f32 1.0, %v7336_v1  ;;  %v2553_v48 = vmul.f32 %v7332_v12, %v2470_v18  ;;  %7349 = vpow2.f32 %v6834_v44  ;;  %v2692_v31 = vand.u32 2147483648, %v9906_v50 }
 0x2dc   : > { %v7340_v9 = vpop.eup %7339  ;;  %v2644_v39 = vmul.f32 %v7338_v16, %v9904_v62  ;;  %v2652_v3 = vand.u32 2147483647, %v9904_v62  ;;  %v2654_v24 = vand.u32 2147483648, %v9904_v62  ;;  %v2537_v46 = vsub.f32 1.0, %v2536_v60 }
 0x2dd   : > { %v2682_v7 = vmul.f32 %v7340_v9, %v9906_v50  ;;  %v7342_v45 = vpop.eup %7341  ;;  %v2690_v61 = vand.u32 2147483647, %v9906_v50  ;;  %vm2649_vm10 = vweird.f32 %v7338_v16  ;;  %7351 = vrcp.f32 %v9950_v2 }
 0x2de   : > { %v2645_v42 = vsub.f32 1.0, %v2644_v39  ;;  %v7344_v19 = vpop.eup %7343  ;;  %v9958_v55 = vadd.f32 1.0, %v7342_v45  ;;  %v9963_v1 = vadd.f32 %v2553_v48, %v2551_v47  ;;  %vm2540_vm11 = vweird.f32 %v9891_v54 }
 0x2df   : > { %v2683_v11 = vsub.f32 1.0, %v2682_v7  ;;  %v9961_v5 = vadd.f32 1.0, %v7344_v19  ;;  %v7346_v44 = vpop.eup %7345  ;;  %vm2687_vm12 = vweird.f32 %v7340_v9  ;;  %vm2686_vm13 = vweird.f32 %v9906_v50 }
 0x2e0   : > { %v2646_v12 = vmul.f32 %v7338_v16, %v2645_v42  ;;  %7353 = vrcp.f32 %v9958_v55  ;;  %v7348_v20 = vpop.eup %7347  ;;  %vm2648_vm14 = vweird.f32 %v9904_v62  ;;  %v2538_v60 = vmul.f32 %v9939_v25, %v2537_v46  ;;  %vm2688_vm0 = vmor %vm2686_vm13, %vm2687_vm12 }
 0x2e1   : > { %v2684_v35 = vmul.f32 %v7340_v9, %v2683_v11  ;;  %7355 = vrcp.f32 %v9961_v5  ;;  %v7350_v34 = vpop.eup %7349  ;;  %v2693_v39 = vor.u32 1.1754944e-38, %v2692_v31  ;;  %vm2650_vm15 = vmor %vm2648_vm14, %vm2649_vm10  ;;  %v2655_v47 = vor.u32 1.1754944e-38, %v2654_v24 }
 0x2e2   : > { %v2647_v18 = vadd.f32 %v7338_v16, %v2646_v12  ;;  %vm2653_vm1 = vcmp.eq.f32.partialorder %v2652_v3, 8.507059e+37  ;;  %vm2691_vm2 = vcmp.eq.f32.partialorder %v2690_v61, 8.507059e+37  ;;  %v2524_v45 = vadd.f32 %v9876_v33, %v2523_v17 }
 0x2e3   : > { %v2685_v48 = vadd.f32 %v7340_v9, %v2684_v35  ;;  %7357 = vtanh.f32 %v9963_v1  ;;  %v2529_v42 = vand.u32 2147483647, %v9828_v41  ;;  %v9975_v19 = vpop.eup %7351  ;;  %v2546_v31 = vand.u32 2147483648, %v9891_v54 }
 0x2e4   : > { %v2651_v7 = vsel %vm2650_vm15, %v7338_v16, %v2647_v18  ;;  %v9978_v24 = vadd.f32 1.0, %v7350_v34  ;;  %7359 = vtanh.f32 %v2633_v40  ;;  %vm2541_vm4 = vweird.f32 %v9939_v25 }
 0x2e5   : > { %v2656_v50 = vsel %vm2653_vm1, %v2655_v47, %v2651_v7  ;;  %v2689_v62 = vsel %vm2688_vm0, %v7340_v9, %v2685_v48  ;;  %v2539_v9 = vadd.f32 %v9939_v25, %v2538_v60  ;;  %v2528_v41 = vsel %vm9984_vm3, %v9876_v33, %v2524_v45  ;;  %vm2542_vm7 = vmor %vm2540_vm11, %vm2541_vm4 }
 0x2e6   : > { %v2694_v46 = vsel %vm2691_vm2, %v2693_v39, %v2689_v62  ;;  %v2753_v11 = vmul.f32 %v7346_v44, %v2656_v50  ;;  %v7354_v12 = vpop.eup %7353  ;;  %7361 = vrcp.f32 %v9978_v24  ;;  %v2544_v44 = vand.u32 2147483647, %v9891_v54 }
 0x2e7   : > { %v2751_v17 = vmul.f32 %v2694_v46, %v9680_v0  ;;  %v7356_v3 = vpop.eup %7355  ;;  %v2659_v61 = vmul.f32 %v7354_v12, %v9958_v55  ;;  %vm2663_vm5 = vweird.f32 %v9958_v55  ;;  %vm10001_vm6 = vcmp.eq.f32.partialorder %v2529_v42, 8.507059e+37 }
 0x2e8   : > { %v2697_v0 = vmul.f32 %v7356_v3, %v9961_v5  ;;  %v2722_v18 = vmul.f32 %v9975_v19, %v9950_v2  ;;  %v2707_v60 = vand.u32 2147483648, %v9961_v5  ;;  %v2667_v33 = vand.u32 2147483647, %v9958_v55 }
 0x2e9   : > { %v9997_v35 = vadd.f32 %v2753_v11, %v2751_v17  ;;  %v2660_v34 = vsub.f32 1.0, %v2659_v61  ;;  %v7358_v39 = vpop.eup %7357  ;;  %v2669_v48 = vand.u32 2147483648, %v9958_v55  ;;  %v2543_v7 = vsel %vm2542_vm7, %v9939_v25, %v2539_v9 }
 0x2ea   : > { %v2698_v47 = vsub.f32 1.0, %v2697_v0  ;;  %v2547_v45 = vor.u32 1.1754944e-38, %v2546_v31  ;;  %vm2664_vm8 = vweird.f32 %v7354_v12  ;;  %v2705_v62 = vand.u32 2147483647, %v9961_v5  ;;  %v7360_v42 = vpop.eup %7359 }
 0x2eb   : > { %v2661_v50 = vmul.f32 %v7354_v12, %v2660_v34  ;;  %vm2545_vm9 = vcmp.eq.f32.partialorder %v2544_v44, 8.507059e+37  ;;  %vm2702_vm10 = vweird.f32 %v7356_v3  ;;  %v2533_v54 = vsel %vm10001_vm6, %v9943_v63, %v2528_v41  ;;  %vm2665_vm12 = vmor %vm2663_vm5, %vm2664_vm8 }
 0x2ec   : > { %v2699_v46 = vmul.f32 %v7356_v3, %v2698_v47  ;;  %v2548_v11 = vsel %vm2545_vm9, %v2547_v45, %v2543_v7  ;;  %v10017_v16 = vpop.eup %7361  ;;  %v2723_v17 = vsub.f32 1.0, %v2722_v18  ;;  %v2558_v0 = vmul.f32 %v7348_v20, %v2533_v54  ;;  %v12826_v7 = vld [vmem:[#allocation106_spill] sm:$0xff] }
 0x2ed   : > { %v2662_v61 = vadd.f32 %v7354_v12, %v2661_v50  ;;  %v2559_v25 = vmul.f32 %v7358_v39, %v2548_v11  ;;  %vm2701_vm11 = vweird.f32 %v9961_v5  ;;  %v2670_v31 = vor.u32 1.1754944e-38, %v2669_v48 }
 0x2ee   : > { %v2700_v9 = vadd.f32 %v7356_v3, %v2699_v46  ;;  %v2737_v44 = vmul.f32 %v10017_v16, %v9978_v24  ;;  %vm2703_vm13 = vmor %vm2701_vm11, %vm2702_vm10  ;;  %v2708_v40 = vor.u32 1.1754944e-38, %v2707_v60  ;;  %vm2668_vm14 = vcmp.eq.f32.partialorder %v2667_v33, 8.507059e+37 }
 0x2ef   : > { %v2666_v63 = vsel %vm2665_vm12, %v7354_v12, %v2662_v61  ;;  %v2762_v41 = vpack.c.bf16 %v2559_v25, %v2558_v0  ;;  %vm2706_vm15 = vcmp.eq.f32.partialorder %v2705_v62, 8.507059e+37  ;;  %v2724_v39 = vmul.f32 %v9975_v19, %v2723_v17  ;;  %v12806_v62 = vld [vmem:[#allocation13_spill] sm:$0xff]  ;;  %v12809_v61 = vld [vmem:[#allocation15_spill] sm:$0xff] }
 0x2f0   : > { %v2671_v34 = vsel %vm2668_vm14, %v2670_v31, %v2666_v63  ;;  %v2704_v18 = vsel %vm2703_vm13, %v7356_v3, %v2700_v9  ;;  %v2738_v20 = vsub.f32 1.0, %v2737_v44  ;;  %7363 = vtanh.f32 %v9997_v35  ;;  %v12810_v9 = vld [vmem:[#allocation17_spill] sm:$0xff]  ;;  %v12812_v63 = vld [vmem:[#allocation19_spill] sm:$0xff] }
 0x2f1   : > { %v2709_v5 = vsel %vm2706_vm15, %v2708_v40, %v2704_v18  ;;  %v2754_v47 = vmul.f32 %v7360_v42, %v2671_v34  ;;  %2771 = vmatmul.bf16.vlgmr.msra.gmra.mxu0 %v2762_v41  ;;  %2785 = vmatmul.bf16.vlgmr.msra.gmra.mxu1 %v2762_v41  ;;  %vm2727_vm0 = vweird.f32 %v9975_v19  ;;  %vm2742_vm1 = vweird.f32 %v10017_v16  ;;  %v12807_v42 = vld [vmem:[#allocation10_spill] sm:$0xff]  ;;  %v12814_v34 = vld [vmem:[#allocation88_spill] sm:$0xff]  ;;  %v12815_v18 = vld [vmem:[#allocation89_spill] sm:$0xff] }
 0x2f2   : > { %v2752_v55 = vmul.f32 %v2709_v5, %v9709_v6  ;;  %v2739_v48 = vmul.f32 %v10017_v16, %v2738_v20  ;;  %2799 = vmatmul.bf16.vlgmr.msra.gmra.mxu2 %v2762_v41  ;;  %2813 = vmatmul.bf16.vlgmr.msra.gmra.mxu3 %v2762_v41  ;;  %v2725_v6 = vadd.f32 %v9975_v19, %v2724_v39  ;;  %vm2726_vm2 = vweird.f32 %v9950_v2  ;;  %v12813_v41 = vld [vmem:[#allocation24_spill] sm:$0xff]  ;;  %v12817_v39 = vld [vmem:[#allocation93_spill] sm:$0xff]  ;;  %v12818_v5 = vld [vmem:[#allocation94_spill] sm:$0xff] }
 0x2f3   : > { %3020 = vmatpush.bf16.msra.mxu0 %v8488_v8  ;;  %3034 = vmatpush.bf16.msra.mxu1 %v8493_v10  ;;  %v2732_v60 = vand.u32 2147483648, %v9950_v2  ;;  %v2747_v33 = vand.u32 2147483648, %v9978_v24  ;;  %vm10042_vm3 = vmor %vm2726_vm2, %vm2727_vm0  ;;  %v2730_v45 = vand.u32 2147483647, %v9950_v2  ;;  %vm2741_vm4 = vweird.f32 %v9978_v24  ;;  %v12816_v20 = vld [vmem:[#allocation92_spill] sm:$0xff] }
 0x2f4   : > { %v10031_v12 = vadd.f32 %v2754_v47, %v2752_v55  ;;  %3048 = vmatpush.bf16.msra.mxu2 %v8523_v22  ;;  %3062 = vmatpush.bf16.msra.mxu3 %v8505_v15  ;;  %v2740_v3 = vadd.f32 %v10017_v16, %v2739_v48  ;;  %v2745_v50 = vand.u32 2147483647, %v9978_v24  ;;  %vm2743_vm5 = vmor %vm2741_vm4, %vm2742_vm1  ;;  %v2729_v46 = vsel %vm10042_vm3, %v9975_v19, %v2725_v6  ;;  %v12808_v24 = vld [vmem:[#allocation14_spill] sm:$0xff]  ;;  %v12819_v47 = vld [vmem:[#allocation96_spill] sm:$0xff] }
 0x2f5   : > { %v2733_v11 = vor.u32 1.1754944e-38, %v2732_v60  ;;  %v2748_v17 = vor.u32 1.1754944e-38, %v2747_v33  ;;  %vm2731_vm6 = vcmp.eq.f32.partialorder %v2730_v45, 8.507059e+37  ;;  %v12820_v55 = vld [vmem:[#allocation97_spill] sm:$0xff]  ;;  %v12821_v48 = vld [vmem:[#allocation98_spill] sm:$0xff]  ;;  %v12822_v6 = vld [vmem:[#allocation99_spill] sm:$0xff] }
 0x2f6   : > { %7365 = vtanh.f32 %v10031_v12  ;;  %v2744_v54 = vsel %vm2743_vm5, %v10017_v16, %v2740_v3  ;;  %v7364_v2 = vpop.eup %7363  ;;  %vm2746_vm7 = vcmp.eq.f32.partialorder %v2745_v50, 8.507059e+37  ;;  %v12811_v16 = vld [vmem:[#allocation18_spill] sm:$0xff]  ;;  %v12823_v3 = vld [vmem:[#allocation100_spill] sm:$0xff]  ;;  %v12824_v60 = vld [vmem:[#allocation103_spill] sm:$0xff] }
 0x2f7   : > { %3021 = vmatpush.bf16.msra.mxu0 %v8536_v28  ;;  %3035 = vmatpush.bf16.msra.mxu1 %v8541_v30  ;;  %v2734_v25 = vsel %vm2731_vm6, %v2733_v11, %v2729_v46  ;;  %v2749_v31 = vsel %vm2746_vm7, %v2748_v17, %v2744_v54  ;;  %v12825_v33 = vld [vmem:[#allocation105_spill] sm:$0xff]  ;;  %v12827_v45 = vld [vmem:[#allocation107_spill] sm:$0xff]  ;;  %v12828_v50 = vld [vmem:[#allocation108_spill] sm:$0xff] }
 0x2f8   : > { %3049 = vmatpush.bf16.msra.mxu2 %v12806_v62  ;;  %3063 = vmatpush.bf16.msra.mxu3 %v12807_v42  ;;  %v2759_v44 = vmul.f32 %v7364_v2, %v2734_v25  ;;  %v12829_v46 = vld [vmem:[#allocation109_spill] sm:$0xff]  ;;  %v12830_v54 = vld [vmem:[#allocation110_spill] sm:$0xff]  ;;  %v12831_v2 = vld [vmem:[#allocation111_spill] sm:$0xff] }
 0x2f9   : > { %v12832_v11 = vld [vmem:[#allocation114_spill] sm:$0xff]  ;;  %v12833_v17 = vld [vmem:[#allocation115_spill] sm:$0xff] }
 0x2fa   : > { %v12835_v25 = vld [vmem:[#allocation118_spill] sm:$0xff] }
 0x2fb   : > { %3022 = vmatpush.bf16.msra.mxu0 %v12808_v24  ;;  %3036 = vmatpush.bf16.msra.mxu1 %v12809_v61 }
 0x2fc   : > { %v7366_v0 = vpop.eup %7365  ;;  %3050 = vmatpush.bf16.msra.mxu2 %v12810_v9  ;;  %3064 = vmatpush.bf16.msra.mxu3 %v8611_v4 }
 0x2fd   : > { %v2760_v19 = vmul.f32 %v7366_v0, %v2749_v31  ;;  %v12834_v0 = vld [vmem:[#allocation116_spill] sm:$0xff]  ;;  %v12836_v31 = vld [vmem:[#allocation119_spill] sm:$0xff] }
 0x2ff   : > { %v2761_v40 = vpack.c.bf16 %v2760_v19, %v2759_v44  ;;  %3023 = vmatpush.bf16.msra.mxu0 %v12811_v16  ;;  %3037 = vmatpush.bf16.msra.mxu1 %v12812_v63  ;;  %v12837_v44 = vld [vmem:[#allocation120_spill] sm:$0xff]  ;;  %v12838_v19 = vld [vmem:[#allocation121_spill] sm:$0xff] }
 0x300   : > { %3051 = vmatpush.bf16.msra.mxu2 %v12813_v41  ;;  %3065 = vmatpush.bf16.msra.mxu3 %v8663_v53 }
 0x301   : > { %2827 = vmatmul.bf16.vlgmr.msrb.gmra.mxu0 %v2761_v40  ;;  %2841 = vmatmul.bf16.vlgmr.msrb.gmra.mxu1 %v2761_v40 }
 0x302   : > { %2855 = vmatmul.bf16.vlgmr.msrb.gmra.mxu2 %v2761_v40  ;;  %2869 = vmatmul.bf16.vlgmr.msrb.gmra.mxu3 %v2761_v40 }
 0x303   : > { %3024 = vmatpush.bf16.msra.mxu0 %v8694_v21  ;;  %3038 = vmatpush.bf16.msra.mxu1 %v8699_v26 }
 0x304   : > { %3052 = vmatpush.bf16.msra.mxu2 %v8733_v14  ;;  %3066 = vmatpush.bf16.msra.mxu3 %v8715_v52 }
 0x307   : > { %3025 = vmatpush.bf16.msra.mxu0 %v8746_v27  ;;  %3039 = vmatpush.bf16.msra.mxu1 %v8751_v29 }
 0x308   : > { %3053 = vmatpush.bf16.msra.mxu2 %v8785_v38  ;;  %3067 = vmatpush.bf16.msra.mxu3 %v8767_v58 }
 0x30b   : > { %3026 = vmatpush.bf16.msra.mxu0 %v8798_v57  ;;  %3040 = vmatpush.bf16.msra.mxu1 %v8803_v59 }
 0x30c   : > { %3054 = vmatpush.bf16.msra.mxu2 %v8837_v23  ;;  %3068 = vmatpush.bf16.msra.mxu3 %v8819_v56 }
 0x30f   : > { %3027 = vmatpush.bf16.msra.mxu0 %v8850_v13  ;;  %3041 = vmatpush.bf16.msra.mxu1 %v8855_v49  ;;  %v12894_v49 = vld [vmem:[#allocation26_spill] sm:$0xff] }
 0x310   : > { %3055 = vmatpush.bf16.msra.mxu2 %v8885_v32  ;;  %3069 = vmatpush.bf16.msra.mxu3 %v8872_v43 }
 0x312   : > { %3028 = vmatmul.bf16.vlgmr.msra.gmra.mxu0 %v2761_v40  ;;  %3042 = vmatmul.bf16.vlgmr.msra.gmra.mxu1 %v2761_v40 }
 0x313   : > { %3212 = vmatpush.bf16.msrb.mxu0 %v9005_v37  ;;  %3226 = vmatpush.bf16.msrb.mxu1 %v9016_v51 }
 0x314   : > { %3056 = vmatmul.bf16.vlgmr.msra.gmra.mxu2 %v2761_v40  ;;  %3070 = vmatmul.bf16.vlgmr.msra.gmra.mxu3 %v2761_v40  ;;  %v12839_v40 = vld [vmem:[#allocation122_spill] sm:$0xff] }
 0x315   : > { %3240 = vmatpush.bf16.msrb.mxu2 %v12814_v34  ;;  %3254 = vmatpush.bf16.msrb.mxu3 %v12815_v18  ;;  %v12878_v18 = vld [vmem:[#allocation172_spill] sm:$0xff] }
 0x317   : > { %3213 = vmatpush.bf16.msrb.mxu0 %v12816_v20  ;;  %3227 = vmatpush.bf16.msrb.mxu1 %v12817_v39 }
 0x319   : > { %3241 = vmatpush.bf16.msrb.mxu2 %v12818_v5  ;;  %3255 = vmatpush.bf16.msrb.mxu3 %v12819_v47 }
 0x31b   : > { %3214 = vmatpush.bf16.msrb.mxu0 %v12820_v55  ;;  %3228 = vmatpush.bf16.msrb.mxu1 %v12821_v48 }
 0x31d   : > { %3242 = vmatpush.bf16.msrb.mxu2 %v12822_v6  ;;  %3256 = vmatpush.bf16.msrb.mxu3 %v12823_v3  ;;  %v12876_v3 = vld [vmem:[#allocation170_spill] sm:$0xff]  ;;  %v12877_v6 = vld [vmem:[#allocation171_spill] sm:$0xff] }
 0x31f   : > { %3215 = vmatpush.bf16.msrb.mxu0 %v12824_v60  ;;  %3229 = vmatpush.bf16.msrb.mxu1 %v12825_v33 }
 0x321   : > { %3243 = vmatpush.bf16.msrb.mxu2 %v12826_v7  ;;  %3257 = vmatpush.bf16.msrb.mxu3 %v12827_v45 }
 0x323   : > { %3216 = vmatpush.bf16.msrb.mxu0 %v12828_v50  ;;  %3230 = vmatpush.bf16.msrb.mxu1 %v12829_v46  ;;  %v12840_v46 = vld [vmem:[#allocation126_spill] sm:$0xff] }
 0x325   : > { %3244 = vmatpush.bf16.msrb.mxu2 %v12830_v54  ;;  %3258 = vmatpush.bf16.msrb.mxu3 %v12831_v2  ;;  %v12841_v54 = vld [vmem:[#allocation127_spill] sm:$0xff]  ;;  %v12842_v2 = vld [vmem:[#allocation130_spill] sm:$0xff] }
 0x327   : > { %3217 = vmatpush.bf16.msrb.mxu0 %v12832_v11  ;;  %3231 = vmatpush.bf16.msrb.mxu1 %v12833_v17  ;;  %v12843_v11 = vld [vmem:[#allocation131_spill] sm:$0xff]  ;;  %v12844_v17 = vld [vmem:[#allocation128_spill] sm:$0xff] }
 0x329   : > { %3245 = vmatpush.bf16.msrb.mxu2 %v12834_v0  ;;  %3259 = vmatpush.bf16.msrb.mxu3 %v12835_v25  ;;  %v12845_v0 = vld [vmem:[#allocation129_spill] sm:$0xff] }
 0x32a   : > { %v12846_v25 = vld [vmem:[#allocation133_spill] sm:$0xff] }
 0x32b   : > { %3218 = vmatpush.bf16.msrb.mxu0 %v12836_v31  ;;  %3232 = vmatpush.bf16.msrb.mxu1 %v12837_v44  ;;  %v12847_v31 = vld [vmem:[#allocation135_spill] sm:$0xff]  ;;  %v12848_v44 = vld [vmem:[#allocation136_spill] sm:$0xff] }
 0x32d   : > { %3246 = vmatpush.bf16.msrb.mxu2 %v12838_v19  ;;  %3260 = vmatpush.bf16.msrb.mxu3 %v12839_v40  ;;  %v12849_v19 = vld [vmem:[#allocation138_spill] sm:$0xff]  ;;  %v12850_v40 = vld [vmem:[#allocation139_spill] sm:$0xff] }
 0x32f   : > { %3219 = vmatpush.bf16.msrb.mxu0 %v12840_v46  ;;  %3233 = vmatpush.bf16.msrb.mxu1 %v12841_v54  ;;  %v12851_v46 = vld [vmem:[#allocation140_spill] sm:$0xff]  ;;  %v12852_v54 = vld [vmem:[#allocation141_spill] sm:$0xff] }
 0x331   : > { %3247 = vmatpush.bf16.msrb.mxu2 %v12844_v17  ;;  %3261 = vmatpush.bf16.msrb.mxu3 %v12845_v0  ;;  %v12855_v17 = vld [vmem:[#allocation145_spill] sm:$0xff]  ;;  %v12856_v0 = vld [vmem:[#allocation148_spill] sm:$0xff] }
 0x333   : > { %3268 = vmatpush.bf16.msra.mxu0 %v12842_v2  ;;  %3282 = vmatpush.bf16.msra.mxu1 %v12843_v11  ;;  %v12853_v2 = vld [vmem:[#allocation142_spill] sm:$0xff]  ;;  %v12854_v11 = vld [vmem:[#allocation143_spill] sm:$0xff] }
 0x335   : > { %3296 = vmatpush.bf16.msra.mxu2 %v12846_v25  ;;  %3310 = vmatpush.bf16.msra.mxu3 %v12847_v31  ;;  %v12857_v25 = vld [vmem:[#allocation149_spill] sm:$0xff]  ;;  %v12858_v31 = vld [vmem:[#allocation150_spill] sm:$0xff] }
 0x337   : > { %3269 = vmatpush.bf16.msra.mxu0 %v12848_v44  ;;  %3283 = vmatpush.bf16.msra.mxu1 %v12849_v19  ;;  %v12859_v44 = vld [vmem:[#allocation151_spill] sm:$0xff]  ;;  %v12860_v19 = vld [vmem:[#allocation152_spill] sm:$0xff] }
 0x339   : > { %3297 = vmatpush.bf16.msra.mxu2 %v12850_v40  ;;  %3311 = vmatpush.bf16.msra.mxu3 %v12851_v46  ;;  %v12861_v40 = vld [vmem:[#allocation153_spill] sm:$0xff]  ;;  %v12862_v46 = vld [vmem:[#allocation154_spill] sm:$0xff] }
 0x33b   : > { %3270 = vmatpush.bf16.msra.mxu0 %v12852_v54  ;;  %3284 = vmatpush.bf16.msra.mxu1 %v12853_v2  ;;  %v12863_v54 = vld [vmem:[#allocation156_spill] sm:$0xff]  ;;  %v12864_v2 = vld [vmem:[#allocation157_spill] sm:$0xff] }
 0x33d   : > { %3298 = vmatpush.bf16.msra.mxu2 %v12854_v11  ;;  %3312 = vmatpush.bf16.msra.mxu3 %v12855_v17  ;;  %v12865_v11 = vld [vmem:[#allocation158_spill] sm:$0xff]  ;;  %v12866_v17 = vld [vmem:[#allocation159_spill] sm:$0xff] }
 0x33f   : > { %3271 = vmatpush.bf16.msra.mxu0 %v12856_v0  ;;  %3285 = vmatpush.bf16.msra.mxu1 %v12857_v25  ;;  %v12867_v0 = vld [vmem:[#allocation160_spill] sm:$0xff]  ;;  %v12868_v25 = vld [vmem:[#allocation162_spill] sm:$0xff] }
 0x341   : > { %3299 = vmatpush.bf16.msra.mxu2 %v12858_v31  ;;  %3313 = vmatpush.bf16.msra.mxu3 %v12859_v44  ;;  %v12869_v31 = vld [vmem:[#allocation163_spill] sm:$0xff]  ;;  %v12870_v44 = vld [vmem:[#allocation164_spill] sm:$0xff] }
 0x343   : > { %3272 = vmatpush.bf16.msra.mxu0 %v12860_v19  ;;  %3286 = vmatpush.bf16.msra.mxu1 %v12861_v40  ;;  %v12871_v19 = vld [vmem:[#allocation165_spill] sm:$0xff]  ;;  %v12872_v40 = vld [vmem:[#allocation166_spill] sm:$0xff] }
 0x345   : > { %3300 = vmatpush.bf16.msra.mxu2 %v12862_v46  ;;  %3314 = vmatpush.bf16.msra.mxu3 %v12863_v54  ;;  %v12873_v46 = vld [vmem:[#allocation167_spill] sm:$0xff]  ;;  %v12874_v54 = vld [vmem:[#allocation168_spill] sm:$0xff] }
 0x347   : > { %3273 = vmatpush.bf16.msra.mxu0 %v12864_v2  ;;  %3287 = vmatpush.bf16.msra.mxu1 %v12865_v11  ;;  %v12875_v2 = vld [vmem:[#allocation169_spill] sm:$0xff] }
 0x349   : > { %3301 = vmatpush.bf16.msra.mxu2 %v12866_v17  ;;  %3315 = vmatpush.bf16.msra.mxu3 %v12867_v0 }
 0x34b   : > { %3274 = vmatpush.bf16.msra.mxu0 %v12868_v25  ;;  %3288 = vmatpush.bf16.msra.mxu1 %v12869_v31 }
 0x34d   : > { %3302 = vmatpush.bf16.msra.mxu2 %v12870_v44  ;;  %3316 = vmatpush.bf16.msra.mxu3 %v12871_v19 }
 0x34f   : > { %3275 = vmatpush.bf16.msra.mxu0 %v12872_v40  ;;  %3289 = vmatpush.bf16.msra.mxu1 %v12873_v46 }
 0x351   : > { %3303 = vmatpush.bf16.msra.mxu2 %v12874_v54  ;;  %3317 = vmatpush.bf16.msra.mxu3 %v12875_v2 }
 0x36e   : > { %v2772_v11 = vpop.f32.mrf.mxu0  ;;  %v2786_v17 = vpop.f32.mrf.mxu1 }
 0x375   : > { %v2800_v50 = vpop.f32.mrf.mxu2  ;;  %v2814_v0 = vpop.f32.mrf.mxu3 }
 0x376   : > { %v2774_v45 = vpop.f32.mrf.mxu0  ;;  %v2788_v25 = vpop.f32.mrf.mxu1 }
 0x37d   : > { %v2816_v7 = vpop.f32.mrf.mxu3  ;;  %v2802_v19 = vpop.f32.mrf.mxu2 }
 0x37e   : > { %v2828_v31 = vpop.f32.mrf.mxu0  ;;  %v2842_v33 = vpop.f32.mrf.mxu1 }
 0x37f   : > { %v2829_v44 = vadd.f32 %v2828_v31, %v2772_v11  ;;  %v2843_v60 = vadd.f32 %v2842_v33, %v2786_v17 }
 0x381   : > { %v2875_v40 = vadd.f32 %v2829_v44, %v12876_v3  ;;  %v2876_v46 = vadd.f32 %v2843_v60, %v12877_v6 }
 0x383   : > { %v6835_v48 = vmul.f32 -1.442695, %v2875_v40  ;;  %v6837_v54 = vmul.f32 -1.442695, %v2876_v46 }
 0x385   : > { %7367 = vpow2.f32 %v6835_v48  ;;  %v2870_v2 = vpop.f32.mrf.mxu3  ;;  %v2856_v17 = vpop.f32.mrf.mxu2 }
 0x386   : > { %7369 = vpow2.f32 %v6837_v54  ;;  %v2871_v55 = vadd.f32 %v2870_v2, %v2814_v0  ;;  %v2830_v47 = vpop.f32.mrf.mxu0  ;;  %v2844_v5 = vpop.f32.mrf.mxu1  ;;  %v2857_v0 = vadd.f32 %v2856_v17, %v2800_v50 }
 0x387   : > { %v2831_v39 = vadd.f32 %v2830_v47, %v2774_v45  ;;  %v2845_v20 = vadd.f32 %v2844_v5, %v2788_v25 }
 0x388   : > { %v2878_v34 = vadd.f32 %v2871_v55, %v12878_v18 }
 0x389   : > { %v2879_v11 = vadd.f32 %v2831_v39, %v12876_v3  ;;  %v2880_v33 = vadd.f32 %v2845_v20, %v12877_v6  ;;  %v12879_v39 = vld [vmem:[#allocation63_spill] sm:$0xff]  ;;  %v12880_v20 = vld [vmem:[#allocation74_spill] sm:$0xff]  ;;  %v12884_v6 = vld [vmem:[#allocation68_spill] sm:$0xff] }
 0x38a   : > { %v6839_v31 = vmul.f32 -1.442695, %v2878_v34  ;;  %v1376_v47 = vadd.f32 %v12880_v20, %v12879_v39  ;;  %v2877_v3 = vadd.f32 %v2857_v0, %v12884_v6 }
 0x38b   : > { %v7368_v44 = vpop.eup %7367  ;;  %v6836_v60 = vmul.f32 -1.442695, %v2879_v11  ;;  %v6838_v48 = vmul.f32 -1.442695, %v2880_v33 }
 0x38c   : > { %v7370_v40 = vpop.eup %7369  ;;  %v10150_v46 = vadd.f32 1.0, %v7368_v44  ;;  %7371 = vpow2.f32 %v6839_v31 }
 0x38d   : > { %v10152_v54 = vadd.f32 1.0, %v7370_v40  ;;  %7373 = vpow2.f32 %v6836_v60  ;;  %v2872_v5 = vpop.f32.mrf.mxu3  ;;  %v2858_v31 = vpop.f32.mrf.mxu2  ;;  %v12881_v40 = vld [vmem:[#allocation75_spill] sm:$0xff] }
 0x38e   : > { %7375 = vrcp.f32 %v10150_v46  ;;  %v2873_v34 = vadd.f32 %v2872_v5, %v2816_v7  ;;  %v12882_v5 = vld [vmem:[#allocation23_spill] sm:$0xff]  ;;  %v2900_v37 = vand.u32 2147483647, %v10150_v46  ;;  %vm2896_vm10 = vweird.f32 %v10150_v46 }
 0x38f   : > { %7377 = vrcp.f32 %v10152_v54  ;;  %v3029_v45 = vpop.f32.mrf.mxu0  ;;  %v3043_v25 = vpop.f32.mrf.mxu1  ;;  %v2940_v43 = vand.u32 2147483648, %v10152_v54  ;;  %vm2934_vm11 = vweird.f32 %v10152_v54 }
 0x390   : > { %7379 = vpow2.f32 %v6838_v48  ;;  %v2882_v44 = vadd.f32 %v2873_v34, %v12878_v18  ;;  %v10166_v48 = vadd.f32 %v12881_v40, %v1376_v47  ;;  %v3076_v20 = vadd.f32 %v3029_v45, %v12882_v5 }
 0x391   : > { %v2859_v40 = vadd.f32 %v2858_v31, %v2802_v19  ;;  %v2902_v45 = vand.u32 2147483648, %v10150_v46  ;;  %v2938_v31 = vand.u32 2147483647, %v10152_v54  ;;  %vm10201_vm13 = vcmp.eq.f32.partialorder %v2900_v37, 8.507059e+37 }
 0x392   : > { %v7372_v55 = vpop.eup %7371  ;;  %v6840_v5 = vmul.f32 -1.442695, %v2882_v44  ;;  %v6841_v32 = vmul.f32 -1.442695, %v3076_v20 }
 0x393   : > { %v7374_v2 = vpop.eup %7373  ;;  %v10173_v17 = vadd.f32 1.0, %v7372_v55  ;;  %v2881_v44 = vadd.f32 %v2859_v40, %v12884_v6  ;;  %vm10216_vm15 = vcmp.eq.f32.partialorder %v2938_v31, 8.507059e+37 }
 0x394   : > { %v10158_v11 = vpop.eup %7375  ;;  %v10160_v33 = vadd.f32 1.0, %v7374_v2  ;;  %v12883_v2 = vld [vmem:[#allocation25_spill] sm:$0xff] }
 0x395   : > { %v10163_v60 = vpop.eup %7377  ;;  %v2892_v7 = vmul.f32 %v10158_v11, %v10150_v46  ;;  %v3077_v34 = vadd.f32 %v3043_v25, %v12883_v2  ;;  %vm2897_vm8 = vweird.f32 %v10158_v11  ;;  %v2941_v2 = vor.u32 1.1754944e-38, %v2940_v43 }
 0x396   : > { %v7380_v39 = vpop.eup %7379  ;;  %v2930_v50 = vmul.f32 %v10163_v60, %v10152_v54  ;;  %7381 = vrcp.f32 %v10160_v33  ;;  %vm2935_vm9 = vweird.f32 %v10163_v60  ;;  %vm10197_vm12 = vmor %vm2896_vm10, %vm2897_vm8  ;;  %vm2911_vm0 = vweird.f32 %v10160_v33 }
 0x397   : > { %v2893_v18 = vsub.f32 1.0, %v2892_v7  ;;  %v10178_v47 = vadd.f32 1.0, %v7380_v39  ;;  %v6843_v19 = vmul.f32 -1.442695, %v3077_v34  ;;  %v3071_v39 = vpop.f32.mrf.mxu3  ;;  %vm10212_vm14 = vmor %vm2934_vm11, %vm2935_vm9  ;;  %vm2974_vm9 = vweird.f32 %v10173_v17 }
 0x398   : > { %v2931_v51 = vsub.f32 1.0, %v2930_v50 }
 0x399   : > { %v2894_v55 = vmul.f32 %v10158_v11, %v2893_v18  ;;  %7383 = vrcp.f32 %v10178_v47  ;;  %vm2949_vm1 = vweird.f32 %v10178_v47  ;;  %v12893_v18 = vld [vmem:[#allocation73_spill] sm:$0xff]  ;;  %v2955_v34 = vand.u32 2147483648, %v10178_v47 }
 0x39a   : > { %v2932_v25 = vmul.f32 %v10163_v60, %v2931_v51  ;;  %7385 = vrcp.f32 %v10173_v17 }
 0x39b   : > { %v2895_v0 = vadd.f32 %v10158_v11, %v2894_v55  ;;  %7387 = vpow2.f32 %v6840_v5  ;;  %v2915_v5 = vand.u32 2147483647, %v10160_v33  ;;  %v2917_v55 = vand.u32 2147483648, %v10160_v33 }
 0x39c   : > { %v10191_v7 = vpop.eup %7381  ;;  %v2933_v51 = vadd.f32 %v10163_v60, %v2932_v25  ;;  %7389 = vtanh.f32 %v2877_v3  ;;  %v2903_v3 = vor.u32 1.1754944e-38, %v2902_v45  ;;  %v3045_v25 = vpop.f32.mrf.mxu1 }
 0x39d   : > { %v2907_v50 = vmul.f32 %v10191_v7, %v10160_v33  ;;  %7391 = vpow2.f32 %v6841_v32  ;;  %v2899_v46 = vsel %vm10197_vm12, %v10158_v11, %v2895_v0  ;;  %v3031_v32 = vpop.f32.mrf.mxu0  ;;  %vm2912_vm3 = vweird.f32 %v10191_v7 }
 0x39e   : > { %7393 = vpow2.f32 %v6843_v19  ;;  %v2937_v11 = vsel %vm10212_vm14, %v10163_v60, %v2933_v51  ;;  %v2904_v0 = vsel %vm10201_vm13, %v2903_v3, %v2899_v46  ;;  %v3080_v13 = vadd.f32 %v3031_v32, %v12894_v49  ;;  %vm10257_vm4 = vmor %vm2911_vm0, %vm2912_vm3 }
 0x39f   : > { %v10210_v54 = vpop.eup %7383  ;;  %v2908_v40 = vsub.f32 1.0, %v2907_v50  ;;  %7395 = vtanh.f32 %v2881_v44  ;;  %v3057_v44 = vpop.f32.mrf.mxu2  ;;  %v3079_v50 = vadd.f32 %v3071_v39, %v12893_v18  ;;  %v2942_v20 = vsel %vm10216_vm15, %v2941_v2, %v2937_v11 }
 0x3a0   : > { %v10221_v43 = vpop.eup %7385  ;;  %v2945_v45 = vmul.f32 %v10210_v54, %v10178_v47  ;;  %vm2950_vm2 = vweird.f32 %v10210_v54  ;;  %v2999_v11 = vmul.f32 %v2942_v20, %v9937_v36  ;;  %v12902_v20 = vld [vmem:[#allocation70_spill] sm:$0xff]  ;;  %vm2916_vm6 = vcmp.eq.f32.partialorder %v2915_v5, 8.507059e+37 }
 0x3a1   : > { %v7388_v19 = vpop.eup %7387  ;;  %v2909_v31 = vmul.f32 %v10191_v7, %v2908_v40  ;;  %v2970_v46 = vmul.f32 %v10221_v43, %v10173_v17  ;;  %v6845_v3 = vmul.f32 -1.442695, %v3079_v50  ;;  %v12895_v40 = vld [vmem:[#allocation27_spill] sm:$0xff]  ;;  %v12898_v50 = vld [vmem:[#allocation60_spill] sm:$0xff]  ;;  %vm10271_vm5 = vmor %vm2949_vm1, %vm2950_vm2  ;;  %vm2975_vm8 = vweird.f32 %v10221_v43 }
 0x3a2   : > { %v7390_v60 = vpop.eup %7389  ;;  %v2946_v51 = vsub.f32 1.0, %v2945_v45  ;;  %v10236_v6 = vadd.f32 1.0, %v7388_v19  ;;  %v3081_v23 = vadd.f32 %v3045_v25, %v12895_v40  ;;  %v3073_v19 = vpop.f32.mrf.mxu3  ;;  %vm10331_vm3 = vmor %vm2974_vm9, %vm2975_vm8 }
 0x3a3   : > { %v7392_v56 = vpop.eup %7391  ;;  %v3001_v39 = vmul.f32 %v7390_v60, %v2904_v0  ;;  %v2910_v32 = vadd.f32 %v10191_v7, %v2909_v31  ;;  %v6842_v0 = vmul.f32 -1.442695, %v3080_v13  ;;  %v2953_v31 = vand.u32 2147483647, %v10178_v47  ;;  %v12899_v60 = vld [vmem:[#allocation71_spill] sm:$0xff] }
 0x3a4   : > { %v7394_v59 = vpop.eup %7393  ;;  %v2947_v45 = vmul.f32 %v10210_v54, %v2946_v51  ;;  %7397 = vrcp.f32 %v10236_v6  ;;  %v10249_v2 = vadd.f32 1.0, %v7392_v56  ;;  %v6844_v56 = vmul.f32 -1.442695, %v3081_v23 }
 0x3a5   : > { %v7396_v49 = vpop.eup %7395  ;;  %v10251_v37 = vadd.f32 1.0, %v7394_v59  ;;  %7399 = vpow2.f32 %v6845_v3  ;;  %v3083_v59 = vadd.f32 %v3073_v19, %v10166_v48  ;;  %v1278_v36 = vadd.f32 %v12899_v60, %v12898_v50 }
 0x3a6   : > { %v2948_v25 = vadd.f32 %v10210_v54, %v2947_v45  ;;  %7401 = vrcp.f32 %v10249_v2  ;;  %v2980_v51 = vand.u32 2147483648, %v10173_v17  ;;  %v2971_v33 = vsub.f32 1.0, %v2970_v46 }
 0x3a7   : > { %7403 = vrcp.f32 %v10251_v37  ;;  %v2914_v23 = vsel %vm10257_vm4, %v10191_v7, %v2910_v32  ;;  %v3078_v3 = vadd.f32 %v3057_v44, %v12902_v20  ;;  %v10283_v40 = vadd.f32 %v3001_v39, %v2999_v11  ;;  %v3059_v46 = vpop.f32.mrf.mxu2  ;;  %v12903_v7 = vld [vmem:[#allocation72_spill] sm:$0xff] }
 0x3a8   : > { %v2952_v48 = vsel %vm10271_vm5, %v10210_v54, %v2948_v25  ;;  %v2956_v47 = vor.u32 1.1754944e-38, %v2955_v34  ;;  %v2918_v45 = vor.u32 1.1754944e-38, %v2917_v55  ;;  %7405 = vpow2.f32 %v6842_v0 }
 0x3a9   : > { %vm2954_vm7 = vcmp.eq.f32.partialorder %v2953_v31, 8.507059e+37  ;;  %7407 = vpow2.f32 %v6844_v56  ;;  %v6846_v60 = vmul.f32 -1.442695, %v3083_v59  ;;  %v1327_v32 = vadd.f32 %v12903_v7, %v1278_v36 }
 0x3aa   : > { %v10285_v19 = vpop.eup %7397  ;;  %v2919_v50 = vsel %vm2916_vm6, %v2918_v45, %v2914_v23  ;;  %v2957_v13 = vsel %vm2954_vm7, %v2956_v47, %v2952_v48  ;;  %v2972_v44 = vmul.f32 %v10221_v43, %v2971_v33  ;;  %v10289_v39 = vor.u32 1.1754944e-38, %v2980_v51 }
 0x3ab   : > { %v7400_v18 = vpop.eup %7399  ;;  %v2985_v55 = vmul.f32 %v10285_v19, %v10236_v6  ;;  %7409 = vtanh.f32 %v3078_v3  ;;  %v3082_v25 = vadd.f32 %v3059_v46, %v1327_v32  ;;  %v3000_v0 = vmul.f32 %v2957_v13, %v9963_v1 }
 0x3ac   : > { %v7402_v54 = vpop.eup %7401  ;;  %7411 = vtanh.f32 %v10283_v40  ;;  %v10296_v11 = vadd.f32 1.0, %v7400_v18  ;;  %v3002_v31 = vmul.f32 %v7396_v49, %v2919_v50  ;;  %v3141_v51 = vand.u32 2147483648, %v10251_v37 }
 0x3ad   : > { %v7404_v34 = vpop.eup %7403  ;;  %v3093_v5 = vmul.f32 %v7402_v54, %v10249_v2  ;;  %7413 = vpow2.f32 %v6846_v60  ;;  %v3101_v33 = vand.u32 2147483647, %v10249_v2  ;;  %v3103_v23 = vand.u32 2147483648, %v10249_v2 }
 0x3ae   : > { %v3131_v56 = vmul.f32 %v7404_v34, %v10251_v37  ;;  %v7406_v59 = vpop.eup %7405  ;;  %v2986_v20 = vsub.f32 1.0, %v2985_v55  ;;  %v3139_v47 = vand.u32 2147483647, %v10251_v37  ;;  %vm3098_vm10 = vweird.f32 %v7402_v54 }
 0x3af   : > { %v3094_v36 = vsub.f32 1.0, %v3093_v5  ;;  %v7408_v48 = vpop.eup %7407  ;;  %v10305_v1 = vadd.f32 1.0, %v7406_v59  ;;  %7415 = vrcp.f32 %v10296_v11  ;;  %v10310_v46 = vadd.f32 %v3002_v31, %v3000_v0 }
 0x3b0   : > { %v3132_v3 = vsub.f32 1.0, %v3131_v56  ;;  %v10308_v50 = vadd.f32 1.0, %v7408_v48  ;;  %vm2989_vm11 = vweird.f32 %v10236_v6  ;;  %vm3136_vm12 = vweird.f32 %v7404_v34 }
 0x3b1   : > { %v3095_v49 = vmul.f32 %v7402_v54, %v3094_v36  ;;  %v7410_v45 = vpop.eup %7409  ;;  %7417 = vrcp.f32 %v10305_v1  ;;  %vm3135_vm13 = vweird.f32 %v10251_v37  ;;  %vm3097_vm14 = vweird.f32 %v10249_v2 }
 0x3b2   : > { %v3133_v60 = vmul.f32 %v7404_v34, %v3132_v3  ;;  %v7412_v18 = vpop.eup %7411  ;;  %7419 = vrcp.f32 %v10308_v50  ;;  %v2987_v13 = vmul.f32 %v10285_v19, %v2986_v20  ;;  %v3142_v55 = vor.u32 1.1754944e-38, %v3141_v51  ;;  %vm3099_vm15 = vmor %vm3097_vm14, %vm3098_vm10 }
 0x3b3   : > { %v3096_v7 = vadd.f32 %v7402_v54, %v3095_v49  ;;  %v7414_v32 = vpop.eup %7413  ;;  %v3104_v5 = vor.u32 1.1754944e-38, %v3103_v23  ;;  %vm3137_vm0 = vmor %vm3135_vm13, %vm3136_vm12  ;;  %vm3102_vm1 = vcmp.eq.f32.partialorder %v3101_v33, 8.507059e+37  ;;  %vm3140_vm2 = vcmp.eq.f32.partialorder %v3139_v47, 8.507059e+37 }
 0x3b4   : > { %v3134_v0 = vadd.f32 %v7404_v34, %v3133_v60  ;;  %v2973_v56 = vadd.f32 %v10221_v43, %v2972_v44  ;;  %7421 = vtanh.f32 %v10310_v46  ;;  %v2978_v59 = vand.u32 2147483647, %v10173_v17 }
 0x3b5   : > { %v3100_v31 = vsel %vm3099_vm15, %v7402_v54, %v3096_v7  ;;  %v10322_v36 = vpop.eup %7415  ;;  %v2995_v51 = vand.u32 2147483648, %v10236_v6  ;;  %v10325_v23 = vadd.f32 1.0, %v7414_v32  ;;  %7423 = vtanh.f32 %v3082_v25 }
 0x3b6   : > { %v3105_v37 = vsel %vm3102_vm1, %v3104_v5, %v3100_v31  ;;  %v3138_v2 = vsel %vm3137_vm0, %v7404_v34, %v3134_v0  ;;  %v2988_v34 = vadd.f32 %v10285_v19, %v2987_v13  ;;  %vm2990_vm4 = vweird.f32 %v10285_v19 }
 0x3b7   : > { %v3143_v48 = vsel %vm3140_vm2, %v3142_v55, %v3138_v2  ;;  %v3202_v20 = vmul.f32 %v7410_v45, %v3105_v37  ;;  %v7418_v3 = vpop.eup %7417  ;;  %7425 = vrcp.f32 %v10325_v23  ;;  %v2977_v17 = vsel %vm10331_vm3, %v10221_v43, %v2973_v56  ;;  %vm2991_vm7 = vmor %vm2989_vm11, %vm2990_vm4 }
 0x3b8   : > { %v3200_v44 = vmul.f32 %v3143_v48, %v9997_v35  ;;  %v7420_v33 = vpop.eup %7419  ;;  %v3108_v47 = vmul.f32 %v7418_v3, %v10305_v1  ;;  %v2993_v49 = vand.u32 2147483647, %v10236_v6  ;;  %vm3112_vm5 = vweird.f32 %v10305_v1 }
 0x3b9   : > { %v3146_v35 = vmul.f32 %v7420_v33, %v10308_v50  ;;  %vm10348_vm6 = vcmp.eq.f32.partialorder %v2978_v59, 8.507059e+37  ;;  %v3171_v60 = vmul.f32 %v10322_v36, %v10296_v11  ;;  %v3156_v32 = vand.u32 2147483648, %v10308_v50 }
 0x3ba   : > { %v10344_v45 = vadd.f32 %v3202_v20, %v3200_v44  ;;  %v3109_v7 = vsub.f32 1.0, %v3108_v47  ;;  %v3116_v43 = vand.u32 2147483647, %v10305_v1  ;;  %v7422_v13 = vpop.eup %7421  ;;  %v3118_v5 = vand.u32 2147483648, %v10305_v1 }
 0x3bb   : > { %v3147_v55 = vsub.f32 1.0, %v3146_v35  ;;  %v2992_v0 = vsel %vm2991_vm7, %v10285_v19, %v2988_v34  ;;  %v2996_v31 = vor.u32 1.1754944e-38, %v2995_v51  ;;  %vm3113_vm8 = vweird.f32 %v7418_v3  ;;  %v7424_v2 = vpop.eup %7423 }
 0x3bc   : > { %v3110_v56 = vmul.f32 %v7418_v3, %v3109_v7  ;;  %v3154_v37 = vand.u32 2147483647, %v10308_v50  ;;  %vm2994_vm9 = vcmp.eq.f32.partialorder %v2993_v49, 8.507059e+37  ;;  %vm3151_vm10 = vweird.f32 %v7420_v33  ;;  %vm3114_vm12 = vmor %vm3112_vm5, %vm3113_vm8 }
 0x3bd   : > { %v3148_v59 = vmul.f32 %v7420_v33, %v3147_v55  ;;  %v2982_v6 = vsel %vm10348_vm6, %v10289_v39, %v2977_v17  ;;  %v2997_v48 = vsel %vm2994_vm9, %v2996_v31, %v2992_v0  ;;  %v10364_v20 = vpop.eup %7425  ;;  %v3172_v54 = vsub.f32 1.0, %v3171_v60 }
 0x3be   : > { %v3111_v44 = vadd.f32 %v7418_v3, %v3110_v56  ;;  %v3007_v47 = vmul.f32 %v7412_v18, %v2982_v6  ;;  %v3008_v19 = vmul.f32 %v7422_v13, %v2997_v48  ;;  %vm3150_vm11 = vweird.f32 %v10308_v50 }
 0x3bf   : > { %v3119_v51 = vor.u32 1.1754944e-38, %v3118_v5  ;;  %v3149_v34 = vadd.f32 %v7420_v33, %v3148_v59  ;;  %v3186_v49 = vmul.f32 %v10364_v20, %v10325_v23  ;;  %vm3152_vm13 = vmor %vm3150_vm11, %vm3151_vm10  ;;  %v3157_v35 = vor.u32 1.1754944e-38, %v3156_v32  ;;  %v12931_v5 = vld [vmem:[#allocation106_spill] sm:$0xff] }
 0x3c0   : > { %v3115_v39 = vsel %vm3114_vm12, %v7418_v3, %v3111_v44  ;;  %vm3117_vm14 = vcmp.eq.f32.partialorder %v3116_v43, 8.507059e+37  ;;  %v3211_v17 = vpack.c.bf16 %v3008_v19, %v3007_v47  ;;  %vm3155_vm15 = vcmp.eq.f32.partialorder %v3154_v37, 8.507059e+37  ;;  %v12911_v47 = vld [vmem:[#allocation40_spill] sm:$0xff]  ;;  %v12912_v19 = vld [vmem:[#allocation37_spill] sm:$0xff] }
 0x3c1   : > { %v3120_v25 = vsel %vm3117_vm14, %v3119_v51, %v3115_v39  ;;  %v3153_v60 = vsel %vm3152_vm13, %v7420_v33, %v3149_v34  ;;  %v3187_v18 = vsub.f32 1.0, %v3186_v49  ;;  %v3173_v7 = vmul.f32 %v10322_v36, %v3172_v54  ;;  %v12913_v51 = vld [vmem:[#allocation41_spill] sm:$0xff]  ;;  %v12914_v34 = vld [vmem:[#allocation42_spill] sm:$0xff] }
 0x3c2   : > { %v3158_v50 = vsel %vm3155_vm15, %v3157_v35, %v3153_v60  ;;  %v3203_v13 = vmul.f32 %v7424_v2, %v3120_v25  ;;  %3220 = vmatmul.bf16.vlgmr.msrb.gmra.mxu0 %v3211_v17  ;;  %3234 = vmatmul.bf16.vlgmr.msrb.gmra.mxu1 %v3211_v17  ;;  %7427 = vtanh.f32 %v10344_v45  ;;  %vm3176_vm0 = vweird.f32 %v10322_v36  ;;  %v12915_v49 = vld [vmem:[#allocation49_spill] sm:$0xff]  ;;  %v12916_v35 = vld [vmem:[#allocation46_spill] sm:$0xff]  ;;  %v12919_v25 = vld [vmem:[#allocation88_spill] sm:$0xff] }
 0x3c3   : > { %v3201_v1 = vmul.f32 %v3158_v50, %v10031_v12  ;;  %v3188_v55 = vmul.f32 %v10364_v20, %v3187_v18  ;;  %3248 = vmatmul.bf16.vlgmr.msrb.gmra.mxu2 %v3211_v17  ;;  %3262 = vmatmul.bf16.vlgmr.msrb.gmra.mxu3 %v3211_v17  ;;  %v3174_v12 = vadd.f32 %v10322_v36, %v3173_v7  ;;  %vm3191_vm1 = vweird.f32 %v10364_v20  ;;  %v12917_v39 = vld [vmem:[#allocation86_spill] sm:$0xff]  ;;  %v12918_v17 = vld [vmem:[#allocation87_spill] sm:$0xff]  ;;  %v12920_v60 = vld [vmem:[#allocation89_spill] sm:$0xff] }
 0x3c4   : > { %3469 = vmatpush.bf16.msrb.mxu0 %v8488_v8  ;;  %3483 = vmatpush.bf16.msrb.mxu1 %v8493_v10  ;;  %vm3175_vm2 = vweird.f32 %v10296_v11  ;;  %v3181_v32 = vand.u32 2147483648, %v10296_v11  ;;  %v3196_v43 = vand.u32 2147483648, %v10325_v23  ;;  %v3179_v0 = vand.u32 2147483647, %v10296_v11  ;;  %v12921_v18 = vld [vmem:[#allocation92_spill] sm:$0xff]  ;;  %v12922_v7 = vld [vmem:[#allocation93_spill] sm:$0xff] }
 0x3c5   : > { %v10378_v3 = vadd.f32 %v3203_v13, %v3201_v1  ;;  %3497 = vmatpush.bf16.msrb.mxu2 %v8523_v22  ;;  %3511 = vmatpush.bf16.msrb.mxu3 %v8505_v15  ;;  %v3189_v33 = vadd.f32 %v10364_v20, %v3188_v55  ;;  %vm10389_vm3 = vmor %vm3175_vm2, %vm3176_vm0  ;;  %vm3190_vm4 = vweird.f32 %v10325_v23  ;;  %v3194_v31 = vand.u32 2147483647, %v10325_v23  ;;  %v12923_v50 = vld [vmem:[#allocation94_spill] sm:$0xff]  ;;  %v12924_v13 = vld [vmem:[#allocation96_spill] sm:$0xff] }
 0x3c6   : > { %vm3192_vm5 = vmor %vm3190_vm4, %vm3191_vm1  ;;  %v3178_v56 = vsel %vm10389_vm3, %v10322_v36, %v3174_v12  ;;  %v3182_v2 = vor.u32 1.1754944e-38, %v3181_v32  ;;  %v3197_v59 = vor.u32 1.1754944e-38, %v3196_v43  ;;  %vm3180_vm6 = vcmp.eq.f32.partialorder %v3179_v0, 8.507059e+37  ;;  %v12925_v1 = vld [vmem:[#allocation97_spill] sm:$0xff]  ;;  %v12926_v55 = vld [vmem:[#allocation98_spill] sm:$0xff] }
 0x3c7   : > { %7429 = vtanh.f32 %v10378_v3  ;;  %v3193_v37 = vsel %vm3192_vm5, %v10364_v20, %v3189_v33  ;;  %vm3195_vm7 = vcmp.eq.f32.partialorder %v3194_v31, 8.507059e+37  ;;  %v12910_v20 = vld [vmem:[#allocation34_spill] sm:$0xff]  ;;  %v12927_v12 = vld [vmem:[#allocation99_spill] sm:$0xff]  ;;  %v12928_v33 = vld [vmem:[#allocation100_spill] sm:$0xff] }
 0x3c8   : > { %3470 = vmatpush.bf16.msrb.mxu0 %v8536_v28  ;;  %3484 = vmatpush.bf16.msrb.mxu1 %v8541_v30  ;;  %v7428_v11 = vpop.eup %7427  ;;  %v3183_v6 = vsel %vm3180_vm6, %v3182_v2, %v3178_v56  ;;  %v3198_v48 = vsel %vm3195_vm7, %v3197_v59, %v3193_v37  ;;  %v12929_v32 = vld [vmem:[#allocation103_spill] sm:$0xff]  ;;  %v12930_v43 = vld [vmem:[#allocation105_spill] sm:$0xff]  ;;  %v12933_v31 = vld [vmem:[#allocation108_spill] sm:$0xff] }
 0x3c9   : > { %3498 = vmatpush.bf16.msrb.mxu2 %v12806_v62  ;;  %3512 = vmatpush.bf16.msrb.mxu3 %v12807_v42  ;;  %v3208_v54 = vmul.f32 %v7428_v11, %v3183_v6  ;;  %v12932_v0 = vld [vmem:[#allocation107_spill] sm:$0xff]  ;;  %v12934_v56 = vld [vmem:[#allocation109_spill] sm:$0xff]  ;;  %v12935_v37 = vld [vmem:[#allocation110_spill] sm:$0xff] }
 0x3ca   : > { %v12936_v11 = vld [vmem:[#allocation111_spill] sm:$0xff]  ;;  %v12937_v2 = vld [vmem:[#allocation114_spill] sm:$0xff] }
 0x3cb   : > { %v12938_v59 = vld [vmem:[#allocation115_spill] sm:$0xff]  ;;  %v12940_v6 = vld [vmem:[#allocation118_spill] sm:$0xff] }
 0x3cc   : > { %3471 = vmatpush.bf16.msrb.mxu0 %v12808_v24  ;;  %3485 = vmatpush.bf16.msrb.mxu1 %v12809_v61 }
 0x3cd   : > { %v7430_v23 = vpop.eup %7429  ;;  %3499 = vmatpush.bf16.msrb.mxu2 %v12810_v9  ;;  %3513 = vmatpush.bf16.msrb.mxu3 %v8611_v4 }
 0x3ce   : > { %v3209_v36 = vmul.f32 %v7430_v23, %v3198_v48  ;;  %v12939_v23 = vld [vmem:[#allocation116_spill] sm:$0xff]  ;;  %v12941_v48 = vld [vmem:[#allocation119_spill] sm:$0xff] }
 0x3d0   : > { %v3210_v44 = vpack.c.bf16 %v3209_v36, %v3208_v54  ;;  %3472 = vmatpush.bf16.msrb.mxu0 %v12811_v16  ;;  %3486 = vmatpush.bf16.msrb.mxu1 %v12812_v63  ;;  %v12942_v54 = vld [vmem:[#allocation120_spill] sm:$0xff]  ;;  %v12943_v36 = vld [vmem:[#allocation121_spill] sm:$0xff] }
 0x3d1   : > { %3500 = vmatpush.bf16.msrb.mxu2 %v12813_v41  ;;  %3514 = vmatpush.bf16.msrb.mxu3 %v8663_v53 }
 0x3d2   : > { %3276 = vmatmul.bf16.vlgmr.msra.gmra.mxu0 %v3210_v44  ;;  %3290 = vmatmul.bf16.vlgmr.msra.gmra.mxu1 %v3210_v44 }
 0x3d3   : > { %3304 = vmatmul.bf16.vlgmr.msra.gmra.mxu2 %v3210_v44  ;;  %3318 = vmatmul.bf16.vlgmr.msra.gmra.mxu3 %v3210_v44 }
 0x3d4   : > { %3473 = vmatpush.bf16.msrb.mxu0 %v8694_v21  ;;  %3487 = vmatpush.bf16.msrb.mxu1 %v8699_v26 }
 0x3d5   : > { %3501 = vmatpush.bf16.msrb.mxu2 %v8733_v14  ;;  %3515 = vmatpush.bf16.msrb.mxu3 %v8715_v52 }
 0x3d8   : > { %3474 = vmatpush.bf16.msrb.mxu0 %v8746_v27  ;;  %3488 = vmatpush.bf16.msrb.mxu1 %v8751_v29 }
 0x3d9   : > { %3502 = vmatpush.bf16.msrb.mxu2 %v8785_v38  ;;  %3516 = vmatpush.bf16.msrb.mxu3 %v8767_v58 }
 0x3dc   : > { %3475 = vmatpush.bf16.msrb.mxu0 %v8798_v57  ;;  %3489 = vmatpush.bf16.msrb.mxu1 %v12910_v20 }
 0x3dd   : > { %3503 = vmatpush.bf16.msrb.mxu2 %v12911_v47  ;;  %3517 = vmatpush.bf16.msrb.mxu3 %v12912_v19 }
 0x3e0   : > { %3476 = vmatpush.bf16.msrb.mxu0 %v12913_v51  ;;  %3490 = vmatpush.bf16.msrb.mxu1 %v12914_v34  ;;  %v12999_v34 = vld [vmem:[#allocation30_spill] sm:$0xff] }
 0x3e1   : > { %3504 = vmatpush.bf16.msrb.mxu2 %v12915_v49  ;;  %3518 = vmatpush.bf16.msrb.mxu3 %v12916_v35 }
 0x3e3   : > { %3477 = vmatmul.bf16.vlgmr.msrb.gmra.mxu0 %v3210_v44  ;;  %3491 = vmatmul.bf16.vlgmr.msrb.gmra.mxu1 %v3210_v44 }
 0x3e4   : > { %3661 = vmatpush.bf16.msra.mxu0 %v12917_v39  ;;  %3675 = vmatpush.bf16.msra.mxu1 %v12918_v17 }
 0x3e5   : > { %3505 = vmatmul.bf16.vlgmr.msrb.gmra.mxu2 %v3210_v44  ;;  %3519 = vmatmul.bf16.vlgmr.msrb.gmra.mxu3 %v3210_v44  ;;  %v12944_v44 = vld [vmem:[#allocation122_spill] sm:$0xff] }
 0x3e6   : > { %3689 = vmatpush.bf16.msra.mxu2 %v12919_v25  ;;  %3703 = vmatpush.bf16.msra.mxu3 %v12920_v60  ;;  %v12983_v60 = vld [vmem:[#allocation172_spill] sm:$0xff] }
 0x3e8   : > { %3662 = vmatpush.bf16.msra.mxu0 %v12921_v18  ;;  %3676 = vmatpush.bf16.msra.mxu1 %v12922_v7 }
 0x3ea   : > { %3690 = vmatpush.bf16.msra.mxu2 %v12923_v50  ;;  %3704 = vmatpush.bf16.msra.mxu3 %v12924_v13 }
 0x3ec   : > { %3663 = vmatpush.bf16.msra.mxu0 %v12925_v1  ;;  %3677 = vmatpush.bf16.msra.mxu1 %v12926_v55 }
 0x3ee   : > { %3691 = vmatpush.bf16.msra.mxu2 %v12927_v12  ;;  %3705 = vmatpush.bf16.msra.mxu3 %v12928_v33  ;;  %v12981_v33 = vld [vmem:[#allocation170_spill] sm:$0xff]  ;;  %v12982_v12 = vld [vmem:[#allocation171_spill] sm:$0xff] }
 0x3f0   : > { %3664 = vmatpush.bf16.msra.mxu0 %v12929_v32  ;;  %3678 = vmatpush.bf16.msra.mxu1 %v12930_v43 }
 0x3f2   : > { %3692 = vmatpush.bf16.msra.mxu2 %v12931_v5  ;;  %3706 = vmatpush.bf16.msra.mxu3 %v12932_v0 }
 0x3f4   : > { %3665 = vmatpush.bf16.msra.mxu0 %v12933_v31  ;;  %3679 = vmatpush.bf16.msra.mxu1 %v12934_v56  ;;  %v12945_v56 = vld [vmem:[#allocation126_spill] sm:$0xff] }
 0x3f6   : > { %3693 = vmatpush.bf16.msra.mxu2 %v12935_v37  ;;  %3707 = vmatpush.bf16.msra.mxu3 %v12936_v11  ;;  %v12946_v37 = vld [vmem:[#allocation127_spill] sm:$0xff]  ;;  %v12947_v11 = vld [vmem:[#allocation130_spill] sm:$0xff] }
 0x3f8   : > { %3666 = vmatpush.bf16.msra.mxu0 %v12937_v2  ;;  %3680 = vmatpush.bf16.msra.mxu1 %v12938_v59  ;;  %v12948_v2 = vld [vmem:[#allocation131_spill] sm:$0xff]  ;;  %v12949_v59 = vld [vmem:[#allocation128_spill] sm:$0xff] }
 0x3fa   : > { %3694 = vmatpush.bf16.msra.mxu2 %v12939_v23  ;;  %3708 = vmatpush.bf16.msra.mxu3 %v12940_v6  ;;  %v12950_v23 = vld [vmem:[#allocation129_spill] sm:$0xff] }
 0x3fb   : > { %v12951_v6 = vld [vmem:[#allocation133_spill] sm:$0xff] }
 0x3fc   : > { %3667 = vmatpush.bf16.msra.mxu0 %v12941_v48  ;;  %3681 = vmatpush.bf16.msra.mxu1 %v12942_v54  ;;  %v12952_v48 = vld [vmem:[#allocation135_spill] sm:$0xff]  ;;  %v12953_v54 = vld [vmem:[#allocation136_spill] sm:$0xff] }
 0x3fe   : > { %3695 = vmatpush.bf16.msra.mxu2 %v12943_v36  ;;  %3709 = vmatpush.bf16.msra.mxu3 %v12944_v44  ;;  %v12954_v36 = vld [vmem:[#allocation138_spill] sm:$0xff]  ;;  %v12955_v44 = vld [vmem:[#allocation139_spill] sm:$0xff] }
 0x400   : > { %3668 = vmatpush.bf16.msra.mxu0 %v12945_v56  ;;  %3682 = vmatpush.bf16.msra.mxu1 %v12946_v37  ;;  %v12956_v56 = vld [vmem:[#allocation140_spill] sm:$0xff]  ;;  %v12957_v37 = vld [vmem:[#allocation141_spill] sm:$0xff] }
 0x402   : > { %3696 = vmatpush.bf16.msra.mxu2 %v12949_v59  ;;  %3710 = vmatpush.bf16.msra.mxu3 %v12950_v23  ;;  %v12960_v59 = vld [vmem:[#allocation145_spill] sm:$0xff]  ;;  %v12961_v23 = vld [vmem:[#allocation148_spill] sm:$0xff] }
 0x404   : > { %3717 = vmatpush.bf16.msrb.mxu0 %v12947_v11  ;;  %3731 = vmatpush.bf16.msrb.mxu1 %v12948_v2  ;;  %v12958_v11 = vld [vmem:[#allocation142_spill] sm:$0xff]  ;;  %v12959_v2 = vld [vmem:[#allocation143_spill] sm:$0xff] }
 0x406   : > { %3745 = vmatpush.bf16.msrb.mxu2 %v12951_v6  ;;  %3759 = vmatpush.bf16.msrb.mxu3 %v12952_v48  ;;  %v12962_v6 = vld [vmem:[#allocation149_spill] sm:$0xff]  ;;  %v12963_v48 = vld [vmem:[#allocation150_spill] sm:$0xff] }
 0x408   : > { %3718 = vmatpush.bf16.msrb.mxu0 %v12953_v54  ;;  %3732 = vmatpush.bf16.msrb.mxu1 %v12954_v36  ;;  %v12964_v54 = vld [vmem:[#allocation151_spill] sm:$0xff]  ;;  %v12965_v36 = vld [vmem:[#allocation152_spill] sm:$0xff] }
 0x40a   : > { %3746 = vmatpush.bf16.msrb.mxu2 %v12955_v44  ;;  %3760 = vmatpush.bf16.msrb.mxu3 %v12956_v56  ;;  %v12966_v44 = vld [vmem:[#allocation153_spill] sm:$0xff]  ;;  %v12967_v56 = vld [vmem:[#allocation154_spill] sm:$0xff] }
 0x40c   : > { %3719 = vmatpush.bf16.msrb.mxu0 %v12957_v37  ;;  %3733 = vmatpush.bf16.msrb.mxu1 %v12958_v11  ;;  %v12968_v37 = vld [vmem:[#allocation156_spill] sm:$0xff]  ;;  %v12969_v11 = vld [vmem:[#allocation157_spill] sm:$0xff] }
 0x40e   : > { %3747 = vmatpush.bf16.msrb.mxu2 %v12959_v2  ;;  %3761 = vmatpush.bf16.msrb.mxu3 %v12960_v59  ;;  %v12970_v2 = vld [vmem:[#allocation158_spill] sm:$0xff]  ;;  %v12971_v59 = vld [vmem:[#allocation159_spill] sm:$0xff] }
 0x410   : > { %3720 = vmatpush.bf16.msrb.mxu0 %v12961_v23  ;;  %3734 = vmatpush.bf16.msrb.mxu1 %v12962_v6  ;;  %v12972_v23 = vld [vmem:[#allocation160_spill] sm:$0xff]  ;;  %v12973_v6 = vld [vmem:[#allocation162_spill] sm:$0xff] }
 0x412   : > { %3748 = vmatpush.bf16.msrb.mxu2 %v12963_v48  ;;  %3762 = vmatpush.bf16.msrb.mxu3 %v12964_v54  ;;  %v12974_v48 = vld [vmem:[#allocation163_spill] sm:$0xff]  ;;  %v12975_v54 = vld [vmem:[#allocation164_spill] sm:$0xff] }
 0x414   : > { %3721 = vmatpush.bf16.msrb.mxu0 %v12965_v36  ;;  %3735 = vmatpush.bf16.msrb.mxu1 %v12966_v44  ;;  %v12976_v36 = vld [vmem:[#allocation165_spill] sm:$0xff]  ;;  %v12977_v44 = vld [vmem:[#allocation166_spill] sm:$0xff] }
 0x416   : > { %3749 = vmatpush.bf16.msrb.mxu2 %v12967_v56  ;;  %3763 = vmatpush.bf16.msrb.mxu3 %v12968_v37  ;;  %v12978_v56 = vld [vmem:[#allocation167_spill] sm:$0xff]  ;;  %v12979_v37 = vld [vmem:[#allocation168_spill] sm:$0xff] }
 0x418   : > { %3722 = vmatpush.bf16.msrb.mxu0 %v12969_v11  ;;  %3736 = vmatpush.bf16.msrb.mxu1 %v12970_v2  ;;  %v12980_v11 = vld [vmem:[#allocation169_spill] sm:$0xff] }
 0x41a   : > { %3750 = vmatpush.bf16.msrb.mxu2 %v12971_v59  ;;  %3764 = vmatpush.bf16.msrb.mxu3 %v12972_v23 }
 0x41c   : > { %3723 = vmatpush.bf16.msrb.mxu0 %v12973_v6  ;;  %3737 = vmatpush.bf16.msrb.mxu1 %v12974_v48 }
 0x41e   : > { %3751 = vmatpush.bf16.msrb.mxu2 %v12975_v54  ;;  %3765 = vmatpush.bf16.msrb.mxu3 %v12976_v36 }
 0x420   : > { %3724 = vmatpush.bf16.msrb.mxu0 %v12977_v44  ;;  %3738 = vmatpush.bf16.msrb.mxu1 %v12978_v56 }
 0x422   : > { %3752 = vmatpush.bf16.msrb.mxu2 %v12979_v37  ;;  %3766 = vmatpush.bf16.msrb.mxu3 %v12980_v11 }
 0x43f   : > { %v3221_v2 = vpop.f32.mrf.mxu0  ;;  %v3235_v59 = vpop.f32.mrf.mxu1 }
 0x446   : > { %v3249_v31 = vpop.f32.mrf.mxu2  ;;  %v3263_v23 = vpop.f32.mrf.mxu3 }
 0x447   : > { %v3223_v0 = vpop.f32.mrf.mxu0  ;;  %v3237_v6 = vpop.f32.mrf.mxu1 }
 0x44e   : > { %v3265_v5 = vpop.f32.mrf.mxu3  ;;  %v3251_v36 = vpop.f32.mrf.mxu2 }
 0x44f   : > { %v3277_v48 = vpop.f32.mrf.mxu0  ;;  %v3291_v43 = vpop.f32.mrf.mxu1 }
 0x450   : > { %v3278_v54 = vadd.f32 %v3277_v48, %v3221_v2  ;;  %v3292_v32 = vadd.f32 %v3291_v43, %v3235_v59 }
 0x452   : > { %v3324_v44 = vadd.f32 %v3278_v54, %v12981_v33  ;;  %v3325_v56 = vadd.f32 %v3292_v32, %v12982_v12 }
 0x454   : > { %v6847_v55 = vmul.f32 -1.442695, %v3324_v44  ;;  %v6849_v37 = vmul.f32 -1.442695, %v3325_v56 }
 0x456   : > { %7431 = vpow2.f32 %v6847_v55  ;;  %v3319_v11 = vpop.f32.mrf.mxu3  ;;  %v3305_v59 = vpop.f32.mrf.mxu2 }
 0x457   : > { %7433 = vpow2.f32 %v6849_v37  ;;  %v3320_v1 = vadd.f32 %v3319_v11, %v3263_v23  ;;  %v3279_v13 = vpop.f32.mrf.mxu0  ;;  %v3293_v50 = vpop.f32.mrf.mxu1  ;;  %v3306_v23 = vadd.f32 %v3305_v59, %v3249_v31 }
 0x458   : > { %v3280_v7 = vadd.f32 %v3279_v13, %v3223_v0  ;;  %v3294_v18 = vadd.f32 %v3293_v50, %v3237_v6 }
 0x459   : > { %v3327_v25 = vadd.f32 %v3320_v1, %v12983_v60 }
 0x45a   : > { %v3328_v2 = vadd.f32 %v3280_v7, %v12981_v33  ;;  %v3329_v43 = vadd.f32 %v3294_v18, %v12982_v12  ;;  %v12984_v7 = vld [vmem:[#allocation63_spill] sm:$0xff]  ;;  %v12985_v18 = vld [vmem:[#allocation80_spill] sm:$0xff] }
 0x45b   : > { %v6851_v48 = vmul.f32 -1.442695, %v3327_v25  ;;  %v1381_v13 = vadd.f32 %v12985_v18, %v12984_v7  ;;  %v12989_v12 = vld [vmem:[#allocation68_spill] sm:$0xff] }
 0x45c   : > { %v7432_v54 = vpop.eup %7431  ;;  %v6848_v32 = vmul.f32 -1.442695, %v3328_v2  ;;  %v6850_v55 = vmul.f32 -1.442695, %v3329_v43  ;;  %v3326_v33 = vadd.f32 %v3306_v23, %v12989_v12 }
 0x45d   : > { %v7434_v44 = vpop.eup %7433  ;;  %v10497_v56 = vadd.f32 1.0, %v7432_v54  ;;  %7435 = vpow2.f32 %v6851_v48 }
 0x45e   : > { %v10499_v37 = vadd.f32 1.0, %v7434_v44  ;;  %7437 = vpow2.f32 %v6848_v32  ;;  %v3321_v50 = vpop.f32.mrf.mxu3  ;;  %v3307_v48 = vpop.f32.mrf.mxu2  ;;  %v12986_v44 = vld [vmem:[#allocation81_spill] sm:$0xff] }
 0x45f   : > { %7439 = vrcp.f32 %v10497_v56  ;;  %v3322_v25 = vadd.f32 %v3321_v50, %v3265_v5  ;;  %v12987_v50 = vld [vmem:[#allocation28_spill] sm:$0xff]  ;;  %v3349_v39 = vand.u32 2147483647, %v10497_v56  ;;  %vm3345_vm10 = vweird.f32 %v10497_v56 }
 0x460   : > { %7441 = vrcp.f32 %v10499_v37  ;;  %v3478_v0 = vpop.f32.mrf.mxu0  ;;  %v3492_v6 = vpop.f32.mrf.mxu1  ;;  %v3389_v35 = vand.u32 2147483648, %v10499_v37  ;;  %vm3383_vm11 = vweird.f32 %v10499_v37 }
 0x461   : > { %7443 = vpow2.f32 %v6850_v55  ;;  %v3331_v54 = vadd.f32 %v3322_v25, %v12983_v60  ;;  %v10513_v55 = vadd.f32 %v12986_v44, %v1381_v13  ;;  %v3525_v18 = vadd.f32 %v3478_v0, %v12987_v50 }
 0x462   : > { %v3308_v44 = vadd.f32 %v3307_v48, %v3251_v36  ;;  %v3351_v0 = vand.u32 2147483648, %v10497_v56  ;;  %v3387_v48 = vand.u32 2147483647, %v10499_v37  ;;  %vm10548_vm13 = vcmp.eq.f32.partialorder %v3349_v39, 8.507059e+37 }
 0x463   : > { %v7436_v1 = vpop.eup %7435  ;;  %v6852_v50 = vmul.f32 -1.442695, %v3331_v54  ;;  %v6853_v49 = vmul.f32 -1.442695, %v3525_v18 }
 0x464   : > { %v7438_v11 = vpop.eup %7437  ;;  %v10520_v59 = vadd.f32 1.0, %v7436_v1  ;;  %v3330_v54 = vadd.f32 %v3308_v44, %v12989_v12  ;;  %vm10563_vm15 = vcmp.eq.f32.partialorder %v3387_v48, 8.507059e+37 }
 0x465   : > { %v10505_v2 = vpop.eup %7439  ;;  %v10507_v43 = vadd.f32 1.0, %v7438_v11  ;;  %v12988_v11 = vld [vmem:[#allocation29_spill] sm:$0xff] }
 0x466   : > { %v10510_v32 = vpop.eup %7441  ;;  %v3341_v5 = vmul.f32 %v10505_v2, %v10497_v56  ;;  %v3526_v25 = vadd.f32 %v3492_v6, %v12988_v11  ;;  %vm3346_vm8 = vweird.f32 %v10505_v2  ;;  %v3390_v11 = vor.u32 1.1754944e-38, %v3389_v35 }
 0x467   : > { %v7444_v7 = vpop.eup %7443  ;;  %v3379_v31 = vmul.f32 %v10510_v32, %v10499_v37  ;;  %7445 = vrcp.f32 %v10507_v43  ;;  %vm3384_vm9 = vweird.f32 %v10510_v32  ;;  %vm10544_vm12 = vmor %vm3345_vm10, %vm3346_vm8  ;;  %vm3360_vm0 = vweird.f32 %v10507_v43 }
 0x468   : > { %v3342_v60 = vsub.f32 1.0, %v3341_v5  ;;  %v10525_v13 = vadd.f32 1.0, %v7444_v7  ;;  %v6855_v36 = vmul.f32 -1.442695, %v3526_v25  ;;  %v3520_v7 = vpop.f32.mrf.mxu3  ;;  %vm10559_vm14 = vmor %vm3383_vm11, %vm3384_vm9  ;;  %vm3423_vm9 = vweird.f32 %v10520_v59 }
 0x469   : > { %v3380_v17 = vsub.f32 1.0, %v3379_v31 }
 0x46a   : > { %v3343_v1 = vmul.f32 %v10505_v2, %v3342_v60  ;;  %7447 = vrcp.f32 %v10525_v13  ;;  %vm3398_vm1 = vweird.f32 %v10525_v13  ;;  %v12998_v60 = vld [vmem:[#allocation79_spill] sm:$0xff]  ;;  %v3404_v25 = vand.u32 2147483648, %v10525_v13 }
 0x46b   : > { %v3381_v6 = vmul.f32 %v10510_v32, %v3380_v17  ;;  %7449 = vrcp.f32 %v10520_v59 }
 0x46c   : > { %v3344_v23 = vadd.f32 %v10505_v2, %v3343_v1  ;;  %7451 = vpow2.f32 %v6852_v50  ;;  %v3364_v50 = vand.u32 2147483647, %v10507_v43  ;;  %v3366_v1 = vand.u32 2147483648, %v10507_v43 }
 0x46d   : > { %v10538_v5 = vpop.eup %7445  ;;  %v3382_v17 = vadd.f32 %v10510_v32, %v3381_v6  ;;  %7453 = vtanh.f32 %v3326_v33  ;;  %v3352_v33 = vor.u32 1.1754944e-38, %v3351_v0  ;;  %v3494_v6 = vpop.f32.mrf.mxu1 }
 0x46e   : > { %v3356_v31 = vmul.f32 %v10538_v5, %v10507_v43  ;;  %7455 = vpow2.f32 %v6853_v49  ;;  %v3348_v56 = vsel %vm10544_vm12, %v10505_v2, %v3344_v23  ;;  %v3480_v49 = vpop.f32.mrf.mxu0  ;;  %vm3361_vm3 = vweird.f32 %v10538_v5 }
 0x46f   : > { %7457 = vpow2.f32 %v6855_v36  ;;  %v3386_v2 = vsel %vm10559_vm14, %v10510_v32, %v3382_v17  ;;  %v3353_v23 = vsel %vm10548_vm13, %v3352_v33, %v3348_v56  ;;  %v3529_v51 = vadd.f32 %v3480_v49, %v12999_v34  ;;  %vm10604_vm4 = vmor %vm3360_vm0, %vm3361_vm3 }
 0x470   : > { %v10557_v37 = vpop.eup %7447  ;;  %v3357_v44 = vsub.f32 1.0, %v3356_v31  ;;  %7459 = vtanh.f32 %v3330_v54  ;;  %v3506_v54 = vpop.f32.mrf.mxu2  ;;  %v3528_v31 = vadd.f32 %v3520_v7, %v12998_v60  ;;  %v3391_v18 = vsel %vm10563_vm15, %v3390_v11, %v3386_v2 }
 0x471   : > { %v10568_v35 = vpop.eup %7449  ;;  %v3394_v0 = vmul.f32 %v10557_v37, %v10525_v13  ;;  %vm3399_vm2 = vweird.f32 %v10557_v37  ;;  %v3448_v2 = vmul.f32 %v3391_v18, %v10283_v40  ;;  %v13007_v18 = vld [vmem:[#allocation76_spill] sm:$0xff]  ;;  %vm3365_vm6 = vcmp.eq.f32.partialorder %v3364_v50, 8.507059e+37 }
 0x472   : > { %v7452_v36 = vpop.eup %7451  ;;  %v3358_v48 = vmul.f32 %v10538_v5, %v3357_v44  ;;  %v3419_v56 = vmul.f32 %v10568_v35, %v10520_v59  ;;  %v6857_v33 = vmul.f32 -1.442695, %v3528_v31  ;;  %v13000_v44 = vld [vmem:[#allocation31_spill] sm:$0xff]  ;;  %v13003_v31 = vld [vmem:[#allocation60_spill] sm:$0xff]  ;;  %vm10618_vm5 = vmor %vm3398_vm1, %vm3399_vm2  ;;  %vm3424_vm8 = vweird.f32 %v10568_v35 }
 0x473   : > { %v7454_v32 = vpop.eup %7453  ;;  %v3395_v17 = vsub.f32 1.0, %v3394_v0  ;;  %v10583_v12 = vadd.f32 1.0, %v7452_v36  ;;  %v3530_v47 = vadd.f32 %v3494_v6, %v13000_v44  ;;  %v3522_v36 = vpop.f32.mrf.mxu3  ;;  %vm10678_vm3 = vmor %vm3423_vm9, %vm3424_vm8 }
 0x474   : > { %v7456_v19 = vpop.eup %7455  ;;  %v3450_v7 = vmul.f32 %v7454_v32, %v3353_v23  ;;  %v3359_v49 = vadd.f32 %v10538_v5, %v3358_v48  ;;  %v6854_v23 = vmul.f32 -1.442695, %v3529_v51  ;;  %v3402_v48 = vand.u32 2147483647, %v10525_v13  ;;  %v13004_v32 = vld [vmem:[#allocation77_spill] sm:$0xff] }
 0x475   : > { %v7458_v20 = vpop.eup %7457  ;;  %v3396_v0 = vmul.f32 %v10557_v37, %v3395_v17  ;;  %7461 = vrcp.f32 %v10583_v12  ;;  %v10596_v11 = vadd.f32 1.0, %v7456_v19  ;;  %v6856_v19 = vmul.f32 -1.442695, %v3530_v47 }
 0x476   : > { %v7460_v34 = vpop.eup %7459  ;;  %v10598_v39 = vadd.f32 1.0, %v7458_v20  ;;  %7463 = vpow2.f32 %v6857_v33  ;;  %v3532_v20 = vadd.f32 %v3522_v36, %v10513_v55  ;;  %v1283_v40 = vadd.f32 %v13004_v32, %v13003_v31 }
 0x477   : > { %v3397_v6 = vadd.f32 %v10557_v37, %v3396_v0  ;;  %7465 = vrcp.f32 %v10596_v11  ;;  %v3429_v17 = vand.u32 2147483648, %v10520_v59  ;;  %v3420_v43 = vsub.f32 1.0, %v3419_v56 }
 0x478   : > { %7467 = vrcp.f32 %v10598_v39  ;;  %v3363_v47 = vsel %vm10604_vm4, %v10538_v5, %v3359_v49  ;;  %v3527_v33 = vadd.f32 %v3506_v54, %v13007_v18  ;;  %v10630_v44 = vadd.f32 %v3450_v7, %v3448_v2  ;;  %v3508_v56 = vpop.f32.mrf.mxu2  ;;  %v13008_v5 = vld [vmem:[#allocation78_spill] sm:$0xff] }
 0x479   : > { %v3401_v55 = vsel %vm10618_vm5, %v10557_v37, %v3397_v6  ;;  %v3405_v13 = vor.u32 1.1754944e-38, %v3404_v25  ;;  %v3367_v0 = vor.u32 1.1754944e-38, %v3366_v1  ;;  %7469 = vpow2.f32 %v6854_v23 }
 0x47a   : > { %vm3403_vm7 = vcmp.eq.f32.partialorder %v3402_v48, 8.507059e+37  ;;  %7471 = vpow2.f32 %v6856_v19  ;;  %v6858_v32 = vmul.f32 -1.442695, %v3532_v20  ;;  %v1332_v49 = vadd.f32 %v13008_v5, %v1283_v40 }
 0x47b   : > { %v10632_v36 = vpop.eup %7461  ;;  %v3368_v31 = vsel %vm3365_vm6, %v3367_v0, %v3363_v47  ;;  %v3406_v51 = vsel %vm3403_vm7, %v3405_v13, %v3401_v55  ;;  %v3421_v54 = vmul.f32 %v10568_v35, %v3420_v43  ;;  %v10636_v7 = vor.u32 1.1754944e-38, %v3429_v17 }
 0x47c   : > { %v7464_v60 = vpop.eup %7463  ;;  %v3434_v1 = vmul.f32 %v10632_v36, %v10583_v12  ;;  %7473 = vtanh.f32 %v3527_v33  ;;  %v3531_v6 = vadd.f32 %v3508_v56, %v1332_v49  ;;  %v3449_v23 = vmul.f32 %v3406_v51, %v10310_v46 }
 0x47d   : > { %v7466_v37 = vpop.eup %7465  ;;  %7475 = vtanh.f32 %v10630_v44  ;;  %v10643_v2 = vadd.f32 1.0, %v7464_v60  ;;  %v3451_v48 = vmul.f32 %v7460_v34, %v3368_v31  ;;  %v3590_v17 = vand.u32 2147483648, %v10598_v39 }
 0x47e   : > { %v7468_v25 = vpop.eup %7467  ;;  %v3542_v50 = vmul.f32 %v7466_v37, %v10596_v11  ;;  %7477 = vpow2.f32 %v6858_v32  ;;  %v3550_v43 = vand.u32 2147483647, %v10596_v11  ;;  %v3552_v47 = vand.u32 2147483648, %v10596_v11 }
 0x47f   : > { %v3580_v19 = vmul.f32 %v7468_v25, %v10598_v39  ;;  %v7470_v20 = vpop.eup %7469  ;;  %v3435_v18 = vsub.f32 1.0, %v3434_v1  ;;  %v3588_v13 = vand.u32 2147483647, %v10598_v39  ;;  %vm3547_vm10 = vweird.f32 %v7466_v37 }
 0x480   : > { %v3543_v40 = vsub.f32 1.0, %v3542_v50  ;;  %v7472_v55 = vpop.eup %7471  ;;  %v10652_v46 = vadd.f32 1.0, %v7470_v20  ;;  %7479 = vrcp.f32 %v10643_v2  ;;  %v10657_v56 = vadd.f32 %v3451_v48, %v3449_v23 }
 0x481   : > { %v3581_v33 = vsub.f32 1.0, %v3580_v19  ;;  %v10655_v31 = vadd.f32 1.0, %v7472_v55  ;;  %vm3438_vm11 = vweird.f32 %v10583_v12  ;;  %vm3585_vm12 = vweird.f32 %v7468_v25 }
 0x482   : > { %v3544_v34 = vmul.f32 %v7466_v37, %v3543_v40  ;;  %v7474_v0 = vpop.eup %7473  ;;  %7481 = vrcp.f32 %v10652_v46  ;;  %vm3584_vm13 = vweird.f32 %v10598_v39  ;;  %vm3546_vm14 = vweird.f32 %v10596_v11 }
 0x483   : > { %v3582_v32 = vmul.f32 %v7468_v25, %v3581_v33  ;;  %v7476_v60 = vpop.eup %7475  ;;  %7483 = vrcp.f32 %v10655_v31  ;;  %v3436_v51 = vmul.f32 %v10632_v36, %v3435_v18  ;;  %v3591_v1 = vor.u32 1.1754944e-38, %v3590_v17  ;;  %vm3548_vm15 = vmor %vm3546_vm14, %vm3547_vm10 }
 0x484   : > { %v3545_v5 = vadd.f32 %v7466_v37, %v3544_v34  ;;  %v7478_v49 = vpop.eup %7477  ;;  %v3553_v50 = vor.u32 1.1754944e-38, %v3552_v47  ;;  %vm3586_vm0 = vmor %vm3584_vm13, %vm3585_vm12  ;;  %vm3551_vm1 = vcmp.eq.f32.partialorder %v3550_v43, 8.507059e+37  ;;  %vm3589_vm2 = vcmp.eq.f32.partialorder %v3588_v13, 8.507059e+37 }
 0x485   : > { %v3583_v23 = vadd.f32 %v7468_v25, %v3582_v32  ;;  %v3422_v19 = vadd.f32 %v10568_v35, %v3421_v54  ;;  %7485 = vtanh.f32 %v10657_v56  ;;  %v3427_v20 = vand.u32 2147483647, %v10520_v59 }
 0x486   : > { %v3549_v48 = vsel %vm3548_vm15, %v7466_v37, %v3545_v5  ;;  %v10669_v40 = vpop.eup %7479  ;;  %v3444_v17 = vand.u32 2147483648, %v10583_v12  ;;  %v10672_v47 = vadd.f32 1.0, %v7478_v49  ;;  %7487 = vtanh.f32 %v3531_v6 }
 0x487   : > { %v3554_v39 = vsel %vm3551_vm1, %v3553_v50, %v3549_v48  ;;  %v3587_v11 = vsel %vm3586_vm0, %v7468_v25, %v3583_v23  ;;  %v3437_v25 = vadd.f32 %v10632_v36, %v3436_v51  ;;  %vm3439_vm4 = vweird.f32 %v10632_v36 }
 0x488   : > { %v3592_v55 = vsel %vm3589_vm2, %v3591_v1, %v3587_v11  ;;  %v3651_v18 = vmul.f32 %v7474_v0, %v3554_v39  ;;  %v7482_v33 = vpop.eup %7481  ;;  %7489 = vrcp.f32 %v10672_v47  ;;  %v3426_v59 = vsel %vm10678_vm3, %v10568_v35, %v3422_v19  ;;  %vm3440_vm7 = vmor %vm3438_vm11, %vm3439_vm4 }
 0x489   : > { %v3649_v54 = vmul.f32 %v3592_v55, %v10344_v45  ;;  %v7484_v43 = vpop.eup %7483  ;;  %v3557_v13 = vmul.f32 %v7482_v33, %v10652_v46  ;;  %v3442_v34 = vand.u32 2147483647, %v10583_v12  ;;  %vm3561_vm5 = vweird.f32 %v10652_v46 }
 0x48a   : > { %v3595_v45 = vmul.f32 %v7484_v43, %v10655_v31  ;;  %vm10695_vm6 = vcmp.eq.f32.partialorder %v3427_v20, 8.507059e+37  ;;  %v3620_v32 = vmul.f32 %v10669_v40, %v10643_v2  ;;  %v3605_v49 = vand.u32 2147483648, %v10655_v31 }
 0x48b   : > { %v10691_v0 = vadd.f32 %v3651_v18, %v3649_v54  ;;  %v3558_v5 = vsub.f32 1.0, %v3557_v13  ;;  %v3565_v35 = vand.u32 2147483647, %v10652_v46  ;;  %v7486_v51 = vpop.eup %7485  ;;  %v3567_v50 = vand.u32 2147483648, %v10652_v46 }
 0x48c   : > { %v3596_v1 = vsub.f32 1.0, %v3595_v45  ;;  %v3441_v23 = vsel %vm3440_vm7, %v10632_v36, %v3437_v25  ;;  %v3445_v48 = vor.u32 1.1754944e-38, %v3444_v17  ;;  %vm3562_vm8 = vweird.f32 %v7482_v33  ;;  %v7488_v11 = vpop.eup %7487 }
 0x48d   : > { %v3559_v19 = vmul.f32 %v7482_v33, %v3558_v5  ;;  %v3603_v39 = vand.u32 2147483647, %v10655_v31  ;;  %vm3443_vm9 = vcmp.eq.f32.partialorder %v3442_v34, 8.507059e+37  ;;  %vm3600_vm10 = vweird.f32 %v7484_v43  ;;  %vm3563_vm12 = vmor %vm3561_vm5, %vm3562_vm8 }
 0x48e   : > { %v3597_v20 = vmul.f32 %v7484_v43, %v3596_v1  ;;  %v3431_v12 = vsel %vm10695_vm6, %v10636_v7, %v3426_v59  ;;  %v3446_v55 = vsel %vm3443_vm9, %v3445_v48, %v3441_v23  ;;  %v10711_v18 = vpop.eup %7489  ;;  %v3621_v37 = vsub.f32 1.0, %v3620_v32 }
 0x48f   : > { %v3560_v54 = vadd.f32 %v7482_v33, %v3559_v19  ;;  %v3456_v13 = vmul.f32 %v7476_v60, %v3431_v12  ;;  %v3457_v36 = vmul.f32 %v7486_v51, %v3446_v55  ;;  %vm3599_vm11 = vweird.f32 %v10655_v31 }
 0x490   : > { %v3568_v17 = vor.u32 1.1754944e-38, %v3567_v50  ;;  %v3598_v25 = vadd.f32 %v7484_v43, %v3597_v20  ;;  %v3635_v34 = vmul.f32 %v10711_v18, %v10672_v47  ;;  %vm3601_vm13 = vmor %vm3599_vm11, %vm3600_vm10  ;;  %v3606_v45 = vor.u32 1.1754944e-38, %v3605_v49  ;;  %v13036_v50 = vld [vmem:[#allocation106_spill] sm:$0xff] }
 0x491   : > { %v3564_v7 = vsel %vm3563_vm12, %v7482_v33, %v3560_v54  ;;  %vm3566_vm14 = vcmp.eq.f32.partialorder %v3565_v35, 8.507059e+37  ;;  %v3660_v59 = vpack.c.bf16 %v3457_v36, %v3456_v13  ;;  %vm3604_vm15 = vcmp.eq.f32.partialorder %v3603_v39, 8.507059e+37  ;;  %v13016_v13 = vld [vmem:[#allocation40_spill] sm:$0xff]  ;;  %v13017_v36 = vld [vmem:[#allocation37_spill] sm:$0xff] }
 0x492   : > { %v3569_v6 = vsel %vm3566_vm14, %v3568_v17, %v3564_v7  ;;  %v3602_v32 = vsel %vm3601_vm13, %v7484_v43, %v3598_v25  ;;  %v3636_v60 = vsub.f32 1.0, %v3635_v34  ;;  %v3622_v5 = vmul.f32 %v10669_v40, %v3621_v37  ;;  %v13018_v17 = vld [vmem:[#allocation41_spill] sm:$0xff]  ;;  %v13019_v25 = vld [vmem:[#allocation42_spill] sm:$0xff] }
 0x493   : > { %v3607_v31 = vsel %vm3604_vm15, %v3606_v45, %v3602_v32  ;;  %v3652_v51 = vmul.f32 %v7488_v11, %v3569_v6  ;;  %3669 = vmatmul.bf16.vlgmr.msra.gmra.mxu0 %v3660_v59  ;;  %3683 = vmatmul.bf16.vlgmr.msra.gmra.mxu1 %v3660_v59  ;;  %7491 = vtanh.f32 %v10691_v0  ;;  %vm3625_vm0 = vweird.f32 %v10669_v40  ;;  %v13020_v34 = vld [vmem:[#allocation49_spill] sm:$0xff]  ;;  %v13021_v45 = vld [vmem:[#allocation46_spill] sm:$0xff]  ;;  %v13024_v6 = vld [vmem:[#allocation88_spill] sm:$0xff] }
 0x494   : > { %v3650_v46 = vmul.f32 %v3607_v31, %v10378_v3  ;;  %v3637_v1 = vmul.f32 %v10711_v18, %v3636_v60  ;;  %3697 = vmatmul.bf16.vlgmr.msra.gmra.mxu2 %v3660_v59  ;;  %3711 = vmatmul.bf16.vlgmr.msra.gmra.mxu3 %v3660_v59  ;;  %v3623_v3 = vadd.f32 %v10669_v40, %v3622_v5  ;;  %vm3640_vm1 = vweird.f32 %v10711_v18  ;;  %v13022_v7 = vld [vmem:[#allocation86_spill] sm:$0xff]  ;;  %v13023_v59 = vld [vmem:[#allocation87_spill] sm:$0xff]  ;;  %v13025_v32 = vld [vmem:[#allocation89_spill] sm:$0xff] }
 0x495   : > { %3918 = vmatpush.bf16.msra.mxu0 %v8488_v8  ;;  %3932 = vmatpush.bf16.msra.mxu1 %v8493_v10  ;;  %vm3624_vm2 = vweird.f32 %v10643_v2  ;;  %v3630_v49 = vand.u32 2147483648, %v10643_v2  ;;  %v3645_v35 = vand.u32 2147483648, %v10672_v47  ;;  %v3628_v23 = vand.u32 2147483647, %v10643_v2  ;;  %v13026_v60 = vld [vmem:[#allocation92_spill] sm:$0xff]  ;;  %v13027_v5 = vld [vmem:[#allocation93_spill] sm:$0xff] }
 0x496   : > { %v10725_v33 = vadd.f32 %v3652_v51, %v3650_v46  ;;  %3946 = vmatpush.bf16.msra.mxu2 %v8523_v22  ;;  %3960 = vmatpush.bf16.msra.mxu3 %v8505_v15  ;;  %v3638_v43 = vadd.f32 %v10711_v18, %v3637_v1  ;;  %vm10736_vm3 = vmor %vm3624_vm2, %vm3625_vm0  ;;  %vm3639_vm4 = vweird.f32 %v10672_v47  ;;  %v3643_v48 = vand.u32 2147483647, %v10672_v47  ;;  %v13028_v31 = vld [vmem:[#allocation94_spill] sm:$0xff]  ;;  %v13029_v51 = vld [vmem:[#allocation96_spill] sm:$0xff] }
 0x497   : > { %vm3641_vm5 = vmor %vm3639_vm4, %vm3640_vm1  ;;  %v3627_v19 = vsel %vm10736_vm3, %v10669_v40, %v3623_v3  ;;  %v3631_v11 = vor.u32 1.1754944e-38, %v3630_v49  ;;  %v3646_v20 = vor.u32 1.1754944e-38, %v3645_v35  ;;  %vm3629_vm6 = vcmp.eq.f32.partialorder %v3628_v23, 8.507059e+37  ;;  %v13030_v46 = vld [vmem:[#allocation97_spill] sm:$0xff]  ;;  %v13031_v1 = vld [vmem:[#allocation98_spill] sm:$0xff] }
 0x498   : > { %7493 = vtanh.f32 %v10725_v33  ;;  %v3642_v39 = vsel %vm3641_vm5, %v10711_v18, %v3638_v43  ;;  %vm3644_vm7 = vcmp.eq.f32.partialorder %v3643_v48, 8.507059e+37  ;;  %v13015_v18 = vld [vmem:[#allocation34_spill] sm:$0xff]  ;;  %v13032_v3 = vld [vmem:[#allocation99_spill] sm:$0xff]  ;;  %v13033_v43 = vld [vmem:[#allocation100_spill] sm:$0xff] }
 0x499   : > { %3919 = vmatpush.bf16.msra.mxu0 %v8536_v28  ;;  %3933 = vmatpush.bf16.msra.mxu1 %v8541_v30  ;;  %v7492_v2 = vpop.eup %7491  ;;  %v3632_v12 = vsel %vm3629_vm6, %v3631_v11, %v3627_v19  ;;  %v3647_v55 = vsel %vm3644_vm7, %v3646_v20, %v3642_v39  ;;  %v13034_v49 = vld [vmem:[#allocation103_spill] sm:$0xff]  ;;  %v13035_v35 = vld [vmem:[#allocation105_spill] sm:$0xff]  ;;  %v13038_v48 = vld [vmem:[#allocation108_spill] sm:$0xff] }
 0x49a   : > { %3947 = vmatpush.bf16.msra.mxu2 %v12806_v62  ;;  %3961 = vmatpush.bf16.msra.mxu3 %v12807_v42  ;;  %v3657_v37 = vmul.f32 %v7492_v2, %v3632_v12  ;;  %v13037_v23 = vld [vmem:[#allocation107_spill] sm:$0xff]  ;;  %v13039_v19 = vld [vmem:[#allocation109_spill] sm:$0xff]  ;;  %v13040_v39 = vld [vmem:[#allocation110_spill] sm:$0xff] }
 0x49b   : > { %v13041_v2 = vld [vmem:[#allocation111_spill] sm:$0xff]  ;;  %v13042_v11 = vld [vmem:[#allocation114_spill] sm:$0xff] }
 0x49c   : > { %v13043_v20 = vld [vmem:[#allocation115_spill] sm:$0xff]  ;;  %v13045_v12 = vld [vmem:[#allocation118_spill] sm:$0xff] }
 0x49d   : > { %3920 = vmatpush.bf16.msra.mxu0 %v12808_v24  ;;  %3934 = vmatpush.bf16.msra.mxu1 %v12809_v61 }
 0x49e   : > { %v7494_v47 = vpop.eup %7493  ;;  %3948 = vmatpush.bf16.msra.mxu2 %v12810_v9  ;;  %3962 = vmatpush.bf16.msra.mxu3 %v8611_v4 }
 0x49f   : > { %v3658_v40 = vmul.f32 %v7494_v47, %v3647_v55  ;;  %v13044_v47 = vld [vmem:[#allocation116_spill] sm:$0xff]  ;;  %v13046_v55 = vld [vmem:[#allocation119_spill] sm:$0xff] }
 0x4a1   : > { %v3659_v54 = vpack.c.bf16 %v3658_v40, %v3657_v37  ;;  %3921 = vmatpush.bf16.msra.mxu0 %v12811_v16  ;;  %3935 = vmatpush.bf16.msra.mxu1 %v12812_v63  ;;  %v13047_v37 = vld [vmem:[#allocation120_spill] sm:$0xff]  ;;  %v13048_v40 = vld [vmem:[#allocation121_spill] sm:$0xff] }
 0x4a2   : > { %3949 = vmatpush.bf16.msra.mxu2 %v12813_v41  ;;  %3963 = vmatpush.bf16.msra.mxu3 %v8663_v53 }
 0x4a3   : > { %3725 = vmatmul.bf16.vlgmr.msrb.gmra.mxu0 %v3659_v54  ;;  %3739 = vmatmul.bf16.vlgmr.msrb.gmra.mxu1 %v3659_v54 }
 0x4a4   : > { %3753 = vmatmul.bf16.vlgmr.msrb.gmra.mxu2 %v3659_v54  ;;  %3767 = vmatmul.bf16.vlgmr.msrb.gmra.mxu3 %v3659_v54 }
 0x4a5   : > { %3922 = vmatpush.bf16.msra.mxu0 %v8694_v21  ;;  %3936 = vmatpush.bf16.msra.mxu1 %v8699_v26 }
 0x4a6   : > { %3950 = vmatpush.bf16.msra.mxu2 %v8733_v14  ;;  %3964 = vmatpush.bf16.msra.mxu3 %v8715_v52 }
 0x4a9   : > { %3923 = vmatpush.bf16.msra.mxu0 %v8746_v27  ;;  %3937 = vmatpush.bf16.msra.mxu1 %v8751_v29 }
 0x4aa   : > { %3951 = vmatpush.bf16.msra.mxu2 %v8785_v38  ;;  %3965 = vmatpush.bf16.msra.mxu3 %v8767_v58 }
 0x4ad   : > { %3924 = vmatpush.bf16.msra.mxu0 %v8798_v57  ;;  %3938 = vmatpush.bf16.msra.mxu1 %v13015_v18 }
 0x4ae   : > { %3952 = vmatpush.bf16.msra.mxu2 %v13016_v13  ;;  %3966 = vmatpush.bf16.msra.mxu3 %v13017_v36 }
 0x4b1   : > { %3925 = vmatpush.bf16.msra.mxu0 %v13018_v17  ;;  %3939 = vmatpush.bf16.msra.mxu1 %v13019_v25  ;;  %v13104_v25 = vld [vmem:[#allocation36_spill] sm:$0xff] }
 0x4b2   : > { %3953 = vmatpush.bf16.msra.mxu2 %v13020_v34  ;;  %3967 = vmatpush.bf16.msra.mxu3 %v13021_v45 }
 0x4b4   : > { %3926 = vmatmul.bf16.vlgmr.msra.gmra.mxu0 %v3659_v54  ;;  %3940 = vmatmul.bf16.vlgmr.msra.gmra.mxu1 %v3659_v54 }
 0x4b5   : > { %4110 = vmatpush.bf16.msrb.mxu0 %v13022_v7  ;;  %4124 = vmatpush.bf16.msrb.mxu1 %v13023_v59 }
 0x4b6   : > { %3954 = vmatmul.bf16.vlgmr.msra.gmra.mxu2 %v3659_v54  ;;  %3968 = vmatmul.bf16.vlgmr.msra.gmra.mxu3 %v3659_v54  ;;  %v13049_v54 = vld [vmem:[#allocation122_spill] sm:$0xff] }
 0x4b7   : > { %4138 = vmatpush.bf16.msrb.mxu2 %v13024_v6  ;;  %4152 = vmatpush.bf16.msrb.mxu3 %v13025_v32  ;;  %v13088_v32 = vld [vmem:[#allocation172_spill] sm:$0xff] }
 0x4b9   : > { %4111 = vmatpush.bf16.msrb.mxu0 %v13026_v60  ;;  %4125 = vmatpush.bf16.msrb.mxu1 %v13027_v5 }
 0x4bb   : > { %4139 = vmatpush.bf16.msrb.mxu2 %v13028_v31  ;;  %4153 = vmatpush.bf16.msrb.mxu3 %v13029_v51 }
 0x4bd   : > { %4112 = vmatpush.bf16.msrb.mxu0 %v13030_v46  ;;  %4126 = vmatpush.bf16.msrb.mxu1 %v13031_v1 }
 0x4bf   : > { %4140 = vmatpush.bf16.msrb.mxu2 %v13032_v3  ;;  %4154 = vmatpush.bf16.msrb.mxu3 %v13033_v43  ;;  %v13086_v43 = vld [vmem:[#allocation170_spill] sm:$0xff]  ;;  %v13087_v3 = vld [vmem:[#allocation171_spill] sm:$0xff] }
 0x4c1   : > { %4113 = vmatpush.bf16.msrb.mxu0 %v13034_v49  ;;  %4127 = vmatpush.bf16.msrb.mxu1 %v13035_v35 }
 0x4c3   : > { %4141 = vmatpush.bf16.msrb.mxu2 %v13036_v50  ;;  %4155 = vmatpush.bf16.msrb.mxu3 %v13037_v23 }
 0x4c5   : > { %4114 = vmatpush.bf16.msrb.mxu0 %v13038_v48  ;;  %4128 = vmatpush.bf16.msrb.mxu1 %v13039_v19  ;;  %v13050_v19 = vld [vmem:[#allocation126_spill] sm:$0xff] }
 0x4c7   : > { %4142 = vmatpush.bf16.msrb.mxu2 %v13040_v39  ;;  %4156 = vmatpush.bf16.msrb.mxu3 %v13041_v2  ;;  %v13051_v39 = vld [vmem:[#allocation127_spill] sm:$0xff]  ;;  %v13052_v2 = vld [vmem:[#allocation130_spill] sm:$0xff] }
 0x4c9   : > { %4115 = vmatpush.bf16.msrb.mxu0 %v13042_v11  ;;  %4129 = vmatpush.bf16.msrb.mxu1 %v13043_v20  ;;  %v13053_v11 = vld [vmem:[#allocation131_spill] sm:$0xff]  ;;  %v13054_v20 = vld [vmem:[#allocation128_spill] sm:$0xff] }
 0x4cb   : > { %4143 = vmatpush.bf16.msrb.mxu2 %v13044_v47  ;;  %4157 = vmatpush.bf16.msrb.mxu3 %v13045_v12  ;;  %v13055_v47 = vld [vmem:[#allocation129_spill] sm:$0xff] }
 0x4cc   : > { %v13056_v12 = vld [vmem:[#allocation133_spill] sm:$0xff] }
 0x4cd   : > { %4116 = vmatpush.bf16.msrb.mxu0 %v13046_v55  ;;  %4130 = vmatpush.bf16.msrb.mxu1 %v13047_v37  ;;  %v13057_v55 = vld [vmem:[#allocation135_spill] sm:$0xff]  ;;  %v13058_v37 = vld [vmem:[#allocation136_spill] sm:$0xff] }
 0x4cf   : > { %4144 = vmatpush.bf16.msrb.mxu2 %v13048_v40  ;;  %4158 = vmatpush.bf16.msrb.mxu3 %v13049_v54  ;;  %v13059_v40 = vld [vmem:[#allocation138_spill] sm:$0xff]  ;;  %v13060_v54 = vld [vmem:[#allocation139_spill] sm:$0xff] }
 0x4d1   : > { %4117 = vmatpush.bf16.msrb.mxu0 %v13050_v19  ;;  %4131 = vmatpush.bf16.msrb.mxu1 %v13051_v39  ;;  %v13061_v19 = vld [vmem:[#allocation140_spill] sm:$0xff]  ;;  %v13062_v39 = vld [vmem:[#allocation141_spill] sm:$0xff] }
 0x4d3   : > { %4145 = vmatpush.bf16.msrb.mxu2 %v13054_v20  ;;  %4159 = vmatpush.bf16.msrb.mxu3 %v13055_v47  ;;  %v13065_v20 = vld [vmem:[#allocation145_spill] sm:$0xff]  ;;  %v13066_v47 = vld [vmem:[#allocation148_spill] sm:$0xff] }
 0x4d5   : > { %4166 = vmatpush.bf16.msra.mxu0 %v13052_v2  ;;  %4180 = vmatpush.bf16.msra.mxu1 %v13053_v11  ;;  %v13063_v2 = vld [vmem:[#allocation142_spill] sm:$0xff]  ;;  %v13064_v11 = vld [vmem:[#allocation143_spill] sm:$0xff] }
 0x4d7   : > { %4194 = vmatpush.bf16.msra.mxu2 %v13056_v12  ;;  %4208 = vmatpush.bf16.msra.mxu3 %v13057_v55  ;;  %v13067_v12 = vld [vmem:[#allocation149_spill] sm:$0xff]  ;;  %v13068_v55 = vld [vmem:[#allocation150_spill] sm:$0xff] }
 0x4d9   : > { %4167 = vmatpush.bf16.msra.mxu0 %v13058_v37  ;;  %4181 = vmatpush.bf16.msra.mxu1 %v13059_v40  ;;  %v13069_v37 = vld [vmem:[#allocation151_spill] sm:$0xff]  ;;  %v13070_v40 = vld [vmem:[#allocation152_spill] sm:$0xff] }
 0x4db   : > { %4195 = vmatpush.bf16.msra.mxu2 %v13060_v54  ;;  %4209 = vmatpush.bf16.msra.mxu3 %v13061_v19  ;;  %v13071_v54 = vld [vmem:[#allocation153_spill] sm:$0xff]  ;;  %v13072_v19 = vld [vmem:[#allocation154_spill] sm:$0xff] }
 0x4dd   : > { %4168 = vmatpush.bf16.msra.mxu0 %v13062_v39  ;;  %4182 = vmatpush.bf16.msra.mxu1 %v13063_v2  ;;  %v13073_v39 = vld [vmem:[#allocation156_spill] sm:$0xff]  ;;  %v13074_v2 = vld [vmem:[#allocation157_spill] sm:$0xff] }
 0x4df   : > { %4196 = vmatpush.bf16.msra.mxu2 %v13064_v11  ;;  %4210 = vmatpush.bf16.msra.mxu3 %v13065_v20  ;;  %v13075_v11 = vld [vmem:[#allocation158_spill] sm:$0xff]  ;;  %v13076_v20 = vld [vmem:[#allocation159_spill] sm:$0xff] }
 0x4e1   : > { %4169 = vmatpush.bf16.msra.mxu0 %v13066_v47  ;;  %4183 = vmatpush.bf16.msra.mxu1 %v13067_v12  ;;  %v13077_v47 = vld [vmem:[#allocation160_spill] sm:$0xff]  ;;  %v13078_v12 = vld [vmem:[#allocation162_spill] sm:$0xff] }
 0x4e3   : > { %4197 = vmatpush.bf16.msra.mxu2 %v13068_v55  ;;  %4211 = vmatpush.bf16.msra.mxu3 %v13069_v37  ;;  %v13079_v55 = vld [vmem:[#allocation163_spill] sm:$0xff]  ;;  %v13080_v37 = vld [vmem:[#allocation164_spill] sm:$0xff] }
 0x4e5   : > { %4170 = vmatpush.bf16.msra.mxu0 %v13070_v40  ;;  %4184 = vmatpush.bf16.msra.mxu1 %v13071_v54  ;;  %v13081_v40 = vld [vmem:[#allocation165_spill] sm:$0xff]  ;;  %v13082_v54 = vld [vmem:[#allocation166_spill] sm:$0xff] }
 0x4e7   : > { %4198 = vmatpush.bf16.msra.mxu2 %v13072_v19  ;;  %4212 = vmatpush.bf16.msra.mxu3 %v13073_v39  ;;  %v13083_v19 = vld [vmem:[#allocation167_spill] sm:$0xff]  ;;  %v13084_v39 = vld [vmem:[#allocation168_spill] sm:$0xff] }
 0x4e9   : > { %4171 = vmatpush.bf16.msra.mxu0 %v13074_v2  ;;  %4185 = vmatpush.bf16.msra.mxu1 %v13075_v11  ;;  %v13085_v2 = vld [vmem:[#allocation169_spill] sm:$0xff] }
 0x4eb   : > { %4199 = vmatpush.bf16.msra.mxu2 %v13076_v20  ;;  %4213 = vmatpush.bf16.msra.mxu3 %v13077_v47 }
 0x4ed   : > { %4172 = vmatpush.bf16.msra.mxu0 %v13078_v12  ;;  %4186 = vmatpush.bf16.msra.mxu1 %v13079_v55 }
 0x4ef   : > { %4200 = vmatpush.bf16.msra.mxu2 %v13080_v37  ;;  %4214 = vmatpush.bf16.msra.mxu3 %v13081_v40 }
 0x4f1   : > { %4173 = vmatpush.bf16.msra.mxu0 %v13082_v54  ;;  %4187 = vmatpush.bf16.msra.mxu1 %v13083_v19 }
 0x4f3   : > { %4201 = vmatpush.bf16.msra.mxu2 %v13084_v39  ;;  %4215 = vmatpush.bf16.msra.mxu3 %v13085_v2 }
 0x510   : > { %v3670_v11 = vpop.f32.mrf.mxu0  ;;  %v3684_v20 = vpop.f32.mrf.mxu1 }
 0x517   : > { %v3698_v48 = vpop.f32.mrf.mxu2  ;;  %v3712_v47 = vpop.f32.mrf.mxu3 }
 0x518   : > { %v3672_v23 = vpop.f32.mrf.mxu0  ;;  %v3686_v12 = vpop.f32.mrf.mxu1 }
 0x51f   : > { %v3714_v50 = vpop.f32.mrf.mxu3  ;;  %v3700_v40 = vpop.f32.mrf.mxu2 }
 0x520   : > { %v3726_v55 = vpop.f32.mrf.mxu0  ;;  %v3740_v35 = vpop.f32.mrf.mxu1 }
 0x521   : > { %v3727_v37 = vadd.f32 %v3726_v55, %v3670_v11  ;;  %v3741_v49 = vadd.f32 %v3740_v35, %v3684_v20 }
 0x523   : > { %v3773_v54 = vadd.f32 %v3727_v37, %v13086_v43  ;;  %v3774_v19 = vadd.f32 %v3741_v49, %v13087_v3 }
 0x525   : > { %v6859_v1 = vmul.f32 -1.442695, %v3773_v54  ;;  %v6861_v39 = vmul.f32 -1.442695, %v3774_v19 }
 0x527   : > { %7495 = vpow2.f32 %v6859_v1  ;;  %v3768_v2 = vpop.f32.mrf.mxu3  ;;  %v3754_v20 = vpop.f32.mrf.mxu2 }
 0x528   : > { %7497 = vpow2.f32 %v6861_v39  ;;  %v3769_v46 = vadd.f32 %v3768_v2, %v3712_v47  ;;  %v3728_v51 = vpop.f32.mrf.mxu0  ;;  %v3742_v31 = vpop.f32.mrf.mxu1  ;;  %v3755_v47 = vadd.f32 %v3754_v20, %v3698_v48 }
 0x529   : > { %v3729_v5 = vadd.f32 %v3728_v51, %v3672_v23  ;;  %v3743_v60 = vadd.f32 %v3742_v31, %v3686_v12 }
 0x52a   : > { %v3776_v6 = vadd.f32 %v3769_v46, %v13088_v32 }
 0x52b   : > { %v3777_v11 = vadd.f32 %v3729_v5, %v13086_v43  ;;  %v3778_v35 = vadd.f32 %v3743_v60, %v13087_v3  ;;  %v13089_v5 = vld [vmem:[#allocation63_spill] sm:$0xff]  ;;  %v13090_v60 = vld [vmem:[#allocation90_spill] sm:$0xff]  ;;  %v13094_v3 = vld [vmem:[#allocation68_spill] sm:$0xff] }
 0x52c   : > { %v6863_v55 = vmul.f32 -1.442695, %v3776_v6  ;;  %v1386_v51 = vadd.f32 %v13090_v60, %v13089_v5  ;;  %v3775_v43 = vadd.f32 %v3755_v47, %v13094_v3 }
 0x52d   : > { %v7496_v37 = vpop.eup %7495  ;;  %v6860_v49 = vmul.f32 -1.442695, %v3777_v11  ;;  %v6862_v1 = vmul.f32 -1.442695, %v3778_v35 }
 0x52e   : > { %v7498_v54 = vpop.eup %7497  ;;  %v10844_v19 = vadd.f32 1.0, %v7496_v37  ;;  %7499 = vpow2.f32 %v6863_v55 }
 0x52f   : > { %v10846_v39 = vadd.f32 1.0, %v7498_v54  ;;  %7501 = vpow2.f32 %v6860_v49  ;;  %v3770_v31 = vpop.f32.mrf.mxu3  ;;  %v3756_v55 = vpop.f32.mrf.mxu2  ;;  %v13091_v54 = vld [vmem:[#allocation91_spill] sm:$0xff] }
 0x530   : > { %7503 = vrcp.f32 %v10844_v19  ;;  %v3771_v6 = vadd.f32 %v3770_v31, %v3714_v50  ;;  %v13092_v31 = vld [vmem:[#allocation32_spill] sm:$0xff]  ;;  %v3798_v7 = vand.u32 2147483647, %v10844_v19  ;;  %vm3794_vm10 = vweird.f32 %v10844_v19 }
 0x531   : > { %7505 = vrcp.f32 %v10846_v39  ;;  %v3927_v23 = vpop.f32.mrf.mxu0  ;;  %v3941_v12 = vpop.f32.mrf.mxu1  ;;  %v3838_v45 = vand.u32 2147483648, %v10846_v39  ;;  %vm3832_vm11 = vweird.f32 %v10846_v39 }
 0x532   : > { %7507 = vpow2.f32 %v6862_v1  ;;  %v3780_v37 = vadd.f32 %v3771_v6, %v13088_v32  ;;  %v10860_v1 = vadd.f32 %v13091_v54, %v1386_v51  ;;  %v3974_v60 = vadd.f32 %v3927_v23, %v13092_v31 }
 0x533   : > { %v3757_v54 = vadd.f32 %v3756_v55, %v3700_v40  ;;  %v3800_v23 = vand.u32 2147483648, %v10844_v19  ;;  %v3836_v55 = vand.u32 2147483647, %v10846_v39  ;;  %vm10895_vm13 = vcmp.eq.f32.partialorder %v3798_v7, 8.507059e+37 }
 0x534   : > { %v7500_v46 = vpop.eup %7499  ;;  %v6864_v31 = vmul.f32 -1.442695, %v3780_v37  ;;  %v6865_v34 = vmul.f32 -1.442695, %v3974_v60 }
 0x535   : > { %v7502_v2 = vpop.eup %7501  ;;  %v10867_v20 = vadd.f32 1.0, %v7500_v46  ;;  %v3779_v37 = vadd.f32 %v3757_v54, %v13094_v3  ;;  %vm10910_vm15 = vcmp.eq.f32.partialorder %v3836_v55, 8.507059e+37 }
 0x536   : > { %v10852_v11 = vpop.eup %7503  ;;  %v10854_v35 = vadd.f32 1.0, %v7502_v2  ;;  %v13093_v2 = vld [vmem:[#allocation35_spill] sm:$0xff] }
 0x537   : > { %v10857_v49 = vpop.eup %7505  ;;  %v3790_v50 = vmul.f32 %v10852_v11, %v10844_v19  ;;  %v3975_v6 = vadd.f32 %v3941_v12, %v13093_v2  ;;  %vm3795_vm8 = vweird.f32 %v10852_v11  ;;  %v3839_v2 = vor.u32 1.1754944e-38, %v3838_v45 }
 0x538   : > { %v7508_v5 = vpop.eup %7507  ;;  %v3828_v48 = vmul.f32 %v10857_v49, %v10846_v39  ;;  %7509 = vrcp.f32 %v10854_v35  ;;  %vm3833_vm9 = vweird.f32 %v10857_v49  ;;  %vm10891_vm12 = vmor %vm3794_vm10, %vm3795_vm8  ;;  %vm3809_vm0 = vweird.f32 %v10854_v35 }
 0x539   : > { %v3791_v32 = vsub.f32 1.0, %v3790_v50  ;;  %v10872_v51 = vadd.f32 1.0, %v7508_v5  ;;  %v6867_v40 = vmul.f32 -1.442695, %v3975_v6  ;;  %v3969_v5 = vpop.f32.mrf.mxu3  ;;  %vm10906_vm14 = vmor %vm3832_vm11, %vm3833_vm9  ;;  %vm3872_vm9 = vweird.f32 %v10867_v20 }
 0x53a   : > { %v3829_v59 = vsub.f32 1.0, %v3828_v48 }
 0x53b   : > { %v3792_v46 = vmul.f32 %v10852_v11, %v3791_v32  ;;  %7511 = vrcp.f32 %v10872_v51  ;;  %vm3847_vm1 = vweird.f32 %v10872_v51  ;;  %v13103_v32 = vld [vmem:[#allocation85_spill] sm:$0xff]  ;;  %v3853_v6 = vand.u32 2147483648, %v10872_v51 }
 0x53c   : > { %v3830_v12 = vmul.f32 %v10857_v49, %v3829_v59  ;;  %7513 = vrcp.f32 %v10867_v20 }
 0x53d   : > { %v3793_v47 = vadd.f32 %v10852_v11, %v3792_v46  ;;  %7515 = vpow2.f32 %v6864_v31  ;;  %v3813_v31 = vand.u32 2147483647, %v10854_v35  ;;  %v3815_v46 = vand.u32 2147483648, %v10854_v35 }
 0x53e   : > { %v10885_v50 = vpop.eup %7509  ;;  %v3831_v59 = vadd.f32 %v10857_v49, %v3830_v12  ;;  %7517 = vtanh.f32 %v3775_v43  ;;  %v3801_v43 = vor.u32 1.1754944e-38, %v3800_v23  ;;  %v3943_v12 = vpop.f32.mrf.mxu1 }
 0x53f   : > { %v3805_v48 = vmul.f32 %v10885_v50, %v10854_v35  ;;  %7519 = vpow2.f32 %v6865_v34  ;;  %v3797_v19 = vsel %vm10891_vm12, %v10852_v11, %v3793_v47  ;;  %v3929_v34 = vpop.f32.mrf.mxu0  ;;  %vm3810_vm3 = vweird.f32 %v10885_v50 }
 0x540   : > { %7521 = vpow2.f32 %v6867_v40  ;;  %v3835_v11 = vsel %vm10906_vm14, %v10857_v49, %v3831_v59  ;;  %v3802_v47 = vsel %vm10895_vm13, %v3801_v43, %v3797_v19  ;;  %v3978_v17 = vadd.f32 %v3929_v34, %v13104_v25  ;;  %vm10951_vm4 = vmor %vm3809_vm0, %vm3810_vm3 }
 0x541   : > { %v10904_v39 = vpop.eup %7511  ;;  %v3806_v54 = vsub.f32 1.0, %v3805_v48  ;;  %7523 = vtanh.f32 %v3779_v37  ;;  %v3955_v37 = vpop.f32.mrf.mxu2  ;;  %v3977_v48 = vadd.f32 %v3969_v5, %v13103_v32  ;;  %v3840_v60 = vsel %vm10910_vm15, %v3839_v2, %v3835_v11 }
 0x542   : > { %v10915_v45 = vpop.eup %7513  ;;  %v3843_v23 = vmul.f32 %v10904_v39, %v10872_v51  ;;  %vm3848_vm2 = vweird.f32 %v10904_v39  ;;  %v3897_v11 = vmul.f32 %v3840_v60, %v10630_v44  ;;  %v13112_v60 = vld [vmem:[#allocation82_spill] sm:$0xff]  ;;  %vm3814_vm6 = vcmp.eq.f32.partialorder %v3813_v31, 8.507059e+37 }
 0x543   : > { %v7516_v40 = vpop.eup %7515  ;;  %v3807_v55 = vmul.f32 %v10885_v50, %v3806_v54  ;;  %v3868_v19 = vmul.f32 %v10915_v45, %v10867_v20  ;;  %v6869_v43 = vmul.f32 -1.442695, %v3977_v48  ;;  %v13105_v54 = vld [vmem:[#allocation38_spill] sm:$0xff]  ;;  %v13108_v48 = vld [vmem:[#allocation60_spill] sm:$0xff]  ;;  %vm10965_vm5 = vmor %vm3847_vm1, %vm3848_vm2  ;;  %vm3873_vm8 = vweird.f32 %v10915_v45 }
 0x544   : > { %v7518_v49 = vpop.eup %7517  ;;  %v3844_v59 = vsub.f32 1.0, %v3843_v23  ;;  %v10930_v3 = vadd.f32 1.0, %v7516_v40  ;;  %v3979_v13 = vadd.f32 %v3943_v12, %v13105_v54  ;;  %v3971_v40 = vpop.f32.mrf.mxu3  ;;  %vm11025_vm3 = vmor %vm3872_vm9, %vm3873_vm8 }
 0x545   : > { %v7520_v36 = vpop.eup %7519  ;;  %v3899_v5 = vmul.f32 %v7518_v49, %v3802_v47  ;;  %v3808_v34 = vadd.f32 %v10885_v50, %v3807_v55  ;;  %v6866_v47 = vmul.f32 -1.442695, %v3978_v17  ;;  %v3851_v55 = vand.u32 2147483647, %v10872_v51  ;;  %v13109_v49 = vld [vmem:[#allocation83_spill] sm:$0xff] }
 0x546   : > { %v7522_v18 = vpop.eup %7521  ;;  %v3845_v23 = vmul.f32 %v10904_v39, %v3844_v59  ;;  %7525 = vrcp.f32 %v10930_v3  ;;  %v10943_v2 = vadd.f32 1.0, %v7520_v36  ;;  %v6868_v36 = vmul.f32 -1.442695, %v3979_v13 }
 0x547   : > { %v7524_v25 = vpop.eup %7523  ;;  %v10945_v7 = vadd.f32 1.0, %v7522_v18  ;;  %7527 = vpow2.f32 %v6869_v43  ;;  %v3981_v18 = vadd.f32 %v3971_v40, %v10860_v1  ;;  %v1288_v44 = vadd.f32 %v13109_v49, %v13108_v48 }
 0x548   : > { %v3846_v12 = vadd.f32 %v10904_v39, %v3845_v23  ;;  %7529 = vrcp.f32 %v10943_v2  ;;  %v3878_v59 = vand.u32 2147483648, %v10867_v20  ;;  %v3869_v35 = vsub.f32 1.0, %v3868_v19 }
 0x549   : > { %7531 = vrcp.f32 %v10945_v7  ;;  %v3812_v13 = vsel %vm10951_vm4, %v10885_v50, %v3808_v34  ;;  %v3976_v43 = vadd.f32 %v3955_v37, %v13112_v60  ;;  %v10977_v54 = vadd.f32 %v3899_v5, %v3897_v11  ;;  %v3957_v19 = vpop.f32.mrf.mxu2  ;;  %v13113_v50 = vld [vmem:[#allocation84_spill] sm:$0xff] }
 0x54a   : > { %v3850_v1 = vsel %vm10965_vm5, %v10904_v39, %v3846_v12  ;;  %v3854_v51 = vor.u32 1.1754944e-38, %v3853_v6  ;;  %v3816_v23 = vor.u32 1.1754944e-38, %v3815_v46  ;;  %7533 = vpow2.f32 %v6866_v47 }
 0x54b   : > { %vm3852_vm7 = vcmp.eq.f32.partialorder %v3851_v55, 8.507059e+37  ;;  %7535 = vpow2.f32 %v6868_v36  ;;  %v6870_v49 = vmul.f32 -1.442695, %v3981_v18  ;;  %v1337_v34 = vadd.f32 %v13113_v50, %v1288_v44 }
 0x54c   : > { %v10979_v40 = vpop.eup %7525  ;;  %v3817_v48 = vsel %vm3814_vm6, %v3816_v23, %v3812_v13  ;;  %v3855_v17 = vsel %vm3852_vm7, %v3854_v51, %v3850_v1  ;;  %v3870_v37 = vmul.f32 %v10915_v45, %v3869_v35  ;;  %v10983_v5 = vor.u32 1.1754944e-38, %v3878_v59 }
 0x54d   : > { %v7528_v32 = vpop.eup %7527  ;;  %v3883_v46 = vmul.f32 %v10979_v40, %v10930_v3  ;;  %7537 = vtanh.f32 %v3976_v43  ;;  %v3980_v12 = vadd.f32 %v3957_v19, %v1337_v34  ;;  %v3898_v47 = vmul.f32 %v3855_v17, %v10657_v56 }
 0x54e   : > { %v7530_v39 = vpop.eup %7529  ;;  %7539 = vtanh.f32 %v10977_v54  ;;  %v10990_v11 = vadd.f32 1.0, %v7528_v32  ;;  %v3900_v55 = vmul.f32 %v7524_v25, %v3817_v48  ;;  %v4039_v59 = vand.u32 2147483648, %v10945_v7 }
 0x54f   : > { %v7532_v6 = vpop.eup %7531  ;;  %v3991_v31 = vmul.f32 %v7530_v39, %v10943_v2  ;;  %7541 = vpow2.f32 %v6870_v49  ;;  %v3999_v35 = vand.u32 2147483647, %v10943_v2  ;;  %v4001_v13 = vand.u32 2147483648, %v10943_v2 }
 0x550   : > { %v4029_v36 = vmul.f32 %v7532_v6, %v10945_v7  ;;  %v7534_v18 = vpop.eup %7533  ;;  %v3884_v60 = vsub.f32 1.0, %v3883_v46  ;;  %v4037_v51 = vand.u32 2147483647, %v10945_v7  ;;  %vm3996_vm10 = vweird.f32 %v7530_v39 }
 0x551   : > { %v3992_v44 = vsub.f32 1.0, %v3991_v31  ;;  %v7536_v1 = vpop.eup %7535  ;;  %v10999_v56 = vadd.f32 1.0, %v7534_v18  ;;  %7543 = vrcp.f32 %v10990_v11  ;;  %v11004_v19 = vadd.f32 %v3900_v55, %v3898_v47 }
 0x552   : > { %v4030_v43 = vsub.f32 1.0, %v4029_v36  ;;  %v11002_v48 = vadd.f32 1.0, %v7536_v1  ;;  %vm3887_vm11 = vweird.f32 %v10930_v3  ;;  %vm4034_vm12 = vweird.f32 %v7532_v6 }
 0x553   : > { %v3993_v25 = vmul.f32 %v7530_v39, %v3992_v44  ;;  %v7538_v23 = vpop.eup %7537  ;;  %7545 = vrcp.f32 %v10999_v56  ;;  %vm4033_vm13 = vweird.f32 %v10945_v7  ;;  %vm3995_vm14 = vweird.f32 %v10943_v2 }
 0x554   : > { %v4031_v49 = vmul.f32 %v7532_v6, %v4030_v43  ;;  %v7540_v32 = vpop.eup %7539  ;;  %7547 = vrcp.f32 %v11002_v48  ;;  %v3885_v17 = vmul.f32 %v10979_v40, %v3884_v60  ;;  %v4040_v46 = vor.u32 1.1754944e-38, %v4039_v59  ;;  %vm3997_vm15 = vmor %vm3995_vm14, %vm3996_vm10 }
 0x555   : > { %v3994_v50 = vadd.f32 %v7530_v39, %v3993_v25  ;;  %v7542_v34 = vpop.eup %7541  ;;  %v4002_v31 = vor.u32 1.1754944e-38, %v4001_v13  ;;  %vm4035_vm0 = vmor %vm4033_vm13, %vm4034_vm12  ;;  %vm4000_vm1 = vcmp.eq.f32.partialorder %v3999_v35, 8.507059e+37  ;;  %vm4038_vm2 = vcmp.eq.f32.partialorder %v4037_v51, 8.507059e+37 }
 0x556   : > { %v4032_v47 = vadd.f32 %v7532_v6, %v4031_v49  ;;  %v3871_v36 = vadd.f32 %v10915_v45, %v3870_v37  ;;  %7549 = vtanh.f32 %v11004_v19  ;;  %v3876_v18 = vand.u32 2147483647, %v10867_v20 }
 0x557   : > { %v3998_v55 = vsel %vm3997_vm15, %v7530_v39, %v3994_v50  ;;  %v11016_v44 = vpop.eup %7543  ;;  %v3893_v59 = vand.u32 2147483648, %v10930_v3  ;;  %v11019_v13 = vadd.f32 1.0, %v7542_v34  ;;  %7551 = vtanh.f32 %v3980_v12 }
 0x558   : > { %v4003_v7 = vsel %vm4000_vm1, %v4002_v31, %v3998_v55  ;;  %v4036_v2 = vsel %vm4035_vm0, %v7532_v6, %v4032_v47  ;;  %v3886_v6 = vadd.f32 %v10979_v40, %v3885_v17  ;;  %vm3888_vm4 = vweird.f32 %v10979_v40 }
 0x559   : > { %v4041_v1 = vsel %vm4038_vm2, %v4040_v46, %v4036_v2  ;;  %v4100_v60 = vmul.f32 %v7538_v23, %v4003_v7  ;;  %v7546_v43 = vpop.eup %7545  ;;  %7553 = vrcp.f32 %v11019_v13  ;;  %v3875_v20 = vsel %vm11025_vm3, %v10915_v45, %v3871_v36  ;;  %vm3889_vm7 = vmor %vm3887_vm11, %vm3888_vm4 }
 0x55a   : > { %v4098_v37 = vmul.f32 %v4041_v1, %v10691_v0  ;;  %v7548_v35 = vpop.eup %7547  ;;  %v4006_v51 = vmul.f32 %v7546_v43, %v10999_v56  ;;  %v3891_v25 = vand.u32 2147483647, %v10930_v3  ;;  %vm4010_vm5 = vweird.f32 %v10999_v56 }
 0x55b   : > { %v4044_v0 = vmul.f32 %v7548_v35, %v11002_v48  ;;  %vm11042_vm6 = vcmp.eq.f32.partialorder %v3876_v18, 8.507059e+37  ;;  %v4069_v49 = vmul.f32 %v11016_v44, %v10990_v11  ;;  %v4054_v34 = vand.u32 2147483648, %v11002_v48 }
 0x55c   : > { %v11038_v23 = vadd.f32 %v4100_v60, %v4098_v37  ;;  %v4007_v50 = vsub.f32 1.0, %v4006_v51  ;;  %v4014_v45 = vand.u32 2147483647, %v10999_v56  ;;  %v7550_v17 = vpop.eup %7549  ;;  %v4016_v31 = vand.u32 2147483648, %v10999_v56 }
 0x55d   : > { %v4045_v46 = vsub.f32 1.0, %v4044_v0  ;;  %v3890_v47 = vsel %vm3889_vm7, %v10979_v40, %v3886_v6  ;;  %v3894_v55 = vor.u32 1.1754944e-38, %v3893_v59  ;;  %vm4011_vm8 = vweird.f32 %v7546_v43  ;;  %v7552_v2 = vpop.eup %7551 }
 0x55e   : > { %v4008_v36 = vmul.f32 %v7546_v43, %v4007_v50  ;;  %v4052_v7 = vand.u32 2147483647, %v11002_v48  ;;  %vm3892_vm9 = vcmp.eq.f32.partialorder %v3891_v25, 8.507059e+37  ;;  %vm4049_vm10 = vweird.f32 %v7548_v35  ;;  %vm4012_vm12 = vmor %vm4010_vm5, %vm4011_vm8 }
 0x55f   : > { %v4046_v18 = vmul.f32 %v7548_v35, %v4045_v46  ;;  %v3880_v3 = vsel %vm11042_vm6, %v10983_v5, %v3875_v20  ;;  %v3895_v1 = vsel %vm3892_vm9, %v3894_v55, %v3890_v47  ;;  %v11058_v60 = vpop.eup %7553  ;;  %v4070_v39 = vsub.f32 1.0, %v4069_v49 }
 0x560   : > { %v4009_v37 = vadd.f32 %v7546_v43, %v4008_v36  ;;  %v3905_v51 = vmul.f32 %v7540_v32, %v3880_v3  ;;  %v3906_v40 = vmul.f32 %v7550_v17, %v3895_v1  ;;  %vm4048_vm11 = vweird.f32 %v11002_v48 }
 0x561   : > { %v4017_v59 = vor.u32 1.1754944e-38, %v4016_v31  ;;  %v4047_v6 = vadd.f32 %v7548_v35, %v4046_v18  ;;  %v4084_v25 = vmul.f32 %v11058_v60, %v11019_v13  ;;  %vm4050_vm13 = vmor %vm4048_vm11, %vm4049_vm10  ;;  %v4055_v0 = vor.u32 1.1754944e-38, %v4054_v34  ;;  %v13141_v31 = vld [vmem:[#allocation106_spill] sm:$0xff] }
 0x562   : > { %v4013_v5 = vsel %vm4012_vm12, %v7546_v43, %v4009_v37  ;;  %vm4015_vm14 = vcmp.eq.f32.partialorder %v4014_v45, 8.507059e+37  ;;  %v4109_v20 = vpack.c.bf16 %v3906_v40, %v3905_v51  ;;  %vm4053_vm15 = vcmp.eq.f32.partialorder %v4052_v7, 8.507059e+37  ;;  %v13121_v51 = vld [vmem:[#allocation40_spill] sm:$0xff]  ;;  %v13122_v40 = vld [vmem:[#allocation37_spill] sm:$0xff] }
 0x563   : > { %v4018_v12 = vsel %vm4015_vm14, %v4017_v59, %v4013_v5  ;;  %v4051_v49 = vsel %vm4050_vm13, %v7548_v35, %v4047_v6  ;;  %v4085_v32 = vsub.f32 1.0, %v4084_v25  ;;  %v4071_v50 = vmul.f32 %v11016_v44, %v4070_v39  ;;  %v13123_v59 = vld [vmem:[#allocation41_spill] sm:$0xff]  ;;  %v13124_v6 = vld [vmem:[#allocation42_spill] sm:$0xff] }
 0x564   : > { %v4056_v48 = vsel %vm4053_vm15, %v4055_v0, %v4051_v49  ;;  %v4101_v17 = vmul.f32 %v7552_v2, %v4018_v12  ;;  %4118 = vmatmul.bf16.vlgmr.msrb.gmra.mxu0 %v4109_v20  ;;  %4132 = vmatmul.bf16.vlgmr.msrb.gmra.mxu1 %v4109_v20  ;;  %7555 = vtanh.f32 %v11038_v23  ;;  %vm4074_vm0 = vweird.f32 %v11016_v44  ;;  %v13125_v25 = vld [vmem:[#allocation49_spill] sm:$0xff]  ;;  %v13126_v0 = vld [vmem:[#allocation46_spill] sm:$0xff]  ;;  %v13129_v12 = vld [vmem:[#allocation88_spill] sm:$0xff] }
 0x565   : > { %v4099_v56 = vmul.f32 %v4056_v48, %v10725_v33  ;;  %v4086_v46 = vmul.f32 %v11058_v60, %v4085_v32  ;;  %4146 = vmatmul.bf16.vlgmr.msrb.gmra.mxu2 %v4109_v20  ;;  %4160 = vmatmul.bf16.vlgmr.msrb.gmra.mxu3 %v4109_v20  ;;  %v4072_v33 = vadd.f32 %v11016_v44, %v4071_v50  ;;  %vm4089_vm1 = vweird.f32 %v11058_v60  ;;  %v13127_v5 = vld [vmem:[#allocation86_spill] sm:$0xff]  ;;  %v13128_v20 = vld [vmem:[#allocation87_spill] sm:$0xff]  ;;  %v13130_v49 = vld [vmem:[#allocation89_spill] sm:$0xff] }
 0x566   : > { %4367 = vmatpush.bf16.msrb.mxu0 %v8488_v8  ;;  %4381 = vmatpush.bf16.msrb.mxu1 %v8493_v10  ;;  %vm4073_vm2 = vweird.f32 %v10990_v11  ;;  %v4079_v34 = vand.u32 2147483648, %v10990_v11  ;;  %v4094_v45 = vand.u32 2147483648, %v11019_v13  ;;  %v4077_v47 = vand.u32 2147483647, %v10990_v11  ;;  %v13131_v32 = vld [vmem:[#allocation92_spill] sm:$0xff]  ;;  %v13132_v50 = vld [vmem:[#allocation93_spill] sm:$0xff] }
 0x567   : > { %v11072_v43 = vadd.f32 %v4101_v17, %v4099_v56  ;;  %4395 = vmatpush.bf16.msrb.mxu2 %v8523_v22  ;;  %4409 = vmatpush.bf16.msrb.mxu3 %v8505_v15  ;;  %v4087_v35 = vadd.f32 %v11058_v60, %v4086_v46  ;;  %vm11083_vm3 = vmor %vm4073_vm2, %vm4074_vm0  ;;  %vm4088_vm4 = vweird.f32 %v11019_v13  ;;  %v4092_v55 = vand.u32 2147483647, %v11019_v13  ;;  %v13133_v48 = vld [vmem:[#allocation94_spill] sm:$0xff]  ;;  %v13134_v17 = vld [vmem:[#allocation96_spill] sm:$0xff] }
 0x568   : > { %vm4090_vm5 = vmor %vm4088_vm4, %vm4089_vm1  ;;  %v4076_v36 = vsel %vm11083_vm3, %v11016_v44, %v4072_v33  ;;  %v4080_v2 = vor.u32 1.1754944e-38, %v4079_v34  ;;  %v4095_v18 = vor.u32 1.1754944e-38, %v4094_v45  ;;  %vm4078_vm6 = vcmp.eq.f32.partialorder %v4077_v47, 8.507059e+37  ;;  %v13135_v56 = vld [vmem:[#allocation97_spill] sm:$0xff]  ;;  %v13136_v46 = vld [vmem:[#allocation98_spill] sm:$0xff] }
 0x569   : > { %7557 = vtanh.f32 %v11072_v43  ;;  %v4091_v7 = vsel %vm4090_vm5, %v11058_v60, %v4087_v35  ;;  %vm4093_vm7 = vcmp.eq.f32.partialorder %v4092_v55, 8.507059e+37  ;;  %v13120_v60 = vld [vmem:[#allocation34_spill] sm:$0xff]  ;;  %v13137_v33 = vld [vmem:[#allocation99_spill] sm:$0xff]  ;;  %v13138_v35 = vld [vmem:[#allocation100_spill] sm:$0xff] }
 0x56a   : > { %4368 = vmatpush.bf16.msrb.mxu0 %v8536_v28  ;;  %4382 = vmatpush.bf16.msrb.mxu1 %v8541_v30  ;;  %v7556_v11 = vpop.eup %7555  ;;  %v4081_v3 = vsel %vm4078_vm6, %v4080_v2, %v4076_v36  ;;  %v4096_v1 = vsel %vm4093_vm7, %v4095_v18, %v4091_v7  ;;  %v13139_v34 = vld [vmem:[#allocation103_spill] sm:$0xff]  ;;  %v13140_v45 = vld [vmem:[#allocation105_spill] sm:$0xff]  ;;  %v13143_v55 = vld [vmem:[#allocation108_spill] sm:$0xff] }
 0x56b   : > { %4396 = vmatpush.bf16.msrb.mxu2 %v12806_v62  ;;  %4410 = vmatpush.bf16.msrb.mxu3 %v12807_v42  ;;  %v4106_v39 = vmul.f32 %v7556_v11, %v4081_v3  ;;  %v13142_v47 = vld [vmem:[#allocation107_spill] sm:$0xff]  ;;  %v13144_v36 = vld [vmem:[#allocation109_spill] sm:$0xff]  ;;  %v13145_v7 = vld [vmem:[#allocation110_spill] sm:$0xff] }
 0x56c   : > { %v13146_v11 = vld [vmem:[#allocation111_spill] sm:$0xff]  ;;  %v13147_v2 = vld [vmem:[#allocation114_spill] sm:$0xff] }
 0x56d   : > { %v13148_v18 = vld [vmem:[#allocation115_spill] sm:$0xff]  ;;  %v13150_v3 = vld [vmem:[#allocation118_spill] sm:$0xff] }
 0x56e   : > { %4369 = vmatpush.bf16.msrb.mxu0 %v12808_v24  ;;  %4383 = vmatpush.bf16.msrb.mxu1 %v12809_v61 }
 0x56f   : > { %v7558_v13 = vpop.eup %7557  ;;  %4397 = vmatpush.bf16.msrb.mxu2 %v12810_v9  ;;  %4411 = vmatpush.bf16.msrb.mxu3 %v8611_v4 }
 0x570   : > { %v4107_v44 = vmul.f32 %v7558_v13, %v4096_v1  ;;  %v13149_v13 = vld [vmem:[#allocation116_spill] sm:$0xff]  ;;  %v13151_v1 = vld [vmem:[#allocation119_spill] sm:$0xff] }
 0x572   : > { %v4108_v37 = vpack.c.bf16 %v4107_v44, %v4106_v39  ;;  %4370 = vmatpush.bf16.msrb.mxu0 %v12811_v16  ;;  %4384 = vmatpush.bf16.msrb.mxu1 %v12812_v63  ;;  %v13152_v39 = vld [vmem:[#allocation120_spill] sm:$0xff]  ;;  %v13153_v44 = vld [vmem:[#allocation121_spill] sm:$0xff] }
 0x573   : > { %4398 = vmatpush.bf16.msrb.mxu2 %v12813_v41  ;;  %4412 = vmatpush.bf16.msrb.mxu3 %v8663_v53 }
 0x574   : > { %4174 = vmatmul.bf16.vlgmr.msra.gmra.mxu0 %v4108_v37  ;;  %4188 = vmatmul.bf16.vlgmr.msra.gmra.mxu1 %v4108_v37 }
 0x575   : > { %4202 = vmatmul.bf16.vlgmr.msra.gmra.mxu2 %v4108_v37  ;;  %4216 = vmatmul.bf16.vlgmr.msra.gmra.mxu3 %v4108_v37 }
 0x576   : > { %4371 = vmatpush.bf16.msrb.mxu0 %v8694_v21  ;;  %4385 = vmatpush.bf16.msrb.mxu1 %v8699_v26 }
 0x577   : > { %4399 = vmatpush.bf16.msrb.mxu2 %v8733_v14  ;;  %4413 = vmatpush.bf16.msrb.mxu3 %v8715_v52 }
 0x57a   : > { %4372 = vmatpush.bf16.msrb.mxu0 %v8746_v27  ;;  %4386 = vmatpush.bf16.msrb.mxu1 %v8751_v29 }
 0x57b   : > { %4400 = vmatpush.bf16.msrb.mxu2 %v8785_v38  ;;  %4414 = vmatpush.bf16.msrb.mxu3 %v8767_v58 }
 0x57e   : > { %4373 = vmatpush.bf16.msrb.mxu0 %v8798_v57  ;;  %4387 = vmatpush.bf16.msrb.mxu1 %v13120_v60 }
 0x57f   : > { %4401 = vmatpush.bf16.msrb.mxu2 %v13121_v51  ;;  %4415 = vmatpush.bf16.msrb.mxu3 %v13122_v40 }
 0x582   : > { %4374 = vmatpush.bf16.msrb.mxu0 %v13123_v59  ;;  %4388 = vmatpush.bf16.msrb.mxu1 %v13124_v6 }
 0x583   : > { %4402 = vmatpush.bf16.msrb.mxu2 %v13125_v25  ;;  %4416 = vmatpush.bf16.msrb.mxu3 %v13126_v0 }
 0x585   : > { %4375 = vmatmul.bf16.vlgmr.msrb.gmra.mxu0 %v4108_v37  ;;  %4389 = vmatmul.bf16.vlgmr.msrb.gmra.mxu1 %v4108_v37 }
 0x586   : > { %4559 = vmatpush.bf16.msra.mxu0 %v13127_v5  ;;  %4573 = vmatpush.bf16.msra.mxu1 %v13128_v20 }
 0x587   : > { %4403 = vmatmul.bf16.vlgmr.msrb.gmra.mxu2 %v4108_v37  ;;  %4417 = vmatmul.bf16.vlgmr.msrb.gmra.mxu3 %v4108_v37  ;;  %v13154_v37 = vld [vmem:[#allocation122_spill] sm:$0xff] }
 0x588   : > { %4587 = vmatpush.bf16.msra.mxu2 %v13129_v12  ;;  %4601 = vmatpush.bf16.msra.mxu3 %v13130_v49  ;;  %v13193_v49 = vld [vmem:[#allocation172_spill] sm:$0xff] }
 0x58a   : > { %4560 = vmatpush.bf16.msra.mxu0 %v13131_v32  ;;  %4574 = vmatpush.bf16.msra.mxu1 %v13132_v50 }
 0x58c   : > { %4588 = vmatpush.bf16.msra.mxu2 %v13133_v48  ;;  %4602 = vmatpush.bf16.msra.mxu3 %v13134_v17 }
 0x58e   : > { %4561 = vmatpush.bf16.msra.mxu0 %v13135_v56  ;;  %4575 = vmatpush.bf16.msra.mxu1 %v13136_v46 }
 0x590   : > { %4589 = vmatpush.bf16.msra.mxu2 %v13137_v33  ;;  %4603 = vmatpush.bf16.msra.mxu3 %v13138_v35  ;;  %v13191_v35 = vld [vmem:[#allocation170_spill] sm:$0xff]  ;;  %v13192_v33 = vld [vmem:[#allocation171_spill] sm:$0xff] }
 0x592   : > { %4562 = vmatpush.bf16.msra.mxu0 %v13139_v34  ;;  %4576 = vmatpush.bf16.msra.mxu1 %v13140_v45 }
 0x594   : > { %4590 = vmatpush.bf16.msra.mxu2 %v13141_v31  ;;  %4604 = vmatpush.bf16.msra.mxu3 %v13142_v47 }
 0x596   : > { %4563 = vmatpush.bf16.msra.mxu0 %v13143_v55  ;;  %4577 = vmatpush.bf16.msra.mxu1 %v13144_v36  ;;  %v13155_v36 = vld [vmem:[#allocation126_spill] sm:$0xff] }
 0x598   : > { %4591 = vmatpush.bf16.msra.mxu2 %v13145_v7  ;;  %4605 = vmatpush.bf16.msra.mxu3 %v13146_v11  ;;  %v13156_v7 = vld [vmem:[#allocation127_spill] sm:$0xff]  ;;  %v13157_v11 = vld [vmem:[#allocation130_spill] sm:$0xff] }
 0x59a   : > { %4564 = vmatpush.bf16.msra.mxu0 %v13147_v2  ;;  %4578 = vmatpush.bf16.msra.mxu1 %v13148_v18  ;;  %v13158_v2 = vld [vmem:[#allocation131_spill] sm:$0xff]  ;;  %v13159_v18 = vld [vmem:[#allocation128_spill] sm:$0xff] }
 0x59c   : > { %4592 = vmatpush.bf16.msra.mxu2 %v13149_v13  ;;  %4606 = vmatpush.bf16.msra.mxu3 %v13150_v3  ;;  %v13160_v13 = vld [vmem:[#allocation129_spill] sm:$0xff] }
 0x59d   : > { %v13161_v3 = vld [vmem:[#allocation133_spill] sm:$0xff] }
 0x59e   : > { %4565 = vmatpush.bf16.msra.mxu0 %v13151_v1  ;;  %4579 = vmatpush.bf16.msra.mxu1 %v13152_v39  ;;  %v13162_v1 = vld [vmem:[#allocation135_spill] sm:$0xff]  ;;  %v13163_v39 = vld [vmem:[#allocation136_spill] sm:$0xff] }
 0x5a0   : > { %4593 = vmatpush.bf16.msra.mxu2 %v13153_v44  ;;  %4607 = vmatpush.bf16.msra.mxu3 %v13154_v37  ;;  %v13164_v44 = vld [vmem:[#allocation138_spill] sm:$0xff]  ;;  %v13165_v37 = vld [vmem:[#allocation139_spill] sm:$0xff] }
 0x5a2   : > { %4566 = vmatpush.bf16.msra.mxu0 %v13155_v36  ;;  %4580 = vmatpush.bf16.msra.mxu1 %v13156_v7  ;;  %v13166_v36 = vld [vmem:[#allocation140_spill] sm:$0xff]  ;;  %v13167_v7 = vld [vmem:[#allocation141_spill] sm:$0xff] }
 0x5a4   : > { %4594 = vmatpush.bf16.msra.mxu2 %v13159_v18  ;;  %4608 = vmatpush.bf16.msra.mxu3 %v13160_v13  ;;  %v13170_v18 = vld [vmem:[#allocation145_spill] sm:$0xff]  ;;  %v13171_v13 = vld [vmem:[#allocation148_spill] sm:$0xff] }
 0x5a6   : > { %4615 = vmatpush.bf16.msrb.mxu0 %v13157_v11  ;;  %4629 = vmatpush.bf16.msrb.mxu1 %v13158_v2  ;;  %v13168_v11 = vld [vmem:[#allocation142_spill] sm:$0xff]  ;;  %v13169_v2 = vld [vmem:[#allocation143_spill] sm:$0xff] }
 0x5a8   : > { %4643 = vmatpush.bf16.msrb.mxu2 %v13161_v3  ;;  %4657 = vmatpush.bf16.msrb.mxu3 %v13162_v1  ;;  %v13172_v3 = vld [vmem:[#allocation149_spill] sm:$0xff]  ;;  %v13173_v1 = vld [vmem:[#allocation150_spill] sm:$0xff] }
 0x5aa   : > { %4616 = vmatpush.bf16.msrb.mxu0 %v13163_v39  ;;  %4630 = vmatpush.bf16.msrb.mxu1 %v13164_v44  ;;  %v13174_v39 = vld [vmem:[#allocation151_spill] sm:$0xff]  ;;  %v13175_v44 = vld [vmem:[#allocation152_spill] sm:$0xff] }
 0x5ac   : > { %4644 = vmatpush.bf16.msrb.mxu2 %v13165_v37  ;;  %4658 = vmatpush.bf16.msrb.mxu3 %v13166_v36  ;;  %v13176_v37 = vld [vmem:[#allocation153_spill] sm:$0xff]  ;;  %v13177_v36 = vld [vmem:[#allocation154_spill] sm:$0xff] }
 0x5ae   : > { %4617 = vmatpush.bf16.msrb.mxu0 %v13167_v7  ;;  %4631 = vmatpush.bf16.msrb.mxu1 %v13168_v11  ;;  %v13178_v7 = vld [vmem:[#allocation156_spill] sm:$0xff]  ;;  %v13179_v11 = vld [vmem:[#allocation157_spill] sm:$0xff] }
 0x5b0   : > { %4645 = vmatpush.bf16.msrb.mxu2 %v13169_v2  ;;  %4659 = vmatpush.bf16.msrb.mxu3 %v13170_v18  ;;  %v13180_v2 = vld [vmem:[#allocation158_spill] sm:$0xff]  ;;  %v13181_v18 = vld [vmem:[#allocation159_spill] sm:$0xff] }
 0x5b2   : > { %4618 = vmatpush.bf16.msrb.mxu0 %v13171_v13  ;;  %4632 = vmatpush.bf16.msrb.mxu1 %v13172_v3  ;;  %v13182_v13 = vld [vmem:[#allocation160_spill] sm:$0xff]  ;;  %v13183_v3 = vld [vmem:[#allocation162_spill] sm:$0xff] }
 0x5b4   : > { %4646 = vmatpush.bf16.msrb.mxu2 %v13173_v1  ;;  %4660 = vmatpush.bf16.msrb.mxu3 %v13174_v39  ;;  %v13184_v1 = vld [vmem:[#allocation163_spill] sm:$0xff]  ;;  %v13185_v39 = vld [vmem:[#allocation164_spill] sm:$0xff] }
 0x5b6   : > { %4619 = vmatpush.bf16.msrb.mxu0 %v13175_v44  ;;  %4633 = vmatpush.bf16.msrb.mxu1 %v13176_v37  ;;  %v13186_v44 = vld [vmem:[#allocation165_spill] sm:$0xff]  ;;  %v13187_v37 = vld [vmem:[#allocation166_spill] sm:$0xff] }
 0x5b8   : > { %4647 = vmatpush.bf16.msrb.mxu2 %v13177_v36  ;;  %4661 = vmatpush.bf16.msrb.mxu3 %v13178_v7  ;;  %v13188_v36 = vld [vmem:[#allocation167_spill] sm:$0xff]  ;;  %v13189_v7 = vld [vmem:[#allocation168_spill] sm:$0xff] }
 0x5ba   : > { %4620 = vmatpush.bf16.msrb.mxu0 %v13179_v11  ;;  %4634 = vmatpush.bf16.msrb.mxu1 %v13180_v2  ;;  %v13190_v11 = vld [vmem:[#allocation169_spill] sm:$0xff] }
 0x5bc   : > { %4648 = vmatpush.bf16.msrb.mxu2 %v13181_v18  ;;  %4662 = vmatpush.bf16.msrb.mxu3 %v13182_v13 }
 0x5be   : > { %4621 = vmatpush.bf16.msrb.mxu0 %v13183_v3  ;;  %4635 = vmatpush.bf16.msrb.mxu1 %v13184_v1 }
 0x5c0   : > { %4649 = vmatpush.bf16.msrb.mxu2 %v13185_v39  ;;  %4663 = vmatpush.bf16.msrb.mxu3 %v13186_v44 }
 0x5c2   : > { %4622 = vmatpush.bf16.msrb.mxu0 %v13187_v37  ;;  %4636 = vmatpush.bf16.msrb.mxu1 %v13188_v36 }
 0x5c4   : > { %4650 = vmatpush.bf16.msrb.mxu2 %v13189_v7  ;;  %4664 = vmatpush.bf16.msrb.mxu3 %v13190_v11 }
 0x5e1   : > { %v4119_v2 = vpop.f32.mrf.mxu0  ;;  %v4133_v18 = vpop.f32.mrf.mxu1 }
 0x5e8   : > { %v4147_v55 = vpop.f32.mrf.mxu2  ;;  %v4161_v13 = vpop.f32.mrf.mxu3 }
 0x5e9   : > { %v4121_v47 = vpop.f32.mrf.mxu0  ;;  %v4135_v3 = vpop.f32.mrf.mxu1 }
 0x5f0   : > { %v4163_v31 = vpop.f32.mrf.mxu3  ;;  %v4149_v44 = vpop.f32.mrf.mxu2 }
 0x5f1   : > { %v4175_v1 = vpop.f32.mrf.mxu0  ;;  %v4189_v45 = vpop.f32.mrf.mxu1 }
 0x5f2   : > { %v4176_v39 = vadd.f32 %v4175_v1, %v4119_v2  ;;  %v4190_v34 = vadd.f32 %v4189_v45, %v4133_v18 }
 0x5f4   : > { %v4222_v37 = vadd.f32 %v4176_v39, %v13191_v35  ;;  %v4223_v36 = vadd.f32 %v4190_v34, %v13192_v33 }
 0x5f6   : > { %v6871_v46 = vmul.f32 -1.442695, %v4222_v37  ;;  %v6873_v7 = vmul.f32 -1.442695, %v4223_v36 }
 0x5f8   : > { %7559 = vpow2.f32 %v6871_v46  ;;  %v4217_v11 = vpop.f32.mrf.mxu3  ;;  %v4203_v18 = vpop.f32.mrf.mxu2 }
 0x5f9   : > { %7561 = vpow2.f32 %v6873_v7  ;;  %v4218_v56 = vadd.f32 %v4217_v11, %v4161_v13  ;;  %v4177_v17 = vpop.f32.mrf.mxu0  ;;  %v4191_v48 = vpop.f32.mrf.mxu1 }
 0x5fa   : > { %v4178_v50 = vadd.f32 %v4177_v17, %v4121_v47  ;;  %v4192_v32 = vadd.f32 %v4191_v48, %v4135_v3  ;;  %v13195_v17 = vld [vmem:[#allocation43_spill] sm:$0xff] }
 0x5fb   : > { %v4225_v12 = vadd.f32 %v4218_v56, %v13193_v49  ;;  %v13197_v56 = vld [vmem:[#allocation47_spill] sm:$0xff] }
 0x5fc   : > { %v4226_v2 = vadd.f32 %v4178_v50, %v13191_v35  ;;  %v4227_v45 = vadd.f32 %v4192_v32, %v13192_v33  ;;  %v13194_v50 = vld [vmem:[#allocation11_spill] sm:$0xff] }
 0x5fd   : > { %v6875_v1 = vmul.f32 -1.442695, %v4225_v12  ;;  %v1097_v32 = vadd.f32 %v13195_v17, %v13194_v50  ;;  %v13196_v12 = vld [vmem:[#allocation12_spill] sm:$0xff] }
 0x5fe   : > { %v7560_v39 = vpop.eup %7559  ;;  %v6872_v34 = vmul.f32 -1.442695, %v4226_v2  ;;  %v6874_v46 = vmul.f32 -1.442695, %v4227_v45  ;;  %v1195_v47 = vadd.f32 %v13197_v56, %v13196_v12  ;;  %v4204_v45 = vadd.f32 %v4203_v18, %v4147_v55  ;;  %v13199_v50 = vld [vmem:[#allocation48_spill] sm:$0xff]  ;;  %v13202_v18 = vld [vmem:[#allocation39_spill] sm:$0xff] }
 0x5ff   : > { %v7562_v37 = vpop.eup %7561  ;;  %v11191_v36 = vadd.f32 1.0, %v7560_v39  ;;  %7563 = vpow2.f32 %v6875_v1 }
 0x600   : > { %v11193_v7 = vadd.f32 1.0, %v7562_v37  ;;  %7565 = vpow2.f32 %v6872_v34  ;;  %v4219_v48 = vpop.f32.mrf.mxu3  ;;  %v13198_v34 = vld [vmem:[#allocation44_spill] sm:$0xff]  ;;  %v4205_v35 = vpop.f32.mrf.mxu2  ;;  %v11212_v56 = vadd.f32 %v13199_v50, %v1195_v47 }
 0x601   : > { %7567 = vrcp.f32 %v11191_v36  ;;  %v4220_v11 = vadd.f32 %v4219_v48, %v4163_v31  ;;  %v11204_v37 = vadd.f32 %v13198_v34, %v1097_v32  ;;  %v13200_v31 = vld [vmem:[#allocation60_spill] sm:$0xff]  ;;  %v13201_v48 = vld [vmem:[#allocation101_spill] sm:$0xff]  ;;  %v4247_v25 = vand.u32 2147483647, %v11191_v36 }
 0x602   : > { %7569 = vrcp.f32 %v11193_v7  ;;  %v4376_v3 = vpop.f32.mrf.mxu0  ;;  %v4390_v1 = vpop.f32.mrf.mxu1  ;;  %v11216_v12 = vadd.f32 %v13201_v48, %v13200_v31  ;;  %v4206_v31 = vadd.f32 %v4205_v35, %v4149_v44  ;;  %v4287_v6 = vand.u32 2147483648, %v11193_v7 }
 0x603   : > { %7571 = vpow2.f32 %v6874_v46  ;;  %v4229_v17 = vadd.f32 %v4220_v11, %v13193_v49  ;;  %v4423_v32 = vadd.f32 %v4376_v3, %v13202_v18  ;;  %v13203_v11 = vld [vmem:[#allocation45_spill] sm:$0xff]  ;;  %v13204_v49 = vld [vmem:[#allocation68_spill] sm:$0xff]  ;;  %v4249_v3 = vand.u32 2147483648, %v11191_v36 }
 0x604   : > { %v4424_v50 = vadd.f32 %v4390_v1, %v13203_v11  ;;  %v4224_v5 = vadd.f32 %v4204_v45, %v13204_v49  ;;  %v4285_v45 = vand.u32 2147483647, %v11193_v7  ;;  %vm4243_vm10 = vweird.f32 %v11191_v36 }
 0x605   : > { %v7564_v13 = vpop.eup %7563  ;;  %v6876_v18 = vmul.f32 -1.442695, %v4229_v17  ;;  %v6877_v59 = vmul.f32 -1.442695, %v4423_v32  ;;  %v4228_v17 = vadd.f32 %v4206_v31, %v13204_v49  ;;  %v13205_v32 = vld [vmem:[#allocation63_spill] sm:$0xff]  ;;  %vm4281_vm11 = vweird.f32 %v11193_v7 }
 0x606   : > { %v7566_v2 = vpop.eup %7565  ;;  %v11223_v20 = vadd.f32 1.0, %v7564_v13  ;;  %v6879_v35 = vmul.f32 -1.442695, %v4424_v50  ;;  %vm11258_vm13 = vcmp.eq.f32.partialorder %v4247_v25, 8.507059e+37  ;;  %vm11270_vm15 = vcmp.eq.f32.partialorder %v4285_v45, 8.507059e+37 }
 0x607   : > { %v11201_v39 = vpop.eup %7567  ;;  %v11206_v33 = vadd.f32 1.0, %v7566_v2 }
 0x608   : > { %v11209_v46 = vpop.eup %7569  ;;  %v4239_v55 = vmul.f32 %v11201_v39, %v11191_v36  ;;  %vm4244_vm8 = vweird.f32 %v11201_v39 }
 0x609   : > { %v7572_v34 = vpop.eup %7571  ;;  %v4277_v2 = vmul.f32 %v11209_v46, %v11193_v7  ;;  %7573 = vrcp.f32 %v11206_v33  ;;  %vm4282_vm9 = vweird.f32 %v11209_v46  ;;  %vm11249_vm12 = vmor %vm4243_vm10, %vm4244_vm8  ;;  %vm4258_vm0 = vweird.f32 %v11206_v33 }
 0x60a   : > { %v4240_v47 = vsub.f32 1.0, %v4239_v55  ;;  %v11228_v48 = vadd.f32 1.0, %v7572_v34  ;;  %v13206_v34 = vld [vmem:[#allocation112_spill] sm:$0xff]  ;;  %v4418_v50 = vpop.f32.mrf.mxu3  ;;  %vm11266_vm14 = vmor %vm4281_vm11, %vm4282_vm9  ;;  %v4378_v25 = vpop.f32.mrf.mxu0  ;;  %vm4321_vm9 = vweird.f32 %v11223_v20 }
 0x60b   : > { %v4278_v0 = vsub.f32 1.0, %v4277_v2  ;;  %v1391_v2 = vadd.f32 %v13206_v34, %v13205_v32  ;;  %v4392_v45 = vpop.f32.mrf.mxu1  ;;  %v13215_v32 = vld [vmem:[#allocation104_spill] sm:$0xff]  ;;  %v4427_v51 = vadd.f32 %v4378_v25, %v11204_v37 }
 0x60c   : > { %v4241_v13 = vmul.f32 %v11201_v39, %v4240_v47  ;;  %7575 = vrcp.f32 %v11228_v48  ;;  %v4250_v47 = vor.u32 1.1754944e-38, %v4249_v3  ;;  %v4302_v49 = vand.u32 2147483648, %v11228_v48 }
 0x60d   : > { %v4279_v1 = vmul.f32 %v11209_v46, %v4278_v0  ;;  %7577 = vrcp.f32 %v11223_v20  ;;  %vm4296_vm3 = vweird.f32 %v11228_v48 }
 0x60e   : > { %v4242_v44 = vadd.f32 %v11201_v39, %v4241_v13  ;;  %7579 = vpow2.f32 %v6876_v18  ;;  %v4426_v18 = vadd.f32 %v4418_v50, %v13215_v32 }
 0x60f   : > { %v11241_v55 = vpop.eup %7573  ;;  %v4280_v0 = vadd.f32 %v11209_v46, %v4279_v1  ;;  %7581 = vtanh.f32 %v4224_v5 }
 0x610   : > { %v4254_v31 = vmul.f32 %v11241_v55, %v11206_v33  ;;  %7583 = vpow2.f32 %v6877_v59  ;;  %v4246_v36 = vsel %vm11249_vm12, %v11201_v39, %v4242_v44  ;;  %v4288_v59 = vor.u32 1.1754944e-38, %v4287_v6  ;;  %v4404_v44 = vpop.f32.mrf.mxu2 }
 0x611   : > { %7585 = vpow2.f32 %v6879_v35  ;;  %v4284_v3 = vsel %vm11266_vm14, %v11209_v46, %v4280_v0  ;;  %v4262_v6 = vand.u32 2147483647, %v11206_v33  ;;  %v6881_v5 = vmul.f32 -1.442695, %v4426_v18 }
 0x612   : > { %v11262_v7 = vpop.eup %7575  ;;  %v4255_v39 = vsub.f32 1.0, %v4254_v31  ;;  %7587 = vtanh.f32 %v4228_v17  ;;  %v4251_v17 = vsel %vm11258_vm13, %v4250_v47, %v4246_v36  ;;  %v4264_v31 = vand.u32 2147483648, %v11206_v33  ;;  %v13221_v33 = vld [vmem:[#allocation95_spill] sm:$0xff] }
 0x613   : > { %v11274_v1 = vpop.eup %7577  ;;  %v4292_v35 = vmul.f32 %v11262_v7, %v11228_v48  ;;  %v4289_v57 = vsel %vm11270_vm15, %v4288_v59, %v4284_v3  ;;  %v4428_v47 = vadd.f32 %v4392_v45, %v11212_v56  ;;  %vm4297_vm1 = vweird.f32 %v11262_v7 }
 0x614   : > { %v7580_v34 = vpop.eup %7579  ;;  %v4256_v11 = vmul.f32 %v11241_v55, %v4255_v39  ;;  %v4317_v36 = vmul.f32 %v11274_v1, %v11223_v20  ;;  %vm4259_vm2 = vweird.f32 %v11241_v55  ;;  %v4346_v25 = vmul.f32 %v4289_v57, %v10977_v54  ;;  %vm11321_vm5 = vmor %vm4296_vm3, %vm4297_vm1 }
 0x615   : > { %v7582_v46 = vpop.eup %7581  ;;  %v4293_v0 = vsub.f32 1.0, %v4292_v35  ;;  %v11289_v40 = vadd.f32 1.0, %v7580_v34  ;;  %v6878_v3 = vmul.f32 -1.442695, %v4427_v51  ;;  %vm11311_vm4 = vmor %vm4258_vm0, %vm4259_vm2  ;;  %v4300_v34 = vand.u32 2147483647, %v11228_v48 }
 0x616   : > { %v7584_v60 = vpop.eup %7583  ;;  %v4348_v32 = vmul.f32 %v7582_v46, %v4251_v17  ;;  %v4257_v37 = vadd.f32 %v11241_v55, %v4256_v11  ;;  %v4420_v17 = vpop.f32.mrf.mxu3  ;;  %v13218_v11 = vld [vmem:[#allocation113_spill] sm:$0xff]  ;;  %v4327_v54 = vand.u32 2147483648, %v11223_v20  ;;  %v4425_v18 = vadd.f32 %v4404_v44, %v13221_v33  ;;  %v13222_v44 = vld [vmem:[#allocation102_spill] sm:$0xff] }
 0x617   : > { %v7586_v39 = vpop.eup %7585  ;;  %v4294_v50 = vmul.f32 %v11262_v7, %v4293_v0  ;;  %7589 = vrcp.f32 %v11289_v40  ;;  %v11302_v59 = vadd.f32 1.0, %v7584_v60  ;;  %v6880_v60 = vmul.f32 -1.442695, %v4428_v47 }
 0x618   : > { %v7588_v35 = vpop.eup %7587  ;;  %v11304_v13 = vadd.f32 1.0, %v7586_v39  ;;  %7591 = vpow2.f32 %v6881_v5  ;;  %v1440_v57 = vadd.f32 %v13218_v11, %v1391_v2  ;;  %v4318_v46 = vsub.f32 1.0, %v4317_v36  ;;  %v4406_v39 = vpop.f32.mrf.mxu2 }
 0x619   : > { %v4295_v56 = vadd.f32 %v11262_v7, %v4294_v50  ;;  %7593 = vrcp.f32 %v11302_v59  ;;  %v4261_v48 = vsel %vm11311_vm4, %v11241_v55, %v4257_v37  ;;  %v4265_v0 = vor.u32 1.1754944e-38, %v4264_v31 }
 0x61a   : > { %7595 = vrcp.f32 %v11304_v13  ;;  %v11333_v5 = vadd.f32 %v4348_v32, %v4346_v25  ;;  %v4303_v47 = vor.u32 1.1754944e-38, %v4302_v49  ;;  %v4430_v50 = vadd.f32 %v4420_v17, %v1440_v57 }
 0x61b   : > { %v4299_v2 = vsel %vm11321_vm5, %v11262_v7, %v4295_v56  ;;  %7597 = vpow2.f32 %v6878_v3  ;;  %v1342_v36 = vadd.f32 %v13222_v44, %v11216_v12  ;;  %vm4263_vm6 = vcmp.eq.f32.partialorder %v4262_v6, 8.507059e+37 }
 0x61c   : > { %vm4301_vm7 = vcmp.eq.f32.partialorder %v4300_v34, 8.507059e+37  ;;  %7599 = vpow2.f32 %v6880_v60  ;;  %v11339_v31 = vor.u32 1.1754944e-38, %v4327_v54  ;;  %v4266_v37 = vsel %vm4263_vm6, %v4265_v0, %v4261_v48 }
 0x61d   : > { %v11335_v11 = vpop.eup %7589  ;;  %v4304_v45 = vsel %vm4301_vm7, %v4303_v47, %v4299_v2  ;;  %7601 = vtanh.f32 %v4425_v18  ;;  %v4319_v49 = vmul.f32 %v11274_v1, %v4318_v46  ;;  %v4429_v25 = vadd.f32 %v4406_v39, %v1342_v36 }
 0x61e   : > { %v7592_v55 = vpop.eup %7591  ;;  %v4332_v32 = vmul.f32 %v11335_v11, %v11289_v40  ;;  %v6882_v56 = vmul.f32 -1.442695, %v4430_v50  ;;  %7603 = vtanh.f32 %v11333_v5  ;;  %v4342_v12 = vand.u32 2147483648, %v11289_v40 }
 0x61f   : > { %v7594_v7 = vpop.eup %7593  ;;  %v11347_v34 = vadd.f32 1.0, %v7592_v55  ;;  %vm4322_vm8 = vweird.f32 %v11274_v1  ;;  %v4347_v60 = vmul.f32 %v4304_v45, %v11004_v19  ;;  %v4349_v17 = vmul.f32 %v7588_v35, %v4266_v37 }
 0x620   : > { %v7596_v3 = vpop.eup %7595  ;;  %v4440_v6 = vmul.f32 %v7594_v7, %v11302_v59  ;;  %v4488_v54 = vand.u32 2147483648, %v11304_v13  ;;  %v4448_v18 = vand.u32 2147483647, %v11302_v59  ;;  %v4450_v46 = vand.u32 2147483648, %v11302_v59  ;;  %vm11384_vm4 = vmor %vm4321_vm9, %vm4322_vm8 }
 0x621   : > { %v4478_v57 = vmul.f32 %v7596_v3, %v11304_v13  ;;  %v7598_v51 = vpop.eup %7597  ;;  %v4486_v48 = vand.u32 2147483647, %v11304_v13  ;;  %v4333_v2 = vsub.f32 1.0, %v4332_v32  ;;  %7605 = vpow2.f32 %v6882_v56 }
 0x622   : > { %v4441_v33 = vsub.f32 1.0, %v4440_v6  ;;  %v7600_v0 = vpop.eup %7599  ;;  %v11357_v39 = vadd.f32 1.0, %v7598_v51  ;;  %vm4445_vm10 = vweird.f32 %v7594_v7  ;;  %7607 = vrcp.f32 %v11347_v34 }
 0x623   : > { %v4479_v47 = vsub.f32 1.0, %v4478_v57  ;;  %v7602_v19 = vpop.eup %7601  ;;  %v11360_v50 = vadd.f32 1.0, %v7600_v0  ;;  %v11362_v44 = vadd.f32 %v4349_v17, %v4347_v60  ;;  %vm4483_vm11 = vweird.f32 %v7596_v3 }
 0x624   : > { %v4442_v35 = vmul.f32 %v7594_v7, %v4441_v33  ;;  %7609 = vrcp.f32 %v11357_v39  ;;  %v7604_v55 = vpop.eup %7603  ;;  %vm4482_vm12 = vweird.f32 %v11304_v13  ;;  %vm4444_vm13 = vweird.f32 %v11302_v59 }
 0x625   : > { %v4480_v36 = vmul.f32 %v7596_v3, %v4479_v47  ;;  %7611 = vrcp.f32 %v11360_v50  ;;  %v4334_v45 = vmul.f32 %v11335_v11, %v4333_v2  ;;  %v4489_v32 = vor.u32 1.1754944e-38, %v4488_v54  ;;  %vm4446_vm14 = vmor %vm4444_vm13, %vm4445_vm10 }
 0x626   : > { %v4443_v37 = vadd.f32 %v7594_v7, %v4442_v35  ;;  %v4451_v56 = vor.u32 1.1754944e-38, %v4450_v46  ;;  %vm4484_vm15 = vmor %vm4482_vm12, %vm4483_vm11  ;;  %vm4449_vm0 = vcmp.eq.f32.partialorder %v4448_v18, 8.507059e+37  ;;  %vm4487_vm1 = vcmp.eq.f32.partialorder %v4486_v48, 8.507059e+37 }
 0x627   : > { %v4481_v6 = vadd.f32 %v7596_v3, %v4480_v36  ;;  %v4320_v17 = vadd.f32 %v11274_v1, %v4319_v49  ;;  %v7606_v57 = vpop.eup %7605  ;;  %7613 = vtanh.f32 %v11362_v44  ;;  %v4325_v59 = vand.u32 2147483647, %v11223_v20 }
 0x628   : > { %v4447_v60 = vsel %vm4446_vm14, %v7594_v7, %v4443_v37  ;;  %v11372_v33 = vpop.eup %7607  ;;  %vm4336_vm2 = vweird.f32 %v11289_v40  ;;  %v11375_v0 = vadd.f32 1.0, %v7606_v57  ;;  %vm4337_vm3 = vweird.f32 %v11335_v11 }
 0x629   : > { %v4452_v13 = vsel %vm4449_vm0, %v4451_v56, %v4447_v60  ;;  %v4485_v51 = vsel %vm4484_vm15, %v7596_v3, %v4481_v6  ;;  %7615 = vtanh.f32 %v4429_v25  ;;  %v4335_v18 = vadd.f32 %v11335_v11, %v4334_v45  ;;  %vm11403_vm6 = vmor %vm4336_vm2, %vm4337_vm3 }
 0x62a   : > { %v4490_v54 = vsel %vm4487_vm1, %v4489_v32, %v4485_v51  ;;  %v4549_v46 = vmul.f32 %v7602_v19, %v4452_v13  ;;  %v7610_v7 = vpop.eup %7609  ;;  %v4343_v2 = vor.u32 1.1754944e-38, %v4342_v12  ;;  %7617 = vrcp.f32 %v11375_v0 }
 0x62b   : > { %v4547_v49 = vmul.f32 %v4490_v54, %v11038_v23  ;;  %v7612_v48 = vpop.eup %7611  ;;  %v4455_v47 = vmul.f32 %v7610_v7, %v11357_v39  ;;  %v4340_v19 = vand.u32 2147483647, %v11289_v40  ;;  %v4324_v35 = vsel %vm11384_vm4, %v11274_v1, %v4320_v17 }
 0x62c   : > { %v4493_v25 = vmul.f32 %v7612_v48, %v11360_v50  ;;  %vm11397_vm5 = vcmp.eq.f32.partialorder %v4325_v59, 8.507059e+37  ;;  %v4518_v36 = vmul.f32 %v11372_v33, %v11347_v34  ;;  %vm4459_vm7 = vweird.f32 %v11357_v39 }
 0x62d   : > { %v11391_v23 = vadd.f32 %v4549_v46, %v4547_v49  ;;  %v4456_v37 = vsub.f32 1.0, %v4455_v47  ;;  %v4463_v45 = vand.u32 2147483647, %v11357_v39  ;;  %v7614_v32 = vpop.eup %7613  ;;  %v4503_v56 = vand.u32 2147483648, %v11360_v50 }
 0x62e   : > { %v4494_v1 = vsub.f32 1.0, %v4493_v25  ;;  %v4465_v6 = vand.u32 2147483648, %v11357_v39  ;;  %v4339_v40 = vsel %vm11403_vm6, %v11335_v11, %v4335_v18  ;;  %vm4460_vm8 = vweird.f32 %v7610_v7 }
 0x62f   : > { %v4457_v60 = vmul.f32 %v7610_v7, %v4456_v37  ;;  %v4501_v17 = vand.u32 2147483647, %v11360_v50  ;;  %vm4341_vm9 = vcmp.eq.f32.partialorder %v4340_v19, 8.507059e+37  ;;  %v7616_v57 = vpop.eup %7615  ;;  %vm4498_vm10 = vweird.f32 %v7612_v48  ;;  %vm4461_vm12 = vmor %vm4459_vm7, %vm4460_vm8 }
 0x630   : > { %v4495_v13 = vmul.f32 %v7612_v48, %v4494_v1  ;;  %v4329_v51 = vsel %vm11397_vm5, %v11339_v31, %v4324_v35  ;;  %v4344_v59 = vsel %vm4341_vm9, %v4343_v2, %v4339_v40  ;;  %v11420_v54 = vpop.eup %7617  ;;  %v4519_v46 = vsub.f32 1.0, %v4518_v36  ;;  %v13253_v1 = vld [vmem:[#allocation106_spill] sm:$0xff] }
 0x631   : > { %v4458_v49 = vadd.f32 %v7610_v7, %v4457_v60  ;;  %v4354_v3 = vmul.f32 %v7604_v55, %v4329_v51  ;;  %v4355_v47 = vmul.f32 %v7614_v32, %v4344_v59  ;;  %vm4497_vm11 = vweird.f32 %v11360_v50 }
 0x632   : > { %v4466_v11 = vor.u32 1.1754944e-38, %v4465_v6  ;;  %v4496_v18 = vadd.f32 %v7612_v48, %v4495_v13  ;;  %v4533_v19 = vmul.f32 %v11420_v54, %v11375_v0  ;;  %vm4499_vm13 = vmor %vm4497_vm11, %vm4498_vm10  ;;  %v4504_v25 = vor.u32 1.1754944e-38, %v4503_v56 }
 0x633   : > { %v4462_v31 = vsel %vm4461_vm12, %v7610_v7, %v4458_v49  ;;  %vm4464_vm14 = vcmp.eq.f32.partialorder %v4463_v45, 8.507059e+37  ;;  %v4558_v2 = vpack.c.bf16 %v4355_v47, %v4354_v3  ;;  %vm4502_vm15 = vcmp.eq.f32.partialorder %v4501_v17, 8.507059e+37  ;;  %v13232_v49 = vld [vmem:[#allocation34_spill] sm:$0xff]  ;;  %v13233_v3 = vld [vmem:[#allocation40_spill] sm:$0xff]  ;;  %v13234_v47 = vld [vmem:[#allocation37_spill] sm:$0xff] }
 0x634   : > { %v4467_v35 = vsel %vm4464_vm14, %v4466_v11, %v4462_v31  ;;  %v4500_v20 = vsel %vm4499_vm13, %v7612_v48, %v4496_v18  ;;  %v4534_v55 = vsub.f32 1.0, %v4533_v19  ;;  %v4520_v12 = vmul.f32 %v11372_v33, %v4519_v46  ;;  %v13235_v11 = vld [vmem:[#allocation41_spill] sm:$0xff]  ;;  %v13236_v18 = vld [vmem:[#allocation42_spill] sm:$0xff] }
 0x635   : > { %v4505_v50 = vsel %vm4502_vm15, %v4504_v25, %v4500_v20  ;;  %v4550_v36 = vmul.f32 %v7616_v57, %v4467_v35  ;;  %4567 = vmatmul.bf16.vlgmr.msra.gmra.mxu0 %v4558_v2  ;;  %4581 = vmatmul.bf16.vlgmr.msra.gmra.mxu1 %v4558_v2  ;;  %7619 = vtanh.f32 %v11391_v23  ;;  %vm4523_vm0 = vweird.f32 %v11372_v33  ;;  %v13237_v19 = vld [vmem:[#allocation49_spill] sm:$0xff]  ;;  %v13238_v25 = vld [vmem:[#allocation46_spill] sm:$0xff]  ;;  %v13241_v35 = vld [vmem:[#allocation88_spill] sm:$0xff] }
 0x636   : > { %v4548_v39 = vmul.f32 %v4505_v50, %v11072_v43  ;;  %v4535_v37 = vmul.f32 %v11420_v54, %v4534_v55  ;;  %4595 = vmatmul.bf16.vlgmr.msra.gmra.mxu2 %v4558_v2  ;;  %4609 = vmatmul.bf16.vlgmr.msra.gmra.mxu3 %v4558_v2  ;;  %v4521_v43 = vadd.f32 %v11372_v33, %v4520_v12  ;;  %vm4538_vm1 = vweird.f32 %v11420_v54  ;;  %v13239_v31 = vld [vmem:[#allocation86_spill] sm:$0xff]  ;;  %v13240_v2 = vld [vmem:[#allocation87_spill] sm:$0xff]  ;;  %v13242_v20 = vld [vmem:[#allocation89_spill] sm:$0xff] }
 0x637   : > { %4816 = vmatpush.bf16.msra.mxu0 %v8488_v8  ;;  %4830 = vmatpush.bf16.msra.mxu1 %v8493_v10  ;;  %vm4522_vm2 = vweird.f32 %v11347_v34  ;;  %v4528_v45 = vand.u32 2147483648, %v11347_v34  ;;  %v4543_v32 = vand.u32 2147483648, %v11375_v0  ;;  %v4526_v56 = vand.u32 2147483647, %v11347_v34  ;;  %v13243_v55 = vld [vmem:[#allocation92_spill] sm:$0xff]  ;;  %v13244_v12 = vld [vmem:[#allocation93_spill] sm:$0xff] }
 0x638   : > { %v11434_v7 = vadd.f32 %v4550_v36, %v4548_v39  ;;  %4844 = vmatpush.bf16.msra.mxu2 %v8523_v22  ;;  %4858 = vmatpush.bf16.msra.mxu3 %v8505_v15  ;;  %v4536_v48 = vadd.f32 %v11420_v54, %v4535_v37  ;;  %vm11445_vm3 = vmor %vm4522_vm2, %vm4523_vm0  ;;  %vm4537_vm4 = vweird.f32 %v11375_v0  ;;  %v4541_v6 = vand.u32 2147483647, %v11375_v0  ;;  %v13245_v50 = vld [vmem:[#allocation94_spill] sm:$0xff]  ;;  %v13246_v36 = vld [vmem:[#allocation96_spill] sm:$0xff] }
 0x639   : > { %vm4539_vm5 = vmor %vm4537_vm4, %vm4538_vm1  ;;  %v4525_v40 = vsel %vm11445_vm3, %v11372_v33, %v4521_v43  ;;  %v4529_v17 = vor.u32 1.1754944e-38, %v4528_v45  ;;  %v4544_v57 = vor.u32 1.1754944e-38, %v4543_v32  ;;  %vm4527_vm6 = vcmp.eq.f32.partialorder %v4526_v56, 8.507059e+37  ;;  %v13247_v39 = vld [vmem:[#allocation97_spill] sm:$0xff]  ;;  %v13248_v37 = vld [vmem:[#allocation98_spill] sm:$0xff] }
 0x63a   : > { %7621 = vtanh.f32 %v11434_v7  ;;  %v4540_v60 = vsel %vm4539_vm5, %v11420_v54, %v4536_v48  ;;  %vm4542_vm7 = vcmp.eq.f32.partialorder %v4541_v6, 8.507059e+37  ;;  %v13231_v54 = vld [vmem:[#allocation33_spill] sm:$0xff]  ;;  %v13249_v43 = vld [vmem:[#allocation99_spill] sm:$0xff]  ;;  %v13250_v48 = vld [vmem:[#allocation100_spill] sm:$0xff] }
 0x63b   : > { %4817 = vmatpush.bf16.msra.mxu0 %v8536_v28  ;;  %4831 = vmatpush.bf16.msra.mxu1 %v8541_v30  ;;  %v7620_v34 = vpop.eup %7619  ;;  %v4530_v13 = vsel %vm4527_vm6, %v4529_v17, %v4525_v40  ;;  %v4545_v51 = vsel %vm4542_vm7, %v4544_v57, %v4540_v60  ;;  %v13251_v45 = vld [vmem:[#allocation103_spill] sm:$0xff]  ;;  %v13252_v32 = vld [vmem:[#allocation105_spill] sm:$0xff]  ;;  %v13255_v6 = vld [vmem:[#allocation108_spill] sm:$0xff] }
 0x63c   : > { %4845 = vmatpush.bf16.msra.mxu2 %v12806_v62  ;;  %4859 = vmatpush.bf16.msra.mxu3 %v12807_v42  ;;  %v4555_v59 = vmul.f32 %v7620_v34, %v4530_v13  ;;  %v13254_v56 = vld [vmem:[#allocation107_spill] sm:$0xff]  ;;  %v13256_v40 = vld [vmem:[#allocation109_spill] sm:$0xff]  ;;  %v13257_v60 = vld [vmem:[#allocation110_spill] sm:$0xff] }
 0x63d   : > { %v13258_v34 = vld [vmem:[#allocation111_spill] sm:$0xff]  ;;  %v13259_v17 = vld [vmem:[#allocation114_spill] sm:$0xff] }
 0x63e   : > { %v13260_v57 = vld [vmem:[#allocation115_spill] sm:$0xff]  ;;  %v13262_v13 = vld [vmem:[#allocation118_spill] sm:$0xff] }
 0x63f   : > { %4818 = vmatpush.bf16.msra.mxu0 %v12808_v24  ;;  %4832 = vmatpush.bf16.msra.mxu1 %v12809_v61 }
 0x640   : > { %v7622_v0 = vpop.eup %7621  ;;  %4846 = vmatpush.bf16.msra.mxu2 %v12810_v9  ;;  %4860 = vmatpush.bf16.msra.mxu3 %v8611_v4 }
 0x641   : > { %v4556_v33 = vmul.f32 %v7622_v0, %v4545_v51  ;;  %v13261_v0 = vld [vmem:[#allocation116_spill] sm:$0xff]  ;;  %v13263_v51 = vld [vmem:[#allocation119_spill] sm:$0xff] }
 0x643   : > { %v4557_v46 = vpack.c.bf16 %v4556_v33, %v4555_v59  ;;  %4819 = vmatpush.bf16.msra.mxu0 %v12811_v16  ;;  %4833 = vmatpush.bf16.msra.mxu1 %v12812_v63  ;;  %v13264_v59 = vld [vmem:[#allocation120_spill] sm:$0xff]  ;;  %v13265_v33 = vld [vmem:[#allocation121_spill] sm:$0xff] }
 0x644   : > { %4847 = vmatpush.bf16.msra.mxu2 %v12813_v41  ;;  %4861 = vmatpush.bf16.msra.mxu3 %v8663_v53 }
 0x645   : > { %4623 = vmatmul.bf16.vlgmr.msrb.gmra.mxu0 %v4557_v46  ;;  %4637 = vmatmul.bf16.vlgmr.msrb.gmra.mxu1 %v4557_v46 }
 0x646   : > { %4651 = vmatmul.bf16.vlgmr.msrb.gmra.mxu2 %v4557_v46  ;;  %4665 = vmatmul.bf16.vlgmr.msrb.gmra.mxu3 %v4557_v46 }
 0x647   : > { %4820 = vmatpush.bf16.msra.mxu0 %v8694_v21  ;;  %4834 = vmatpush.bf16.msra.mxu1 %v8699_v26 }
 0x648   : > { %4848 = vmatpush.bf16.msra.mxu2 %v8733_v14  ;;  %4862 = vmatpush.bf16.msra.mxu3 %v8715_v52 }
 0x64b   : > { %4821 = vmatpush.bf16.msra.mxu0 %v8746_v27  ;;  %4835 = vmatpush.bf16.msra.mxu1 %v8751_v29 }
 0x64c   : > { %4849 = vmatpush.bf16.msra.mxu2 %v8785_v38  ;;  %4863 = vmatpush.bf16.msra.mxu3 %v8767_v58 }
 0x64f   : > { %4822 = vmatpush.bf16.msra.mxu0 %v13231_v54  ;;  %4836 = vmatpush.bf16.msra.mxu1 %v13232_v49 }
 0x650   : > { %4850 = vmatpush.bf16.msra.mxu2 %v13233_v3  ;;  %4864 = vmatpush.bf16.msra.mxu3 %v13234_v47 }
 0x653   : > { %4823 = vmatpush.bf16.msra.mxu0 %v13235_v11  ;;  %4837 = vmatpush.bf16.msra.mxu1 %v13236_v18 }
 0x654   : > { %4851 = vmatpush.bf16.msra.mxu2 %v13237_v19  ;;  %4865 = vmatpush.bf16.msra.mxu3 %v13238_v25 }
 0x656   : > { %4824 = vmatmul.bf16.vlgmr.msra.gmra.mxu0 %v4557_v46  ;;  %4838 = vmatmul.bf16.vlgmr.msra.gmra.mxu1 %v4557_v46 }
 0x657   : > { %5008 = vmatpush.bf16.msrb.mxu0 %v13239_v31  ;;  %5022 = vmatpush.bf16.msrb.mxu1 %v13240_v2 }
 0x658   : > { %4852 = vmatmul.bf16.vlgmr.msra.gmra.mxu2 %v4557_v46  ;;  %4866 = vmatmul.bf16.vlgmr.msra.gmra.mxu3 %v4557_v46  ;;  %v13266_v46 = vld [vmem:[#allocation122_spill] sm:$0xff] }
 0x659   : > { %5036 = vmatpush.bf16.msrb.mxu2 %v13241_v35  ;;  %5050 = vmatpush.bf16.msrb.mxu3 %v13242_v20  ;;  %v13305_v20 = vld [vmem:[#allocation172_spill] sm:$0xff] }
 0x65b   : > { %5009 = vmatpush.bf16.msrb.mxu0 %v13243_v55  ;;  %5023 = vmatpush.bf16.msrb.mxu1 %v13244_v12 }
 0x65d   : > { %5037 = vmatpush.bf16.msrb.mxu2 %v13245_v50  ;;  %5051 = vmatpush.bf16.msrb.mxu3 %v13246_v36 }
 0x65f   : > { %5010 = vmatpush.bf16.msrb.mxu0 %v13247_v39  ;;  %5024 = vmatpush.bf16.msrb.mxu1 %v13248_v37 }
 0x661   : > { %5038 = vmatpush.bf16.msrb.mxu2 %v13249_v43  ;;  %5052 = vmatpush.bf16.msrb.mxu3 %v13250_v48  ;;  %v13303_v48 = vld [vmem:[#allocation170_spill] sm:$0xff]  ;;  %v13304_v43 = vld [vmem:[#allocation171_spill] sm:$0xff] }
 0x663   : > { %5011 = vmatpush.bf16.msrb.mxu0 %v13251_v45  ;;  %5025 = vmatpush.bf16.msrb.mxu1 %v13252_v32 }
 0x665   : > { %5039 = vmatpush.bf16.msrb.mxu2 %v13253_v1  ;;  %5053 = vmatpush.bf16.msrb.mxu3 %v13254_v56 }
 0x667   : > { %5012 = vmatpush.bf16.msrb.mxu0 %v13255_v6  ;;  %5026 = vmatpush.bf16.msrb.mxu1 %v13256_v40  ;;  %v13267_v40 = vld [vmem:[#allocation126_spill] sm:$0xff] }
 0x669   : > { %5040 = vmatpush.bf16.msrb.mxu2 %v13257_v60  ;;  %5054 = vmatpush.bf16.msrb.mxu3 %v13258_v34  ;;  %v13268_v60 = vld [vmem:[#allocation127_spill] sm:$0xff]  ;;  %v13269_v34 = vld [vmem:[#allocation130_spill] sm:$0xff] }
 0x66b   : > { %5013 = vmatpush.bf16.msrb.mxu0 %v13259_v17  ;;  %5027 = vmatpush.bf16.msrb.mxu1 %v13260_v57  ;;  %v13270_v17 = vld [vmem:[#allocation131_spill] sm:$0xff]  ;;  %v13271_v57 = vld [vmem:[#allocation128_spill] sm:$0xff] }
 0x66d   : > { %5041 = vmatpush.bf16.msrb.mxu2 %v13261_v0  ;;  %5055 = vmatpush.bf16.msrb.mxu3 %v13262_v13  ;;  %v13272_v0 = vld [vmem:[#allocation129_spill] sm:$0xff] }
 0x66e   : > { %v13273_v13 = vld [vmem:[#allocation133_spill] sm:$0xff] }
 0x66f   : > { %5014 = vmatpush.bf16.msrb.mxu0 %v13263_v51  ;;  %5028 = vmatpush.bf16.msrb.mxu1 %v13264_v59  ;;  %v13274_v51 = vld [vmem:[#allocation135_spill] sm:$0xff]  ;;  %v13275_v59 = vld [vmem:[#allocation136_spill] sm:$0xff] }
 0x671   : > { %5042 = vmatpush.bf16.msrb.mxu2 %v13265_v33  ;;  %5056 = vmatpush.bf16.msrb.mxu3 %v13266_v46  ;;  %v13276_v33 = vld [vmem:[#allocation138_spill] sm:$0xff]  ;;  %v13277_v46 = vld [vmem:[#allocation139_spill] sm:$0xff] }
 0x673   : > { %5015 = vmatpush.bf16.msrb.mxu0 %v13267_v40  ;;  %5029 = vmatpush.bf16.msrb.mxu1 %v13268_v60  ;;  %v13278_v40 = vld [vmem:[#allocation140_spill] sm:$0xff]  ;;  %v13279_v60 = vld [vmem:[#allocation141_spill] sm:$0xff] }
 0x675   : > { %5043 = vmatpush.bf16.msrb.mxu2 %v13271_v57  ;;  %5057 = vmatpush.bf16.msrb.mxu3 %v13272_v0  ;;  %v13282_v57 = vld [vmem:[#allocation145_spill] sm:$0xff]  ;;  %v13283_v0 = vld [vmem:[#allocation148_spill] sm:$0xff] }
 0x677   : > { %5064 = vmatpush.bf16.msra.mxu0 %v13269_v34  ;;  %5078 = vmatpush.bf16.msra.mxu1 %v13270_v17  ;;  %v13280_v34 = vld [vmem:[#allocation142_spill] sm:$0xff]  ;;  %v13281_v17 = vld [vmem:[#allocation143_spill] sm:$0xff] }
 0x679   : > { %5092 = vmatpush.bf16.msra.mxu2 %v13273_v13  ;;  %5106 = vmatpush.bf16.msra.mxu3 %v13274_v51  ;;  %v13284_v13 = vld [vmem:[#allocation149_spill] sm:$0xff]  ;;  %v13285_v51 = vld [vmem:[#allocation150_spill] sm:$0xff] }
 0x67b   : > { %5065 = vmatpush.bf16.msra.mxu0 %v13275_v59  ;;  %5079 = vmatpush.bf16.msra.mxu1 %v13276_v33  ;;  %v13286_v59 = vld [vmem:[#allocation151_spill] sm:$0xff]  ;;  %v13287_v33 = vld [vmem:[#allocation152_spill] sm:$0xff] }
 0x67d   : > { %5093 = vmatpush.bf16.msra.mxu2 %v13277_v46  ;;  %5107 = vmatpush.bf16.msra.mxu3 %v13278_v40  ;;  %v13288_v46 = vld [vmem:[#allocation153_spill] sm:$0xff]  ;;  %v13289_v40 = vld [vmem:[#allocation154_spill] sm:$0xff] }
 0x67f   : > { %5066 = vmatpush.bf16.msra.mxu0 %v13279_v60  ;;  %5080 = vmatpush.bf16.msra.mxu1 %v13280_v34  ;;  %v13290_v60 = vld [vmem:[#allocation156_spill] sm:$0xff]  ;;  %v13291_v34 = vld [vmem:[#allocation157_spill] sm:$0xff] }
 0x681   : > { %5094 = vmatpush.bf16.msra.mxu2 %v13281_v17  ;;  %5108 = vmatpush.bf16.msra.mxu3 %v13282_v57  ;;  %v13292_v17 = vld [vmem:[#allocation158_spill] sm:$0xff]  ;;  %v13293_v57 = vld [vmem:[#allocation159_spill] sm:$0xff] }
 0x683   : > { %5067 = vmatpush.bf16.msra.mxu0 %v13283_v0  ;;  %5081 = vmatpush.bf16.msra.mxu1 %v13284_v13  ;;  %v13294_v0 = vld [vmem:[#allocation160_spill] sm:$0xff]  ;;  %v13295_v13 = vld [vmem:[#allocation162_spill] sm:$0xff] }
 0x685   : > { %5095 = vmatpush.bf16.msra.mxu2 %v13285_v51  ;;  %5109 = vmatpush.bf16.msra.mxu3 %v13286_v59  ;;  %v13296_v51 = vld [vmem:[#allocation163_spill] sm:$0xff]  ;;  %v13297_v59 = vld [vmem:[#allocation164_spill] sm:$0xff] }
 0x687   : > { %5068 = vmatpush.bf16.msra.mxu0 %v13287_v33  ;;  %5082 = vmatpush.bf16.msra.mxu1 %v13288_v46  ;;  %v13298_v33 = vld [vmem:[#allocation165_spill] sm:$0xff]  ;;  %v13299_v46 = vld [vmem:[#allocation166_spill] sm:$0xff] }
 0x689   : > { %5096 = vmatpush.bf16.msra.mxu2 %v13289_v40  ;;  %5110 = vmatpush.bf16.msra.mxu3 %v13290_v60  ;;  %v13300_v40 = vld [vmem:[#allocation167_spill] sm:$0xff]  ;;  %v13301_v60 = vld [vmem:[#allocation168_spill] sm:$0xff] }
 0x68b   : > { %5069 = vmatpush.bf16.msra.mxu0 %v13291_v34  ;;  %5083 = vmatpush.bf16.msra.mxu1 %v13292_v17  ;;  %v13302_v34 = vld [vmem:[#allocation169_spill] sm:$0xff] }
 0x68d   : > { %5097 = vmatpush.bf16.msra.mxu2 %v13293_v57  ;;  %5111 = vmatpush.bf16.msra.mxu3 %v13294_v0 }
 0x68f   : > { %5070 = vmatpush.bf16.msra.mxu0 %v13295_v13  ;;  %5084 = vmatpush.bf16.msra.mxu1 %v13296_v51 }
 0x691   : > { %5098 = vmatpush.bf16.msra.mxu2 %v13297_v59  ;;  %5112 = vmatpush.bf16.msra.mxu3 %v13298_v33 }
 0x693   : > { %5071 = vmatpush.bf16.msra.mxu0 %v13299_v46  ;;  %5085 = vmatpush.bf16.msra.mxu1 %v13300_v40 }
 0x695   : > { %5099 = vmatpush.bf16.msra.mxu2 %v13301_v60  ;;  %5113 = vmatpush.bf16.msra.mxu3 %v13302_v34 }
 0x6b2   : > { %v4568_v17 = vpop.f32.mrf.mxu0  ;;  %v4582_v57 = vpop.f32.mrf.mxu1 }
 0x6b9   : > { %v4596_v6 = vpop.f32.mrf.mxu2  ;;  %v4610_v0 = vpop.f32.mrf.mxu3 }
 0x6ba   : > { %v4570_v56 = vpop.f32.mrf.mxu0  ;;  %v4584_v13 = vpop.f32.mrf.mxu1 }
 0x6c1   : > { %v4612_v1 = vpop.f32.mrf.mxu3  ;;  %v4598_v33 = vpop.f32.mrf.mxu2 }
 0x6c2   : > { %v4624_v51 = vpop.f32.mrf.mxu0  ;;  %v4638_v32 = vpop.f32.mrf.mxu1 }
 0x6c3   : > { %v4625_v59 = vadd.f32 %v4624_v51, %v4568_v17  ;;  %v4639_v45 = vadd.f32 %v4638_v32, %v4582_v57 }
 0x6c5   : > { %v4671_v46 = vadd.f32 %v4625_v59, %v13303_v48  ;;  %v4672_v40 = vadd.f32 %v4639_v45, %v13304_v43 }
 0x6c7   : > { %v6883_v37 = vmul.f32 -1.442695, %v4671_v46  ;;  %v6885_v60 = vmul.f32 -1.442695, %v4672_v40 }
 0x6c9   : > { %7623 = vpow2.f32 %v6883_v37  ;;  %v4666_v34 = vpop.f32.mrf.mxu3  ;;  %v4652_v57 = vpop.f32.mrf.mxu2 }
 0x6ca   : > { %7625 = vpow2.f32 %v6885_v60  ;;  %v4667_v39 = vadd.f32 %v4666_v34, %v4610_v0  ;;  %v4626_v36 = vpop.f32.mrf.mxu0  ;;  %v4640_v50 = vpop.f32.mrf.mxu1 }
 0x6cb   : > { %v4627_v12 = vadd.f32 %v4626_v36, %v4570_v56  ;;  %v4641_v55 = vadd.f32 %v4640_v50, %v4584_v13  ;;  %v13307_v36 = vld [vmem:[#allocation51_spill] sm:$0xff] }
 0x6cc   : > { %v4674_v35 = vadd.f32 %v4667_v39, %v13305_v20  ;;  %v13309_v39 = vld [vmem:[#allocation54_spill] sm:$0xff] }
 0x6cd   : > { %v4675_v17 = vadd.f32 %v4627_v12, %v13303_v48  ;;  %v4676_v32 = vadd.f32 %v4641_v55, %v13304_v43  ;;  %v13306_v12 = vld [vmem:[#allocation11_spill] sm:$0xff] }
 0x6ce   : > { %v6887_v51 = vmul.f32 -1.442695, %v4674_v35  ;;  %v1102_v55 = vadd.f32 %v13307_v36, %v13306_v12  ;;  %v13308_v35 = vld [vmem:[#allocation12_spill] sm:$0xff]  ;;  %v13311_v12 = vld [vmem:[#allocation55_spill] sm:$0xff] }
 0x6cf   : > { %v7624_v59 = vpop.eup %7623  ;;  %v6884_v45 = vmul.f32 -1.442695, %v4675_v17  ;;  %v6886_v37 = vmul.f32 -1.442695, %v4676_v32  ;;  %v1200_v56 = vadd.f32 %v13309_v39, %v13308_v35  ;;  %v4653_v32 = vadd.f32 %v4652_v57, %v4596_v6  ;;  %v13314_v57 = vld [vmem:[#allocation50_spill] sm:$0xff] }
 0x6d0   : > { %v7626_v46 = vpop.eup %7625  ;;  %v11553_v40 = vadd.f32 1.0, %v7624_v59  ;;  %7627 = vpow2.f32 %v6887_v51 }
 0x6d1   : > { %v11555_v60 = vadd.f32 1.0, %v7626_v46  ;;  %7629 = vpow2.f32 %v6884_v45  ;;  %v4668_v50 = vpop.f32.mrf.mxu3  ;;  %v13310_v45 = vld [vmem:[#allocation52_spill] sm:$0xff]  ;;  %v4654_v48 = vpop.f32.mrf.mxu2  ;;  %v11574_v39 = vadd.f32 %v13311_v12, %v1200_v56 }
 0x6d2   : > { %7631 = vrcp.f32 %v11553_v40  ;;  %v4669_v34 = vadd.f32 %v4668_v50, %v4612_v1  ;;  %v11566_v46 = vadd.f32 %v13310_v45, %v1102_v55  ;;  %v13312_v1 = vld [vmem:[#allocation60_spill] sm:$0xff]  ;;  %v13313_v50 = vld [vmem:[#allocation123_spill] sm:$0xff]  ;;  %v4696_v19 = vand.u32 2147483647, %v11553_v40 }
 0x6d3   : > { %7633 = vrcp.f32 %v11555_v60  ;;  %v4825_v13 = vpop.f32.mrf.mxu0  ;;  %v4839_v51 = vpop.f32.mrf.mxu1  ;;  %v11578_v35 = vadd.f32 %v13313_v50, %v13312_v1  ;;  %v4655_v1 = vadd.f32 %v4654_v48, %v4598_v33  ;;  %v4736_v18 = vand.u32 2147483648, %v11555_v60 }
 0x6d4   : > { %7635 = vpow2.f32 %v6886_v37  ;;  %v4678_v36 = vadd.f32 %v4669_v34, %v13305_v20  ;;  %v4872_v55 = vadd.f32 %v4825_v13, %v13314_v57  ;;  %v13315_v34 = vld [vmem:[#allocation53_spill] sm:$0xff]  ;;  %v13316_v20 = vld [vmem:[#allocation68_spill] sm:$0xff]  ;;  %v4698_v13 = vand.u32 2147483648, %v11553_v40 }
 0x6d5   : > { %v4873_v12 = vadd.f32 %v4839_v51, %v13315_v34  ;;  %v4673_v31 = vadd.f32 %v4653_v32, %v13316_v20  ;;  %v4734_v32 = vand.u32 2147483647, %v11555_v60  ;;  %vm4692_vm10 = vweird.f32 %v11553_v40 }
 0x6d6   : > { %v7628_v0 = vpop.eup %7627  ;;  %v6888_v57 = vmul.f32 -1.442695, %v4678_v36  ;;  %v6889_v11 = vmul.f32 -1.442695, %v4872_v55  ;;  %v4677_v36 = vadd.f32 %v4655_v1, %v13316_v20  ;;  %v13317_v55 = vld [vmem:[#allocation63_spill] sm:$0xff]  ;;  %vm4730_vm11 = vweird.f32 %v11555_v60  ;;  %v13327_v20 = vld [vmem:[#allocation125_spill] sm:$0xff] }
 0x6d7   : > { %v7630_v17 = vpop.eup %7629  ;;  %v11585_v2 = vadd.f32 1.0, %v7628_v0  ;;  %v6891_v48 = vmul.f32 -1.442695, %v4873_v12  ;;  %vm11620_vm13 = vcmp.eq.f32.partialorder %v4696_v19, 8.507059e+37  ;;  %vm11632_vm15 = vcmp.eq.f32.partialorder %v4734_v32, 8.507059e+37 }
 0x6d8   : > { %v11563_v59 = vpop.eup %7631  ;;  %v11568_v43 = vadd.f32 1.0, %v7630_v17 }
 0x6d9   : > { %v11571_v37 = vpop.eup %7633  ;;  %v4688_v6 = vmul.f32 %v11563_v59, %v11553_v40  ;;  %vm4693_vm8 = vweird.f32 %v11563_v59 }
 0x6da   : > { %v7636_v45 = vpop.eup %7635  ;;  %v4726_v17 = vmul.f32 %v11571_v37, %v11555_v60  ;;  %7637 = vrcp.f32 %v11568_v43  ;;  %vm4731_vm9 = vweird.f32 %v11571_v37  ;;  %vm11611_vm12 = vmor %vm4692_vm10, %vm4693_vm8  ;;  %vm4707_vm0 = vweird.f32 %v11568_v43 }
 0x6db   : > { %v4689_v56 = vsub.f32 1.0, %v4688_v6  ;;  %v11590_v50 = vadd.f32 1.0, %v7636_v45  ;;  %v13318_v45 = vld [vmem:[#allocation132_spill] sm:$0xff]  ;;  %v4867_v12 = vpop.f32.mrf.mxu3  ;;  %vm11628_vm14 = vmor %vm4730_vm11, %vm4731_vm9  ;;  %v4827_v19 = vpop.f32.mrf.mxu0  ;;  %vm4770_vm9 = vweird.f32 %v11585_v2 }
 0x6dc   : > { %v4727_v25 = vsub.f32 1.0, %v4726_v17  ;;  %v1396_v17 = vadd.f32 %v13318_v45, %v13317_v55  ;;  %v4841_v32 = vpop.f32.mrf.mxu1  ;;  %v4876_v3 = vadd.f32 %v4827_v19, %v11566_v46 }
 0x6dd   : > { %v4690_v0 = vmul.f32 %v11563_v59, %v4689_v56  ;;  %7639 = vrcp.f32 %v11590_v50  ;;  %v4699_v56 = vor.u32 1.1754944e-38, %v4698_v13  ;;  %v4751_v55 = vand.u32 2147483648, %v11590_v50 }
 0x6de   : > { %v4728_v51 = vmul.f32 %v11571_v37, %v4727_v25  ;;  %7641 = vrcp.f32 %v11585_v2  ;;  %vm4745_vm3 = vweird.f32 %v11590_v50 }
 0x6df   : > { %v4691_v33 = vadd.f32 %v11563_v59, %v4690_v0  ;;  %7643 = vpow2.f32 %v6888_v57  ;;  %v4875_v57 = vadd.f32 %v4867_v12, %v13327_v20 }
 0x6e0   : > { %v11603_v6 = vpop.eup %7637  ;;  %v4729_v25 = vadd.f32 %v11571_v37, %v4728_v51  ;;  %7645 = vtanh.f32 %v4673_v31 }
 0x6e1   : > { %v4703_v1 = vmul.f32 %v11603_v6, %v11568_v43  ;;  %7647 = vpow2.f32 %v6889_v11  ;;  %v4695_v40 = vsel %vm11611_vm12, %v11563_v59, %v4691_v33  ;;  %v4737_v11 = vor.u32 1.1754944e-38, %v4736_v18  ;;  %v4853_v33 = vpop.f32.mrf.mxu2 }
 0x6e2   : > { %7649 = vpow2.f32 %v6891_v48  ;;  %v4733_v13 = vsel %vm11628_vm14, %v11571_v37, %v4729_v25  ;;  %v4711_v18 = vand.u32 2147483647, %v11568_v43  ;;  %v6893_v31 = vmul.f32 -1.442695, %v4875_v57 }
 0x6e3   : > { %v11624_v60 = vpop.eup %7639  ;;  %v4704_v59 = vsub.f32 1.0, %v4703_v1  ;;  %7651 = vtanh.f32 %v4677_v36  ;;  %v4700_v36 = vsel %vm11620_vm13, %v4699_v56, %v4695_v40  ;;  %v4713_v1 = vand.u32 2147483648, %v11568_v43  ;;  %v13333_v43 = vld [vmem:[#allocation117_spill] sm:$0xff] }
 0x6e4   : > { %v11636_v51 = vpop.eup %7641  ;;  %v4741_v48 = vmul.f32 %v11624_v60, %v11590_v50  ;;  %v4738_v54 = vsel %vm11632_vm15, %v4737_v11, %v4733_v13  ;;  %v4877_v56 = vadd.f32 %v4841_v32, %v11574_v39  ;;  %vm4746_vm1 = vweird.f32 %v11624_v60 }
 0x6e5   : > { %v7644_v45 = vpop.eup %7643  ;;  %v4705_v34 = vmul.f32 %v11603_v6, %v4704_v59  ;;  %v4766_v40 = vmul.f32 %v11636_v51, %v11585_v2  ;;  %vm4708_vm2 = vweird.f32 %v11603_v6  ;;  %v4795_v19 = vmul.f32 %v4738_v54, %v11333_v5  ;;  %vm11683_vm5 = vmor %vm4745_vm3, %vm4746_vm1 }
 0x6e6   : > { %v7646_v37 = vpop.eup %7645  ;;  %v4742_v25 = vsub.f32 1.0, %v4741_v48  ;;  %v11651_v47 = vadd.f32 1.0, %v7644_v45  ;;  %v6890_v13 = vmul.f32 -1.442695, %v4876_v3  ;;  %vm11673_vm4 = vmor %vm4707_vm0, %vm4708_vm2  ;;  %v4749_v45 = vand.u32 2147483647, %v11590_v50 }
 0x6e7   : > { %v7648_v49 = vpop.eup %7647  ;;  %v4797_v20 = vmul.f32 %v7646_v37, %v4700_v36  ;;  %v4706_v46 = vadd.f32 %v11603_v6, %v4705_v34  ;;  %v4869_v36 = vpop.f32.mrf.mxu3  ;;  %v13330_v34 = vld [vmem:[#allocation134_spill] sm:$0xff]  ;;  %v4776_v54 = vand.u32 2147483648, %v11585_v2  ;;  %v4874_v57 = vadd.f32 %v4853_v33, %v13333_v43  ;;  %v13334_v33 = vld [vmem:[#allocation124_spill] sm:$0xff] }
 0x6e8   : > { %v7650_v59 = vpop.eup %7649  ;;  %v4743_v12 = vmul.f32 %v11624_v60, %v4742_v25  ;;  %7653 = vrcp.f32 %v11651_v47  ;;  %v11664_v11 = vadd.f32 1.0, %v7648_v49  ;;  %v6892_v49 = vmul.f32 -1.442695, %v4877_v56 }
 0x6e9   : > { %v7652_v48 = vpop.eup %7651  ;;  %v11666_v0 = vadd.f32 1.0, %v7650_v59  ;;  %7655 = vpow2.f32 %v6893_v31  ;;  %v1445_v5 = vadd.f32 %v13330_v34, %v1396_v17  ;;  %v4767_v37 = vsub.f32 1.0, %v4766_v40  ;;  %v4855_v59 = vpop.f32.mrf.mxu2 }
 0x6ea   : > { %v4744_v39 = vadd.f32 %v11624_v60, %v4743_v12  ;;  %7657 = vrcp.f32 %v11664_v11  ;;  %v4710_v50 = vsel %vm11673_vm4, %v11603_v6, %v4706_v46  ;;  %v4714_v25 = vor.u32 1.1754944e-38, %v4713_v1 }
 0x6eb   : > { %7659 = vrcp.f32 %v11666_v0  ;;  %v11695_v31 = vadd.f32 %v4797_v20, %v4795_v19  ;;  %v4752_v56 = vor.u32 1.1754944e-38, %v4751_v55  ;;  %v4879_v12 = vadd.f32 %v4869_v36, %v1445_v5 }
 0x6ec   : > { %v4748_v17 = vsel %vm11683_vm5, %v11624_v60, %v4744_v39  ;;  %7661 = vpow2.f32 %v6890_v13  ;;  %v1347_v40 = vadd.f32 %v13334_v33, %v11578_v35  ;;  %vm4712_vm6 = vcmp.eq.f32.partialorder %v4711_v18, 8.507059e+37 }
 0x6ed   : > { %vm4750_vm7 = vcmp.eq.f32.partialorder %v4749_v45, 8.507059e+37  ;;  %7663 = vpow2.f32 %v6892_v49  ;;  %v11701_v1 = vor.u32 1.1754944e-38, %v4776_v54  ;;  %v4715_v46 = vsel %vm4712_vm6, %v4714_v25, %v4710_v50 }
 0x6ee   : > { %v11697_v34 = vpop.eup %7653  ;;  %v4753_v32 = vsel %vm4750_vm7, %v4752_v56, %v4748_v17  ;;  %7665 = vtanh.f32 %v4874_v57  ;;  %v4768_v55 = vmul.f32 %v11636_v51, %v4767_v37  ;;  %v4878_v19 = vadd.f32 %v4855_v59, %v1347_v40 }
 0x6ef   : > { %v7656_v6 = vpop.eup %7655  ;;  %v4781_v20 = vmul.f32 %v11697_v34, %v11651_v47  ;;  %v6894_v39 = vmul.f32 -1.442695, %v4879_v12  ;;  %7667 = vtanh.f32 %v11695_v31  ;;  %v4791_v35 = vand.u32 2147483648, %v11651_v47 }
 0x6f0   : > { %v7658_v60 = vpop.eup %7657  ;;  %v11709_v45 = vadd.f32 1.0, %v7656_v6  ;;  %vm4771_vm8 = vweird.f32 %v11636_v51  ;;  %v4796_v49 = vmul.f32 %v4753_v32, %v11362_v44  ;;  %v4798_v36 = vmul.f32 %v7652_v48, %v4715_v46 }
 0x6f1   : > { %v7660_v13 = vpop.eup %7659  ;;  %v4889_v18 = vmul.f32 %v7658_v60, %v11664_v11  ;;  %v4937_v54 = vand.u32 2147483648, %v11666_v0  ;;  %v4897_v57 = vand.u32 2147483647, %v11664_v11  ;;  %v4899_v37 = vand.u32 2147483648, %v11664_v11  ;;  %vm11746_vm4 = vmor %vm4770_vm9, %vm4771_vm8 }
 0x6f2   : > { %v4927_v5 = vmul.f32 %v7660_v13, %v11666_v0  ;;  %v7662_v3 = vpop.eup %7661  ;;  %v4935_v50 = vand.u32 2147483647, %v11666_v0  ;;  %v4782_v17 = vsub.f32 1.0, %v4781_v20  ;;  %7669 = vpow2.f32 %v6894_v39 }
 0x6f3   : > { %v4890_v43 = vsub.f32 1.0, %v4889_v18  ;;  %v7664_v25 = vpop.eup %7663  ;;  %v11719_v59 = vadd.f32 1.0, %v7662_v3  ;;  %vm4894_vm10 = vweird.f32 %v7658_v60  ;;  %7671 = vrcp.f32 %v11709_v45 }
 0x6f4   : > { %v4928_v56 = vsub.f32 1.0, %v4927_v5  ;;  %v7666_v44 = vpop.eup %7665  ;;  %v11722_v12 = vadd.f32 1.0, %v7664_v25  ;;  %v11724_v33 = vadd.f32 %v4798_v36, %v4796_v49  ;;  %vm4932_vm11 = vweird.f32 %v7660_v13 }
 0x6f5   : > { %v4891_v48 = vmul.f32 %v7658_v60, %v4890_v43  ;;  %7673 = vrcp.f32 %v11719_v59  ;;  %v7668_v6 = vpop.eup %7667  ;;  %vm4931_vm12 = vweird.f32 %v11666_v0  ;;  %vm4893_vm13 = vweird.f32 %v11664_v11 }
 0x6f6   : > { %v4929_v40 = vmul.f32 %v7660_v13, %v4928_v56  ;;  %7675 = vrcp.f32 %v11722_v12  ;;  %v4783_v32 = vmul.f32 %v11697_v34, %v4782_v17  ;;  %v4938_v20 = vor.u32 1.1754944e-38, %v4937_v54  ;;  %vm4895_vm14 = vmor %vm4893_vm13, %vm4894_vm10 }
 0x6f7   : > { %v4892_v46 = vadd.f32 %v7658_v60, %v4891_v48  ;;  %v4900_v39 = vor.u32 1.1754944e-38, %v4899_v37  ;;  %vm4933_vm15 = vmor %vm4931_vm12, %vm4932_vm11  ;;  %vm4898_vm0 = vcmp.eq.f32.partialorder %v4897_v57, 8.507059e+37  ;;  %vm4936_vm1 = vcmp.eq.f32.partialorder %v4935_v50, 8.507059e+37 }
 0x6f8   : > { %v4930_v18 = vadd.f32 %v7660_v13, %v4929_v40  ;;  %v4769_v36 = vadd.f32 %v11636_v51, %v4768_v55  ;;  %v7670_v5 = vpop.eup %7669  ;;  %7677 = vtanh.f32 %v11724_v33  ;;  %v4774_v11 = vand.u32 2147483647, %v11585_v2 }
 0x6f9   : > { %v4896_v49 = vsel %vm4895_vm14, %v7658_v60, %v4892_v46  ;;  %v11734_v43 = vpop.eup %7671  ;;  %vm4785_vm2 = vweird.f32 %v11651_v47  ;;  %v11737_v25 = vadd.f32 1.0, %v7670_v5  ;;  %vm4786_vm3 = vweird.f32 %v11697_v34 }
 0x6fa   : > { %v4901_v0 = vsel %vm4898_vm0, %v4900_v39, %v4896_v49  ;;  %v4934_v3 = vsel %vm4933_vm15, %v7660_v13, %v4930_v18  ;;  %7679 = vtanh.f32 %v4878_v19  ;;  %v4784_v57 = vadd.f32 %v11697_v34, %v4783_v32  ;;  %vm11765_vm6 = vmor %vm4785_vm2, %vm4786_vm3 }
 0x6fb   : > { %v4939_v54 = vsel %vm4936_vm1, %v4938_v20, %v4934_v3  ;;  %v4998_v37 = vmul.f32 %v7666_v44, %v4901_v0  ;;  %v7674_v60 = vpop.eup %7673  ;;  %v4792_v17 = vor.u32 1.1754944e-38, %v4791_v35  ;;  %7681 = vrcp.f32 %v11737_v25 }
 0x6fc   : > { %v4996_v55 = vmul.f32 %v4939_v54, %v11391_v23  ;;  %v7676_v50 = vpop.eup %7675  ;;  %v4904_v56 = vmul.f32 %v7674_v60, %v11719_v59  ;;  %v4789_v44 = vand.u32 2147483647, %v11651_v47  ;;  %v4773_v48 = vsel %vm11746_vm4, %v11636_v51, %v4769_v36 }
 0x6fd   : > { %v4942_v19 = vmul.f32 %v7676_v50, %v11722_v12  ;;  %vm11759_vm5 = vcmp.eq.f32.partialorder %v4774_v11, 8.507059e+37  ;;  %v4967_v40 = vmul.f32 %v11734_v43, %v11709_v45  ;;  %vm4908_vm7 = vweird.f32 %v11719_v59 }
 0x6fe   : > { %v11753_v23 = vadd.f32 %v4998_v37, %v4996_v55  ;;  %v4905_v46 = vsub.f32 1.0, %v4904_v56  ;;  %v4912_v32 = vand.u32 2147483647, %v11719_v59  ;;  %v7678_v20 = vpop.eup %7677  ;;  %v4952_v39 = vand.u32 2147483648, %v11722_v12 }
 0x6ff   : > { %v4943_v51 = vsub.f32 1.0, %v4942_v19  ;;  %v4914_v18 = vand.u32 2147483648, %v11719_v59  ;;  %v4788_v47 = vsel %vm11765_vm6, %v11697_v34, %v4784_v57  ;;  %vm4909_vm8 = vweird.f32 %v7674_v60 }
 0x700   : > { %v4906_v49 = vmul.f32 %v7674_v60, %v4905_v46  ;;  %v4950_v36 = vand.u32 2147483647, %v11722_v12  ;;  %vm4790_vm9 = vcmp.eq.f32.partialorder %v4789_v44, 8.507059e+37  ;;  %v7680_v5 = vpop.eup %7679  ;;  %vm4947_vm10 = vweird.f32 %v7676_v50  ;;  %vm4910_vm12 = vmor %vm4908_vm7, %vm4909_vm8 }
 0x701   : > { %v4944_v0 = vmul.f32 %v7676_v50, %v4943_v51  ;;  %v4778_v3 = vsel %vm11759_vm5, %v11701_v1, %v4773_v48  ;;  %v4793_v11 = vsel %vm4790_vm9, %v4792_v17, %v4788_v47  ;;  %v11782_v54 = vpop.eup %7681  ;;  %v4968_v37 = vsub.f32 1.0, %v4967_v40  ;;  %v13359_v47 = vld [vmem:[#allocation97_spill] sm:$0xff] }
 0x702   : > { %v4907_v55 = vadd.f32 %v7674_v60, %v4906_v49  ;;  %v4803_v13 = vmul.f32 %v7668_v6, %v4778_v3  ;;  %v4804_v56 = vmul.f32 %v7678_v20, %v4793_v11  ;;  %vm4946_vm11 = vweird.f32 %v11722_v12  ;;  %v13360_v49 = vld [vmem:[#allocation98_spill] sm:$0xff]  ;;  %v13364_v3 = vld [vmem:[#allocation105_spill] sm:$0xff] }
 0x703   : > { %v4915_v34 = vor.u32 1.1754944e-38, %v4914_v18  ;;  %v4945_v57 = vadd.f32 %v7676_v50, %v4944_v0  ;;  %v4982_v44 = vmul.f32 %v11782_v54, %v11737_v25  ;;  %vm4948_vm13 = vmor %vm4946_vm11, %vm4947_vm10  ;;  %v4953_v19 = vor.u32 1.1754944e-38, %v4952_v39  ;;  %v13363_v0 = vld [vmem:[#allocation103_spill] sm:$0xff]  ;;  %v13365_v11 = vld [vmem:[#allocation106_spill] sm:$0xff] }
 0x704   : > { %v4911_v1 = vsel %vm4910_vm12, %v7674_v60, %v4907_v55  ;;  %vm4913_vm14 = vcmp.eq.f32.partialorder %v4912_v32, 8.507059e+37  ;;  %v5007_v17 = vpack.c.bf16 %v4804_v56, %v4803_v13  ;;  %vm4951_vm15 = vcmp.eq.f32.partialorder %v4950_v36, 8.507059e+37  ;;  %v13361_v36 = vld [vmem:[#allocation99_spill] sm:$0xff]  ;;  %v13368_v55 = vld [vmem:[#allocation109_spill] sm:$0xff]  ;;  %v13369_v13 = vld [vmem:[#allocation110_spill] sm:$0xff] }
 0x705   : > { %v4916_v48 = vsel %vm4913_vm14, %v4915_v34, %v4911_v1  ;;  %v4949_v2 = vsel %vm4948_vm13, %v7676_v50, %v4945_v57  ;;  %v4983_v6 = vsub.f32 1.0, %v4982_v44  ;;  %v4969_v35 = vmul.f32 %v11734_v43, %v4968_v37  ;;  %v13367_v37 = vld [vmem:[#allocation108_spill] sm:$0xff]  ;;  %v13370_v56 = vld [vmem:[#allocation111_spill] sm:$0xff]  ;;  %v13371_v34 = vld [vmem:[#allocation114_spill] sm:$0xff] }
 0x706   : > { %v4954_v12 = vsel %vm4951_vm15, %v4953_v19, %v4949_v2  ;;  %v4999_v40 = vmul.f32 %v7680_v5, %v4916_v48  ;;  %5016 = vmatmul.bf16.vlgmr.msrb.gmra.mxu0 %v5007_v17  ;;  %5030 = vmatmul.bf16.vlgmr.msrb.gmra.mxu1 %v5007_v17  ;;  %7683 = vtanh.f32 %v11753_v23  ;;  %vm4972_vm0 = vweird.f32 %v11734_v43  ;;  %v13362_v5 = vld [vmem:[#allocation100_spill] sm:$0xff]  ;;  %v13372_v57 = vld [vmem:[#allocation115_spill] sm:$0xff]  ;;  %v13374_v19 = vld [vmem:[#allocation118_spill] sm:$0xff] }
 0x707   : > { %v4997_v59 = vmul.f32 %v4954_v12, %v11434_v7  ;;  %v4984_v46 = vmul.f32 %v11782_v54, %v4983_v6  ;;  %5044 = vmatmul.bf16.vlgmr.msrb.gmra.mxu2 %v5007_v17  ;;  %5058 = vmatmul.bf16.vlgmr.msrb.gmra.mxu3 %v5007_v17  ;;  %v4970_v7 = vadd.f32 %v11734_v43, %v4969_v35  ;;  %vm4987_vm1 = vweird.f32 %v11782_v54  ;;  %v13373_v44 = vld [vmem:[#allocation116_spill] sm:$0xff]  ;;  %v13375_v1 = vld [vmem:[#allocation119_spill] sm:$0xff]  ;;  %v13377_v48 = vld [vmem:[#allocation121_spill] sm:$0xff] }
 0x708   : > { %5265 = vmatpush.bf16.msrb.mxu0 %v8488_v8  ;;  %5279 = vmatpush.bf16.msrb.mxu1 %v8493_v10  ;;  %vm4971_vm2 = vweird.f32 %v11709_v45  ;;  %v4977_v8 = vand.u32 2147483648, %v11709_v45  ;;  %v4992_v10 = vand.u32 2147483648, %v11737_v25  ;;  %vm4986_vm4 = vweird.f32 %v11737_v25  ;;  %v13376_v17 = vld [vmem:[#allocation120_spill] sm:$0xff]  ;;  %v13378_v2 = vld [vmem:[#allocation122_spill] sm:$0xff]  ;;  %v13380_v35 = vld [vmem:[#allocation127_spill] sm:$0xff] }
 0x709   : > { %v11796_v60 = vadd.f32 %v4999_v40, %v4997_v59  ;;  %5293 = vmatpush.bf16.msrb.mxu2 %v8523_v22  ;;  %5307 = vmatpush.bf16.msrb.mxu3 %v8505_v15  ;;  %v4985_v50 = vadd.f32 %v11782_v54, %v4984_v46  ;;  %vm11807_vm3 = vmor %vm4971_vm2, %vm4972_vm0  ;;  %v4975_v15 = vand.u32 2147483647, %v11709_v45  ;;  %v4990_v22 = vand.u32 2147483647, %v11737_v25  ;;  %v13379_v6 = vld [vmem:[#allocation126_spill] sm:$0xff]  ;;  %v13382_v40 = vld [vmem:[#allocation131_spill] sm:$0xff] }
 0x70a   : > { %vm4988_vm5 = vmor %vm4986_vm4, %vm4987_vm1  ;;  %v4974_v20 = vsel %vm11807_vm3, %v11734_v43, %v4970_v7  ;;  %v4978_v39 = vor.u32 1.1754944e-38, %v4977_v8  ;;  %v4993_v18 = vor.u32 1.1754944e-38, %v4992_v10  ;;  %v13381_v12 = vld [vmem:[#allocation130_spill] sm:$0xff]  ;;  %v13383_v59 = vld [vmem:[#allocation128_spill] sm:$0xff] }
 0x70b   : > { %7685 = vtanh.f32 %v11796_v60  ;;  %v4989_v51 = vsel %vm4988_vm5, %v11782_v54, %v4985_v50  ;;  %vm4976_vm6 = vcmp.eq.f32.partialorder %v4975_v15, 8.507059e+37  ;;  %vm4991_vm7 = vcmp.eq.f32.partialorder %v4990_v22, 8.507059e+37  ;;  %v13366_v54 = vld [vmem:[#allocation107_spill] sm:$0xff]  ;;  %v13384_v46 = vld [vmem:[#allocation129_spill] sm:$0xff]  ;;  %v13387_v8 = vld [vmem:[#allocation136_spill] sm:$0xff] }
 0x70c   : > { %5266 = vmatpush.bf16.msrb.mxu0 %v8536_v28  ;;  %5280 = vmatpush.bf16.msrb.mxu1 %v8541_v30  ;;  %v7684_v45 = vpop.eup %7683  ;;  %v4979_v30 = vsel %vm4976_vm6, %v4978_v39, %v4974_v20  ;;  %v13385_v7 = vld [vmem:[#allocation133_spill] sm:$0xff]  ;;  %v13386_v50 = vld [vmem:[#allocation135_spill] sm:$0xff]  ;;  %v13388_v10 = vld [vmem:[#allocation138_spill] sm:$0xff] }
 0x70d   : > { %5294 = vmatpush.bf16.msrb.mxu2 %v12806_v62  ;;  %5308 = vmatpush.bf16.msrb.mxu3 %v12807_v42  ;;  %v4994_v62 = vsel %vm4991_vm7, %v4993_v18, %v4989_v51  ;;  %v5004_v42 = vmul.f32 %v7684_v45, %v4979_v30  ;;  %v13389_v32 = vld [vmem:[#allocation139_spill] sm:$0xff]  ;;  %v13390_v15 = vld [vmem:[#allocation140_spill] sm:$0xff]  ;;  %v13391_v22 = vld [vmem:[#allocation141_spill] sm:$0xff] }
 0x70e   : > { %v13392_v20 = vld [vmem:[#allocation142_spill] sm:$0xff]  ;;  %v13393_v51 = vld [vmem:[#allocation143_spill] sm:$0xff]  ;;  %v13394_v45 = vld [vmem:[#allocation145_spill] sm:$0xff] }
 0x70f   : > { %v13395_v39 = vld [vmem:[#allocation148_spill] sm:$0xff]  ;;  %v13396_v18 = vld [vmem:[#allocation149_spill] sm:$0xff]  ;;  %v13398_v30 = vld [vmem:[#allocation151_spill] sm:$0xff] }
 0x710   : > { %5267 = vmatpush.bf16.msrb.mxu0 %v12808_v24  ;;  %5281 = vmatpush.bf16.msrb.mxu1 %v12809_v61  ;;  %v13345_v24 = vld [vmem:[#allocation40_spill] sm:$0xff]  ;;  %v13354_v61 = vld [vmem:[#allocation89_spill] sm:$0xff] }
 0x711   : > { %v7686_v28 = vpop.eup %7685  ;;  %5295 = vmatpush.bf16.msrb.mxu2 %v12810_v9  ;;  %5309 = vmatpush.bf16.msrb.mxu3 %v8611_v4  ;;  %v13343_v4 = vld [vmem:[#allocation33_spill] sm:$0xff]  ;;  %v13355_v9 = vld [vmem:[#allocation92_spill] sm:$0xff] }
 0x712   : > { %v5005_v43 = vmul.f32 %v7686_v28, %v4994_v62  ;;  %v13397_v28 = vld [vmem:[#allocation150_spill] sm:$0xff]  ;;  %v13399_v62 = vld [vmem:[#allocation152_spill] sm:$0xff] }
 0x714   : > { %v5006_v25 = vpack.c.bf16 %v5005_v43, %v5004_v42  ;;  %5268 = vmatpush.bf16.msrb.mxu0 %v12811_v16  ;;  %5282 = vmatpush.bf16.msrb.mxu1 %v12812_v63  ;;  %v13356_v16 = vld [vmem:[#allocation93_spill] sm:$0xff]  ;;  %v13357_v63 = vld [vmem:[#allocation94_spill] sm:$0xff] }
 0x715   : > { %5296 = vmatpush.bf16.msrb.mxu2 %v12813_v41  ;;  %5310 = vmatpush.bf16.msrb.mxu3 %v8663_v53  ;;  %v13344_v53 = vld [vmem:[#allocation34_spill] sm:$0xff]  ;;  %v13358_v41 = vld [vmem:[#allocation96_spill] sm:$0xff]  ;;  %v13400_v42 = vld [vmem:[#allocation153_spill] sm:$0xff] }
 0x716   : > { %5072 = vmatmul.bf16.vlgmr.msra.gmra.mxu0 %v5006_v25  ;;  %5086 = vmatmul.bf16.vlgmr.msra.gmra.mxu1 %v5006_v25  ;;  %v13401_v43 = vld [vmem:[#allocation154_spill] sm:$0xff] }
 0x717   : > { %5100 = vmatmul.bf16.vlgmr.msra.gmra.mxu2 %v5006_v25  ;;  %5114 = vmatmul.bf16.vlgmr.msra.gmra.mxu3 %v5006_v25 }
 0x718   : > { %5269 = vmatpush.bf16.msrb.mxu0 %v8694_v21  ;;  %5283 = vmatpush.bf16.msrb.mxu1 %v8699_v26  ;;  %v13346_v21 = vld [vmem:[#allocation37_spill] sm:$0xff] }
 0x719   : > { %5297 = vmatpush.bf16.msrb.mxu2 %v8733_v14  ;;  %5311 = vmatpush.bf16.msrb.mxu3 %v8715_v52  ;;  %v13347_v26 = vld [vmem:[#allocation41_spill] sm:$0xff]  ;;  %v13348_v14 = vld [vmem:[#allocation42_spill] sm:$0xff] }
 0x71a   : > { %v13349_v52 = vld [vmem:[#allocation49_spill] sm:$0xff] }
 0x71c   : > { %5270 = vmatpush.bf16.msrb.mxu0 %v8746_v27  ;;  %5284 = vmatpush.bf16.msrb.mxu1 %v8751_v29  ;;  %v13350_v27 = vld [vmem:[#allocation46_spill] sm:$0xff] }
 0x71d   : > { %5298 = vmatpush.bf16.msrb.mxu2 %v8785_v38  ;;  %5312 = vmatpush.bf16.msrb.mxu3 %v8767_v58  ;;  %v13351_v29 = vld [vmem:[#allocation86_spill] sm:$0xff]  ;;  %v13352_v38 = vld [vmem:[#allocation87_spill] sm:$0xff]  ;;  %v13353_v58 = vld [vmem:[#allocation88_spill] sm:$0xff] }
 0x720   : > { %5271 = vmatpush.bf16.msrb.mxu0 %v13343_v4  ;;  %5285 = vmatpush.bf16.msrb.mxu1 %v13344_v53  ;;  %v13403_v4 = vld [vmem:[#allocation157_spill] sm:$0xff]  ;;  %v13404_v53 = vld [vmem:[#allocation158_spill] sm:$0xff] }
 0x721   : > { %5299 = vmatpush.bf16.msrb.mxu2 %v13345_v24  ;;  %5313 = vmatpush.bf16.msrb.mxu3 %v13346_v21  ;;  %v13405_v24 = vld [vmem:[#allocation159_spill] sm:$0xff]  ;;  %v13406_v21 = vld [vmem:[#allocation160_spill] sm:$0xff] }
 0x724   : > { %5272 = vmatpush.bf16.msrb.mxu0 %v13347_v26  ;;  %5286 = vmatpush.bf16.msrb.mxu1 %v13348_v14  ;;  %v13407_v26 = vld [vmem:[#allocation162_spill] sm:$0xff]  ;;  %v13408_v14 = vld [vmem:[#allocation163_spill] sm:$0xff] }
 0x725   : > { %5300 = vmatpush.bf16.msrb.mxu2 %v13349_v52  ;;  %5314 = vmatpush.bf16.msrb.mxu3 %v13350_v27  ;;  %v13409_v52 = vld [vmem:[#allocation164_spill] sm:$0xff]  ;;  %v13410_v27 = vld [vmem:[#allocation165_spill] sm:$0xff] }
 0x727   : > { %5273 = vmatmul.bf16.vlgmr.msrb.gmra.mxu0 %v5006_v25  ;;  %5287 = vmatmul.bf16.vlgmr.msrb.gmra.mxu1 %v5006_v25 }
 0x728   : > { %5457 = vmatpush.bf16.msra.mxu0 %v13351_v29  ;;  %5471 = vmatpush.bf16.msra.mxu1 %v13352_v38  ;;  %v13411_v29 = vld [vmem:[#allocation166_spill] sm:$0xff]  ;;  %v13412_v38 = vld [vmem:[#allocation167_spill] sm:$0xff] }
 0x729   : > { %5301 = vmatmul.bf16.vlgmr.msrb.gmra.mxu2 %v5006_v25  ;;  %5315 = vmatmul.bf16.vlgmr.msrb.gmra.mxu3 %v5006_v25  ;;  %v13402_v25 = vld [vmem:[#allocation156_spill] sm:$0xff] }
 0x72a   : > { %5485 = vmatpush.bf16.msra.mxu2 %v13353_v58  ;;  %5499 = vmatpush.bf16.msra.mxu3 %v13354_v61  ;;  %v13413_v58 = vld [vmem:[#allocation168_spill] sm:$0xff]  ;;  %v13414_v61 = vld [vmem:[#allocation169_spill] sm:$0xff] }
 0x72c   : > { %5458 = vmatpush.bf16.msra.mxu0 %v13355_v9  ;;  %5472 = vmatpush.bf16.msra.mxu1 %v13356_v16 }
 0x72e   : > { %5486 = vmatpush.bf16.msra.mxu2 %v13357_v63  ;;  %5500 = vmatpush.bf16.msra.mxu3 %v13358_v41 }
 0x730   : > { %5459 = vmatpush.bf16.msra.mxu0 %v13359_v47  ;;  %5473 = vmatpush.bf16.msra.mxu1 %v13360_v49 }
 0x732   : > { %5487 = vmatpush.bf16.msra.mxu2 %v13361_v36  ;;  %5501 = vmatpush.bf16.msra.mxu3 %v13362_v5 }
 0x734   : > { %5460 = vmatpush.bf16.msra.mxu0 %v13363_v0  ;;  %5474 = vmatpush.bf16.msra.mxu1 %v13364_v3 }
 0x736   : > { %5488 = vmatpush.bf16.msra.mxu2 %v13365_v11  ;;  %5502 = vmatpush.bf16.msra.mxu3 %v13366_v54 }
 0x738   : > { %5461 = vmatpush.bf16.msra.mxu0 %v13367_v37  ;;  %5475 = vmatpush.bf16.msra.mxu1 %v13368_v55  ;;  %v13415_v37 = vld [vmem:[#allocation170_spill] sm:$0xff] }
 0x73a   : > { %5489 = vmatpush.bf16.msra.mxu2 %v13369_v13  ;;  %5503 = vmatpush.bf16.msra.mxu3 %v13370_v56  ;;  %v13416_v13 = vld [vmem:[#allocation171_spill] sm:$0xff] }
 0x73c   : > { %5462 = vmatpush.bf16.msra.mxu0 %v13371_v34  ;;  %5476 = vmatpush.bf16.msra.mxu1 %v13372_v57 }
 0x73e   : > { %5490 = vmatpush.bf16.msra.mxu2 %v13373_v44  ;;  %5504 = vmatpush.bf16.msra.mxu3 %v13374_v19 }
 0x740   : > { %5463 = vmatpush.bf16.msra.mxu0 %v13375_v1  ;;  %5477 = vmatpush.bf16.msra.mxu1 %v13376_v17 }
 0x742   : > { %5491 = vmatpush.bf16.msra.mxu2 %v13377_v48  ;;  %5505 = vmatpush.bf16.msra.mxu3 %v13378_v2 }
 0x744   : > { %5464 = vmatpush.bf16.msra.mxu0 %v13379_v6  ;;  %5478 = vmatpush.bf16.msra.mxu1 %v13380_v35  ;;  %v13417_v35 = vld [vmem:[#allocation172_spill] sm:$0xff] }
 0x746   : > { %5492 = vmatpush.bf16.msra.mxu2 %v13383_v59  ;;  %5506 = vmatpush.bf16.msra.mxu3 %v13384_v46 }
 0x748   : > { %5513 = vmatpush.bf16.msrb.mxu0 %v13381_v12  ;;  %5527 = vmatpush.bf16.msrb.mxu1 %v13382_v40 }
 0x74a   : > { %5541 = vmatpush.bf16.msrb.mxu2 %v13385_v7  ;;  %5555 = vmatpush.bf16.msrb.mxu3 %v13386_v50 }
 0x74c   : > { %5514 = vmatpush.bf16.msrb.mxu0 %v13387_v8  ;;  %5528 = vmatpush.bf16.msrb.mxu1 %v13388_v10 }
 0x74e   : > { %5542 = vmatpush.bf16.msrb.mxu2 %v13389_v32  ;;  %5556 = vmatpush.bf16.msrb.mxu3 %v13390_v15 }
 0x750   : > { %5515 = vmatpush.bf16.msrb.mxu0 %v13391_v22  ;;  %5529 = vmatpush.bf16.msrb.mxu1 %v13392_v20  ;;  %v13418_v20 = vld [vmem:[#allocation11_spill] sm:$0xff] }
 0x752   : > { %5543 = vmatpush.bf16.msrb.mxu2 %v13393_v51  ;;  %5557 = vmatpush.bf16.msrb.mxu3 %v13394_v45  ;;  %v13419_v51 = vld [vmem:[#allocation57_spill] sm:$0xff] }
 0x753   : > { %v1107_v45 = vadd.f32 %v13419_v51, %v13418_v20 }
 0x754   : > { %5516 = vmatpush.bf16.msrb.mxu0 %v13395_v39  ;;  %5530 = vmatpush.bf16.msrb.mxu1 %v13396_v18  ;;  %v13420_v39 = vld [vmem:[#allocation12_spill] sm:$0xff]  ;;  %v13421_v18 = vld [vmem:[#allocation61_spill] sm:$0xff] }
 0x756   : > { %5544 = vmatpush.bf16.msrb.mxu2 %v13397_v28  ;;  %5558 = vmatpush.bf16.msrb.mxu3 %v13398_v30  ;;  %v1205_v28 = vadd.f32 %v13421_v18, %v13420_v39 }
 0x758   : > { %5517 = vmatpush.bf16.msrb.mxu0 %v13399_v62  ;;  %5531 = vmatpush.bf16.msrb.mxu1 %v13400_v42  ;;  %v13422_v62 = vld [vmem:[#allocation60_spill] sm:$0xff] }
 0x759   : > { %v13423_v42 = vld [vmem:[#allocation144_spill] sm:$0xff] }
 0x75a   : > { %5545 = vmatpush.bf16.msrb.mxu2 %v13401_v43  ;;  %5559 = vmatpush.bf16.msrb.mxu3 %v13402_v25  ;;  %v1303_v43 = vadd.f32 %v13423_v42, %v13422_v62  ;;  %v13424_v25 = vld [vmem:[#allocation63_spill] sm:$0xff] }
 0x75c   : > { %5518 = vmatpush.bf16.msrb.mxu0 %v13403_v4  ;;  %5532 = vmatpush.bf16.msrb.mxu1 %v13404_v53  ;;  %v13425_v4 = vld [vmem:[#allocation161_spill] sm:$0xff] }
 0x75d   : > { %v1401_v53 = vadd.f32 %v13425_v4, %v13424_v25 }
 0x75e   : > { %5546 = vmatpush.bf16.msrb.mxu2 %v13405_v24  ;;  %5560 = vmatpush.bf16.msrb.mxu3 %v13406_v21  ;;  %v13426_v24 = vld [vmem:[#allocation68_spill] sm:$0xff] }
 0x760   : > { %5519 = vmatpush.bf16.msrb.mxu0 %v13407_v26  ;;  %5533 = vmatpush.bf16.msrb.mxu1 %v13408_v14 }
 0x762   : > { %5547 = vmatpush.bf16.msrb.mxu2 %v13409_v52  ;;  %5561 = vmatpush.bf16.msrb.mxu3 %v13410_v27  ;;  %v13427_v27 = vld [vmem:[#allocation58_spill] sm:$0xff] }
 0x764   : > { %5520 = vmatpush.bf16.msrb.mxu0 %v13411_v29  ;;  %5534 = vmatpush.bf16.msrb.mxu1 %v13412_v38  ;;  %v11931_v29 = vadd.f32 %v13427_v27, %v1107_v45  ;;  %v13428_v38 = vld [vmem:[#allocation62_spill] sm:$0xff] }
 0x766   : > { %5548 = vmatpush.bf16.msrb.mxu2 %v13413_v58  ;;  %5562 = vmatpush.bf16.msrb.mxu3 %v13414_v61  ;;  %v11934_v58 = vadd.f32 %v13428_v38, %v1205_v28 }
 0x783   : > { %v5017_v9 = vpop.f32.mrf.mxu0  ;;  %v5031_v16 = vpop.f32.mrf.mxu1 }
 0x78a   : > { %v5045_v63 = vpop.f32.mrf.mxu2  ;;  %v5059_v41 = vpop.f32.mrf.mxu3 }
 0x78b   : > { %v5019_v47 = vpop.f32.mrf.mxu0  ;;  %v5033_v49 = vpop.f32.mrf.mxu1 }
 0x792   : > { %v5047_v36 = vpop.f32.mrf.mxu2  ;;  %v5061_v5 = vpop.f32.mrf.mxu3 }
 0x793   : > { %v5073_v0 = vpop.f32.mrf.mxu0  ;;  %v5087_v3 = vpop.f32.mrf.mxu1 }
 0x794   : > { %v5074_v11 = vadd.f32 %v5073_v0, %v5017_v9  ;;  %v5088_v54 = vadd.f32 %v5087_v3, %v5031_v16  ;;  %v13429_v16 = vld [vmem:[#allocation146_spill] sm:$0xff] }
 0x796   : > { %v5120_v55 = vadd.f32 %v5074_v11, %v13415_v37  ;;  %v5121_v56 = vadd.f32 %v5088_v54, %v13416_v13 }
 0x798   : > { %v6895_v34 = vmul.f32 -1.442695, %v5120_v55  ;;  %v6897_v57 = vmul.f32 -1.442695, %v5121_v56 }
 0x79a   : > { %7687 = vpow2.f32 %v6895_v34  ;;  %v5115_v44 = vpop.f32.mrf.mxu3  ;;  %v5101_v48 = vpop.f32.mrf.mxu2 }
 0x79b   : > { %7689 = vpow2.f32 %v6897_v57  ;;  %v5116_v19 = vadd.f32 %v5115_v44, %v5059_v41  ;;  %v5075_v1 = vpop.f32.mrf.mxu0  ;;  %v5089_v17 = vpop.f32.mrf.mxu1  ;;  %v5102_v50 = vadd.f32 %v5101_v48, %v5045_v63  ;;  %v11937_v63 = vadd.f32 %v13429_v16, %v1303_v43  ;;  %v13430_v41 = vld [vmem:[#allocation155_spill] sm:$0xff]  ;;  %v13431_v57 = vld [vmem:[#allocation56_spill] sm:$0xff] }
 0x79c   : > { %v5076_v2 = vadd.f32 %v5075_v1, %v5019_v47  ;;  %v5090_v6 = vadd.f32 %v5089_v17, %v5033_v49  ;;  %v11940_v47 = vadd.f32 %v13430_v41, %v1401_v53 }
 0x79d   : > { %v5123_v12 = vadd.f32 %v5116_v19, %v13417_v35  ;;  %v5122_v21 = vadd.f32 %v5102_v50, %v13426_v24 }
 0x79e   : > { %v5124_v40 = vadd.f32 %v5076_v2, %v13415_v37  ;;  %v5125_v59 = vadd.f32 %v5090_v6, %v13416_v13 }
 0x79f   : > { %v6899_v46 = vmul.f32 -1.442695, %v5123_v12 }
 0x7a0   : > { %v7688_v7 = vpop.eup %7687  ;;  %v6896_v8 = vmul.f32 -1.442695, %v5124_v40  ;;  %v6898_v15 = vmul.f32 -1.442695, %v5125_v59 }
 0x7a1   : > { %v7690_v10 = vpop.eup %7689  ;;  %v11915_v32 = vadd.f32 1.0, %v7688_v7  ;;  %7691 = vpow2.f32 %v6899_v46 }
 0x7a2   : > { %v11917_v22 = vadd.f32 1.0, %v7690_v10  ;;  %7693 = vpow2.f32 %v6896_v8  ;;  %v5117_v30 = vpop.f32.mrf.mxu3  ;;  %v5103_v26 = vpop.f32.mrf.mxu2 }
 0x7a3   : > { %7695 = vrcp.f32 %v11915_v32  ;;  %v5118_v14 = vadd.f32 %v5117_v30, %v5061_v5  ;;  %vm5141_vm8 = vweird.f32 %v11915_v32  ;;  %v5145_v0 = vand.u32 2147483647, %v11915_v32 }
 0x7a4   : > { %7697 = vrcp.f32 %v11917_v22  ;;  %v5274_v61 = vpop.f32.mrf.mxu0  ;;  %v5288_v49 = vpop.f32.mrf.mxu1  ;;  %v5104_v11 = vadd.f32 %v5103_v26, %v5047_v36  ;;  %vm5179_vm9 = vweird.f32 %v11917_v22  ;;  %v5147_v34 = vand.u32 2147483648, %v11915_v32  ;;  %v13432_v36 = vld [vmem:[#allocation59_spill] sm:$0xff] }
 0x7a5   : > { %7699 = vpow2.f32 %v6898_v15  ;;  %v5127_v54 = vadd.f32 %v5118_v14, %v13417_v35  ;;  %v5321_v44 = vadd.f32 %v5274_v61, %v13431_v57  ;;  %v5322_v48 = vadd.f32 %v5288_v49, %v13432_v36  ;;  %v13443_v57 = vld [vmem:[#allocation147_spill] sm:$0xff] }
 0x7a6   : > { %7701 = vtanh.f32 %v5122_v21  ;;  %v5185_v6 = vand.u32 2147483648, %v11917_v22  ;;  %v5183_v12 = vand.u32 2147483647, %v11917_v22  ;;  %vm11966_vm10 = vcmp.eq.f32.partialorder %v5145_v0, 8.507059e+37 }
 0x7a7   : > { %v7692_v52 = vpop.eup %7691  ;;  %v5126_v7 = vadd.f32 %v5104_v11, %v13426_v24  ;;  %v6900_v50 = vmul.f32 -1.442695, %v5127_v54  ;;  %v6901_v15 = vmul.f32 -1.442695, %v5321_v44  ;;  %v6903_v51 = vmul.f32 -1.442695, %v5322_v48 }
 0x7a8   : > { %v7694_v9 = vpop.eup %7693  ;;  %v11958_v17 = vadd.f32 1.0, %v7692_v52  ;;  %v5148_v39 = vor.u32 1.1754944e-38, %v5147_v34  ;;  %v5186_v4 = vor.u32 1.1754944e-38, %v5185_v6  ;;  %vm11996_vm15 = vcmp.eq.f32.partialorder %v5183_v12, 8.507059e+37 }
 0x7a9   : > { %v11943_v5 = vpop.eup %7695  ;;  %v11946_v3 = vadd.f32 1.0, %v7694_v9 }
 0x7aa   : > { %v11949_v55 = vpop.eup %7697  ;;  %v5137_v56 = vmul.f32 %v11943_v5, %v11915_v32  ;;  %vm5142_vm11 = vweird.f32 %v11943_v5  ;;  %v5225_v18 = vand.u32 2147483648, %v11958_v17 }
 0x7ab   : > { %v7700_v19 = vpop.eup %7699  ;;  %v5175_v1 = vmul.f32 %v11949_v55, %v11917_v22  ;;  %7703 = vrcp.f32 %v11946_v3  ;;  %vm5180_vm12 = vweird.f32 %v11949_v55  ;;  %vm11983_vm13 = vmor %vm5141_vm8, %vm5142_vm11  ;;  %v5160_v42 = vand.u32 2147483647, %v11946_v3 }
 0x7ac   : > { %v5138_v2 = vsub.f32 1.0, %v5137_v56  ;;  %v11964_v40 = vadd.f32 1.0, %v7700_v19  ;;  %v7702_v8 = vpop.eup %7701  ;;  %v5162_v43 = vand.u32 2147483648, %v11946_v3  ;;  %vm11992_vm14 = vmor %vm5179_vm9, %vm5180_vm12  ;;  %v5316_v21 = vpop.f32.mrf.mxu3  ;;  %vm5156_vm0 = vweird.f32 %v11946_v3 }
 0x7ad   : > { %v5176_v59 = vsub.f32 1.0, %v5175_v1  ;;  %v5302_v14 = vpop.f32.mrf.mxu2  ;;  %v12009_v27 = vor.u32 1.1754944e-38, %v5225_v18  ;;  %v5276_v9 = vpop.f32.mrf.mxu0  ;;  %vm12016_vm2 = vcmp.eq.f32.partialorder %v5160_v42, 8.507059e+37  ;;  %v5324_v44 = vadd.f32 %v5316_v21, %v13443_v57 }
 0x7ae   : > { %v5139_v10 = vmul.f32 %v11943_v5, %v5138_v2  ;;  %7705 = vrcp.f32 %v11964_v40  ;;  %vm5194_vm1 = vweird.f32 %v11964_v40  ;;  %v5200_v61 = vand.u32 2147483648, %v11964_v40  ;;  %v5290_v11 = vpop.f32.mrf.mxu1 }
 0x7af   : > { %v5177_v20 = vmul.f32 %v11949_v55, %v5176_v59  ;;  %7707 = vrcp.f32 %v11958_v17  ;;  %v5198_v0 = vand.u32 2147483647, %v11964_v40  ;;  %v5325_v48 = vadd.f32 %v5276_v9, %v11931_v29 }
 0x7b0   : > { %v5140_v45 = vadd.f32 %v11943_v5, %v5139_v10  ;;  %7709 = vpow2.f32 %v6900_v50  ;;  %v6905_v59 = vmul.f32 -1.442695, %v5324_v44  ;;  %v5326_v46 = vadd.f32 %v5290_v11, %v11934_v58 }
 0x7b1   : > { %v11979_v28 = vpop.eup %7703  ;;  %v5178_v62 = vadd.f32 %v11949_v55, %v5177_v20  ;;  %7711 = vtanh.f32 %v5126_v7  ;;  %v5201_v18 = vor.u32 1.1754944e-38, %v5200_v61  ;;  %vm5199_vm7 = vcmp.eq.f32.partialorder %v5198_v0, 8.507059e+37 }
 0x7b2   : > { %v5152_v53 = vmul.f32 %v11979_v28, %v11946_v3  ;;  %7713 = vpow2.f32 %v6901_v15  ;;  %v5144_v26 = vsel %vm11983_vm13, %v11943_v5, %v5140_v45  ;;  %v5163_v5 = vor.u32 1.1754944e-38, %v5162_v43  ;;  %v13446_v45 = vld [vmem:[#allocation137_spill] sm:$0xff] }
 0x7b3   : > { %v5182_v22 = vsel %vm11992_vm14, %v11949_v55, %v5178_v62  ;;  %7715 = vpow2.f32 %v6903_v51  ;;  %v5149_v55 = vsel %vm11966_vm10, %v5148_v39, %v5144_v26  ;;  %vm5157_vm3 = vweird.f32 %v11979_v28 }
 0x7b4   : > { %v7706_v52 = vpop.eup %7705  ;;  %v5153_v38 = vsub.f32 1.0, %v5152_v53  ;;  %v5187_v56 = vsel %vm11996_vm15, %v5186_v4, %v5182_v22  ;;  %v5246_v10 = vmul.f32 %v7702_v8, %v5149_v55  ;;  %vm12038_vm5 = vmor %vm5156_vm0, %vm5157_vm3  ;;  %v5323_v58 = vadd.f32 %v5302_v14, %v13446_v45  ;;  %v5318_v62 = vpop.f32.mrf.mxu3 }
 0x7b5   : > { %v12013_v16 = vpop.eup %7707  ;;  %v5190_v41 = vmul.f32 %v7706_v52, %v11964_v40  ;;  %v5244_v50 = vmul.f32 %v5187_v56, %v11695_v31  ;;  %vm5195_vm4 = vweird.f32 %v7706_v52  ;;  %v6902_v39 = vmul.f32 -1.442695, %v5325_v48  ;;  %v5304_v25 = vpop.f32.mrf.mxu2 }
 0x7b6   : > { %v7710_v54 = vpop.eup %7709  ;;  %v5154_v34 = vmul.f32 %v11979_v28, %v5153_v38  ;;  %v5215_v6 = vmul.f32 %v12013_v16, %v11958_v17  ;;  %vm5196_vm6 = vmor %vm5194_vm1, %vm5195_vm4  ;;  %v6904_v30 = vmul.f32 -1.442695, %v5326_v46  ;;  %vm5220_vm8 = vweird.f32 %v12013_v16 }
 0x7b7   : > { %v7712_v19 = vpop.eup %7711  ;;  %v5191_v1 = vsub.f32 1.0, %v5190_v41  ;;  %v12028_v36 = vadd.f32 1.0, %v7710_v54  ;;  %v12054_v42 = vadd.f32 %v5246_v10, %v5244_v50  ;;  %v5328_v53 = vadd.f32 %v5318_v62, %v11940_v47 }
 0x7b8   : > { %v7714_v2 = vpop.eup %7713  ;;  %v5155_v12 = vadd.f32 %v11979_v28, %v5154_v34  ;;  %v5216_v3 = vsub.f32 1.0, %v5215_v6  ;;  %vm5219_vm9 = vweird.f32 %v11958_v17  ;;  %v5327_v14 = vadd.f32 %v5304_v25, %v11937_v63 }
 0x7b9   : > { %v7716_v7 = vpop.eup %7715  ;;  %v5192_v15 = vmul.f32 %v7706_v52, %v5191_v1  ;;  %7717 = vrcp.f32 %v12028_v36  ;;  %v12043_v29 = vadd.f32 1.0, %v7714_v2  ;;  %v5240_v32 = vand.u32 2147483648, %v12028_v36  ;;  %vm12106_vm0 = vmor %vm5219_vm9, %vm5220_vm8 }
 0x7ba   : > { %v12045_v51 = vadd.f32 1.0, %v7716_v7  ;;  %v5159_v31 = vsel %vm12038_vm5, %v11979_v28, %v5155_v12  ;;  %7719 = vpow2.f32 %v6905_v59  ;;  %v5217_v26 = vmul.f32 %v12013_v16, %v5216_v3 }
 0x7bb   : > { %v5193_v8 = vadd.f32 %v7706_v52, %v5192_v15  ;;  %7721 = vrcp.f32 %v12043_v29  ;;  %v5164_v28 = vsel %vm12016_vm2, %v5163_v5, %v5159_v31  ;;  %v5346_v22 = vand.u32 2147483647, %v12043_v29 }
 0x7bc   : > { %7723 = vrcp.f32 %v12045_v51  ;;  %v5386_v40 = vand.u32 2147483648, %v12045_v51  ;;  %v5247_v61 = vmul.f32 %v7712_v19, %v5164_v28  ;;  %v5348_v9 = vand.u32 2147483648, %v12043_v29 }
 0x7bd   : > { %v5197_v43 = vsel %vm5196_vm6, %v7706_v52, %v5193_v8  ;;  %7725 = vtanh.f32 %v5323_v58  ;;  %v12074_v49 = vor.u32 1.1754944e-38, %v5240_v32  ;;  %v6906_v0 = vmul.f32 -1.442695, %v5328_v53 }
 0x7be   : > { %v5202_v4 = vsel %vm5199_vm7, %v5201_v18, %v5197_v43  ;;  %7727 = vpow2.f32 %v6902_v39  ;;  %vm5380_vm10 = vweird.f32 %v12045_v51  ;;  %v5387_v54 = vor.u32 1.1754944e-38, %v5386_v40 }
 0x7bf   : > { %v12063_v21 = vpop.eup %7717  ;;  %7729 = vpow2.f32 %v6904_v30  ;;  %v5245_v38 = vmul.f32 %v5202_v4, %v11724_v33  ;;  %vm5342_vm11 = vweird.f32 %v12043_v29  ;;  %vm12082_vm12 = vcmp.eq.f32.partialorder %v5346_v22, 8.507059e+37 }
 0x7c0   : > { %v7720_v52 = vpop.eup %7719  ;;  %7731 = vtanh.f32 %v12054_v42  ;;  %v5230_v41 = vmul.f32 %v12063_v21, %v12028_v36  ;;  %v5384_v34 = vand.u32 2147483647, %v12045_v51  ;;  %v5349_v1 = vor.u32 1.1754944e-38, %v5348_v9 }
 0x7c1   : > { %v7722_v47 = vpop.eup %7721  ;;  %v12076_v5 = vadd.f32 1.0, %v7720_v52  ;;  %v12088_v44 = vadd.f32 %v5247_v61, %v5245_v38  ;;  %v12091_v48 = vadd.f32 %v12013_v16, %v5217_v26  ;;  %vm5234_vm14 = vweird.f32 %v12028_v36 }
 0x7c2   : > { %v7724_v11 = vpop.eup %7723  ;;  %v5338_v63 = vmul.f32 %v7722_v47, %v12043_v29  ;;  %v5231_v6 = vsub.f32 1.0, %v5230_v41  ;;  %vm5343_vm13 = vweird.f32 %v7722_v47  ;;  %v5223_v15 = vand.u32 2147483647, %v11958_v17 }
 0x7c3   : > { %v7726_v33 = vpop.eup %7725  ;;  %v5376_v55 = vmul.f32 %v7724_v11, %v12045_v51  ;;  %7733 = vrcp.f32 %v12076_v5  ;;  %vm5381_vm15 = vweird.f32 %v7724_v11  ;;  %vm5235_vm1 = vweird.f32 %v12063_v21  ;;  %vm5344_vm3 = vmor %vm5342_vm11, %vm5343_vm13 }
 0x7c4   : > { %v7728_v57 = vpop.eup %7727  ;;  %v5339_v19 = vsub.f32 1.0, %v5338_v63  ;;  %7735 = vpow2.f32 %v6906_v0  ;;  %vm12111_vm2 = vcmp.eq.f32.partialorder %v5384_v34, 8.507059e+37  ;;  %v5232_v8 = vmul.f32 %v12063_v21, %v5231_v6  ;;  %vm5382_vm4 = vmor %vm5380_vm10, %vm5381_vm15 }
 0x7c5   : > { %v7730_v2 = vpop.eup %7729  ;;  %v5377_v12 = vsub.f32 1.0, %v5376_v55  ;;  %v12093_v59 = vadd.f32 1.0, %v7728_v57  ;;  %7737 = vtanh.f32 %v5327_v14  ;;  %v5426_v39 = vand.u32 2147483648, %v12076_v5  ;;  %vm5236_vm8 = vmor %vm5234_vm14, %vm5235_vm1 }
 0x7c6   : > { %v12095_v46 = vpop.eup %7731  ;;  %v5340_v7 = vmul.f32 %v7722_v47, %v5339_v19  ;;  %v12097_v50 = vadd.f32 1.0, %v7730_v2  ;;  %v5222_v3 = vsel %vm12106_vm0, %v12013_v16, %v12091_v48  ;;  %v5424_v29 = vand.u32 2147483647, %v12076_v5 }
 0x7c7   : > { %v5378_v10 = vmul.f32 %v7724_v11, %v5377_v12  ;;  %7739 = vrcp.f32 %v12093_v59  ;;  %vm5420_vm5 = vweird.f32 %v12076_v5  ;;  %vm12137_vm6 = vcmp.eq.f32.partialorder %v5223_v15, 8.507059e+37 }
 0x7c8   : > { %v5341_v45 = vadd.f32 %v7722_v47, %v5340_v7  ;;  %7741 = vrcp.f32 %v12097_v50  ;;  %v5427_v22 = vor.u32 1.1754944e-38, %v5426_v39  ;;  %v5233_v14 = vadd.f32 %v12063_v21, %v5232_v8 }
 0x7c9   : > { %v12116_v31 = vpop.eup %7733  ;;  %v5379_v17 = vadd.f32 %v7724_v11, %v5378_v10  ;;  %7743 = vtanh.f32 %v12088_v44  ;;  %v5238_v52 = vand.u32 2147483647, %v12028_v36  ;;  %vm12151_vm7 = vcmp.eq.f32.partialorder %v5424_v29, 8.507059e+37 }
 0x7ca   : > { %v5345_v18 = vsel %vm5344_vm3, %v7722_v47, %v5341_v45  ;;  %v5416_v30 = vmul.f32 %v12116_v31, %v12076_v5  ;;  %v7736_v62 = vpop.eup %7735  ;;  %v5361_v41 = vand.u32 2147483647, %v12093_v59  ;;  %v5363_v63 = vand.u32 2147483648, %v12093_v59 }
 0x7cb   : > { %v5350_v43 = vsel %vm12082_vm12, %v5349_v1, %v5345_v18  ;;  %v5383_v25 = vsel %vm5382_vm4, %v7724_v11, %v5379_v17  ;;  %v12141_v28 = vpop.eup %7737  ;;  %v12145_v40 = vadd.f32 1.0, %v7736_v62  ;;  %v5401_v11 = vand.u32 2147483648, %v12097_v50 }
 0x7cc   : > { %v5388_v51 = vsel %vm12111_vm2, %v5387_v54, %v5383_v25  ;;  %v5447_v4 = vmul.f32 %v7726_v33, %v5350_v43  ;;  %v5417_v32 = vsub.f32 1.0, %v5416_v30  ;;  %vm5421_vm9 = vweird.f32 %v12116_v31 }
 0x7cd   : > { %v7740_v53 = vpop.eup %7739  ;;  %v5445_v26 = vmul.f32 %v5388_v51, %v11753_v23  ;;  %7745 = vrcp.f32 %v12145_v40  ;;  %v5399_v56 = vand.u32 2147483647, %v12097_v50  ;;  %v5237_v57 = vsel %vm5236_vm8, %v12063_v21, %v5233_v14  ;;  %vm12175_vm12 = vmor %vm5420_vm5, %vm5421_vm9 }
 0x7ce   : > { %v7742_v38 = vpop.eup %7741  ;;  %v5418_v61 = vmul.f32 %v12116_v31, %v5417_v32  ;;  %v5353_v47 = vmul.f32 %v7740_v53, %v12093_v59  ;;  %vm5239_vm10 = vcmp.eq.f32.partialorder %v5238_v52, 8.507059e+37  ;;  %vm5358_vm11 = vweird.f32 %v7740_v53 }
 0x7cf   : > { %v5449_v0 = vadd.f32 %v5447_v4, %v5445_v26  ;;  %v5391_v23 = vmul.f32 %v7742_v38, %v12097_v50  ;;  %v7744_v54 = vpop.eup %7743  ;;  %v5227_v36 = vsel %vm12137_vm6, %v12009_v27, %v5222_v3  ;;  %v5242_v1 = vsel %vm5239_vm10, %v12074_v49, %v5237_v57 }
 0x7d0   : > { %v5419_v33 = vadd.f32 %v12116_v31, %v5418_v61  ;;  %v5354_v55 = vsub.f32 1.0, %v5353_v47  ;;  %vm5396_vm13 = vweird.f32 %v7742_v38  ;;  %v5252_v6 = vmul.f32 %v12095_v46, %v5227_v36 }
 0x7d1   : > { %7747 = vtanh.f32 %v5449_v0  ;;  %5705 = vst [vmem:[#allocation4 + $0x8] sm:$0xff] %v5449_v0  ;;  %v5392_v34 = vsub.f32 1.0, %v5391_v23  ;;  %v5253_v21 = vmul.f32 %v7744_v54, %v5242_v1  ;;  %vm5395_vm14 = vweird.f32 %v12097_v50 }
 0x7d2   : > { %v5355_v19 = vmul.f32 %v7740_v53, %v5354_v55  ;;  %vm5357_vm15 = vweird.f32 %v12093_v59  ;;  %v5423_v27 = vsel %vm12175_vm12, %v12116_v31, %v5419_v33  ;;  %v5364_v49 = vor.u32 1.1754944e-38, %v5363_v63  ;;  %vm5397_vm1 = vmor %vm5395_vm14, %vm5396_vm13 }
 0x7d3   : > { %v5393_v2 = vmul.f32 %v7742_v38, %v5392_v34  ;;  %v7746_v12 = vpop.eup %7745  ;;  %vm5359_vm0 = vmor %vm5357_vm15, %vm5358_vm11  ;;  %v5456_v15 = vpack.c.bf16 %v5253_v21, %v5252_v6  ;;  %v5402_v20 = vor.u32 1.1754944e-38, %v5401_v11  ;;  %vm5362_vm2 = vcmp.eq.f32.partialorder %v5361_v41, 8.507059e+37 }
 0x7d4   : > { %v5356_v7 = vadd.f32 %v7740_v53, %v5355_v19  ;;  %v5431_v10 = vmul.f32 %v7746_v12, %v12145_v40  ;;  %vm5400_vm3 = vcmp.eq.f32.partialorder %v5399_v56, 8.507059e+37  ;;  %v5428_v59 = vsel %vm12151_vm7, %v5427_v22, %v5423_v27 }
 0x7d5   : > { %v5394_v5 = vadd.f32 %v7742_v38, %v5393_v2  ;;  %5465 = vmatmul.bf16.vlgmr.msra.gmra.mxu0 %v5456_v15  ;;  %5479 = vmatmul.bf16.vlgmr.msra.gmra.mxu1 %v5456_v15  ;;  %vm5436_vm4 = vweird.f32 %v7746_v12  ;;  %v5441_v62 = vand.u32 2147483648, %v12145_v40  ;;  %vm5435_vm5 = vweird.f32 %v12145_v40 }
 0x7d6   : > { %v5360_v46 = vsel %vm5359_vm0, %v7740_v53, %v5356_v7  ;;  %v5432_v8 = vsub.f32 1.0, %v5431_v10  ;;  %5493 = vmatmul.bf16.vlgmr.msra.gmra.mxu2 %v5456_v15  ;;  %5507 = vmatmul.bf16.vlgmr.msra.gmra.mxu3 %v5456_v15  ;;  %v5439_v43 = vand.u32 2147483647, %v12145_v40  ;;  %vm5437_vm6 = vmor %vm5435_vm5, %vm5436_vm4 }
 0x7d7   : > { %v7748_v45 = vpop.eup %7747  ;;  %v5365_v50 = vsel %vm5362_vm2, %v5364_v49, %v5360_v46  ;;  %v5398_v58 = vsel %vm5397_vm1, %v7742_v38, %v5394_v5  ;;  %v5442_v16 = vor.u32 1.1754944e-38, %v5441_v62 }
 0x7d8   : > { %v5403_v31 = vsel %vm5400_vm3, %v5402_v20, %v5398_v58  ;;  %v5448_v17 = vmul.f32 %v12141_v28, %v5365_v50  ;;  %v5453_v39 = vmul.f32 %v7748_v45, %v5428_v59  ;;  %v5433_v18 = vmul.f32 %v7746_v12, %v5432_v8 }
 0x7d9   : > { %v5446_v3 = vmul.f32 %v5403_v31, %v11796_v60  ;;  %vm5440_vm7 = vcmp.eq.f32.partialorder %v5439_v43, 8.507059e+37 }
 0x7da   : > { %5703 = vst [vmem:[#allocation3] sm:$0xff] %v5453_v39  ;;  %v5434_v29 = vadd.f32 %v7746_v12, %v5433_v18 }
 0x7db   : > { %v5450_v30 = vadd.f32 %v5448_v17, %v5446_v3 }
 0x7dc   : > { %v5438_v25 = vsel %vm5437_vm6, %v7746_v12, %v5434_v29 }
 0x7dd   : > { %7749 = vtanh.f32 %v5450_v30  ;;  %5706 = vst [vmem:[#allocation4] sm:$0xff] %v5450_v30  ;;  %v5443_v51 = vsel %vm5440_vm7, %v5442_v16, %v5438_v25 }
 0x7e3   : > { %v7750_v28 = vpop.eup %7749 }
 0x7e4   : > { %v5454_v60 = vmul.f32 %v7750_v28, %v5443_v51 }
 0x7e6   : > { %v5455_v4 = vpack.c.bf16 %v5454_v60, %v5453_v39  ;;  %5704 = vst [vmem:[#allocation3 + $0x8] sm:$0xff] %v5454_v60 }
 0x7e8   : > { %5521 = vmatmul.bf16.vlgmr.msrb.gmra.mxu0 %v5455_v4  ;;  %5535 = vmatmul.bf16.vlgmr.msrb.gmra.mxu1 %v5455_v4 }
 0x7e9   : > { %5549 = vmatmul.bf16.vlgmr.msrb.gmra.mxu2 %v5455_v4  ;;  %5563 = vmatmul.bf16.vlgmr.msrb.gmra.mxu3 %v5455_v4 }
 0x852   : > { %v5466_v32 = vpop.f32.mrf.mxu0  ;;  %v5480_v53 = vpop.f32.mrf.mxu1 }
 0x859   : > { %v5494_v26 = vpop.f32.mrf.mxu2  ;;  %v5508_v22 = vpop.f32.mrf.mxu3 }
 0x85a   : > { %v5468_v14 = vpop.f32.mrf.mxu0  ;;  %v5482_v52 = vpop.f32.mrf.mxu1 }
 0x861   : > { %v5510_v40 = vpop.f32.mrf.mxu3  ;;  %v5496_v9 = vpop.f32.mrf.mxu2 }
 0x865   : > { %v5522_v38 = vpop.f32.mrf.mxu0  ;;  %v5536_v61 = vpop.f32.mrf.mxu1 }
 0x866   : > { %v5523_v47 = vadd.f32 %v5522_v38, %v5466_v32  ;;  %v5537_v41 = vadd.f32 %v5536_v61, %v5480_v53 }
 0x868   : > { %v5569_v0 = vadd.f32 %v5523_v47, %v13415_v37  ;;  %v5570_v23 = vadd.f32 %v5537_v41, %v13416_v13 }
 0x86a   : > { %v6907_v11 = vmul.f32 -1.442695, %v5569_v0  ;;  %v6909_v63 = vmul.f32 -1.442695, %v5570_v23 }
 0x86c   : > { %7751 = vpow2.f32 %v6907_v11  ;;  %v5564_v54 = vpop.f32.mrf.mxu3  ;;  %v5550_v36 = vpop.f32.mrf.mxu2 }
 0x86d   : > { %7753 = vpow2.f32 %v6909_v63  ;;  %v5565_v33 = vadd.f32 %v5564_v54, %v5508_v22  ;;  %v5524_v55 = vpop.f32.mrf.mxu0  ;;  %v5538_v56 = vpop.f32.mrf.mxu1  ;;  %v5551_v5 = vadd.f32 %v5550_v36, %v5494_v26 }
 0x86e   : > { %v5525_v34 = vadd.f32 %v5524_v55, %v5468_v14  ;;  %v5539_v57 = vadd.f32 %v5538_v56, %v5482_v52 }
 0x86f   : > { %v5572_v19 = vadd.f32 %v5565_v33, %v13417_v35  ;;  %v5571_v20 = vadd.f32 %v5551_v5, %v13426_v24 }
 0x870   : > { %v5573_v1 = vadd.f32 %v5525_v34, %v13415_v37  ;;  %v5574_v48 = vadd.f32 %v5539_v57, %v13416_v13 }
 0x871   : > { %v6911_v2 = vmul.f32 -1.442695, %v5572_v19 }
 0x872   : > { %v7752_v6 = vpop.eup %7751  ;;  %v6908_v21 = vmul.f32 -1.442695, %v5573_v1  ;;  %v6910_v27 = vmul.f32 -1.442695, %v5574_v48 }
 0x873   : > { %v7754_v12 = vpop.eup %7753  ;;  %v5583_v7 = vadd.f32 1.0, %v7752_v6  ;;  %7755 = vpow2.f32 %v6911_v2 }
 0x874   : > { %v5621_v49 = vadd.f32 1.0, %v7754_v12  ;;  %7757 = vpow2.f32 %v6908_v21  ;;  %v5566_v10 = vpop.f32.mrf.mxu3  ;;  %v5552_v13 = vpop.f32.mrf.mxu2 }
 0x875   : > { %7759 = vrcp.f32 %v5583_v7  ;;  %v5567_v45 = vadd.f32 %v5566_v10, %v5510_v40  ;;  %v5553_v39 = vadd.f32 %v5552_v13, %v5496_v9  ;;  %v5594_v43 = vand.u32 2147483647, %v5583_v7 }
 0x876   : > { %7761 = vrcp.f32 %v5621_v49  ;;  %v5634_v62 = vand.u32 2147483648, %v5621_v49  ;;  %v5596_v25 = vand.u32 2147483648, %v5583_v7  ;;  %v5632_v28 = vand.u32 2147483647, %v5621_v49 }
 0x877   : > { %7763 = vpow2.f32 %v6910_v27  ;;  %v5576_v30 = vadd.f32 %v5567_v45, %v13417_v35  ;;  %vm5590_vm10 = vweird.f32 %v5583_v7  ;;  %vm5628_vm11 = vweird.f32 %v5621_v49 }
 0x878   : > { %v5575_v32 = vadd.f32 %v5553_v39, %v13426_v24  ;;  %vm5595_vm13 = vcmp.eq.f32.partialorder %v5594_v43, 8.507059e+37  ;;  %v5597_v26 = vor.u32 1.1754944e-38, %v5596_v25  ;;  %v5635_v40 = vor.u32 1.1754944e-38, %v5634_v62 }
 0x879   : > { %v7756_v15 = vpop.eup %7755  ;;  %v6912_v53 = vmul.f32 -1.442695, %v5576_v30  ;;  %vm5633_vm15 = vcmp.eq.f32.partialorder %v5632_v28, 8.507059e+37 }
 0x87a   : > { %v7758_v37 = vpop.eup %7757  ;;  %v12199_v46 = vadd.f32 1.0, %v7756_v15 }
 0x87b   : > { %v7760_v50 = vpop.eup %7759  ;;  %v12201_v58 = vadd.f32 1.0, %v7758_v37 }
 0x87c   : > { %v7762_v8 = vpop.eup %7761  ;;  %v5586_v59 = vmul.f32 %v7760_v50, %v5583_v7  ;;  %7765 = vrcp.f32 %v12199_v46  ;;  %vm5591_vm8 = vweird.f32 %v7760_v50  ;;  %v5674_v55 = vand.u32 2147483648, %v12199_v46 }
 0x87d   : > { %v7764_v31 = vpop.eup %7763  ;;  %v5624_v17 = vmul.f32 %v7762_v8, %v5621_v49  ;;  %7767 = vtanh.f32 %v5571_v20  ;;  %vm5629_vm9 = vweird.f32 %v7762_v8  ;;  %vm5592_vm12 = vmor %vm5590_vm10, %vm5591_vm8  ;;  %vm5605_vm0 = vweird.f32 %v12201_v58 }
 0x87e   : > { %v5587_v3 = vsub.f32 1.0, %v5586_v59  ;;  %7769 = vrcp.f32 %v12201_v58  ;;  %v12205_v18 = vadd.f32 1.0, %v7764_v31  ;;  %vm5630_vm14 = vmor %vm5628_vm11, %vm5629_vm9  ;;  %v5609_v56 = vand.u32 2147483647, %v12201_v58 }
 0x87f   : > { %v5625_v29 = vsub.f32 1.0, %v5624_v17  ;;  %v5611_v34 = vand.u32 2147483648, %v12201_v58  ;;  %vm5668_vm4 = vweird.f32 %v12199_v46  ;;  %v5672_v7 = vand.u32 2147483647, %v12199_v46 }
 0x880   : > { %v5588_v16 = vmul.f32 %v7760_v50, %v5587_v3  ;;  %7771 = vrcp.f32 %v12205_v18  ;;  %v5649_v48 = vand.u32 2147483648, %v12205_v18  ;;  %v5647_v2 = vand.u32 2147483647, %v12205_v18 }
 0x881   : > { %v5626_v51 = vmul.f32 %v7762_v8, %v5625_v29  ;;  %7773 = vpow2.f32 %v6912_v53  ;;  %v5612_v27 = vor.u32 1.1754944e-38, %v5611_v34  ;;  %vm5643_vm7 = vweird.f32 %v12205_v18 }
 0x882   : > { %v12209_v60 = vpop.eup %7765  ;;  %v5589_v4 = vadd.f32 %v7760_v50, %v5588_v16  ;;  %7775 = vtanh.f32 %v5575_v32  ;;  %vm5610_vm8 = vcmp.eq.f32.partialorder %v5609_v56, 8.507059e+37  ;;  %v5650_v37 = vor.u32 1.1754944e-38, %v5649_v48 }
 0x883   : > { %v7768_v35 = vpop.eup %7767  ;;  %v5627_v22 = vadd.f32 %v7762_v8, %v5626_v51  ;;  %v5664_v14 = vmul.f32 %v12209_v60, %v12199_v46  ;;  %vm5669_vm2 = vweird.f32 %v12209_v60  ;;  %v5675_v13 = vor.u32 1.1754944e-38, %v5674_v55 }
 0x884   : > { %v7770_v52 = vpop.eup %7769  ;;  %v5593_v38 = vsel %vm5592_vm12, %v7760_v50, %v5589_v4  ;;  %vm12230_vm6 = vmor %vm5668_vm4, %vm5669_vm2  ;;  %vm5648_vm10 = vcmp.eq.f32.partialorder %v5647_v2, 8.507059e+37  ;;  %vm5673_vm11 = vcmp.eq.f32.partialorder %v5672_v7, 8.507059e+37 }
 0x885   : > { %v5598_v61 = vsel %vm5595_vm13, %v5597_v26, %v5593_v38  ;;  %v5631_v9 = vsel %vm5630_vm14, %v7762_v8, %v5627_v22  ;;  %v5665_v47 = vsub.f32 1.0, %v5664_v14  ;;  %v5601_v24 = vmul.f32 %v7770_v52, %v12201_v58 }
 0x886   : > { %v7772_v41 = vpop.eup %7771  ;;  %v5636_v0 = vsel %vm5633_vm15, %v5635_v40, %v5631_v9  ;;  %v5695_v23 = vmul.f32 %v7768_v35, %v5598_v61  ;;  %vm5606_vm1 = vweird.f32 %v7770_v52 }
 0x887   : > { %v5693_v11 = vmul.f32 %v5636_v0, %v12054_v42  ;;  %v5666_v63 = vmul.f32 %v12209_v60, %v5665_v47  ;;  %v5602_v54 = vsub.f32 1.0, %v5601_v24  ;;  %v5639_v33 = vmul.f32 %v7772_v41, %v12205_v18  ;;  %v7774_v1 = vpop.eup %7773  ;;  %vm5607_vm5 = vmor %vm5605_vm0, %vm5606_vm1 }
 0x888   : > { %vm5644_vm3 = vweird.f32 %v7772_v41  ;;  %v7776_v12 = vpop.eup %7775  ;;  %v5662_v49 = vadd.f32 1.0, %v7774_v1 }
 0x889   : > { %v5697_v57 = vadd.f32 %v5695_v23, %v5693_v11  ;;  %v5640_v19 = vsub.f32 1.0, %v5639_v33  ;;  %v5603_v36 = vmul.f32 %v7770_v52, %v5602_v54  ;;  %v5667_v42 = vadd.f32 %v12209_v60, %v5666_v63  ;;  %vm5645_vm9 = vmor %vm5643_vm7, %vm5644_vm3 }
 0x88a   : > { %v5689_v29 = vand.u32 2147483648, %v5662_v49  ;;  %v5687_v43 = vand.u32 2147483647, %v5662_v49  ;;  %vm5683_vm13 = vweird.f32 %v5662_v49 }
 0x88b   : > { %7777 = vtanh.f32 %v5697_v57  ;;  %5709 = vst [vmem:[#allocation6] sm:$0xff] %v5697_v57  ;;  %v5641_v6 = vmul.f32 %v7772_v41, %v5640_v19  ;;  %v5604_v21 = vadd.f32 %v7770_v52, %v5603_v36  ;;  %v5671_v20 = vsel %vm12230_vm6, %v12209_v60, %v5667_v42 }
 0x88c   : > { %7779 = vrcp.f32 %v5662_v49  ;;  %v5676_v59 = vsel %vm5673_vm11, %v5675_v13, %v5671_v20  ;;  %v5690_v28 = vor.u32 1.1754944e-38, %v5689_v29  ;;  %vm5688_vm15 = vcmp.eq.f32.partialorder %v5687_v43, 8.507059e+37 }
 0x88d   : > { %v5608_v10 = vsel %vm5607_vm5, %v7770_v52, %v5604_v21  ;;  %v5642_v15 = vadd.f32 %v7772_v41, %v5641_v6 }
 0x88e   : > { %v5613_v46 = vsel %vm5610_vm8, %v5612_v27, %v5608_v10 }
 0x88f   : > { %v5646_v45 = vsel %vm5645_vm9, %v7772_v41, %v5642_v15  ;;  %v5696_v50 = vmul.f32 %v7776_v12, %v5613_v46 }
 0x890   : > { %v5651_v58 = vsel %vm5648_vm10, %v5650_v37, %v5646_v45 }
 0x891   : > { %v7778_v8 = vpop.eup %7777  ;;  %v5694_v31 = vmul.f32 %v5651_v58, %v12088_v44 }
 0x892   : > { %v5701_v17 = vmul.f32 %v7778_v8, %v5676_v59  ;;  %v7780_v3 = vpop.eup %7779 }
 0x893   : > { %v5698_v39 = vadd.f32 %v5696_v50, %v5694_v31  ;;  %v5679_v18 = vmul.f32 %v7780_v3, %v5662_v49  ;;  %vm5684_vm12 = vweird.f32 %v7780_v3 }
 0x894   : > { %5707 = vst [vmem:[#allocation5 + $0x8] sm:$0xff] %v5701_v17  ;;  %vm5685_vm14 = vmor %vm5683_vm13, %vm5684_vm12 }
 0x895   : > { %5710 = vst [vmem:[#allocation6 + $0x8] sm:$0xff] %v5698_v39  ;;  %7781 = vtanh.f32 %v5698_v39  ;;  %v5680_v30 = vsub.f32 1.0, %v5679_v18 }
 0x897   : > { %v5681_v62 = vmul.f32 %v7780_v3, %v5680_v30 }
 0x899   : > { %v5682_v25 = vadd.f32 %v7780_v3, %v5681_v62 }
 0x89b   : > { %v7782_v16 = vpop.eup %7781  ;;  %v5686_v51 = vsel %vm5685_vm14, %v7780_v3, %v5682_v25  ;;  %5714 = sbr.rel (%p6913_p12) target bundleno = 2925 (0xb6d), region = 118 }
 0x89c   : > { %v5691_v44 = vsel %vm5688_vm15, %v5690_v28, %v5686_v51 }
 0x89d   : > { %v5702_v60 = vmul.f32 %v7782_v16, %v5691_v44 }
 0x89f   : > { %5708 = vst [vmem:[#allocation5] sm:$0xff] %v5702_v60 }
 0x8a0   : > { %v7197_v4 = vld [vmem:[%s12351_s7 + $0x38] sm:$0xff]  ;;  %v7196_v32 = vld [vmem:[%s12351_s7 + $0x30] sm:$0xff]  ;;  %v7195_v26 = vld [vmem:[%s12351_s7 + $0x28] sm:$0xff]  ;;  %v5715_v47 = vpack.c.bf16 %v5702_v60, %v5701_v17 }
 0x8a1   : > { %5784 = vmatpush.bf16.msra.mxu0 %v7197_v4  ;;  %v7205_v53 = vld [vmem:[%s12353_s9 + $0x38] sm:$0xff]  ;;  %v7204_v35 = vld [vmem:[%s12353_s9 + $0x30] sm:$0xff]  ;;  %v7203_v22 = vld [vmem:[%s12353_s9 + $0x28] sm:$0xff] }
 0x8a2   : > { %5869 = vmatpush.bf16.msra.mxu1 %v7205_v53  ;;  %v7194_v14 = vld [vmem:[%s12351_s7 + $0x20] sm:$0xff]  ;;  %v7193_v40 = vld [vmem:[%s12351_s7 + $0x18] sm:$0xff]  ;;  %v7192_v38 = vld [vmem:[%s12351_s7 + $0x10] sm:$0xff] }
 0x8a3   : > { %v7202_v52 = vld [vmem:[%s12353_s9 + $0x20] sm:$0xff]  ;;  %v7191_v61 = vld [vmem:[%s12351_s7 + $0x8] sm:$0xff]  ;;  %v7201_v24 = vld [vmem:[%s12353_s9 + $0x18] sm:$0xff] }
 0x8a4   : > { %v7190_v9 = vld [vmem:[%s12351_s7] sm:$0xff]  ;;  %v7200_v41 = vld [vmem:[%s12353_s9 + $0x10] sm:$0xff]  ;;  %v7199_v0 = vld [vmem:[%s12353_s9 + $0x8] sm:$0xff] }
 0x8a5   : > { %5785 = vmatpush.bf16.msra.mxu0 %v7196_v32  ;;  %v7198_v23 = vld [vmem:[%s12353_s9] sm:$0xff]  ;;  %v7213_v11 = vld [vmem:[%s12355_s11 + $0x38] sm:$0xff]  ;;  %v7212_v63 = vld [vmem:[%s12355_s11 + $0x30] sm:$0xff] }
 0x8a6   : > { %5870 = vmatpush.bf16.msra.mxu1 %v7204_v35  ;;  %5954 = vmatpush.bf16.msra.mxu2 %v7213_v11  ;;  %v7211_v54 = vld [vmem:[%s12355_s11 + $0x28] sm:$0xff]  ;;  %v7210_v33 = vld [vmem:[%s12355_s11 + $0x20] sm:$0xff]  ;;  %v7209_v48 = vld [vmem:[%s12355_s11 + $0x18] sm:$0xff] }
 0x8a7   : > { %v7783_v56 = vld [vmem:[%s13461_s24] ss:$0 sm:$0xff]  ;;  %v7208_v2 = vld [vmem:[%s12355_s11 + $0x10] sm:$0xff]  ;;  %v7207_v6 = vld [vmem:[%s12355_s11 + $0x8] sm:$0xff]  ;;  %s13463_s24 = sld [smem:[#allocation175_spill]] }
 0x8a8   : > { %v7206_v21 = vld [vmem:[%s12355_s11] sm:$0xff] }
 0x8a9   : > { %5786 = vmatpush.bf16.msra.mxu0 %v7195_v26  ;;  %v7784_v7 = vld [vmem:[%s13462_s25] ss:$0 sm:$0xff] }
 0x8aa   : > { %5871 = vmatpush.bf16.msra.mxu1 %v7203_v22  ;;  %5955 = vmatpush.bf16.msra.mxu2 %v7212_v63 }
 0x8ad   : > { %5787 = vmatpush.bf16.msra.mxu0 %v7194_v14  ;;  %v7785_v37 = vld [vmem:[%s13463_s24] ss:$0 sm:$0xff] }
 0x8ae   : > { %5872 = vmatpush.bf16.msra.mxu1 %v7202_v52  ;;  %5956 = vmatpush.bf16.msra.mxu2 %v7211_v54 }
 0x8b1   : > { %5788 = vmatpush.bf16.msra.mxu0 %v7193_v40 }
 0x8b2   : > { %5873 = vmatpush.bf16.msra.mxu1 %v7201_v24  ;;  %5957 = vmatpush.bf16.msra.mxu2 %v7210_v33 }
 0x8b5   : > { %5789 = vmatpush.bf16.msra.mxu0 %v7192_v38 }
 0x8b6   : > { %5874 = vmatpush.bf16.msra.mxu1 %v7200_v41  ;;  %5958 = vmatpush.bf16.msra.mxu2 %v7209_v48 }
 0x8b9   : > { %5790 = vmatpush.bf16.msra.mxu0 %v7191_v61 }
 0x8ba   : > { %5875 = vmatpush.bf16.msra.mxu1 %v7199_v0  ;;  %5959 = vmatpush.bf16.msra.mxu2 %v7208_v2 }
 0x8bd   : > { %5791 = vmatpush.bf16.msra.mxu0 %v7190_v9 }
 0x8be   : > { %5876 = vmatpush.bf16.msra.mxu1 %v7198_v23  ;;  %5960 = vmatpush.bf16.msra.mxu2 %v7207_v6 }
 0x8c0   : > { %5792 = vmatmul.bf16.vlgmr.msra.gmra.mxu0 %v5715_v47 }
 0x8c2   : > { %5961 = vmatpush.bf16.msra.mxu2 %v7206_v21 }
 0x93d   : > { %v5793_v55 = vpop.f32.mrf.mxu0 }
 0x93e   : > { %v5794_v34 = vadd.f32 %v7783_v56, %v5793_v55 }
 0x940   : > { %v5798_v36 = vmax.f32 %v5794_v34, 0.0 }
 0x945   : > { %v5795_v57 = vpop.f32.mrf.mxu0 }
 0x946   : > { %v5796_v19 = vadd.f32 %v7783_v56, %v5795_v57 }
 0x948   : > { %v5799_v1 = vmax.f32 %v5796_v19, 0.0 }
 0x94a   : > { %v5800_v42 = vpack.c.bf16 %v5799_v1, %v5798_v36 }
 0x94c   : > { %5877 = vmatmul.bf16.vlgmr.msra.gmra.mxu1 %v5800_v42 }
 0x9c9   : > { %v5878_v12 = vpop.f32.mrf.mxu1 }
 0x9ca   : > { %v5879_v27 = vadd.f32 %v7784_v7, %v5878_v12 }
 0x9cc   : > { %v5883_v10 = vmax.f32 %v5879_v27, 0.0 }
 0x9d1   : > { %v5880_v49 = vpop.f32.mrf.mxu1 }
 0x9d2   : > { %v5881_v5 = vadd.f32 %v7784_v7, %v5880_v49 }
 0x9d4   : > { %v5884_v15 = vmax.f32 %v5881_v5, 0.0 }
 0x9d6   : > { %v5885_v20 = vpack.c.bf16 %v5884_v15, %v5883_v10 }
 0x9d8   : > { %5962 = vmatmul.bf16.vlgmr.msra.gmra.mxu2 %v5885_v20 }
 0xa5b   : > { %v5963_v46 = vpop.f32.mrf.mxu2 }
 0xa5c   : > { %v5964_v13 = vadd.f32 %v7785_v37, %v5963_v46 }
 0xa5e   : > { %5968 = vmax.xlane.f32.xlu0 %v5964_v13 }
 0xa63   : > { %v5965_v45 = vpop.f32.mrf.mxu2 }
 0xa64   : > { %v5966_v50 = vadd.f32 %v7785_v37, %v5965_v45 }
 0xa66   : > { %5970 = vmax.xlane.f32.xlu0 %v5966_v50 }
 0xad1   : > { %v5969_v58 = vpop.xlane.xlu0 %5968 }
 0xad2   : > { %v5972_v8 = vsub.f32 %v5964_v13, %v5969_v58 }
 0xad4   : > { %v5974_v59 = vmul.f32 1.442695, %v5972_v8 }
 0xad6   : > { %7786 = vpow2.f32 %v5974_v59 }
 0xad9   : > { %v5971_v31 = vpop.xlane.xlu0 %5970 }
 0xada   : > { %v5973_v17 = vsub.f32 %v5966_v50, %v5971_v31 }
 0xadc   : > { %v7787_v39 = vpop.eup %7786  ;;  %v5976_v3 = vmul.f32 1.442695, %v5973_v17 }
 0xadd   : > { %5978 = vadd.xlane.f32.xlu1 %v7787_v39 }
 0xade   : > { %7788 = vpow2.f32 %v5976_v3 }
 0xae4   : > { %v7789_v18 = vpop.eup %7788 }
 0xae5   : > { %5980 = vadd.xlane.f32.xlu1 %v7789_v18 }
 0xb50   : > { %v5979_v30 = vpop.xlane.xlu1 %5978 }
 0xb51   : > { %7790 = vrcp.f32 %v5979_v30  ;;  %v5993_v16 = vand.u32 2147483648, %v5979_v30  ;;  %v5991_v51 = vand.u32 2147483647, %v5979_v30  ;;  %vm5987_vm1 = vweird.f32 %v5979_v30 }
 0xb53   : > { %v5994_v4 = vor.u32 1.1754944e-38, %v5993_v16  ;;  %vm5992_vm3 = vcmp.eq.f32.partialorder %v5991_v51, 8.507059e+37 }
 0xb57   : > { %v7791_v29 = vpop.eup %7790 }
 0xb58   : > { %v5983_v62 = vmul.f32 %v7791_v29, %v5979_v30  ;;  %v5981_v43 = vpop.xlane.xlu1 %5980  ;;  %vm5988_vm0 = vweird.f32 %v7791_v29 }
 0xb59   : > { %7792 = vrcp.f32 %v5981_v43  ;;  %vm5989_vm2 = vmor %vm5987_vm1, %vm5988_vm0  ;;  %v6008_v14 = vand.u32 2147483648, %v5981_v43  ;;  %v6006_v40 = vand.u32 2147483647, %v5981_v43  ;;  %vm6002_vm5 = vweird.f32 %v5981_v43 }
 0xb5a   : > { %v5984_v25 = vsub.f32 1.0, %v5983_v62 }
 0xb5b   : > { %v6009_v61 = vor.u32 1.1754944e-38, %v6008_v14  ;;  %vm6007_vm7 = vcmp.eq.f32.partialorder %v6006_v40, 8.507059e+37 }
 0xb5c   : > { %v5985_v28 = vmul.f32 %v7791_v29, %v5984_v25 }
 0xb5e   : > { %v5986_v44 = vadd.f32 %v7791_v29, %v5985_v28 }
 0xb5f   : > { %v7793_v60 = vpop.eup %7792 }
 0xb60   : > { %v5990_v32 = vsel %vm5989_vm2, %v7791_v29, %v5986_v44  ;;  %v5998_v53 = vmul.f32 %v7793_v60, %v5981_v43  ;;  %vm6003_vm4 = vweird.f32 %v7793_v60 }
 0xb61   : > { %v5995_v35 = vsel %vm5992_vm3, %v5994_v4, %v5990_v32  ;;  %vm6004_vm6 = vmor %vm6002_vm5, %vm6003_vm4 }
 0xb62   : > { %v5996_v26 = vmul.f32 %v7787_v39, %v5995_v35  ;;  %v5999_v22 = vsub.f32 1.0, %v5998_v53 }
 0xb64   : > { %6012 = vst [vmem:[%s8006_s20] sm:$0xff] %v5996_v26  ;;  %v6000_v52 = vmul.f32 %v7793_v60, %v5999_v22 }
 0xb66   : > { %v6001_v38 = vadd.f32 %v7793_v60, %v6000_v52 }
 0xb68   : > { %v6005_v9 = vsel %vm6004_vm6, %v7793_v60, %v6001_v38 }
 0xb69   : > { %v6010_v47 = vsel %vm6007_vm7, %v6009_v61, %v6005_v9 }
 0xb6a   : > { %v6011_v24 = vmul.f32 %v7789_v18, %v6010_v47 }
 0xb6c   : > { %6013 = vst [vmem:[%s8006_s20 + $0x8] sm:$0xff] %v6011_v24 }
 0xb6d PF: > { %s23_s14 = sadd.s32 1, %s7848_s14   ;;  %s13464_s17 = sld [smem:[#allocation8_spill]] }
 0xb6e   : > { %p20_p13 = scmp.ge.s32.totalorder %s23_s14, 6   ;;  %s13465_s15 = sld [smem:[#allocation9_spill]] }
 0xb6f   : > { %s13466_s25 = smov %s7828_s26  ;;  %s13467_s26 = smov %s7972_s21 }
 0xb70   : > { %s13468_s27 = smov %s7840_s29  ;;  %s13469_s28 = smov %s7844_s30 }
 0xb71   :  { %22 = sbr.rel (!%p20_p13) target bundleno = 8 (0x8), region = 161 }
 0xb73   : > { %s13470_s29 = smov %s13464_s17 }
 0xb74   : > { %s13471_s30 = smov %s13465_s15 }

</bundles_post_ra>
